<compile_context>
chip_gen: v5e
topology: v5e:2x2
jax: 0.10.0
libtpu: 0.0.40
codegen_flags: <defaults>
</compile_context>

<pallas_src>
import functools

import jax
import jax.numpy as jnp
from jax import lax
from jax.experimental import pallas as pl
from jax.experimental.pallas import tpu as pltpu


def _round_up(x, m):
    return ((x + m - 1) // m) * m


def _choose_tile(dim, candidates=(512, 256, 128)):
    """Return (tile, padded_dim) with padded_dim % tile == 0, tile % 128 == 0."""
    padded = _round_up(dim, 128)
    for t in candidates:
        if padded % t == 0:
            return t, padded
    return 128, padded  # 128 always divides a 128-rounded dim


# ----------------------------------------------------------------------------
# Kernel 1: fused propagate + degree + row-normalize
#   Hhat = normalize( X + (A @ X) / (rowsum(A) + 1e-6) ), norm clamped at 1e-8
# grid = (N // tm, N // tk); reduction over k; matmul accumulator and the
# per-row degree accumulator live in VMEM scratch.
# ----------------------------------------------------------------------------
def _propagate_normalize_kernel(a_ref, xk_ref, xres_ref, h_ref,
                                acc_ref, deg_ref):
    k = pl.program_id(1)

    @pl.when(k == 0)
    def _():
        acc_ref[...] = jnp.zeros_like(acc_ref)
        deg_ref[...] = jnp.zeros_like(deg_ref)

    a = a_ref[...]                                           # bf16 [tm, tk]
    acc_ref[...] += jnp.dot(a, xk_ref[...],
                            preferred_element_type=jnp.float32)
    # fused degree: reuse the adjacency tile already in VMEM (XLU reduce,
    # off the MXU critical slot)
    deg_ref[...] += jnp.sum(a.astype(jnp.float32), axis=1, keepdims=True)

    @pl.when(k == pl.num_programs(1) - 1)
    def _():
        inv_deg = pl.reciprocal(deg_ref[...] + 1e-6, approx=True)  # EUP slot
        h = xres_ref[...] + acc_ref[...] * inv_deg                 # [tm, d]
        sq = jnp.sum(h * h, axis=1, keepdims=True)
        inv_norm = lax.rsqrt(jnp.maximum(sq, 1e-16))   # clamp ||h|| at 1e-8
        h_ref[...] = h * inv_norm


def propagate_normalize(adj_bf16, x_f32, x_bf16, *, tm, tk):
    n, d = x_f32.shape
    assert n % tm == 0 and n % tk == 0
    return pl.pallas_call(
        _propagate_normalize_kernel,
        out_shape=jax.ShapeDtypeStruct((n, d), jnp.float32),
        grid_spec=pltpu.PrefetchScalarGridSpec(
            num_scalar_prefetch=0,
            grid=(n // tm, n // tk),
            in_specs=[
                pl.BlockSpec((tm, tk), lambda i, k: (i, k)),   # adj tile, bf16
                pl.BlockSpec((tk, d), lambda i, k: (k, 0)),    # X bf16 (rhs)
                pl.BlockSpec((tm, d), lambda i, k: (i, 0)),    # X f32 (residual)
            ],
            out_specs=pl.BlockSpec((tm, d), lambda i, k: (i, 0)),
            scratch_shapes=[
                pltpu.VMEM((tm, d), jnp.float32),   # A@X accumulator
                pltpu.VMEM((tm, 1), jnp.float32),   # degree accumulator
            ],
        ),
        compiler_params=pltpu.CompilerParams(
            dimension_semantics=("parallel", "arbitrary")),
    )(adj_bf16, x_bf16, x_f32)


# ----------------------------------------------------------------------------
# Kernel 2: per-edge common-neighbor cosine score on pre-normalized Hhat.
# grid = (E // te, N // tn): edge tiles are independent ("parallel"); the
# candidate-node axis is the reduction (last).  Cosines are NT matmuls (no
# in-kernel transpose); partial products accumulate into a lane-dense
# (te, tn) scratch, reduced + sigmoided once at the final step.
# ----------------------------------------------------------------------------
def _edge_score_kernel(u_ref, v_ref, au_ref, av_ref, h_ref, o_ref, acc_ref):
    k = pl.program_id(1)

    @pl.when(k == 0)
    def _():
        acc_ref[...] = jnp.zeros_like(acc_ref)

    nt = (((1,), (1,)), ((), ()))        # contract dim 1 of both operands (NT)
    cos_u = lax.dot_general(u_ref[...], h_ref[...], nt,
                            preferred_element_type=jnp.float32)   # [te, tn]
    cos_v = lax.dot_general(v_ref[...], h_ref[...], nt,
                            preferred_element_type=jnp.float32)   # [te, tn]
    # mask in f32 (v5e has no bf16 VALU); adjacency values are exact 0/1
    mask = au_ref[...].astype(jnp.float32) * av_ref[...].astype(jnp.float32)
    acc_ref[...] += mask * cos_u * cos_v

    @pl.when(k == pl.num_programs(1) - 1)
    def _():
        # single lane-reduce + store, once per edge tile (not per grid step)
        o_ref[...] = jax.nn.sigmoid(
            jnp.sum(acc_ref[...], axis=1, keepdims=True))


def edge_scores(u, v, au, av, h_hat, *, te, tn):
    e, d = u.shape
    n = h_hat.shape[0]
    assert e % te == 0 and n % tn == 0
    out = pl.pallas_call(
        _edge_score_kernel,
        out_shape=jax.ShapeDtypeStruct((e, 1), jnp.float32),
        grid_spec=pltpu.PrefetchScalarGridSpec(
            num_scalar_prefetch=0,
            grid=(e // te, n // tn),
            in_specs=[
                pl.BlockSpec((te, d), lambda i, k: (i, 0)),    # Hhat[src] tile
                pl.BlockSpec((te, d), lambda i, k: (i, 0)),    # Hhat[dst] tile
                pl.BlockSpec((te, tn), lambda i, k: (i, k)),   # adj[src] (bf16)
                pl.BlockSpec((te, tn), lambda i, k: (i, k)),   # adj[dst] (bf16)
                pl.BlockSpec((tn, d), lambda i, k: (k, 0)),    # Hhat tile
            ],
            out_specs=pl.BlockSpec((te, 1), lambda i, k: (i, 0)),
            scratch_shapes=[
                pltpu.VMEM((te, tn), jnp.float32),   # lane-dense accumulator
            ],
        ),
        compiler_params=pltpu.CompilerParams(
            dimension_semantics=("parallel", "arbitrary")),
    )(u, v, au, av, h_hat)
    return out[:, 0]


# ----------------------------------------------------------------------------
# Full forward (glue in plain JAX: padding, dtype casts, small row gathers).
# ----------------------------------------------------------------------------
@functools.partial(jax.jit, static_argnames=())
def link_gnn_forward(emb_weight, edges, adj):
    """LinkGNN.forward with x=None -> x = emb.weight."""
    n, d = emb_weight.shape
    e = edges.shape[1]

    node_tile, n_pad = _choose_tile(n)
    edge_tile, e_pad = _choose_tile(e)

    x = emb_weight.astype(jnp.float32)
    x = jnp.pad(x, ((0, n_pad - n), (0, 0)))
    x_bf16 = x.astype(jnp.bfloat16)
    adj_bf16 = jnp.pad(adj.astype(jnp.bfloat16),          # 0/1: bf16 is exact
                       ((0, n_pad - n), (0, n_pad - n)))

    h_hat = propagate_normalize(adj_bf16, x, x_bf16,
                                tm=node_tile, tk=node_tile)   # [Np,D] unit rows

    src = jnp.pad(edges[0], (0, e_pad - e))                # pad indices with 0
    dst = jnp.pad(edges[1], (0, e_pad - e))
    u = h_hat[src]                                         # [Ep, D]  (small)
    v = h_hat[dst]                                         # [Ep, D]
    au = adj_bf16[src]                                     # [Ep, Np] (bf16)
    av = adj_bf16[dst]                                     # [Ep, Np]
    scores = edge_scores(u, v, au, av, h_hat,
                         te=edge_tile, tn=node_tile)       # [Ep]
    return scores[:e]                                      # [E]


def _reference(emb_weight, edges, adj):
    """f32 reference with torch F.cosine_similarity per-side eps clamping."""
    x = emb_weight.astype(jnp.float32)
    adj = adj.astype(jnp.float32)
    deg = jnp.sum(adj, axis=-1) + 1e-6
    h = x + (adj @ x) / deg[:, None]
    hn = h / jnp.maximum(jnp.linalg.norm(h, axis=1, keepdims=True), 1e-8)
    u, v = hn[edges[0]], hn[edges[1]]
    au, av = adj[edges[0]], adj[edges[1]]
    cos_u = u @ hn.T
    cos_v = v @ hn.T
    return jax.nn.sigmoid(jnp.sum(au * av * cos_u * cos_v, axis=1))


if __name__ == "__main__":
    N, D, E = 512, 128, 256   # nodes, embedding dim, query edges

    key = jax.random.PRNGKey(0)
    k_adj, k_edges, k_emb = jax.random.split(key, 3)

    # Deterministic synthetic inputs.
    adj = jax.random.bernoulli(k_adj, 0.05, (N, N)).astype(jnp.float32)
    adj = jnp.maximum(adj, adj.T)                  # symmetric 0/1 adjacency
    edges = jax.random.randint(k_edges, (2, E), 0, N, dtype=jnp.int32)
    emb_weight = jax.random.normal(k_emb, (N, D), dtype=jnp.float32)

    out = link_gnn_forward(emb_weight, edges, adj)
    out = jax.block_until_ready(out)

    ref = _reference(emb_weight, edges, adj)
    assert out.shape == (E,)
    assert jnp.allclose(out, ref, atol=5e-3, rtol=5e-3), (
        f"max abs diff {jnp.max(jnp.abs(out - ref))}")

    print("KERNEL_OK")
</pallas_src>

<mosaic_0001>
module attributes {stable_mosaic.version = 11 : i64} {
  func.func @_propagate_normalize_kernel(%arg0: i32, %arg1: i32, %arg2: memref<512x512xbf16, #tpu.memory_space<vmem>>, %arg3: memref<512x128xbf16, #tpu.memory_space<vmem>>, %arg4: memref<512x128xf32, #tpu.memory_space<vmem>>, %arg5: memref<512x128xf32, #tpu.memory_space<vmem>>, %arg6: memref<512x128xf32, #tpu.memory_space<vmem>>, %arg7: memref<512x1xf32, #tpu.memory_space<vmem>>) attributes {dimension_semantics = [#tpu.dimension_semantics<parallel>, #tpu.dimension_semantics<arbitrary>], iteration_bounds = array<i64: 1, 1>, scalar_prefetch = 0 : i64, scratch_operands = 2 : i64, tpu.core_type = #tpu.core_type<tc>, window_params = [{transform_indices = @transform_0, window_bounds = array<i64: 512, 512>}, {transform_indices = @transform_1, window_bounds = array<i64: 512, 128>}, {transform_indices = @transform_2, window_bounds = array<i64: 512, 128>}, {transform_indices = @transform_3, window_bounds = array<i64: 512, 128>}]} {
    %c0_i32 = arith.constant 0 : i32
    %0 = arith.cmpi eq, %arg1, %c0_i32 : i32
    %1 = arith.extui %0 : i1 to i32
    %c0_i32_0 = arith.constant 0 : i32
    %2 = arith.cmpi ne, %1, %c0_i32_0 : i32
    scf.if %2 {
      %cst_15 = arith.constant 0.000000e+00 : f32
      %18 = vector.broadcast %cst_15 : f32 to vector<512x128xf32>
      %c0_16 = arith.constant 0 : index
      %c0_17 = arith.constant 0 : index
      %19 = vector.load %arg6[%c0_16, %c0_17] : memref<512x128xf32, #tpu.memory_space<vmem>>, vector<512x128xf32>
      tpu.vector_store %arg6[%c0_16, %c0_17], %18 {strides = array<i32>} : memref<512x128xf32, #tpu.memory_space<vmem>>, vector<512x128xf32>,
      %cst_18 = arith.constant 0.000000e+00 : f32
      %20 = vector.broadcast %cst_18 : f32 to vector<512x1xf32>
      %c0_19 = arith.constant 0 : index
      %c0_20 = arith.constant 0 : index
      %21 = vector.load %arg7[%c0_19, %c0_20] : memref<512x1xf32, #tpu.memory_space<vmem>>, vector<512x1xf32>
      tpu.vector_store %arg7[%c0_19, %c0_20], %20 {strides = array<i32>} : memref<512x1xf32, #tpu.memory_space<vmem>>, vector<512x1xf32>,
    } else {
    }
    %c0 = arith.constant 0 : index
    %c0_1 = arith.constant 0 : index
    %3 = vector.load %arg2[%c0, %c0_1] : memref<512x512xbf16, #tpu.memory_space<vmem>>, vector<512x512xbf16>
    %c0_2 = arith.constant 0 : index
    %c0_3 = arith.constant 0 : index
    %4 = vector.load %arg6[%c0_2, %c0_3] : memref<512x128xf32, #tpu.memory_space<vmem>>, vector<512x128xf32>
    %c0_4 = arith.constant 0 : index
    %c0_5 = arith.constant 0 : index
    %5 = vector.load %arg3[%c0_4, %c0_5] : memref<512x128xbf16, #tpu.memory_space<vmem>>, vector<512x128xbf16>
    %cst = arith.constant dense<0.000000e+00> : vector<512x128xf32>
    %6 = tpu.matmul %3, %5, %cst {dimension_numbers = #tpu.dot_dimension_numbers<[1], [0], [0], [1], [0, 0, 1, 1], [], []>} : vector<512x512xbf16>, vector<512x128xbf16>, vector<512x128xf32> -> vector<512x128xf32>
    %7 = arith.addf %4, %6 : vector<512x128xf32>
    %c0_6 = arith.constant 0 : index
    %c0_7 = arith.constant 0 : index
    %8 = vector.load %arg6[%c0_6, %c0_7] : memref<512x128xf32, #tpu.memory_space<vmem>>, vector<512x128xf32>
    tpu.vector_store %arg6[%c0_6, %c0_7], %7 {strides = array<i32>} : memref<512x128xf32, #tpu.memory_space<vmem>>, vector<512x128xf32>,
    %c0_8 = arith.constant 0 : index
    %c0_9 = arith.constant 0 : index
    %9 = vector.load %arg7[%c0_8, %c0_9] : memref<512x1xf32, #tpu.memory_space<vmem>>, vector<512x1xf32>
    %10 = arith.extf %3 : vector<512x512xbf16> to vector<512x512xf32>
    %cst_10 = arith.constant dense<0.000000e+00> : vector<512xf32>
    %11 = vector.multi_reduction <add>, %10, %cst_10 [1] : vector<512x512xf32> to vector<512xf32>
    %12 = vector.shape_cast %11 : vector<512xf32> to vector<512x1xf32>
    %13 = arith.addf %9, %12 : vector<512x1xf32>
    %c0_11 = arith.constant 0 : index
    %c0_12 = arith.constant 0 : index
    %14 = vector.load %arg7[%c0_11, %c0_12] : memref<512x1xf32, #tpu.memory_space<vmem>>, vector<512x1xf32>
    tpu.vector_store %arg7[%c0_11, %c0_12], %13 {strides = array<i32>} : memref<512x1xf32, #tpu.memory_space<vmem>>, vector<512x1xf32>,
    %c0_i32_13 = arith.constant 0 : i32
    %15 = arith.cmpi eq, %arg1, %c0_i32_13 : i32
    %16 = arith.extui %15 : i1 to i32
    %c0_i32_14 = arith.constant 0 : i32
    %17 = arith.cmpi ne, %16, %c0_i32_14 : i32
    scf.if %17 {
      %c0_15 = arith.constant 0 : index
      %c0_16 = arith.constant 0 : index
      %18 = vector.load %arg7[%c0_15, %c0_16] : memref<512x1xf32, #tpu.memory_space<vmem>>, vector<512x1xf32>
      %cst_17 = arith.constant 9.99999997E-7 : f32
      %19 = vector.broadcast %cst_17 : f32 to vector<512x1xf32>
      %20 = arith.addf %18, %19 : vector<512x1xf32>
      %21 = tpu.reciprocal %20 {approx = true} : vector<512x1xf32> -> vector<512x1xf32>
      %c0_18 = arith.constant 0 : index
      %c0_19 = arith.constant 0 : index
      %22 = vector.load %arg4[%c0_18, %c0_19] : memref<512x128xf32, #tpu.memory_space<vmem>>, vector<512x128xf32>
      %c0_20 = arith.constant 0 : index
      %c0_21 = arith.constant 0 : index
      %23 = vector.load %arg6[%c0_20, %c0_21] : memref<512x128xf32, #tpu.memory_space<vmem>>, vector<512x128xf32>
      %24 = vector.broadcast %21 : vector<512x1xf32> to vector<512x128xf32>
      %25 = arith.mulf %23, %24 : vector<512x128xf32>
      %26 = arith.addf %22, %25 : vector<512x128xf32>
      %27 = arith.mulf %26, %26 : vector<512x128xf32>
      %cst_22 = arith.constant dense<0.000000e+00> : vector<512xf32>
      %28 = vector.multi_reduction <add>, %27, %cst_22 [1] : vector<512x128xf32> to vector<512xf32>
      %29 = vector.shape_cast %28 : vector<512xf32> to vector<512x1xf32>
      %cst_23 = arith.constant 1.000000e-16 : f32
      %30 = vector.broadcast %cst_23 : f32 to vector<512x1xf32>
      %31 = arith.maximumf %29, %30 : vector<512x1xf32>
      %32 = math.rsqrt %31 : vector<512x1xf32>
      %33 = vector.broadcast %32 : vector<512x1xf32> to vector<512x128xf32>
      %34 = arith.mulf %26, %33 : vector<512x128xf32>
      %c0_24 = arith.constant 0 : index
      %c0_25 = arith.constant 0 : index
      %35 = vector.load %arg5[%c0_24, %c0_25] : memref<512x128xf32, #tpu.memory_space<vmem>>, vector<512x128xf32>
      tpu.vector_store %arg5[%c0_24, %c0_25], %34 {strides = array<i32>} : memref<512x128xf32, #tpu.memory_space<vmem>>, vector<512x128xf32>,
    } else {
    }
    return
  }
  func.func @transform_0(%arg0: i32, %arg1: i32) -> (i32, i32) {
    %c0_i32 = arith.constant 0 : i32
    return %arg0, %arg1 : i32, i32
  }
  func.func @transform_1(%arg0: i32, %arg1: i32) -> (i32, i32) {
    %c0_i32 = arith.constant 0 : i32
    %c0_i32_0 = arith.constant 0 : i32
    return %arg1, %c0_i32 : i32, i32
  }
  func.func @transform_2(%arg0: i32, %arg1: i32) -> (i32, i32) {
    %c0_i32 = arith.constant 0 : i32
    %c0_i32_0 = arith.constant 0 : i32
    return %arg0, %c0_i32 : i32, i32
  }
  func.func @transform_3(%arg0: i32, %arg1: i32) -> (i32, i32) {
    %c0_i32 = arith.constant 0 : i32
    %c0_i32_0 = arith.constant 0 : i32
    return %arg0, %c0_i32 : i32, i32
  }
}

module attributes {stable_mosaic.version = 11 : i64} {
  func.func @_edge_score_kernel(%arg0: i32, %arg1: i32, %arg2: memref<256x128xf32, #tpu.memory_space<vmem>>, %arg3: memref<256x128xf32, #tpu.memory_space<vmem>>, %arg4: memref<256x512xbf16, #tpu.memory_space<vmem>>, %arg5: memref<256x512xbf16, #tpu.memory_space<vmem>>, %arg6: memref<512x128xf32, #tpu.memory_space<vmem>>, %arg7: memref<256x1xf32, #tpu.memory_space<vmem>>, %arg8: memref<256x512xf32, #tpu.memory_space<vmem>>) attributes {dimension_semantics = [#tpu.dimension_semantics<parallel>, #tpu.dimension_semantics<arbitrary>], iteration_bounds = array<i64: 1, 1>, scalar_prefetch = 0 : i64, scratch_operands = 1 : i64, tpu.core_type = #tpu.core_type<tc>, window_params = [{transform_indices = @transform_0, window_bounds = array<i64: 256, 128>}, {transform_indices = @transform_1, window_bounds = array<i64: 256, 128>}, {transform_indices = @transform_2, window_bounds = array<i64: 256, 512>}, {transform_indices = @transform_3, window_bounds = array<i64: 256, 512>}, {transform_indices = @transform_4, window_bounds = array<i64: 512, 128>}, {transform_indices = @transform_5, window_bounds = array<i64: 256, 1>}]} {
    %c0_i32 = arith.constant 0 : i32
    %0 = arith.cmpi eq, %arg1, %c0_i32 : i32
    %1 = arith.extui %0 : i1 to i32
    %c0_i32_0 = arith.constant 0 : i32
    %2 = arith.cmpi ne, %1, %c0_i32_0 : i32
    scf.if %2 {
      %cst_19 = arith.constant 0.000000e+00 : f32
      %22 = vector.broadcast %cst_19 : f32 to vector<256x512xf32>
      %c0_20 = arith.constant 0 : index
      %c0_21 = arith.constant 0 : index
      %23 = vector.load %arg8[%c0_20, %c0_21] : memref<256x512xf32, #tpu.memory_space<vmem>>, vector<256x512xf32>
      tpu.vector_store %arg8[%c0_20, %c0_21], %22 {strides = array<i32>} : memref<256x512xf32, #tpu.memory_space<vmem>>, vector<256x512xf32>,
    } else {
    }
    %c0 = arith.constant 0 : index
    %c0_1 = arith.constant 0 : index
    %3 = vector.load %arg2[%c0, %c0_1] : memref<256x128xf32, #tpu.memory_space<vmem>>, vector<256x128xf32>
    %c0_2 = arith.constant 0 : index
    %c0_3 = arith.constant 0 : index
    %4 = vector.load %arg6[%c0_2, %c0_3] : memref<512x128xf32, #tpu.memory_space<vmem>>, vector<512x128xf32>
    %cst = arith.constant dense<0.000000e+00> : vector<256x512xf32>
    %5 = tpu.matmul %3, %4, %cst {dimension_numbers = #tpu.dot_dimension_numbers<[1], [1], [0], [0], [0, 0, 1, 0], [], []>} : vector<256x128xf32>, vector<512x128xf32>, vector<256x512xf32> -> vector<256x512xf32>
    %c0_4 = arith.constant 0 : index
    %c0_5 = arith.constant 0 : index
    %6 = vector.load %arg3[%c0_4, %c0_5] : memref<256x128xf32, #tpu.memory_space<vmem>>, vector<256x128xf32>
    %c0_6 = arith.constant 0 : index
    %c0_7 = arith.constant 0 : index
    %7 = vector.load %arg6[%c0_6, %c0_7] : memref<512x128xf32, #tpu.memory_space<vmem>>, vector<512x128xf32>
    %cst_8 = arith.constant dense<0.000000e+00> : vector<256x512xf32>
    %8 = tpu.matmul %6, %7, %cst_8 {dimension_numbers = #tpu.dot_dimension_numbers<[1], [1], [0], [0], [0, 0, 1, 0], [], []>} : vector<256x128xf32>, vector<512x128xf32>, vector<256x512xf32> -> vector<256x512xf32>
    %c0_9 = arith.constant 0 : index
    %c0_10 = arith.constant 0 : index
    %9 = vector.load %arg4[%c0_9, %c0_10] : memref<256x512xbf16, #tpu.memory_space<vmem>>, vector<256x512xbf16>
    %10 = arith.extf %9 : vector<256x512xbf16> to vector<256x512xf32>
    %c0_11 = arith.constant 0 : index
    %c0_12 = arith.constant 0 : index
    %11 = vector.load %arg5[%c0_11, %c0_12] : memref<256x512xbf16, #tpu.memory_space<vmem>>, vector<256x512xbf16>
    %12 = arith.extf %11 : vector<256x512xbf16> to vector<256x512xf32>
    %13 = arith.mulf %10, %12 : vector<256x512xf32>
    %c0_13 = arith.constant 0 : index
    %c0_14 = arith.constant 0 : index
    %14 = vector.load %arg8[%c0_13, %c0_14] : memref<256x512xf32, #tpu.memory_space<vmem>>, vector<256x512xf32>
    %15 = arith.mulf %13, %5 : vector<256x512xf32>
    %16 = arith.mulf %15, %8 : vector<256x512xf32>
    %17 = arith.addf %14, %16 : vector<256x512xf32>
    %c0_15 = arith.constant 0 : index
    %c0_16 = arith.constant 0 : index
    %18 = vector.load %arg8[%c0_15, %c0_16] : memref<256x512xf32, #tpu.memory_space<vmem>>, vector<256x512xf32>
    tpu.vector_store %arg8[%c0_15, %c0_16], %17 {strides = array<i32>} : memref<256x512xf32, #tpu.memory_space<vmem>>, vector<256x512xf32>,
    %c0_i32_17 = arith.constant 0 : i32
    %19 = arith.cmpi eq, %arg1, %c0_i32_17 : i32
    %20 = arith.extui %19 : i1 to i32
    %c0_i32_18 = arith.constant 0 : i32
    %21 = arith.cmpi ne, %20, %c0_i32_18 : i32
    scf.if %21 {
      %c0_19 = arith.constant 0 : index
      %c0_20 = arith.constant 0 : index
      %22 = vector.load %arg8[%c0_19, %c0_20] : memref<256x512xf32, #tpu.memory_space<vmem>>, vector<256x512xf32>
      %cst_21 = arith.constant dense<0.000000e+00> : vector<256xf32>
      %23 = vector.multi_reduction <add>, %22, %cst_21 [1] : vector<256x512xf32> to vector<256xf32>
      %24 = vector.shape_cast %23 : vector<256xf32> to vector<256x1xf32>
      %25 = arith.negf %24 : vector<256x1xf32>
      %26 = math.exp %25 : vector<256x1xf32>
      %cst_22 = arith.constant 1.000000e+00 : f32
      %27 = vector.broadcast %cst_22 : f32 to vector<256x1xf32>
      %28 = arith.addf %27, %26 : vector<256x1xf32>
      %29 = arith.divf %27, %28 : vector<256x1xf32>
      %c0_23 = arith.constant 0 : index
      %c0_24 = arith.constant 0 : index
      %30 = vector.load %arg7[%c0_23, %c0_24] : memref<256x1xf32, #tpu.memory_space<vmem>>, vector<256x1xf32>
      tpu.vector_store %arg7[%c0_23, %c0_24], %29 {strides = array<i32>} : memref<256x1xf32, #tpu.memory_space<vmem>>, vector<256x1xf32>,
    } else {
    }
    return
  }
  func.func @transform_0(%arg0: i32, %arg1: i32) -> (i32, i32) {
    %c0_i32 = arith.constant 0 : i32
    %c0_i32_0 = arith.constant 0 : i32
    return %arg0, %c0_i32 : i32, i32
  }
  func.func @transform_1(%arg0: i32, %arg1: i32) -> (i32, i32) {
    %c0_i32 = arith.constant 0 : i32
    %c0_i32_0 = arith.constant 0 : i32
    return %arg0, %c0_i32 : i32, i32
  }
  func.func @transform_2(%arg0: i32, %arg1: i32) -> (i32, i32) {
    %c0_i32 = arith.constant 0 : i32
    return %arg0, %arg1 : i32, i32
  }
  func.func @transform_3(%arg0: i32, %arg1: i32) -> (i32, i32) {
    %c0_i32 = arith.constant 0 : i32
    return %arg0, %arg1 : i32, i32
  }
  func.func @transform_4(%arg0: i32, %arg1: i32) -> (i32, i32) {
    %c0_i32 = arith.constant 0 : i32
    %c0_i32_0 = arith.constant 0 : i32
    return %arg1, %c0_i32 : i32, i32
  }
  func.func @transform_5(%arg0: i32, %arg1: i32) -> (i32, i32) {
    %c0_i32 = arith.constant 0 : i32
    %c0_i32_0 = arith.constant 0 : i32
    return %arg0, %c0_i32 : i32, i32
  }
}

</mosaic_0001>

<bundles_post_ra>
// kernel: link_gnn_forward.3
= control target key start
LH: loop header
LB: loop body
LE: loop exit
PB: predicated region body
PF: predicated region fallthrough
CT: control target
= control target key end

     0   :  { %vm3235_vm1 = vcmask 7168   ;;  %s5641_s4 = inlined_call_operand.vmem [shape: f32[512,128], index: 4, kind: input, shape index: {}]   ;;  %s5642_s0 = inlined_call_operand.vmem [shape: f32[256,128], index: 0, kind: input, shape index: {}]   ;;  %s5643_s1 = inlined_call_operand.vmem [shape: f32[256,128], index: 1, kind: input, shape index: {}]   ;;  %s5644_s2 = inlined_call_operand.vmem [shape: bf16[256,512], index: 2, kind: input, shape index: {}]   ;;  %s5645_s3 = inlined_call_operand.vmem [shape: bf16[256,512], index: 3, kind: input, shape index: {}]   ;;  %s5646_s5 = inlined_call_operand.vmem [shape: f32[256,1], index: 5, kind: output, shape index: {}]  }
   0x1   :  { %v3465_v0 = vld [vmem:[%s5641_s4 + $0x78] sm:$0xff]  ;;  %v3489_v4 = vld [vmem:[%s5641_s4 + $0x70] sm:$0xff]  ;;  %v3513_v8 = vld [vmem:[%s5641_s4 + $0x68] sm:$0xff] }
   0x2   :  { %v3470_v1 = vld [vmem:[%s5641_s4 + $0xf8] sm:$0xff]  ;;  %248 = vmatpush.xpose.msra.mxu0 %v3465_v0  ;;  %v3494_v5 = vld [vmem:[%s5641_s4 + $0xf0] sm:$0xff]  ;;  %v3518_v9 = vld [vmem:[%s5641_s4 + $0xe8] sm:$0xff] }
   0x3   :  { %v3475_v2 = vld [vmem:[%s5641_s4 + $0x178] sm:$0xff]  ;;  %361 = vmatpush.xpose.msra.mxu1 %v3470_v1  ;;  %v3499_v6 = vld [vmem:[%s5641_s4 + $0x170] sm:$0xff]  ;;  %v3523_v10 = vld [vmem:[%s5641_s4 + $0x168] sm:$0xff] }
   0x4   :  { %v3482_v3 = vld [vmem:[%s5641_s4 + $0x1f8] sm:$0xff]  ;;  %474 = vmatpush.xpose.msra.mxu2 %v3475_v2  ;;  %v3504_v7 = vld [vmem:[%s5641_s4 + $0x1f0] sm:$0xff]  ;;  %v3528_v11 = vld [vmem:[%s5641_s4 + $0x1e8] sm:$0xff] }
   0x5   :  { %587 = vmatpush.xpose.msra.mxu3 %v3482_v3  ;;  %v3537_v12 = vld [vmem:[%s5641_s4 + $0x60] sm:$0xff]  ;;  %v3561_v16 = vld [vmem:[%s5641_s4 + $0x58] sm:$0xff]  ;;  %v3585_v20 = vld [vmem:[%s5641_s4 + $0x50] sm:$0xff] }
   0x6   :  { %249 = vmatpush.xpose.msra.mxu0 %v3489_v4  ;;  %v3542_v13 = vld [vmem:[%s5641_s4 + $0xe0] sm:$0xff]  ;;  %v3566_v17 = vld [vmem:[%s5641_s4 + $0xd8] sm:$0xff]  ;;  %v3590_v21 = vld [vmem:[%s5641_s4 + $0xd0] sm:$0xff] }
   0x7   :  { %362 = vmatpush.xpose.msra.mxu1 %v3494_v5  ;;  %v3547_v14 = vld [vmem:[%s5641_s4 + $0x160] sm:$0xff]  ;;  %v3571_v18 = vld [vmem:[%s5641_s4 + $0x158] sm:$0xff]  ;;  %v3595_v22 = vld [vmem:[%s5641_s4 + $0x150] sm:$0xff] }
   0x8   :  { %475 = vmatpush.xpose.msra.mxu2 %v3499_v6  ;;  %v3552_v15 = vld [vmem:[%s5641_s4 + $0x1e0] sm:$0xff]  ;;  %v3576_v19 = vld [vmem:[%s5641_s4 + $0x1d8] sm:$0xff]  ;;  %v3600_v23 = vld [vmem:[%s5641_s4 + $0x1d0] sm:$0xff] }
   0x9   :  { %588 = vmatpush.xpose.msra.mxu3 %v3504_v7  ;;  %v3609_v24 = vld [vmem:[%s5641_s4 + $0x48] sm:$0xff]  ;;  %v3633_v28 = vld [vmem:[%s5641_s4 + $0x40] sm:$0xff]  ;;  %v3657_v32 = vld [vmem:[%s5641_s4 + $0x38] sm:$0xff] }
   0xa   :  { %250 = vmatpush.xpose.msra.mxu0 %v3513_v8  ;;  %v3614_v25 = vld [vmem:[%s5641_s4 + $0xc8] sm:$0xff]  ;;  %v3638_v29 = vld [vmem:[%s5641_s4 + $0xc0] sm:$0xff]  ;;  %v3662_v33 = vld [vmem:[%s5641_s4 + $0xb8] sm:$0xff] }
   0xb   :  { %363 = vmatpush.xpose.msra.mxu1 %v3518_v9  ;;  %v3619_v26 = vld [vmem:[%s5641_s4 + $0x148] sm:$0xff]  ;;  %v3643_v30 = vld [vmem:[%s5641_s4 + $0x140] sm:$0xff]  ;;  %v3667_v34 = vld [vmem:[%s5641_s4 + $0x138] sm:$0xff] }
   0xc   :  { %476 = vmatpush.xpose.msra.mxu2 %v3523_v10  ;;  %v3624_v27 = vld [vmem:[%s5641_s4 + $0x1c8] sm:$0xff]  ;;  %v3648_v31 = vld [vmem:[%s5641_s4 + $0x1c0] sm:$0xff]  ;;  %v3672_v35 = vld [vmem:[%s5641_s4 + $0x1b8] sm:$0xff] }
   0xd   :  { %589 = vmatpush.xpose.msra.mxu3 %v3528_v11  ;;  %v3681_v36 = vld [vmem:[%s5641_s4 + $0x30] sm:$0xff]  ;;  %v3705_v40 = vld [vmem:[%s5641_s4 + $0x28] sm:$0xff]  ;;  %v3729_v44 = vld [vmem:[%s5641_s4 + $0x20] sm:$0xff] }
   0xe   :  { %251 = vmatpush.xpose.msra.mxu0 %v3537_v12  ;;  %v3686_v37 = vld [vmem:[%s5641_s4 + $0xb0] sm:$0xff]  ;;  %v3710_v41 = vld [vmem:[%s5641_s4 + $0xa8] sm:$0xff]  ;;  %v3734_v45 = vld [vmem:[%s5641_s4 + $0xa0] sm:$0xff] }
   0xf   :  { %364 = vmatpush.xpose.msra.mxu1 %v3542_v13  ;;  %v3691_v38 = vld [vmem:[%s5641_s4 + $0x130] sm:$0xff]  ;;  %v3715_v42 = vld [vmem:[%s5641_s4 + $0x128] sm:$0xff]  ;;  %v3739_v46 = vld [vmem:[%s5641_s4 + $0x120] sm:$0xff] }
  0x10   :  { %477 = vmatpush.xpose.msra.mxu2 %v3547_v14  ;;  %v3696_v39 = vld [vmem:[%s5641_s4 + $0x1b0] sm:$0xff]  ;;  %v3720_v43 = vld [vmem:[%s5641_s4 + $0x1a8] sm:$0xff]  ;;  %v3744_v47 = vld [vmem:[%s5641_s4 + $0x1a0] sm:$0xff] }
  0x11   :  { %590 = vmatpush.xpose.msra.mxu3 %v3552_v15  ;;  %v3753_v48 = vld [vmem:[%s5641_s4 + $0x18] sm:$0xff]  ;;  %v3777_v52 = vld [vmem:[%s5641_s4 + $0x10] sm:$0xff]  ;;  %v3801_v56 = vld [vmem:[%s5641_s4 + $0x8] sm:$0xff] }
  0x12   :  { %252 = vmatpush.xpose.msra.mxu0 %v3561_v16  ;;  %v3758_v49 = vld [vmem:[%s5641_s4 + $0x98] sm:$0xff]  ;;  %v3782_v53 = vld [vmem:[%s5641_s4 + $0x90] sm:$0xff]  ;;  %v3806_v57 = vld [vmem:[%s5641_s4 + $0x88] sm:$0xff] }
  0x13   :  { %365 = vmatpush.xpose.msra.mxu1 %v3566_v17  ;;  %v3763_v50 = vld [vmem:[%s5641_s4 + $0x118] sm:$0xff]  ;;  %v3787_v54 = vld [vmem:[%s5641_s4 + $0x110] sm:$0xff]  ;;  %5649 = vst [vmem:[#allocation3_spill] sm:$0xff] %v3806_v57  ;;  %v3811_v58 = vld [vmem:[%s5641_s4 + $0x108] sm:$0xff] }
  0x14   :  { %478 = vmatpush.xpose.msra.mxu2 %v3571_v18  ;;  %v3768_v51 = vld [vmem:[%s5641_s4 + $0x198] sm:$0xff]  ;;  %v3792_v55 = vld [vmem:[%s5641_s4 + $0x190] sm:$0xff]  ;;  %v3816_v59 = vld [vmem:[%s5641_s4 + $0x188] sm:$0xff] }
  0x15   :  { %591 = vmatpush.xpose.msra.mxu3 %v3576_v19  ;;  %v3825_v60 = vld [vmem:[%s5641_s4] sm:$0xff] }
  0x16   :  { %253 = vmatpush.xpose.msra.mxu0 %v3585_v20  ;;  %v3830_v61 = vld [vmem:[%s5641_s4 + $0x80] sm:$0xff] }
  0x17   :  { %366 = vmatpush.xpose.msra.mxu1 %v3590_v21  ;;  %5650 = vst [vmem:[#allocation4_spill] sm:$0xff] %v3830_v61  ;;  %v3835_v62 = vld [vmem:[%s5641_s4 + $0x100] sm:$0xff] }
  0x18   :  { %479 = vmatpush.xpose.msra.mxu2 %v3595_v22  ;;  %v3840_v63 = vld [vmem:[%s5641_s4 + $0x180] sm:$0xff] }
  0x19   :  { %592 = vmatpush.xpose.msra.mxu3 %v3600_v23 }
  0x1a   :  { %254 = vmatpush.xpose.msra.mxu0 %v3609_v24 }
  0x1b   :  { %367 = vmatpush.xpose.msra.mxu1 %v3614_v25 }
  0x1c   :  { %480 = vmatpush.xpose.msra.mxu2 %v3619_v26 }
  0x1d   :  { %593 = vmatpush.xpose.msra.mxu3 %v3624_v27 }
  0x1e   :  { %255 = vmatpush.xpose.msra.mxu0 %v3633_v28 }
  0x1f   :  { %368 = vmatpush.xpose.msra.mxu1 %v3638_v29 }
  0x20   :  { %481 = vmatpush.xpose.msra.mxu2 %v3643_v30 }
  0x21   :  { %594 = vmatpush.xpose.msra.mxu3 %v3648_v31 }
  0x22   :  { %256 = vmatpush.xpose.msra.mxu0 %v3657_v32 }
  0x23   :  { %369 = vmatpush.xpose.msra.mxu1 %v3662_v33 }
  0x24   :  { %482 = vmatpush.xpose.msra.mxu2 %v3667_v34 }
  0x25   :  { %595 = vmatpush.xpose.msra.mxu3 %v3672_v35 }
  0x26   :  { %257 = vmatpush.xpose.msra.mxu0 %v3681_v36 }
  0x27   :  { %370 = vmatpush.xpose.msra.mxu1 %v3686_v37 }
  0x28   :  { %483 = vmatpush.xpose.msra.mxu2 %v3691_v38 }
  0x29   :  { %596 = vmatpush.xpose.msra.mxu3 %v3696_v39 }
  0x2a   :  { %258 = vmatpush.xpose.msra.mxu0 %v3705_v40 }
  0x2b   :  { %371 = vmatpush.xpose.msra.mxu1 %v3710_v41 }
  0x2c   :  { %484 = vmatpush.xpose.msra.mxu2 %v3715_v42 }
  0x2d   :  { %597 = vmatpush.xpose.msra.mxu3 %v3720_v43 }
  0x2e   :  { %259 = vmatpush.xpose.msra.mxu0 %v3729_v44 }
  0x2f   :  { %372 = vmatpush.xpose.msra.mxu1 %v3734_v45 }
  0x30   :  { %485 = vmatpush.xpose.msra.mxu2 %v3739_v46 }
  0x31   :  { %598 = vmatpush.xpose.msra.mxu3 %v3744_v47 }
  0x32   :  { %260 = vmatpush.xpose.msra.mxu0 %v3753_v48 }
  0x33   :  { %373 = vmatpush.xpose.msra.mxu1 %v3758_v49 }
  0x34   :  { %486 = vmatpush.xpose.msra.mxu2 %v3763_v50 }
  0x35   :  { %599 = vmatpush.xpose.msra.mxu3 %v3768_v51 }
  0x36   :  { %261 = vmatpush.xpose.msra.mxu0 %v3777_v52 }
  0x37   :  { %374 = vmatpush.xpose.msra.mxu1 %v3782_v53 }
  0x38   :  { %487 = vmatpush.xpose.msra.mxu2 %v3787_v54 }
  0x39   :  { %600 = vmatpush.xpose.msra.mxu3 %v3792_v55 }
  0x3a   :  { %262 = vmatpush.xpose.msra.mxu0 %v3801_v56 }
  0x3b   :  { %375 = vmatpush.xpose.msra.mxu1 %v3806_v57  ;;  %v152_v57 = vld [vmem:[%s5642_s0] sm:$0xff] }
  0x3c   :  { %488 = vmatpush.xpose.msra.mxu2 %v3811_v58 }
  0x3d   :  { %601 = vmatpush.xpose.msra.mxu3 %v3816_v59 }
  0x3e   :  { %263 = vmatpush.xpose.msra.mxu0 %v3825_v60 }
  0x3f   :  { %376 = vmatpush.xpose.msra.mxu1 %v3830_v61  ;;  %v153_v61 = vld [vmem:[%s5642_s0 + $0x8] sm:$0xff] }
  0x40   :  { %489 = vmatpush.xpose.msra.mxu2 %v3835_v62 }
  0x41   :  { %602 = vmatpush.xpose.msra.mxu3 %v3840_v63  ;;  %264 = vmatmul.f32.vlgmr.msra.gmra.mxu0 %v152_v57 }
  0x42   :  { %377 = vmatmul.f32.vlgmr.msra.gmra.mxu1 %v152_v57  ;;  %732 = vmatpush.xpose.msrb.mxu0 %v3465_v0  ;;  %v154_v0 = vld [vmem:[%s5642_s0 + $0x10] sm:$0xff] }
  0x43   :  { %490 = vmatmul.f32.vlgmr.msra.gmra.mxu2 %v152_v57  ;;  %845 = vmatpush.xpose.msrb.mxu1 %v3470_v1  ;;  %v155_v1 = vld [vmem:[%s5642_s0 + $0x18] sm:$0xff] }
  0x44   :  { %958 = vmatpush.xpose.msrb.mxu2 %v3475_v2  ;;  %603 = vmatmul.f32.vlgmr.msra.gmra.mxu3 %v152_v57  ;;  %v156_v2 = vld [vmem:[%s5642_s0 + $0x20] sm:$0xff] }
  0x45   :  { %1071 = vmatpush.xpose.msrb.mxu3 %v3482_v3  ;;  %v157_v3 = vld [vmem:[%s5642_s0 + $0x28] sm:$0xff] }
  0x46   :  { %733 = vmatpush.xpose.msrb.mxu0 %v3489_v4  ;;  %v158_v4 = vld [vmem:[%s5642_s0 + $0x30] sm:$0xff] }
  0x47   :  { %846 = vmatpush.xpose.msrb.mxu1 %v3494_v5  ;;  %v159_v5 = vld [vmem:[%s5642_s0 + $0x38] sm:$0xff] }
  0x48   :  { %959 = vmatpush.xpose.msrb.mxu2 %v3499_v6  ;;  %v5651_v6 = vld [vmem:[#allocation3_spill] sm:$0xff] }
  0x49   :  { %1072 = vmatpush.xpose.msrb.mxu3 %v3504_v7  ;;  %267 = vmatmul.f32.gmra.mxu0 %v153_v61  ;;  %v160_v7 = vld [vmem:[%s5642_s0 + $0x40] sm:$0xff] }
  0x4a   :  { %380 = vmatmul.f32.gmra.mxu1 %v153_v61  ;;  %734 = vmatpush.xpose.msrb.mxu0 %v3513_v8  ;;  %v5652_v8 = vld [vmem:[#allocation4_spill] sm:$0xff] }
  0x4b   :  { %493 = vmatmul.f32.gmra.mxu2 %v153_v61  ;;  %847 = vmatpush.xpose.msrb.mxu1 %v3518_v9  ;;  %v161_v9 = vld [vmem:[%s5642_s0 + $0x48] sm:$0xff] }
  0x4c   :  { %960 = vmatpush.xpose.msrb.mxu2 %v3523_v10  ;;  %606 = vmatmul.f32.gmra.mxu3 %v153_v61  ;;  %v162_v10 = vld [vmem:[%s5642_s0 + $0x50] sm:$0xff] }
  0x4d   :  { %1073 = vmatpush.xpose.msrb.mxu3 %v3528_v11  ;;  %v163_v11 = vld [vmem:[%s5642_s0 + $0x58] sm:$0xff] }
  0x4e   :  { %735 = vmatpush.xpose.msrb.mxu0 %v3537_v12  ;;  %v164_v12 = vld [vmem:[%s5642_s0 + $0x60] sm:$0xff] }
  0x4f   :  { %848 = vmatpush.xpose.msrb.mxu1 %v3542_v13  ;;  %v165_v13 = vld [vmem:[%s5642_s0 + $0x68] sm:$0xff] }
  0x50   :  { %961 = vmatpush.xpose.msrb.mxu2 %v3547_v14  ;;  %v166_v14 = vld [vmem:[%s5642_s0 + $0x70] sm:$0xff] }
  0x51   :  { %1074 = vmatpush.xpose.msrb.mxu3 %v3552_v15  ;;  %270 = vmatmul.f32.gmra.mxu0 %v154_v0  ;;  %v167_v15 = vld [vmem:[%s5642_s0 + $0x78] sm:$0xff] }
  0x52   :  { %383 = vmatmul.f32.gmra.mxu1 %v154_v0  ;;  %736 = vmatpush.xpose.msrb.mxu0 %v3561_v16 }
  0x53   :  { %496 = vmatmul.f32.gmra.mxu2 %v154_v0  ;;  %849 = vmatpush.xpose.msrb.mxu1 %v3566_v17 }
  0x54   :  { %962 = vmatpush.xpose.msrb.mxu2 %v3571_v18  ;;  %609 = vmatmul.f32.gmra.mxu3 %v154_v0  ;;  %v168_v18 = vld [vmem:[%s5642_s0 + $0x80] sm:$0xff] }
  0x55   :  { %1075 = vmatpush.xpose.msrb.mxu3 %v3576_v19 }
  0x56   :  { %737 = vmatpush.xpose.msrb.mxu0 %v3585_v20 }
  0x57   :  { %850 = vmatpush.xpose.msrb.mxu1 %v3590_v21 }
  0x58   :  { %963 = vmatpush.xpose.msrb.mxu2 %v3595_v22 }
  0x59   :  { %1076 = vmatpush.xpose.msrb.mxu3 %v3600_v23  ;;  %273 = vmatmul.f32.gmra.mxu0 %v155_v1  ;;  %v169_v23 = vld [vmem:[%s5642_s0 + $0x88] sm:$0xff] }
  0x5a   :  { %386 = vmatmul.f32.gmra.mxu1 %v155_v1  ;;  %738 = vmatpush.xpose.msrb.mxu0 %v3609_v24 }
  0x5b   :  { %499 = vmatmul.f32.gmra.mxu2 %v155_v1  ;;  %851 = vmatpush.xpose.msrb.mxu1 %v3614_v25 }
  0x5c   :  { %964 = vmatpush.xpose.msrb.mxu2 %v3619_v26  ;;  %612 = vmatmul.f32.gmra.mxu3 %v155_v1 }
  0x5d   :  { %1077 = vmatpush.xpose.msrb.mxu3 %v3624_v27 }
  0x5e   :  { %739 = vmatpush.xpose.msrb.mxu0 %v3633_v28  ;;  %v170_v28 = vld [vmem:[%s5642_s0 + $0x90] sm:$0xff] }
  0x5f   :  { %852 = vmatpush.xpose.msrb.mxu1 %v3638_v29 }
  0x60   :  { %965 = vmatpush.xpose.msrb.mxu2 %v3643_v30 }
  0x61   :  { %1078 = vmatpush.xpose.msrb.mxu3 %v3648_v31  ;;  %276 = vmatmul.f32.gmra.mxu0 %v156_v2 }
  0x62   :  { %389 = vmatmul.f32.gmra.mxu1 %v156_v2  ;;  %740 = vmatpush.xpose.msrb.mxu0 %v3657_v32 }
  0x63   :  { %502 = vmatmul.f32.gmra.mxu2 %v156_v2  ;;  %853 = vmatpush.xpose.msrb.mxu1 %v3662_v33  ;;  %v171_v33 = vld [vmem:[%s5642_s0 + $0x98] sm:$0xff] }
  0x64   :  { %966 = vmatpush.xpose.msrb.mxu2 %v3667_v34  ;;  %615 = vmatmul.f32.gmra.mxu3 %v156_v2 }
  0x65   :  { %1079 = vmatpush.xpose.msrb.mxu3 %v3672_v35 }
  0x66   :  { %741 = vmatpush.xpose.msrb.mxu0 %v3681_v36 }
  0x67   :  { %854 = vmatpush.xpose.msrb.mxu1 %v3686_v37 }
  0x68   :  { %967 = vmatpush.xpose.msrb.mxu2 %v3691_v38  ;;  %v172_v38 = vld [vmem:[%s5642_s0 + $0xa0] sm:$0xff] }
  0x69   :  { %1080 = vmatpush.xpose.msrb.mxu3 %v3696_v39  ;;  %279 = vmatmul.f32.gmra.mxu0 %v157_v3 }
  0x6a   :  { %392 = vmatmul.f32.gmra.mxu1 %v157_v3  ;;  %742 = vmatpush.xpose.msrb.mxu0 %v3705_v40 }
  0x6b   :  { %505 = vmatmul.f32.gmra.mxu2 %v157_v3  ;;  %855 = vmatpush.xpose.msrb.mxu1 %v3710_v41 }
  0x6c   :  { %968 = vmatpush.xpose.msrb.mxu2 %v3715_v42  ;;  %618 = vmatmul.f32.gmra.mxu3 %v157_v3 }
  0x6d   :  { %1081 = vmatpush.xpose.msrb.mxu3 %v3720_v43  ;;  %v173_v43 = vld [vmem:[%s5642_s0 + $0xa8] sm:$0xff] }
  0x6e   :  { %743 = vmatpush.xpose.msrb.mxu0 %v3729_v44 }
  0x6f   :  { %856 = vmatpush.xpose.msrb.mxu1 %v3734_v45 }
  0x70   :  { %969 = vmatpush.xpose.msrb.mxu2 %v3739_v46 }
  0x71   :  { %1082 = vmatpush.xpose.msrb.mxu3 %v3744_v47  ;;  %282 = vmatmul.f32.gmra.mxu0 %v158_v4 }
  0x72   :  { %395 = vmatmul.f32.gmra.mxu1 %v158_v4  ;;  %744 = vmatpush.xpose.msrb.mxu0 %v3753_v48  ;;  %v174_v48 = vld [vmem:[%s5642_s0 + $0xb0] sm:$0xff] }
  0x73   :  { %508 = vmatmul.f32.gmra.mxu2 %v158_v4  ;;  %857 = vmatpush.xpose.msrb.mxu1 %v3758_v49 }
  0x74   :  { %970 = vmatpush.xpose.msrb.mxu2 %v3763_v50  ;;  %621 = vmatmul.f32.gmra.mxu3 %v158_v4  ;;  %v178_v4 = vld [vmem:[%s5642_s0 + $0xd0] sm:$0xff] }
  0x75   :  { %1083 = vmatpush.xpose.msrb.mxu3 %v3768_v51 }
  0x76   :  { %745 = vmatpush.xpose.msrb.mxu0 %v3777_v52 }
  0x77   :  { %858 = vmatpush.xpose.msrb.mxu1 %v3782_v53  ;;  %v175_v53 = vld [vmem:[%s5642_s0 + $0xb8] sm:$0xff] }
  0x78   :  { %971 = vmatpush.xpose.msrb.mxu2 %v3787_v54 }
  0x79   :  { %1084 = vmatpush.xpose.msrb.mxu3 %v3792_v55  ;;  %285 = vmatmul.f32.gmra.mxu0 %v159_v5 }
  0x7a   :  { %398 = vmatmul.f32.gmra.mxu1 %v159_v5  ;;  %746 = vmatpush.xpose.msrb.mxu0 %v3801_v56 }
  0x7b   :  { %511 = vmatmul.f32.gmra.mxu2 %v159_v5  ;;  %859 = vmatpush.xpose.msrb.mxu1 %v5651_v6 }
  0x7c   :  { %972 = vmatpush.xpose.msrb.mxu2 %v3811_v58  ;;  %624 = vmatmul.f32.gmra.mxu3 %v159_v5  ;;  %v176_v58 = vld [vmem:[%s5642_s0 + $0xc0] sm:$0xff] }
  0x7d   :  { %1085 = vmatpush.xpose.msrb.mxu3 %v3816_v59 }
  0x7e   :  { %747 = vmatpush.xpose.msrb.mxu0 %v3825_v60 }
  0x7f   :  { %860 = vmatpush.xpose.msrb.mxu1 %v5652_v8 }
  0x80   :  { %973 = vmatpush.xpose.msrb.mxu2 %v3835_v62 }
  0x81   :  { %1086 = vmatpush.xpose.msrb.mxu3 %v3840_v63  ;;  %288 = vmatmul.f32.gmra.mxu0 %v160_v7  ;;  %v177_v63 = vld [vmem:[%s5642_s0 + $0xc8] sm:$0xff] }
  0x82   :  { %401 = vmatmul.f32.gmra.mxu1 %v160_v7 }
  0x83   :  { %514 = vmatmul.f32.gmra.mxu2 %v160_v7 }
  0x84   :  { %627 = vmatmul.f32.gmra.mxu3 %v160_v7 }
  0x89   :  { %291 = vmatmul.f32.gmra.mxu0 %v161_v9 }
  0x8a   :  { %404 = vmatmul.f32.gmra.mxu1 %v161_v9 }
  0x8b   :  { %517 = vmatmul.f32.gmra.mxu2 %v161_v9 }
  0x8c   :  { %630 = vmatmul.f32.gmra.mxu3 %v161_v9  ;;  %v179_v9 = vld [vmem:[%s5642_s0 + $0xd8] sm:$0xff] }
  0x91   :  { %294 = vmatmul.f32.gmra.mxu0 %v162_v10 }
  0x92   :  { %407 = vmatmul.f32.gmra.mxu1 %v162_v10 }
  0x93   :  { %520 = vmatmul.f32.gmra.mxu2 %v162_v10 }
  0x94   :  { %633 = vmatmul.f32.gmra.mxu3 %v162_v10 }
  0x99   :  { %297 = vmatmul.f32.gmra.mxu0 %v163_v11 }
  0x9a   :  { %410 = vmatmul.f32.gmra.mxu1 %v163_v11 }
  0x9b   :  { %523 = vmatmul.f32.gmra.mxu2 %v163_v11 }
  0x9c   :  { %636 = vmatmul.f32.gmra.mxu3 %v163_v11 }
  0xa1   :  { %300 = vmatmul.f32.gmra.mxu0 %v164_v12 }
  0xa2   :  { %413 = vmatmul.f32.gmra.mxu1 %v164_v12 }
  0xa3   :  { %526 = vmatmul.f32.gmra.mxu2 %v164_v12 }
  0xa4   :  { %639 = vmatmul.f32.gmra.mxu3 %v164_v12 }
  0xa9   :  { %303 = vmatmul.f32.gmra.mxu0 %v165_v13 }
  0xaa   :  { %416 = vmatmul.f32.gmra.mxu1 %v165_v13 }
  0xab   :  { %529 = vmatmul.f32.gmra.mxu2 %v165_v13 }
  0xac   :  { %642 = vmatmul.f32.gmra.mxu3 %v165_v13 }
  0xb1   :  { %306 = vmatmul.f32.gmra.mxu0 %v166_v14 }
  0xb2   :  { %419 = vmatmul.f32.gmra.mxu1 %v166_v14 }
  0xb3   :  { %532 = vmatmul.f32.gmra.mxu2 %v166_v14 }
  0xb4   :  { %645 = vmatmul.f32.gmra.mxu3 %v166_v14  ;;  %v180_v14 = vld [vmem:[%s5642_s0 + $0xe0] sm:$0xff] }
  0xb9   :  { %309 = vmatmul.f32.gmra.mxu0 %v167_v15 }
  0xba   :  { %422 = vmatmul.f32.gmra.mxu1 %v167_v15 }
  0xbb   :  { %535 = vmatmul.f32.gmra.mxu2 %v167_v15 }
  0xbc   :  { %648 = vmatmul.f32.gmra.mxu3 %v167_v15 }
  0xbe   :  { %v3958_v16 = vpop.f32.mrf.mxu0 }
  0xbf   :  { %v3960_v17 = vpop.f32.mrf.mxu1 }
  0xc1   :  { %312 = vmatmul.f32.gmra.mxu0 %v168_v18 }
  0xc2   :  { %425 = vmatmul.f32.gmra.mxu1 %v168_v18 }
  0xc3   :  { %538 = vmatmul.f32.gmra.mxu2 %v168_v18 }
  0xc4   :  { %651 = vmatmul.f32.gmra.mxu3 %v168_v18 }
  0xc6   :  { %v3965_v19 = vpop.f32.mrf.mxu2  ;;  %v3969_v21 = vpop.f32.mrf.mxu0 }
  0xc7   :  { %v3967_v20 = vpop.f32.mrf.mxu3  ;;  %v3971_v22 = vpop.f32.mrf.mxu1 }
  0xc9   :  { %315 = vmatmul.f32.gmra.mxu0 %v169_v23 }
  0xca   :  { %428 = vmatmul.f32.gmra.mxu1 %v169_v23 }
  0xcb   :  { %541 = vmatmul.f32.gmra.mxu2 %v169_v23 }
  0xcc   :  { %654 = vmatmul.f32.gmra.mxu3 %v169_v23 }
  0xce   :  { %v3976_v24 = vpop.f32.mrf.mxu2  ;;  %v3980_v26 = vpop.f32.mrf.mxu0 }
  0xcf   :  { %v3978_v25 = vpop.f32.mrf.mxu3  ;;  %v3982_v27 = vpop.f32.mrf.mxu1 }
  0xd1   :  { %318 = vmatmul.f32.gmra.mxu0 %v170_v28 }
  0xd2   :  { %431 = vmatmul.f32.gmra.mxu1 %v170_v28 }
  0xd3   :  { %544 = vmatmul.f32.gmra.mxu2 %v170_v28 }
  0xd4   :  { %657 = vmatmul.f32.gmra.mxu3 %v170_v28 }
  0xd6   :  { %v3987_v29 = vpop.f32.mrf.mxu2  ;;  %v3991_v31 = vpop.f32.mrf.mxu0 }
  0xd7   :  { %v3989_v30 = vpop.f32.mrf.mxu3  ;;  %v3993_v32 = vpop.f32.mrf.mxu1 }
  0xd9   :  { %321 = vmatmul.f32.gmra.mxu0 %v171_v33 }
  0xda   :  { %434 = vmatmul.f32.gmra.mxu1 %v171_v33 }
  0xdb   :  { %547 = vmatmul.f32.gmra.mxu2 %v171_v33 }
  0xdc   :  { %660 = vmatmul.f32.gmra.mxu3 %v171_v33  ;;  %v181_v33 = vld [vmem:[%s5642_s0 + $0xe8] sm:$0xff] }
  0xde   :  { %v3998_v34 = vpop.f32.mrf.mxu2  ;;  %v4002_v36 = vpop.f32.mrf.mxu0 }
  0xdf   :  { %v4000_v35 = vpop.f32.mrf.mxu3  ;;  %v4004_v37 = vpop.f32.mrf.mxu1 }
  0xe1   :  { %324 = vmatmul.f32.gmra.mxu0 %v172_v38 }
  0xe2   :  { %437 = vmatmul.f32.gmra.mxu1 %v172_v38 }
  0xe3   :  { %550 = vmatmul.f32.gmra.mxu2 %v172_v38 }
  0xe4   :  { %663 = vmatmul.f32.gmra.mxu3 %v172_v38 }
  0xe6   :  { %v4009_v39 = vpop.f32.mrf.mxu2  ;;  %v4013_v41 = vpop.f32.mrf.mxu0 }
  0xe7   :  { %v4011_v40 = vpop.f32.mrf.mxu3  ;;  %v4015_v42 = vpop.f32.mrf.mxu1 }
  0xe9   :  { %327 = vmatmul.f32.gmra.mxu0 %v173_v43 }
  0xea   :  { %440 = vmatmul.f32.gmra.mxu1 %v173_v43 }
  0xeb   :  { %553 = vmatmul.f32.gmra.mxu2 %v173_v43 }
  0xec   :  { %666 = vmatmul.f32.gmra.mxu3 %v173_v43 }
  0xee   :  { %v4020_v44 = vpop.f32.mrf.mxu2  ;;  %v4024_v46 = vpop.f32.mrf.mxu0 }
  0xef   :  { %v4022_v45 = vpop.f32.mrf.mxu3  ;;  %v4026_v47 = vpop.f32.mrf.mxu1 }
  0xf1   :  { %330 = vmatmul.f32.gmra.mxu0 %v174_v48 }
  0xf2   :  { %443 = vmatmul.f32.gmra.mxu1 %v174_v48 }
  0xf3   :  { %556 = vmatmul.f32.gmra.mxu2 %v174_v48 }
  0xf4   :  { %669 = vmatmul.f32.gmra.mxu3 %v174_v48 }
  0xf6   :  { %v4031_v49 = vpop.f32.mrf.mxu2  ;;  %v4035_v51 = vpop.f32.mrf.mxu0 }
  0xf7   :  { %v4033_v50 = vpop.f32.mrf.mxu3  ;;  %v4037_v52 = vpop.f32.mrf.mxu1 }
  0xf9   :  { %333 = vmatmul.f32.gmra.mxu0 %v175_v53 }
  0xfa   :  { %446 = vmatmul.f32.gmra.mxu1 %v175_v53 }
  0xfb   :  { %559 = vmatmul.f32.gmra.mxu2 %v175_v53 }
  0xfc   :  { %672 = vmatmul.f32.gmra.mxu3 %v175_v53 }
  0xfe   :  { %v4042_v54 = vpop.f32.mrf.mxu2  ;;  %v4046_v56 = vpop.f32.mrf.mxu0 }
  0xff   :  { %v4044_v55 = vpop.f32.mrf.mxu3  ;;  %v4048_v57 = vpop.f32.mrf.mxu1 }
 0x101   :  { %336 = vmatmul.f32.gmra.mxu0 %v176_v58 }
 0x102   :  { %449 = vmatmul.f32.gmra.mxu1 %v176_v58 }
 0x103   :  { %562 = vmatmul.f32.gmra.mxu2 %v176_v58 }
 0x104   :  { %675 = vmatmul.f32.gmra.mxu3 %v176_v58  ;;  %v182_v58 = vld [vmem:[%s5642_s0 + $0xf0] sm:$0xff] }
 0x106   :  { %v4053_v59 = vpop.f32.mrf.mxu2  ;;  %v4057_v61 = vpop.f32.mrf.mxu0 }
 0x107   :  { %v4055_v60 = vpop.f32.mrf.mxu3  ;;  %v4059_v62 = vpop.f32.mrf.mxu1 }
 0x108   :  { %5653 = vst [vmem:[#allocation3_spill] sm:$0xff] %v4059_v62 }
 0x109   :  { %339 = vmatmul.f32.gmra.mxu0 %v177_v63 }
 0x10a   :  { %452 = vmatmul.f32.gmra.mxu1 %v177_v63 }
 0x10b   :  { %565 = vmatmul.f32.gmra.mxu2 %v177_v63 }
 0x10c   :  { %678 = vmatmul.f32.gmra.mxu3 %v177_v63 }
 0x10e   :  { %v4064_v0 = vpop.f32.mrf.mxu2  ;;  %v4068_v2 = vpop.f32.mrf.mxu0 }
 0x10f   :  { %5654 = vst [vmem:[#allocation4_spill] sm:$0xff] %v4064_v0  ;;  %v4066_v1 = vpop.f32.mrf.mxu3  ;;  %v4070_v3 = vpop.f32.mrf.mxu1 }
 0x110   :  { %5655 = vst [vmem:[#allocation5_spill] sm:$0xff] %v4066_v1 }
 0x111   :  { %5656 = vst [vmem:[#allocation6_spill] sm:$0xff] %v4068_v2  ;;  %342 = vmatmul.f32.gmra.mxu0 %v178_v4 }
 0x112   :  { %5657 = vst [vmem:[#allocation7_spill] sm:$0xff] %v4070_v3  ;;  %455 = vmatmul.f32.gmra.mxu1 %v178_v4 }
 0x113   :  { %568 = vmatmul.f32.gmra.mxu2 %v178_v4 }
 0x114   :  { %681 = vmatmul.f32.gmra.mxu3 %v178_v4 }
 0x116   :  { %v4075_v5 = vpop.f32.mrf.mxu2  ;;  %v4079_v7 = vpop.f32.mrf.mxu0 }
 0x117   :  { %5658 = vst [vmem:[#allocation8_spill] sm:$0xff] %v4075_v5  ;;  %v4077_v6 = vpop.f32.mrf.mxu3  ;;  %v4081_v8 = vpop.f32.mrf.mxu1 }
 0x118   :  { %5659 = vst [vmem:[#allocation9_spill] sm:$0xff] %v4077_v6 }
 0x119   :  { %5660 = vst [vmem:[#allocation10_spill] sm:$0xff] %v4079_v7  ;;  %345 = vmatmul.f32.gmra.mxu0 %v179_v9 }
 0x11a   :  { %5661 = vst [vmem:[#allocation11_spill] sm:$0xff] %v4081_v8  ;;  %458 = vmatmul.f32.gmra.mxu1 %v179_v9  ;;  %v1187_v8 = vld [vmem:[%s5644_s2 + $0x18] sm:$0xff] }
 0x11b   :  { %571 = vmatmul.f32.gmra.mxu2 %v179_v9 }
 0x11c   :  { %684 = vmatmul.f32.gmra.mxu3 %v179_v9 }
 0x11e   :  { %v4086_v10 = vpop.f32.mrf.mxu2  ;;  %v4090_v12 = vpop.f32.mrf.mxu0 }
 0x11f   :  { %5662 = vst [vmem:[#allocation12_spill] sm:$0xff] %v4086_v10  ;;  %v4088_v11 = vpop.f32.mrf.mxu3  ;;  %v4092_v13 = vpop.f32.mrf.mxu1 }
 0x120   :  { %5663 = vst [vmem:[#allocation13_spill] sm:$0xff] %v4088_v11 }
 0x121   :  { %5664 = vst [vmem:[#allocation14_spill] sm:$0xff] %v4090_v12  ;;  %348 = vmatmul.f32.gmra.mxu0 %v180_v14 }
 0x122   :  { %5665 = vst [vmem:[#allocation15_spill] sm:$0xff] %v4092_v13  ;;  %461 = vmatmul.f32.gmra.mxu1 %v180_v14 }
 0x123   :  { %574 = vmatmul.f32.gmra.mxu2 %v180_v14 }
 0x124   :  { %687 = vmatmul.f32.gmra.mxu3 %v180_v14 }
 0x126   :  { %v4097_v15 = vpop.f32.mrf.mxu2  ;;  %v4101_v23 = vpop.f32.mrf.mxu0 }
 0x127   :  { %5666 = vst [vmem:[#allocation16_spill] sm:$0xff] %v4097_v15  ;;  %v4099_v18 = vpop.f32.mrf.mxu3  ;;  %v4103_v28 = vpop.f32.mrf.mxu1 }
 0x128   :  { %5667 = vst [vmem:[#allocation17_spill] sm:$0xff] %v4099_v18 }
 0x129   :  { %5668 = vst [vmem:[#allocation18_spill] sm:$0xff] %v4101_v23  ;;  %351 = vmatmul.f32.gmra.mxu0 %v181_v33  ;;  %v1185_v23 = vld [vmem:[%s5644_s2 + $0x8] sm:$0xff] }
 0x12a   :  { %5669 = vst [vmem:[#allocation19_spill] sm:$0xff] %v4103_v28  ;;  %464 = vmatmul.f32.gmra.mxu1 %v181_v33  ;;  %v1251_v15 = vunpack.c.h.bf16 %v1185_v23 }
 0x12b   :  { %577 = vmatmul.f32.gmra.mxu2 %v181_v33 }
 0x12c   :  { %690 = vmatmul.f32.gmra.mxu3 %v181_v33  ;;  %v183_v33 = vld [vmem:[%s5642_s0 + $0xf8] sm:$0xff] }
 0x12e   :  { %v4108_v38 = vpop.f32.mrf.mxu2  ;;  %v4112_v48 = vpop.f32.mrf.mxu0 }
 0x12f   :  { %5670 = vst [vmem:[#allocation20_spill] sm:$0xff] %v4108_v38  ;;  %v4110_v43 = vpop.f32.mrf.mxu3  ;;  %v4114_v53 = vpop.f32.mrf.mxu1 }
 0x130   :  { %5671 = vst [vmem:[#allocation21_spill] sm:$0xff] %v4110_v43 }
 0x131   :  { %5672 = vst [vmem:[#allocation22_spill] sm:$0xff] %v4112_v48  ;;  %354 = vmatmul.f32.gmra.mxu0 %v182_v58 }
 0x132   :  { %5673 = vst [vmem:[#allocation23_spill] sm:$0xff] %v4114_v53  ;;  %467 = vmatmul.f32.gmra.mxu1 %v182_v58 }
 0x133   :  { %580 = vmatmul.f32.gmra.mxu2 %v182_v58 }
 0x134   :  { %693 = vmatmul.f32.gmra.mxu3 %v182_v58 }
 0x136   :  { %v4119_v63 = vpop.f32.mrf.mxu2  ;;  %v4123_v9 = vpop.f32.mrf.mxu0 }
 0x137   :  { %5674 = vst [vmem:[#allocation24_spill] sm:$0xff] %v4119_v63  ;;  %v4121_v4 = vpop.f32.mrf.mxu3  ;;  %v4125_v14 = vpop.f32.mrf.mxu1 }
 0x138   :  { %5675 = vst [vmem:[#allocation25_spill] sm:$0xff] %v4121_v4 }
 0x139   :  { %5676 = vst [vmem:[#allocation26_spill] sm:$0xff] %v4123_v9  ;;  %357 = vmatmul.f32.gmra.mxu0 %v183_v33 }
 0x13a   :  { %5677 = vst [vmem:[#allocation27_spill] sm:$0xff] %v4125_v14  ;;  %470 = vmatmul.f32.gmra.mxu1 %v183_v33  ;;  %v700_v14 = vld [vmem:[%s5643_s1] sm:$0xff] }
 0x13b   :  { %583 = vmatmul.f32.gmra.mxu2 %v183_v33 }
 0x13c   :  { %696 = vmatmul.f32.gmra.mxu3 %v183_v33 }
 0x13e   :  { %v4130_v53 = vpop.f32.mrf.mxu2  ;;  %v4134_v58 = vpop.f32.mrf.mxu0 }
 0x13f   :  { %5678 = vst [vmem:[#allocation28_spill] sm:$0xff] %v4130_v53  ;;  %v4132_v48 = vpop.f32.mrf.mxu3  ;;  %v4136_v63 = vpop.f32.mrf.mxu1 }
 0x140   :  { %5679 = vst [vmem:[#allocation29_spill] sm:$0xff] %v4132_v48 }
 0x141   :  { %5680 = vst [vmem:[#allocation30_spill] sm:$0xff] %v4134_v58  ;;  %748 = vmatmul.f32.vlgmr.msrb.gmra.mxu0 %v700_v14 }
 0x142   :  { %5681 = vst [vmem:[#allocation31_spill] sm:$0xff] %v4136_v63  ;;  %861 = vmatmul.f32.vlgmr.msrb.gmra.mxu1 %v700_v14  ;;  %v701_v63 = vld [vmem:[%s5643_s1 + $0x8] sm:$0xff] }
 0x143   :  { %974 = vmatmul.f32.vlgmr.msrb.gmra.mxu2 %v700_v14 }
 0x144   :  { %1087 = vmatmul.f32.vlgmr.msrb.gmra.mxu3 %v700_v14 }
 0x146   :  { %v4141_v9 = vpop.f32.mrf.mxu2  ;;  %v4145_v33 = vpop.f32.mrf.mxu0 }
 0x147   :  { %5682 = vst [vmem:[#allocation32_spill] sm:$0xff] %v4141_v9  ;;  %v4143_v4 = vpop.f32.mrf.mxu3  ;;  %v4147_v53 = vpop.f32.mrf.mxu1 }
 0x148   :  { %5683 = vst [vmem:[#allocation33_spill] sm:$0xff] %v4143_v4 }
 0x149   :  { %5684 = vst [vmem:[#allocation34_spill] sm:$0xff] %v4145_v33  ;;  %751 = vmatmul.f32.gmra.mxu0 %v701_v63 }
 0x14a   :  { %5685 = vst [vmem:[#allocation35_spill] sm:$0xff] %v4147_v53  ;;  %864 = vmatmul.f32.gmra.mxu1 %v701_v63  ;;  %v702_v53 = vld [vmem:[%s5643_s1 + $0x10] sm:$0xff] }
 0x14b   :  { %977 = vmatmul.f32.gmra.mxu2 %v701_v63 }
 0x14c   :  { %1090 = vmatmul.f32.gmra.mxu3 %v701_v63 }
 0x14e   :  { %v4152_v58 = vpop.f32.mrf.mxu2  ;;  %v4156_v14 = vpop.f32.mrf.mxu0 }
 0x14f   :  { %5686 = vst [vmem:[#allocation36_spill] sm:$0xff] %v4152_v58  ;;  %v4154_v48 = vpop.f32.mrf.mxu3  ;;  %v4158_v9 = vpop.f32.mrf.mxu1 }
 0x150   :  { %5687 = vst [vmem:[#allocation37_spill] sm:$0xff] %v4154_v48 }
 0x151   :  { %5688 = vst [vmem:[#allocation38_spill] sm:$0xff] %v4156_v14  ;;  %754 = vmatmul.f32.gmra.mxu0 %v702_v53 }
 0x152   :  { %5689 = vst [vmem:[#allocation39_spill] sm:$0xff] %v4158_v9  ;;  %867 = vmatmul.f32.gmra.mxu1 %v702_v53  ;;  %v703_v9 = vld [vmem:[%s5643_s1 + $0x18] sm:$0xff] }
 0x153   :  { %980 = vmatmul.f32.gmra.mxu2 %v702_v53 }
 0x154   :  { %1093 = vmatmul.f32.gmra.mxu3 %v702_v53 }
 0x156   :  { %v4163_v33 = vpop.f32.mrf.mxu2  ;;  %v4167_v63 = vpop.f32.mrf.mxu0 }
 0x157   :  { %5690 = vst [vmem:[#allocation40_spill] sm:$0xff] %v4163_v33  ;;  %v4165_v4 = vpop.f32.mrf.mxu3  ;;  %v4169_v58 = vpop.f32.mrf.mxu1 }
 0x158   :  { %5691 = vst [vmem:[#allocation41_spill] sm:$0xff] %v4165_v4 }
 0x159   :  { %5692 = vst [vmem:[#allocation42_spill] sm:$0xff] %v4167_v63  ;;  %757 = vmatmul.f32.gmra.mxu0 %v703_v9 }
 0x15a   :  { %5693 = vst [vmem:[#allocation43_spill] sm:$0xff] %v4169_v58  ;;  %870 = vmatmul.f32.gmra.mxu1 %v703_v9  ;;  %v704_v58 = vld [vmem:[%s5643_s1 + $0x20] sm:$0xff] }
 0x15b   :  { %983 = vmatmul.f32.gmra.mxu2 %v703_v9 }
 0x15c   :  { %1096 = vmatmul.f32.gmra.mxu3 %v703_v9 }
 0x15e   :  { %v4174_v14 = vpop.f32.mrf.mxu2  ;;  %v4178_v53 = vpop.f32.mrf.mxu0 }
 0x15f   :  { %5694 = vst [vmem:[#allocation44_spill] sm:$0xff] %v4174_v14  ;;  %v4176_v48 = vpop.f32.mrf.mxu3  ;;  %v4180_v33 = vpop.f32.mrf.mxu1 }
 0x160   :  { %5695 = vst [vmem:[#allocation45_spill] sm:$0xff] %v4176_v48 }
 0x161   :  { %5696 = vst [vmem:[#allocation46_spill] sm:$0xff] %v4178_v53  ;;  %760 = vmatmul.f32.gmra.mxu0 %v704_v58 }
 0x162   :  { %5697 = vst [vmem:[#allocation47_spill] sm:$0xff] %v4180_v33  ;;  %873 = vmatmul.f32.gmra.mxu1 %v704_v58  ;;  %v705_v33 = vld [vmem:[%s5643_s1 + $0x28] sm:$0xff] }
 0x163   :  { %986 = vmatmul.f32.gmra.mxu2 %v704_v58 }
 0x164   :  { %1099 = vmatmul.f32.gmra.mxu3 %v704_v58 }
 0x166   :  { %v4185_v63 = vpop.f32.mrf.mxu2  ;;  %v4189_v9 = vpop.f32.mrf.mxu0 }
 0x167   :  { %5698 = vst [vmem:[#allocation48_spill] sm:$0xff] %v4185_v63  ;;  %v4187_v4 = vpop.f32.mrf.mxu3  ;;  %v4191_v14 = vpop.f32.mrf.mxu1 }
 0x168   :  { %5699 = vst [vmem:[#allocation49_spill] sm:$0xff] %v4187_v4 }
 0x169   :  { %5700 = vst [vmem:[#allocation50_spill] sm:$0xff] %v4189_v9  ;;  %763 = vmatmul.f32.gmra.mxu0 %v705_v33 }
 0x16a   :  { %5701 = vst [vmem:[#allocation51_spill] sm:$0xff] %v4191_v14  ;;  %876 = vmatmul.f32.gmra.mxu1 %v705_v33  ;;  %v706_v14 = vld [vmem:[%s5643_s1 + $0x30] sm:$0xff] }
 0x16b   :  { %989 = vmatmul.f32.gmra.mxu2 %v705_v33 }
 0x16c   :  { %1102 = vmatmul.f32.gmra.mxu3 %v705_v33 }
 0x16e   :  { %v4196_v53 = vpop.f32.mrf.mxu2  ;;  %v4200_v58 = vpop.f32.mrf.mxu0 }
 0x16f   :  { %5702 = vst [vmem:[#allocation52_spill] sm:$0xff] %v4196_v53  ;;  %v4198_v48 = vpop.f32.mrf.mxu3  ;;  %v4202_v63 = vpop.f32.mrf.mxu1 }
 0x170   :  { %5703 = vst [vmem:[#allocation53_spill] sm:$0xff] %v4198_v48 }
 0x171   :  { %5704 = vst [vmem:[#allocation54_spill] sm:$0xff] %v4200_v58  ;;  %766 = vmatmul.f32.gmra.mxu0 %v706_v14 }
 0x172   :  { %5705 = vst [vmem:[#allocation55_spill] sm:$0xff] %v4202_v63  ;;  %879 = vmatmul.f32.gmra.mxu1 %v706_v14  ;;  %v707_v63 = vld [vmem:[%s5643_s1 + $0x38] sm:$0xff] }
 0x173   :  { %992 = vmatmul.f32.gmra.mxu2 %v706_v14 }
 0x174   :  { %1105 = vmatmul.f32.gmra.mxu3 %v706_v14 }
 0x176   :  { %v4207_v9 = vpop.f32.mrf.mxu2  ;;  %v4211_v33 = vpop.f32.mrf.mxu0 }
 0x177   :  { %5706 = vst [vmem:[#allocation56_spill] sm:$0xff] %v4207_v9  ;;  %v4209_v4 = vpop.f32.mrf.mxu3  ;;  %v4213_v53 = vpop.f32.mrf.mxu1 }
 0x178   :  { %5707 = vst [vmem:[#allocation57_spill] sm:$0xff] %v4209_v4 }
 0x179   :  { %5708 = vst [vmem:[#allocation58_spill] sm:$0xff] %v4211_v33  ;;  %769 = vmatmul.f32.gmra.mxu0 %v707_v63 }
 0x17a   :  { %5709 = vst [vmem:[#allocation59_spill] sm:$0xff] %v4213_v53  ;;  %882 = vmatmul.f32.gmra.mxu1 %v707_v63  ;;  %v708_v53 = vld [vmem:[%s5643_s1 + $0x40] sm:$0xff] }
 0x17b   :  { %995 = vmatmul.f32.gmra.mxu2 %v707_v63 }
 0x17c   :  { %1108 = vmatmul.f32.gmra.mxu3 %v707_v63 }
 0x17e   :  { %v4218_v58 = vpop.f32.mrf.mxu2  ;;  %v4222_v14 = vpop.f32.mrf.mxu0 }
 0x17f   :  { %5710 = vst [vmem:[#allocation60_spill] sm:$0xff] %v4218_v58  ;;  %v4220_v48 = vpop.f32.mrf.mxu3  ;;  %v4224_v9 = vpop.f32.mrf.mxu1 }
 0x180   :  { %5711 = vst [vmem:[#allocation61_spill] sm:$0xff] %v4220_v48 }
 0x181   :  { %5712 = vst [vmem:[#allocation62_spill] sm:$0xff] %v4222_v14  ;;  %772 = vmatmul.f32.gmra.mxu0 %v708_v53 }
 0x182   :  { %5713 = vst [vmem:[#allocation63_spill] sm:$0xff] %v4224_v9  ;;  %885 = vmatmul.f32.gmra.mxu1 %v708_v53  ;;  %v709_v9 = vld [vmem:[%s5643_s1 + $0x48] sm:$0xff] }
 0x183   :  { %998 = vmatmul.f32.gmra.mxu2 %v708_v53 }
 0x184   :  { %1111 = vmatmul.f32.gmra.mxu3 %v708_v53 }
 0x186   :  { %v4229_v33 = vpop.f32.mrf.mxu2  ;;  %v4233_v63 = vpop.f32.mrf.mxu0 }
 0x187   :  { %5714 = vst [vmem:[#allocation64_spill] sm:$0xff] %v4229_v33  ;;  %v4231_v4 = vpop.f32.mrf.mxu3  ;;  %v4235_v58 = vpop.f32.mrf.mxu1 }
 0x188   :  { %5715 = vst [vmem:[#allocation65_spill] sm:$0xff] %v4231_v4 }
 0x189   :  { %5716 = vst [vmem:[#allocation66_spill] sm:$0xff] %v4233_v63  ;;  %775 = vmatmul.f32.gmra.mxu0 %v709_v9 }
 0x18a   :  { %5717 = vst [vmem:[#allocation67_spill] sm:$0xff] %v4235_v58  ;;  %888 = vmatmul.f32.gmra.mxu1 %v709_v9  ;;  %v710_v58 = vld [vmem:[%s5643_s1 + $0x50] sm:$0xff] }
 0x18b   :  { %1001 = vmatmul.f32.gmra.mxu2 %v709_v9 }
 0x18c   :  { %1114 = vmatmul.f32.gmra.mxu3 %v709_v9 }
 0x18e   :  { %v4240_v14 = vpop.f32.mrf.mxu2  ;;  %v4244_v53 = vpop.f32.mrf.mxu0 }
 0x18f   :  { %5718 = vst [vmem:[#allocation68_spill] sm:$0xff] %v4240_v14  ;;  %v4242_v48 = vpop.f32.mrf.mxu3  ;;  %v4246_v33 = vpop.f32.mrf.mxu1 }
 0x190   :  { %5719 = vst [vmem:[#allocation69_spill] sm:$0xff] %v4242_v48 }
 0x191   :  { %5720 = vst [vmem:[#allocation70_spill] sm:$0xff] %v4244_v53  ;;  %778 = vmatmul.f32.gmra.mxu0 %v710_v58 }
 0x192   :  { %5721 = vst [vmem:[#allocation71_spill] sm:$0xff] %v4246_v33  ;;  %891 = vmatmul.f32.gmra.mxu1 %v710_v58  ;;  %v711_v33 = vld [vmem:[%s5643_s1 + $0x58] sm:$0xff] }
 0x193   :  { %1004 = vmatmul.f32.gmra.mxu2 %v710_v58 }
 0x194   :  { %1117 = vmatmul.f32.gmra.mxu3 %v710_v58 }
 0x196   :  { %v4251_v63 = vpop.f32.mrf.mxu2  ;;  %v4255_v9 = vpop.f32.mrf.mxu0 }
 0x197   :  { %5722 = vst [vmem:[#allocation72_spill] sm:$0xff] %v4251_v63  ;;  %v4253_v4 = vpop.f32.mrf.mxu3  ;;  %v4257_v14 = vpop.f32.mrf.mxu1 }
 0x198   :  { %5723 = vst [vmem:[#allocation73_spill] sm:$0xff] %v4253_v4 }
 0x199   :  { %5724 = vst [vmem:[#allocation74_spill] sm:$0xff] %v4255_v9  ;;  %781 = vmatmul.f32.gmra.mxu0 %v711_v33 }
 0x19a   :  { %5725 = vst [vmem:[#allocation75_spill] sm:$0xff] %v4257_v14  ;;  %894 = vmatmul.f32.gmra.mxu1 %v711_v33  ;;  %v712_v14 = vld [vmem:[%s5643_s1 + $0x60] sm:$0xff] }
 0x19b   :  { %1007 = vmatmul.f32.gmra.mxu2 %v711_v33 }
 0x19c   :  { %1120 = vmatmul.f32.gmra.mxu3 %v711_v33 }
 0x19e   :  { %v4262_v53 = vpop.f32.mrf.mxu2  ;;  %v4266_v58 = vpop.f32.mrf.mxu0 }
 0x19f   :  { %5726 = vst [vmem:[#allocation76_spill] sm:$0xff] %v4262_v53  ;;  %v4264_v48 = vpop.f32.mrf.mxu3  ;;  %v4268_v63 = vpop.f32.mrf.mxu1 }
 0x1a0   :  { %5727 = vst [vmem:[#allocation77_spill] sm:$0xff] %v4264_v48 }
 0x1a1   :  { %5728 = vst [vmem:[#allocation78_spill] sm:$0xff] %v4266_v58  ;;  %784 = vmatmul.f32.gmra.mxu0 %v712_v14 }
 0x1a2   :  { %5729 = vst [vmem:[#allocation79_spill] sm:$0xff] %v4268_v63  ;;  %897 = vmatmul.f32.gmra.mxu1 %v712_v14  ;;  %v713_v63 = vld [vmem:[%s5643_s1 + $0x68] sm:$0xff] }
 0x1a3   :  { %1010 = vmatmul.f32.gmra.mxu2 %v712_v14 }
 0x1a4   :  { %1123 = vmatmul.f32.gmra.mxu3 %v712_v14 }
 0x1a6   :  { %v4273_v9 = vpop.f32.mrf.mxu2  ;;  %v4277_v33 = vpop.f32.mrf.mxu0 }
 0x1a7   :  { %5730 = vst [vmem:[#allocation80_spill] sm:$0xff] %v4273_v9  ;;  %v4275_v4 = vpop.f32.mrf.mxu3  ;;  %v4279_v53 = vpop.f32.mrf.mxu1 }
 0x1a8   :  { %5731 = vst [vmem:[#allocation81_spill] sm:$0xff] %v4275_v4 }
 0x1a9   :  { %5732 = vst [vmem:[#allocation82_spill] sm:$0xff] %v4277_v33  ;;  %787 = vmatmul.f32.gmra.mxu0 %v713_v63 }
 0x1aa   :  { %5733 = vst [vmem:[#allocation83_spill] sm:$0xff] %v4279_v53  ;;  %900 = vmatmul.f32.gmra.mxu1 %v713_v63  ;;  %v714_v53 = vld [vmem:[%s5643_s1 + $0x70] sm:$0xff] }
 0x1ab   :  { %1013 = vmatmul.f32.gmra.mxu2 %v713_v63 }
 0x1ac   :  { %1126 = vmatmul.f32.gmra.mxu3 %v713_v63  ;;  %v1184_v63 = vld [vmem:[%s5644_s2] sm:$0xff] }
 0x1ad   :  { %v1248_v4 = vunpack.c.l.bf16 %v1184_v63  ;;  %v1249_v38 = vunpack.c.h.bf16 %v1184_v63  ;;  %v1378_v63 = vld [vmem:[%s5645_s3 + $0x10] sm:$0xff] }
 0x1ae   :  { %v4284_v58 = vpop.f32.mrf.mxu2  ;;  %v4288_v14 = vpop.f32.mrf.mxu0  ;;  %v1445_v7 = vunpack.c.h.bf16 %v1378_v63 }
 0x1af   :  { %5734 = vst [vmem:[#allocation84_spill] sm:$0xff] %v4284_v58  ;;  %v4286_v48 = vpop.f32.mrf.mxu3  ;;  %v4290_v9 = vpop.f32.mrf.mxu1 }
 0x1b0   :  { %5735 = vst [vmem:[#allocation85_spill] sm:$0xff] %v4286_v48  ;;  %v1376_v48 = vld [vmem:[%s5645_s3] sm:$0xff] }
 0x1b1   :  { %5736 = vst [vmem:[#allocation86_spill] sm:$0xff] %v4288_v14  ;;  %790 = vmatmul.f32.gmra.mxu0 %v714_v53  ;;  %v1440_v43 = vunpack.c.l.bf16 %v1376_v48  ;;  %v1441_v28 = vunpack.c.h.bf16 %v1376_v48  ;;  %v1186_v48 = vld [vmem:[%s5644_s2 + $0x10] sm:$0xff] }
 0x1b2   :  { %5737 = vst [vmem:[#allocation87_spill] sm:$0xff] %v4290_v9  ;;  %903 = vmatmul.f32.gmra.mxu1 %v714_v53 }
 0x1b3   :  { %1016 = vmatmul.f32.gmra.mxu2 %v714_v53  ;;  %v1569_v18 = vmul.f32 %v1441_v28, %v1249_v38  ;;  %v716_v28 = vld [vmem:[%s5643_s1 + $0x80] sm:$0xff] }
 0x1b4   :  { %1129 = vmatmul.f32.gmra.mxu3 %v714_v53  ;;  %v715_v53 = vld [vmem:[%s5643_s1 + $0x78] sm:$0xff] }
 0x1b6   :  { %v4301_v58 = vpop.f32.mrf.mxu2  ;;  %v4305_v9 = vpop.f32.mrf.mxu0 }
 0x1b7   :  { %5738 = vst [vmem:[#allocation88_spill] sm:$0xff] %v4301_v58  ;;  %v4303_v14 = vpop.f32.mrf.mxu3  ;;  %v4307_v33 = vpop.f32.mrf.mxu1  ;;  %v1568_v58 = vmul.f32 %v1440_v43, %v1248_v4  ;;  %v1252_v43 = vunpack.c.l.bf16 %v1186_v48  ;;  %v1444_v4 = vunpack.c.l.bf16 %v1378_v63 }
 0x1b8   :  { %5739 = vst [vmem:[#allocation89_spill] sm:$0xff] %v4303_v14  ;;  %v1377_v14 = vld [vmem:[%s5645_s3 + $0x8] sm:$0xff] }
 0x1b9   :  { %5740 = vst [vmem:[#allocation90_spill] sm:$0xff] %v4305_v9  ;;  %793 = vmatmul.f32.gmra.mxu0 %v715_v53  ;;  %v1442_v9 = vunpack.c.l.bf16 %v1377_v14  ;;  %v1443_v13 = vunpack.c.h.bf16 %v1377_v14  ;;  %v1824_v14 = vmul.f32 %v1568_v58, %v3958_v16  ;;  %v1572_v1 = vmul.f32 %v1444_v4, %v1252_v43  ;;  %v1188_v16 = vld [vmem:[%s5644_s2 + $0x20] sm:$0xff] }
 0x1ba   :  { %5741 = vst [vmem:[#allocation91_spill] sm:$0xff] %v4307_v33  ;;  %906 = vmatmul.f32.gmra.mxu1 %v715_v53  ;;  %v1250_v33 = vunpack.c.l.bf16 %v1185_v23  ;;  %v1379_v23 = vld [vmem:[%s5645_s3 + $0x18] sm:$0xff] }
 0x1bb   :  { %1019 = vmatmul.f32.gmra.mxu2 %v715_v53  ;;  %v1571_v6 = vmul.f32 %v1443_v13, %v1251_v15  ;;  %v1255_v13 = vunpack.c.h.bf16 %v1187_v8  ;;  %v1447_v15 = vunpack.c.h.bf16 %v1379_v23 }
 0x1bc   :  { %1132 = vmatmul.f32.gmra.mxu3 %v715_v53  ;;  %v1570_v38 = vmul.f32 %v1442_v9, %v1250_v33  ;;  %v1254_v9 = vunpack.c.l.bf16 %v1187_v8  ;;  %v1446_v33 = vunpack.c.l.bf16 %v1379_v23 }
 0x1be   :  { %v4324_v12 = vpop.f32.mrf.mxu2  ;;  %v749_v10 = vpop.f32.mrf.mxu0  ;;  %v1826_v2 = vmul.f32 %v1570_v38, %v3965_v19  ;;  %v1189_v19 = vld [vmem:[%s5644_s2 + $0x28] sm:$0xff]  ;;  %v1257_v38 = vunpack.c.h.bf16 %v1188_v16 }
 0x1bf   :  { %5742 = vst [vmem:[#allocation92_spill] sm:$0xff] %v4324_v12  ;;  %v4326_v11 = vpop.f32.mrf.mxu3  ;;  %v862_v53 = vpop.f32.mrf.mxu1  ;;  %v1253_v12 = vunpack.c.h.bf16 %v1186_v48  ;;  %v1952_v5 = vmul.f32 %v1824_v14, %v749_v10  ;;  %v1827_v10 = vmul.f32 %v1571_v6, %v3967_v20  ;;  %v1381_v20 = vld [vmem:[%s5645_s3 + $0x28] sm:$0xff]  ;;  %v1828_v6 = vmul.f32 %v1572_v1, %v3969_v21  ;;  %v1190_v21 = vld [vmem:[%s5644_s2 + $0x30] sm:$0xff] }
 0x1c0   :  { %5743 = vst [vmem:[#allocation93_spill] sm:$0xff] %v4326_v11  ;;  %v1825_v11 = vmul.f32 %v1569_v18, %v3960_v17  ;;  %v1380_v17 = vld [vmem:[%s5645_s3 + $0x20] sm:$0xff]  ;;  %v1258_v23 = vunpack.c.l.bf16 %v1189_v19  ;;  %v1450_v14 = vunpack.c.l.bf16 %v1381_v20  ;;  %v1451_v1 = vunpack.c.h.bf16 %v1381_v20 }
 0x1c1   :  { %796 = vmatmul.f32.gmra.mxu0 %v716_v28  ;;  %v1573_v0 = vmul.f32 %v1445_v7, %v1253_v12  ;;  %v1448_v8 = vunpack.c.l.bf16 %v1380_v17  ;;  %v1449_v43 = vunpack.c.h.bf16 %v1380_v17 }
 0x1c2   :  { %909 = vmatmul.f32.gmra.mxu1 %v716_v28  ;;  %v1953_v3 = vmul.f32 %v1825_v11, %v862_v53  ;;  %v1574_v11 = vmul.f32 %v1446_v33, %v1254_v9  ;;  %v717_v53 = vld [vmem:[%s5643_s1 + $0x88] sm:$0xff] }
 0x1c3   :  { %1022 = vmatmul.f32.gmra.mxu2 %v716_v28  ;;  %v1829_v4 = vmul.f32 %v1573_v0, %v3971_v22  ;;  %v1577_v62 = vmul.f32 %v1449_v43, %v1257_v38  ;;  %v1382_v22 = vld [vmem:[%s5645_s3 + $0x30] sm:$0xff]  ;;  %v1259_v0 = vunpack.c.h.bf16 %v1189_v19 }
 0x1c4   :  { %1135 = vmatmul.f32.gmra.mxu3 %v716_v28  ;;  %v2467_v7 = vadd.f32 %v1953_v3, %v1952_v5  ;;  %v1256_v28 = vunpack.c.l.bf16 %v1188_v16  ;;  %v1575_v5 = vmul.f32 %v1447_v15, %v1255_v13  ;;  %v1830_v17 = vmul.f32 %v1574_v11, %v3976_v24  ;;  %v1191_v24 = vld [vmem:[%s5644_s2 + $0x38] sm:$0xff] }
 0x1c5   :  { %v1452_v19 = vunpack.c.l.bf16 %v1382_v22  ;;  %v1833_v43 = vmul.f32 %v1577_v62, %v3982_v27  ;;  %v1384_v27 = vld [vmem:[%s5645_s3 + $0x40] sm:$0xff]  ;;  %v1263_v62 = vunpack.c.h.bf16 %v1191_v24 }
 0x1c6   :  { %v975_v18 = vpop.f32.mrf.mxu2  ;;  %v752_v48 = vpop.f32.mrf.mxu0 }
 0x1c7   :  { %v1088_v58 = vpop.f32.mrf.mxu3  ;;  %v1954_v12 = vmul.f32 %v1826_v2, %v975_v18  ;;  %v865_v63 = vpop.f32.mrf.mxu1  ;;  %v1956_v9 = vmul.f32 %v1828_v6, %v752_v48  ;;  %v1576_v18 = vmul.f32 %v1448_v8, %v1256_v28  ;;  %v1261_v28 = vunpack.c.h.bf16 %v1190_v21 }
 0x1c8   :  { %v1955_v3 = vmul.f32 %v1827_v10, %v1088_v58  ;;  %v1957_v33 = vmul.f32 %v1829_v4, %v865_v63  ;;  %v1831_v58 = vmul.f32 %v1575_v5, %v3978_v25  ;;  %v1578_v10 = vmul.f32 %v1450_v14, %v1258_v23  ;;  %v718_v63 = vld [vmem:[%s5643_s1 + $0x90] sm:$0xff]  ;;  %v1383_v25 = vld [vmem:[%s5645_s3 + $0x38] sm:$0xff] }
 0x1c9   :  { %v2468_v2 = vadd.f32 %v2467_v7, %v1954_v12  ;;  %799 = vmatmul.f32.gmra.mxu0 %v717_v53  ;;  %v1453_v8 = vunpack.c.h.bf16 %v1382_v22  ;;  %v1832_v38 = vmul.f32 %v1576_v18, %v3980_v26  ;;  %v1579_v4 = vmul.f32 %v1451_v1, %v1259_v0  ;;  %v1192_v26 = vld [vmem:[%s5644_s2 + $0x40] sm:$0xff] }
 0x1ca   :  { %912 = vmatmul.f32.gmra.mxu1 %v717_v53  ;;  %v2472_v11 = vadd.f32 %v1957_v33, %v1956_v9  ;;  %v1834_v9 = vmul.f32 %v1578_v10, %v3987_v29  ;;  %v1193_v29 = vld [vmem:[%s5644_s2 + $0x48] sm:$0xff]  ;;  %v719_v10 = vld [vmem:[%s5643_s1 + $0x98] sm:$0xff] }
 0x1cb   :  { %1025 = vmatmul.f32.gmra.mxu2 %v717_v53  ;;  %v2469_v16 = vadd.f32 %v2468_v2, %v1955_v3  ;;  %v1262_v3 = vunpack.c.l.bf16 %v1191_v24  ;;  %v1454_v2 = vunpack.c.l.bf16 %v1383_v25  ;;  %v1835_v22 = vmul.f32 %v1579_v4, %v3989_v30  ;;  %v1385_v30 = vld [vmem:[%s5645_s3 + $0x48] sm:$0xff] }
 0x1cc   :  { %1138 = vmatmul.f32.gmra.mxu3 %v717_v53  ;;  %v1260_v53 = vunpack.c.l.bf16 %v1190_v21  ;;  %v1456_v24 = vunpack.c.l.bf16 %v1384_v27 }
 0x1cd   :  { %2470 = vadd.xlane.f32.xlu0 %v2469_v16  ;;  %v1581_v16 = vmul.f32 %v1453_v8, %v1261_v28  ;;  %v1582_v0 = vmul.f32 %v1454_v2, %v1262_v3  ;;  %v1266_v8 = vunpack.c.l.bf16 %v1193_v29  ;;  %v1267_v2 = vunpack.c.h.bf16 %v1193_v29 }
 0x1ce   :  { %v978_v13 = vpop.f32.mrf.mxu2  ;;  %v755_v12 = vpop.f32.mrf.mxu0  ;;  %v1580_v33 = vmul.f32 %v1452_v19, %v1260_v53 }
 0x1cf   :  { %v1091_v15 = vpop.f32.mrf.mxu3  ;;  %v1958_v7 = vmul.f32 %v1830_v17, %v978_v13  ;;  %v868_v48 = vpop.f32.mrf.mxu1  ;;  %v1960_v5 = vmul.f32 %v1832_v38, %v755_v12  ;;  %v1455_v17 = vunpack.c.h.bf16 %v1383_v25  ;;  %v1457_v12 = vunpack.c.h.bf16 %v1384_v27 }
 0x1d0   :  { %v1959_v20 = vmul.f32 %v1831_v58, %v1091_v15  ;;  %v1961_v23 = vmul.f32 %v1833_v43, %v868_v48  ;;  %v1836_v48 = vmul.f32 %v1580_v33, %v3991_v31  ;;  %v1458_v25 = vunpack.c.l.bf16 %v1385_v30  ;;  %v1194_v31 = vld [vmem:[%s5644_s2 + $0x50] sm:$0xff] }
 0x1d1   :  { %v2473_v6 = vadd.f32 %v2472_v11, %v1958_v7  ;;  %802 = vmatmul.f32.gmra.mxu0 %v718_v63  ;;  %v1264_v11 = vunpack.c.l.bf16 %v1192_v26  ;;  %v1265_v7 = vunpack.c.h.bf16 %v1192_v26  ;;  %v1583_v28 = vmul.f32 %v1455_v17, %v1263_v62  ;;  %v720_v17 = vld [vmem:[%s5643_s1 + $0xa0] sm:$0xff] }
 0x1d2   :  { %915 = vmatmul.f32.gmra.mxu1 %v718_v63  ;;  %v2477_v1 = vadd.f32 %v1961_v23, %v1960_v5  ;;  %v1459_v5 = vunpack.c.h.bf16 %v1385_v30  ;;  %v1586_v33 = vmul.f32 %v1458_v25, %v1266_v8 }
 0x1d3   :  { %1028 = vmatmul.f32.gmra.mxu2 %v718_v63  ;;  %v2474_v14 = vadd.f32 %v2473_v6, %v1959_v20  ;;  %v1838_v6 = vmul.f32 %v1582_v0, %v3998_v34  ;;  %v1584_v4 = vmul.f32 %v1456_v24, %v1264_v11  ;;  %v1585_v3 = vmul.f32 %v1457_v12, %v1265_v7  ;;  %v1195_v34 = vld [vmem:[%s5644_s2 + $0x58] sm:$0xff] }
 0x1d4   :  { %1141 = vmatmul.f32.gmra.mxu3 %v718_v63  ;;  %v1837_v63 = vmul.f32 %v1581_v16, %v3993_v32  ;;  %v1386_v32 = vld [vmem:[%s5645_s3 + $0x50] sm:$0xff]  ;;  %v1842_v30 = vmul.f32 %v1586_v33, %v4009_v39  ;;  %v1197_v39 = vld [vmem:[%s5644_s2 + $0x68] sm:$0xff] }
 0x1d5   :  { %2475 = vadd.xlane.f32.xlu0 %v2474_v14  ;;  %v1461_v0 = vunpack.c.h.bf16 %v1386_v32  ;;  %v1840_v29 = vmul.f32 %v1584_v4, %v4002_v36  ;;  %v1196_v36 = vld [vmem:[%s5644_s2 + $0x60] sm:$0xff] }
 0x1d6   :  { %v981_v18 = vpop.f32.mrf.mxu2  ;;  %v758_v15 = vpop.f32.mrf.mxu0 }
 0x1d7   :  { %v1094_v21 = vpop.f32.mrf.mxu3  ;;  %v1962_v13 = vmul.f32 %v1834_v9, %v981_v18  ;;  %v871_v58 = vpop.f32.mrf.mxu1  ;;  %v1964_v38 = vmul.f32 %v1836_v48, %v758_v15  ;;  %v1839_v9 = vmul.f32 %v1583_v28, %v4000_v35  ;;  %v1268_v18 = vunpack.c.l.bf16 %v1194_v31  ;;  %v1387_v35 = vld [vmem:[%s5645_s3 + $0x58] sm:$0xff] }
 0x1d8   :  { %v1963_v53 = vmul.f32 %v1835_v22, %v1094_v21  ;;  %v1965_v43 = vmul.f32 %v1837_v63, %v871_v58  ;;  %v1460_v21 = vunpack.c.l.bf16 %v1386_v32  ;;  %v1269_v22 = vunpack.c.h.bf16 %v1194_v31  ;;  %v721_v31 = vld [vmem:[%s5643_s1 + $0xa8] sm:$0xff] }
 0x1d9   :  { %v2478_v19 = vadd.f32 %v2477_v1, %v1962_v13  ;;  %805 = vmatmul.f32.gmra.mxu0 %v719_v10  ;;  %v1841_v1 = vmul.f32 %v1585_v3, %v4004_v37  ;;  %v1587_v58 = vmul.f32 %v1459_v5, %v1267_v2  ;;  %v1462_v11 = vunpack.c.l.bf16 %v1387_v35  ;;  %v1388_v37 = vld [vmem:[%s5645_s3 + $0x60] sm:$0xff] }
 0x1da   :  { %918 = vmatmul.f32.gmra.mxu1 %v719_v10  ;;  %v2482_v16 = vadd.f32 %v1965_v43, %v1964_v38  ;;  %v1588_v48 = vmul.f32 %v1460_v21, %v1268_v18  ;;  %v1589_v63 = vmul.f32 %v1461_v0, %v1269_v22  ;;  %v1389_v43 = vld [vmem:[%s5645_s3 + $0x68] sm:$0xff]  ;;  %v1272_v32 = vunpack.c.l.bf16 %v1196_v36  ;;  %v4444_v0 = vld [vmem:[%s5644_s2 + $0x78] sm:$0xff] }
 0x1db   :  { %1031 = vmatmul.f32.gmra.mxu2 %v719_v10  ;;  %v2479_v20 = vadd.f32 %v2478_v19, %v1963_v53  ;;  %v1271_v53 = vunpack.c.h.bf16 %v1195_v34  ;;  %v1463_v19 = vunpack.c.h.bf16 %v1387_v35  ;;  %v1843_v25 = vmul.f32 %v1587_v58, %v4011_v40  ;;  %v4449_v35 = vld [vmem:[%s5645_s3 + $0x78] sm:$0xff] }
 0x1dc   :  { %1144 = vmatmul.f32.gmra.mxu3 %v719_v10  ;;  %v1270_v10 = vunpack.c.l.bf16 %v1195_v34  ;;  %v1464_v2 = vunpack.c.l.bf16 %v1388_v37  ;;  %v1273_v40 = vunpack.c.h.bf16 %v1196_v36  ;;  %v1465_v5 = vunpack.c.h.bf16 %v1388_v37 }
 0x1dd   :  { %2480 = vadd.xlane.f32.xlu1 %v2479_v20  ;;  %v1591_v34 = vmul.f32 %v1463_v19, %v1271_v53  ;;  %v1278_v37 = vunpack.c.l.bf16 %v4444_v0  ;;  %v1470_v53 = vunpack.c.l.bf16 %v4449_v35 }
 0x1de   :  { %v984_v23 = vpop.f32.mrf.mxu2  ;;  %v761_v27 = vpop.f32.mrf.mxu0  ;;  %v1590_v38 = vmul.f32 %v1462_v11, %v1270_v10  ;;  %v1592_v21 = vmul.f32 %v1464_v2, %v1272_v32  ;;  %v1593_v22 = vmul.f32 %v1465_v5, %v1273_v40  ;;  %v1201_v32 = vld [vmem:[%s5644_s2 + $0x88] sm:$0xff]  ;;  %v1471_v40 = vunpack.c.h.bf16 %v4449_v35 }
 0x1df   :  { %v1097_v14 = vpop.f32.mrf.mxu3  ;;  %v1966_v26 = vmul.f32 %v1838_v6, %v984_v23  ;;  %v874_v62 = vpop.f32.mrf.mxu1  ;;  %v1968_v24 = vmul.f32 %v1840_v29, %v761_v27  ;;  %v1844_v23 = vmul.f32 %v1588_v48, %v4013_v41  ;;  %v1198_v27 = vld [vmem:[%s5644_s2 + $0x70] sm:$0xff]  ;;  %v1393_v2 = vld [vmem:[%s5645_s3 + $0x88] sm:$0xff] }
 0x1e0   :  { %v1967_v13 = vmul.f32 %v1839_v9, %v1097_v14  ;;  %v1969_v7 = vmul.f32 %v1841_v1, %v874_v62  ;;  %v1845_v14 = vmul.f32 %v1589_v63, %v4015_v42  ;;  %v1390_v41 = vld [vmem:[%s5645_s3 + $0x70] sm:$0xff]  ;;  %v1846_v42 = vmul.f32 %v1590_v38, %v4020_v44  ;;  %v1200_v38 = vld [vmem:[%s5644_s2 + $0x80] sm:$0xff] }
 0x1e1   :  { %v2483_v15 = vadd.f32 %v2482_v16, %v1966_v26  ;;  %808 = vmatmul.f32.gmra.mxu0 %v720_v17  ;;  %v1274_v16 = vunpack.c.l.bf16 %v1197_v39  ;;  %v1466_v26 = vunpack.c.l.bf16 %v1389_v43  ;;  %v1275_v1 = vunpack.c.h.bf16 %v1197_v39  ;;  %v722_v48 = vld [vmem:[%s5643_s1 + $0xb0] sm:$0xff]  ;;  %v1392_v39 = vld [vmem:[%s5645_s3 + $0x80] sm:$0xff] }
 0x1e2   :  { %921 = vmatmul.f32.gmra.mxu1 %v720_v17  ;;  %v2487_v20 = vadd.f32 %v1969_v7, %v1968_v24  ;;  %v1847_v44 = vmul.f32 %v1591_v34, %v4022_v45  ;;  %v1468_v11 = vunpack.c.l.bf16 %v1390_v41  ;;  %v1277_v63 = vunpack.c.h.bf16 %v1198_v27 }
 0x1e3   :  { %1034 = vmatmul.f32.gmra.mxu2 %v720_v17  ;;  %v2484_v12 = vadd.f32 %v2483_v15, %v1967_v13  ;;  %v1594_v29 = vmul.f32 %v1466_v26, %v1274_v16  ;;  %v1467_v13 = vunpack.c.h.bf16 %v1389_v43  ;;  %v1276_v15 = vunpack.c.l.bf16 %v1198_v27 }
 0x1e4   :  { %1147 = vmatmul.f32.gmra.mxu3 %v720_v17  ;;  %v1469_v36 = vunpack.c.h.bf16 %v1390_v41  ;;  %v1848_v19 = vmul.f32 %v1592_v21, %v4024_v46  ;;  %v1280_v5 = vunpack.c.l.bf16 %v1200_v38  ;;  %v1473_v34 = vunpack.c.h.bf16 %v1392_v39 }
 0x1e5   :  { %2485 = vadd.xlane.f32.xlu1 %v2484_v12  ;;  %v1474_v41 = vunpack.c.l.bf16 %v1393_v2  ;;  %v1475_v21 = vunpack.c.h.bf16 %v1393_v2 }
 0x1e6   :  { %v987_v28 = vpop.f32.mrf.mxu2  ;;  %v764_v4 = vpop.f32.mrf.mxu0 }
 0x1e7   :  { %v1100_v8 = vpop.f32.mrf.mxu3  ;;  %v1970_v6 = vmul.f32 %v1842_v30, %v987_v28  ;;  %v877_v3 = vpop.f32.mrf.mxu1  ;;  %v1972_v62 = vmul.f32 %v1844_v23, %v764_v4  ;;  %v1849_v28 = vmul.f32 %v1593_v22, %v4026_v47  ;;  %v1850_v47 = vmul.f32 %v1594_v29, %v4031_v49 }
 0x1e8   :  { %v1971_v9 = vmul.f32 %v1843_v25, %v1100_v8  ;;  %v1973_v17 = vmul.f32 %v1845_v14, %v877_v3  ;;  %v1595_v25 = vmul.f32 %v1467_v13, %v1275_v1  ;;  %v1597_v4 = vmul.f32 %v1469_v36, %v1277_v63  ;;  %v4483_v1 = vld [vmem:[%s5644_s2 + $0x90] sm:$0xff]  ;;  %v1204_v63 = vld [vmem:[%s5644_s2 + $0xa0] sm:$0xff] }
 0x1e9   :  { %v2488_v33 = vadd.f32 %v2487_v20, %v1970_v6  ;;  %811 = vmatmul.f32.gmra.mxu0 %v721_v31  ;;  %v1596_v6 = vmul.f32 %v1468_v11, %v1276_v15  ;;  %v1598_v3 = vmul.f32 %v1470_v53, %v1278_v37  ;;  %v1472_v23 = vunpack.c.l.bf16 %v1392_v39  ;;  %v1394_v13 = vld [vmem:[%s5645_s3 + $0x90] sm:$0xff]  ;;  %v1396_v36 = vld [vmem:[%s5645_s3 + $0xa0] sm:$0xff]  ;;  %v1397_v39 = vld [vmem:[%s5645_s3 + $0xa8] sm:$0xff] }
 0x1ea   :  { %924 = vmatmul.f32.gmra.mxu1 %v721_v31  ;;  %v2492_v24 = vadd.f32 %v1973_v17, %v1972_v62  ;;  %v1281_v14 = vunpack.c.h.bf16 %v1200_v38  ;;  %v723_v17 = vld [vmem:[%s5643_s1 + $0xb8] sm:$0xff]  ;;  %v1285_v37 = vunpack.c.h.bf16 %v4483_v1  ;;  %v1477_v53 = vunpack.c.h.bf16 %v1394_v13  ;;  %v1205_v38 = vld [vmem:[%s5644_s2 + $0xa8] sm:$0xff] }
 0x1eb   :  { %1037 = vmatmul.f32.gmra.mxu2 %v721_v31  ;;  %v2489_v18 = vadd.f32 %v2488_v33, %v1971_v9  ;;  %v1851_v33 = vmul.f32 %v1595_v25, %v4033_v50  ;;  %v1852_v22 = vmul.f32 %v1596_v6, %v4035_v51  ;;  %v4491_v51 = vld [vmem:[%s5644_s2 + $0x98] sm:$0xff] }
 0x1ec   :  { %1150 = vmatmul.f32.gmra.mxu3 %v721_v31  ;;  %v1279_v31 = vunpack.c.h.bf16 %v4444_v0  ;;  %v1853_v0 = vmul.f32 %v1597_v4, %v4037_v52  ;;  %v1395_v52 = vld [vmem:[%s5645_s3 + $0x98] sm:$0xff]  ;;  %v1601_v11 = vmul.f32 %v1473_v34, %v1281_v14  ;;  %v1287_v25 = vunpack.c.h.bf16 %v4491_v51 }
 0x1ed   :  { %2490 = vadd.xlane.f32.xlu2 %v2489_v18  ;;  %v1282_v18 = vunpack.c.l.bf16 %v1201_v32  ;;  %v1479_v4 = vunpack.c.h.bf16 %v1395_v52  ;;  %v1291_v34 = vunpack.c.h.bf16 %v1205_v38 }
 0x1ee   :  { %v990_v58 = vpop.f32.mrf.mxu2  ;;  %v767_v12 = vpop.f32.mrf.mxu0  ;;  %v1599_v50 = vmul.f32 %v1471_v40, %v1279_v31  ;;  %v1289_v31 = vunpack.c.h.bf16 %v1204_v63  ;;  %v1857_v2 = vmul.f32 %v1601_v11, %v4048_v57  ;;  %v4522_v40 = vld [vmem:[%s5644_s2 + $0xb0] sm:$0xff]  ;;  %v725_v11 = vld [vmem:[%s5643_s1 + $0xc8] sm:$0xff] }
 0x1ef   :  { %v1103_v10 = vpop.f32.mrf.mxu3  ;;  %v1974_v7 = vmul.f32 %v1846_v42, %v990_v58  ;;  %v880_v30 = vpop.f32.mrf.mxu1  ;;  %v1976_v43 = vmul.f32 %v1848_v19, %v767_v12  ;;  %v1283_v42 = vunpack.c.h.bf16 %v1201_v32  ;;  %v1286_v19 = vunpack.c.l.bf16 %v4491_v51  ;;  %v1399_v51 = vld [vmem:[%s5645_s3 + $0xb8] sm:$0xff] }
 0x1f0   :  { %v1975_v45 = vmul.f32 %v1847_v44, %v1103_v10  ;;  %v1977_v20 = vmul.f32 %v1849_v28, %v880_v30  ;;  %v1600_v44 = vmul.f32 %v1472_v23, %v1280_v5  ;;  %v1284_v30 = vunpack.c.l.bf16 %v4483_v1  ;;  %v4527_v5 = vld [vmem:[%s5645_s3 + $0xb0] sm:$0xff] }
 0x1f1   :  { %v2493_v8 = vadd.f32 %v2492_v24, %v1974_v7  ;;  %814 = vmatmul.f32.gmra.mxu0 %v722_v48  ;;  %v1602_v24 = vmul.f32 %v1474_v41, %v1282_v18  ;;  %v1854_v7 = vmul.f32 %v1598_v3, %v4042_v54  ;;  %v1603_v12 = vmul.f32 %v1475_v21, %v1283_v42  ;;  %v4535_v21 = vld [vmem:[%s5644_s2 + $0xb8] sm:$0xff] }
 0x1f2   :  { %927 = vmatmul.f32.gmra.mxu1 %v722_v48  ;;  %v2497_v16 = vadd.f32 %v1977_v20, %v1976_v43  ;;  %v1478_v28 = vunpack.c.l.bf16 %v1395_v52  ;;  %v1480_v3 = vunpack.c.l.bf16 %v1396_v36  ;;  %v1856_v32 = vmul.f32 %v1600_v44, %v4046_v56  ;;  %v1208_v52 = vld [vmem:[%s5644_s2 + $0xc0] sm:$0xff] }
 0x1f3   :  { %1040 = vmatmul.f32.gmra.mxu2 %v722_v48  ;;  %v2494_v46 = vadd.f32 %v2493_v8, %v1975_v45  ;;  %v1855_v8 = vmul.f32 %v1599_v50, %v4044_v55  ;;  %v1288_v55 = vunpack.c.l.bf16 %v1204_v63  ;;  %v1483_v56 = vunpack.c.h.bf16 %v1397_v39  ;;  %v5744_v63 = vld [vmem:[#allocation3_spill] sm:$0xff] }
 0x1f4   :  { %1153 = vmatmul.f32.gmra.mxu3 %v722_v48  ;;  %v1476_v48 = vunpack.c.l.bf16 %v1394_v13  ;;  %v1605_v41 = vmul.f32 %v1477_v53, %v1285_v37  ;;  %v1606_v42 = vmul.f32 %v1478_v28, %v1286_v19  ;;  %v1209_v37 = vld [vmem:[%s5644_s2 + $0xc8] sm:$0xff] }
 0x1f5   :  { %2495 = vadd.xlane.f32.xlu2 %v2494_v46  ;;  %v4544_v13 = vmul.f32 %v1483_v56, %v1291_v34  ;;  %v1401_v53 = vld [vmem:[%s5645_s3 + $0xc8] sm:$0xff]  ;;  %v5746_v34 = vld [vmem:[#allocation5_spill] sm:$0xff] }
 0x1f6   :  { %v993_v9 = vpop.f32.mrf.mxu2  ;;  %v770_v27 = vpop.f32.mrf.mxu0  ;;  %v1604_v18 = vmul.f32 %v1476_v48, %v1284_v30  ;;  %v1400_v30 = vld [vmem:[%s5645_s3 + $0xc0] sm:$0xff] }
 0x1f7   :  { %v1106_v49 = vpop.f32.mrf.mxu3  ;;  %v1978_v26 = vmul.f32 %v1850_v47, %v993_v9  ;;  %v883_v62 = vpop.f32.mrf.mxu1  ;;  %v1980_v15 = vmul.f32 %v1852_v22, %v770_v27  ;;  %v724_v47 = vld [vmem:[%s5643_s1 + $0xc0] sm:$0xff]  ;;  %v1481_v9 = vunpack.c.h.bf16 %v1396_v36  ;;  %v1292_v27 = vunpack.c.l.bf16 %v4522_v40 }
 0x1f8   :  { %v1979_v35 = vmul.f32 %v1851_v33, %v1106_v49  ;;  %v1981_v58 = vmul.f32 %v1853_v0, %v883_v62  ;;  %v1290_v49 = vunpack.c.l.bf16 %v1205_v38  ;;  %v1482_v33 = vunpack.c.l.bf16 %v1397_v39  ;;  %v1210_v38 = vld [vmem:[%s5644_s2 + $0xd0] sm:$0xff] }
 0x1f9   :  { %v2498_v29 = vadd.f32 %v2497_v16, %v1978_v26  ;;  %817 = vmatmul.f32.gmra.mxu0 %v723_v17  ;;  %v1484_v62 = vunpack.c.l.bf16 %v4527_v5  ;;  %v1607_v22 = vmul.f32 %v1479_v4, %v1287_v25  ;;  %v4537_v0 = vmul.f32 %v1480_v3, %v1288_v55  ;;  %v1402_v39 = vld [vmem:[%s5645_s3 + $0xd0] sm:$0xff]  ;;  %v5745_v3 = vld [vmem:[#allocation4_spill] sm:$0xff] }
 0x1fa   :  { %930 = vmatmul.f32.gmra.mxu1 %v723_v17  ;;  %v2502_v43 = vadd.f32 %v1981_v58, %v1980_v15  ;;  %v1860_v48 = vmul.f32 %v1604_v18, %v4057_v61  ;;  %v1861_v36 = vmul.f32 %v1605_v41, %v5744_v63  ;;  %v1296_v25 = vunpack.c.l.bf16 %v1208_v52  ;;  %v726_v18 = vld [vmem:[%s5643_s1 + $0xd0] sm:$0xff] }
 0x1fb   :  { %1043 = vmatmul.f32.gmra.mxu2 %v723_v17  ;;  %v2499_v10 = vadd.f32 %v2498_v29, %v1979_v35  ;;  %v4539_v35 = vmul.f32 %v1481_v9, %v1289_v31  ;;  %v4541_v29 = vmul.f32 %v1482_v33, %v1290_v49  ;;  %v1488_v61 = vunpack.c.l.bf16 %v1400_v30 }
 0x1fc   :  { %1156 = vmatmul.f32.gmra.mxu3 %v723_v17  ;;  %v1858_v17 = vmul.f32 %v1602_v24, %v4053_v59  ;;  %v1859_v59 = vmul.f32 %v1603_v12, %v4055_v60  ;;  %v4555_v24 = vmul.f32 %v1484_v62, %v1292_v27  ;;  %v1293_v60 = vunpack.c.h.bf16 %v4522_v40 }
 0x1fd   :  { %2500 = vadd.xlane.f32.xlu0 %v2499_v10  ;;  %v1294_v12 = vunpack.c.l.bf16 %v4535_v21  ;;  %v1298_v4 = vunpack.c.l.bf16 %v1209_v37  ;;  %v1490_v55 = vunpack.c.l.bf16 %v1401_v53  ;;  %v1862_v31 = vmul.f32 %v1606_v42, %v5745_v3 }
 0x1fe   :  { %v996_v54 = vpop.f32.mrf.mxu2  ;;  %v773_v46 = vpop.f32.mrf.mxu0  ;;  %v1491_v40 = vunpack.c.h.bf16 %v1401_v53  ;;  %v1493_v9 = vunpack.c.h.bf16 %v1402_v39  ;;  %v1863_v56 = vmul.f32 %v1607_v22, %v5746_v34  ;;  %v4594_v42 = vmul.f32 %v1488_v61, %v1296_v25 }
 0x1ff   :  { %v1109_v45 = vpop.f32.mrf.mxu3  ;;  %v1982_v20 = vmul.f32 %v1854_v7, %v996_v54  ;;  %v886_v6 = vpop.f32.mrf.mxu1  ;;  %v1984_v57 = vmul.f32 %v1856_v32, %v773_v46  ;;  %v1485_v7 = vunpack.c.h.bf16 %v4527_v5  ;;  %v1486_v54 = vunpack.c.l.bf16 %v1399_v51 }
 0x200   :  { %v1983_v23 = vmul.f32 %v1855_v8, %v1109_v45  ;;  %v1985_v16 = vmul.f32 %v1857_v2, %v886_v6  ;;  %v1295_v45 = vunpack.c.h.bf16 %v4535_v21  ;;  %v1487_v8 = vunpack.c.h.bf16 %v1399_v51  ;;  %v5748_v51 = vld [vmem:[#allocation7_spill] sm:$0xff] }
 0x201   :  { %v2503_v14 = vadd.f32 %v2502_v43, %v1982_v20  ;;  %820 = vmatmul.f32.gmra.mxu0 %v724_v47  ;;  %v1297_v6 = vunpack.c.h.bf16 %v1208_v52  ;;  %v4579_v32 = vmul.f32 %v1485_v7, %v1293_v60  ;;  %v1299_v2 = vunpack.c.h.bf16 %v1209_v37  ;;  %v1213_v7 = vld [vmem:[%s5644_s2 + $0xe8] sm:$0xff] }
 0x202   :  { %933 = vmatmul.f32.gmra.mxu1 %v724_v47  ;;  %v2507_v15 = vadd.f32 %v1985_v16, %v1984_v57  ;;  %v1300_v5 = vunpack.c.l.bf16 %v1210_v38  ;;  %v4582_v57 = vmul.f32 %v1486_v54, %v1294_v12  ;;  %v4587_v16 = vld [vmem:[%s5644_s2 + $0xd8] sm:$0xff]  ;;  %v4592_v41 = vmul.f32 %v1487_v8, %v1295_v45  ;;  %v5749_v54 = vld [vmem:[#allocation8_spill] sm:$0xff] }
 0x203   :  { %1046 = vmatmul.f32.gmra.mxu2 %v724_v47  ;;  %v2504_v26 = vadd.f32 %v2503_v14, %v1983_v23  ;;  %v1492_v23 = vunpack.c.l.bf16 %v1402_v39  ;;  %v1301_v14 = vunpack.c.h.bf16 %v1210_v38  ;;  %v4598_v22 = vmul.f32 %v1490_v55, %v1298_v4  ;;  %v1214_v38 = vld [vmem:[%s5644_s2 + $0xf0] sm:$0xff]  ;;  %v1407_v4 = vld [vmem:[%s5645_s3 + $0xf8] sm:$0xff] }
 0x204   :  { %1159 = vmatmul.f32.gmra.mxu3 %v724_v47  ;;  %v1489_v47 = vunpack.c.h.bf16 %v1400_v30  ;;  %v1865_v52 = vmul.f32 %v4539_v35, %v5748_v51  ;;  %v1302_v35 = vunpack.c.l.bf16 %v4587_v16  ;;  %v1405_v30 = vld [vmem:[%s5645_s3 + $0xe8] sm:$0xff]  ;;  %v1303_v37 = vunpack.c.h.bf16 %v4587_v16  ;;  %v1406_v39 = vld [vmem:[%s5645_s3 + $0xf0] sm:$0xff] }
 0x205   :  { %2505 = vadd.xlane.f32.xlu1 %v2504_v26  ;;  %v4619_v60 = vmul.f32 %v1492_v23, %v1300_v5  ;;  %v1866_v45 = vmul.f32 %v4541_v29, %v5749_v54  ;;  %v1306_v61 = vunpack.c.l.bf16 %v1213_v7  ;;  %v1499_v29 = vunpack.c.h.bf16 %v1405_v30  ;;  %v5756_v54 = vld [vmem:[#allocation15_spill] sm:$0xff] }
 0x206   :  { %v999_v50 = vpop.f32.mrf.mxu2  ;;  %v776_v10 = vpop.f32.mrf.mxu0  ;;  %v4596_v21 = vmul.f32 %v1489_v47, %v1297_v6  ;;  %v1307_v6 = vunpack.c.h.bf16 %v1213_v7  ;;  %v1215_v47 = vld [vmem:[%s5644_s2 + $0xf8] sm:$0xff]  ;;  %v1500_v34 = vunpack.c.l.bf16 %v1406_v39  ;;  %v1501_v16 = vunpack.c.h.bf16 %v1406_v39  ;;  %v5753_v7 = vld [vmem:[#allocation12_spill] sm:$0xff] }
 0x207   :  { %v1112_v1 = vpop.f32.mrf.mxu3  ;;  %v1986_v58 = vmul.f32 %v1858_v17, %v999_v50  ;;  %v889_v44 = vpop.f32.mrf.mxu1  ;;  %v1988_v43 = vmul.f32 %v1860_v48, %v776_v10  ;;  %v1403_v50 = vld [vmem:[%s5645_s3 + $0xd8] sm:$0xff] }
 0x208   :  { %v1987_v28 = vmul.f32 %v1859_v59, %v1112_v1  ;;  %v1989_v20 = vmul.f32 %v1861_v36, %v889_v44  ;;  %v5747_v1 = vld [vmem:[#allocation6_spill] sm:$0xff]  ;;  %v1494_v12 = vunpack.c.l.bf16 %v1403_v50  ;;  %v1495_v53 = vunpack.c.h.bf16 %v1403_v50 }
 0x209   :  { %v2508_v19 = vadd.f32 %v2507_v15, %v1986_v58  ;;  %823 = vmatmul.f32.gmra.mxu0 %v725_v11  ;;  %v1864_v59 = vmul.f32 %v4537_v0, %v5747_v1  ;;  %v4610_v15 = vld [vmem:[%s5644_s2 + $0xe0] sm:$0xff]  ;;  %v4621_v0 = vmul.f32 %v1493_v9, %v1301_v14  ;;  %v1503_v50 = vunpack.c.h.bf16 %v1407_v4 }
 0x20a   :  { %936 = vmatmul.f32.gmra.mxu1 %v725_v11  ;;  %v2512_v26 = vadd.f32 %v1989_v20, %v1988_v43  ;;  %v4615_v58 = vld [vmem:[%s5645_s3 + $0xe0] sm:$0xff]  ;;  %v1305_v8 = vunpack.c.h.bf16 %v4610_v15  ;;  %v5750_v43 = vld [vmem:[#allocation9_spill] sm:$0xff] }
 0x20b   :  { %1049 = vmatmul.f32.gmra.mxu2 %v725_v11  ;;  %v2509_v46 = vadd.f32 %v2508_v19, %v1987_v28  ;;  %v1304_v19 = vunpack.c.l.bf16 %v4610_v15  ;;  %v1496_v28 = vunpack.c.l.bf16 %v4615_v58  ;;  %v1497_v25 = vunpack.c.h.bf16 %v4615_v58 }
 0x20c   :  { %1162 = vmatmul.f32.gmra.mxu3 %v725_v11  ;;  %v4617_v11 = vmul.f32 %v1491_v40, %v1299_v2  ;;  %v1867_v20 = vmul.f32 %v4544_v13, %v5750_v43  ;;  %v5752_v40 = vld [vmem:[#allocation11_spill] sm:$0xff]  ;;  %v1218_v43 = vld [vmem:[%s5644_s2 + $0x110] sm:$0xff] }
 0x20d   :  { %2510 = vadd.xlane.f32.xlu2 %v2509_v46  ;;  %v1498_v46 = vunpack.c.l.bf16 %v1405_v30  ;;  %v1869_v5 = vmul.f32 %v4579_v32, %v5752_v40  ;;  %v1311_v32 = vunpack.c.h.bf16 %v1215_v47  ;;  %v4664_v15 = vmul.f32 %v1497_v25, %v1305_v8 }
 0x20e   :  { %v1002_v49 = vpop.f32.mrf.mxu2  ;;  %v779_v62 = vpop.f32.mrf.mxu0 }
 0x20f   :  { %v1115_v33 = vpop.f32.mrf.mxu3  ;;  %v1990_v27 = vmul.f32 %v1862_v31, %v1002_v49  ;;  %v892_v17 = vpop.f32.mrf.mxu1  ;;  %v1992_v48 = vmul.f32 %v1864_v59, %v779_v62  ;;  %v5751_v31 = vld [vmem:[#allocation10_spill] sm:$0xff]  ;;  %v4666_v58 = vmul.f32 %v1498_v46, %v1306_v61  ;;  %v4696_v8 = vmul.f32 %v1503_v50, %v1311_v32  ;;  %v5758_v32 = vld [vmem:[#allocation17_spill] sm:$0xff] }
 0x210   :  { %v1991_v44 = vmul.f32 %v1863_v56, %v1115_v33  ;;  %v1993_v63 = vmul.f32 %v1865_v52, %v892_v17  ;;  %v1868_v2 = vmul.f32 %v4555_v24, %v5751_v31  ;;  %v727_v49 = vld [vmem:[%s5643_s1 + $0xd8] sm:$0xff]  ;;  %v1308_v33 = vunpack.c.l.bf16 %v1214_v38 }
 0x211   :  { %v2513_v10 = vadd.f32 %v2512_v26, %v1990_v27  ;;  %826 = vmatmul.f32.gmra.mxu0 %v726_v18  ;;  %v1309_v56 = vunpack.c.h.bf16 %v1214_v38  ;;  %v1310_v26 = vunpack.c.l.bf16 %v1215_v47  ;;  %v1502_v27 = vunpack.c.l.bf16 %v1407_v4 }
 0x212   :  { %939 = vmatmul.f32.gmra.mxu1 %v726_v18  ;;  %v2517_v13 = vadd.f32 %v1993_v63, %v1992_v48  ;;  %v4658_v24 = vmul.f32 %v1494_v12, %v1302_v35  ;;  %v4662_v52 = vmul.f32 %v1496_v28, %v1304_v19  ;;  %v1408_v35 = vld [vmem:[%s5645_s3 + $0x100] sm:$0xff]  ;;  %v1870_v12 = vmul.f32 %v4582_v57, %v5753_v7  ;;  %v5755_v28 = vld [vmem:[#allocation14_spill] sm:$0xff] }
 0x213   :  { %1052 = vmatmul.f32.gmra.mxu2 %v726_v18  ;;  %v2514_v36 = vadd.f32 %v2513_v10, %v1991_v44  ;;  %v4668_v10 = vmul.f32 %v1499_v29, %v1307_v6  ;;  %v1216_v44 = vld [vmem:[%s5644_s2 + $0x100] sm:$0xff]  ;;  %v4678_v30 = vmul.f32 %v1500_v34, %v1308_v33  ;;  %v4680_v48 = vmul.f32 %v1501_v16, %v1309_v56  ;;  %v5757_v16 = vld [vmem:[#allocation16_spill] sm:$0xff] }
 0x214   :  { %1165 = vmatmul.f32.gmra.mxu3 %v726_v18  ;;  %v4660_v18 = vmul.f32 %v1495_v53, %v1303_v37  ;;  %v4682_v63 = vmul.f32 %v1502_v27, %v1310_v26  ;;  %v1409_v37 = vld [vmem:[%s5645_s3 + $0x108] sm:$0xff]  ;;  %v5754_v53 = vld [vmem:[#allocation13_spill] sm:$0xff]  ;;  %v1872_v57 = vmul.f32 %v4594_v42, %v5755_v28  ;;  %v1312_v38 = vunpack.c.l.bf16 %v1216_v44  ;;  %v1412_v7 = vld [vmem:[%s5645_s3 + $0x120] sm:$0xff] }
 0x215   :  { %2515 = vadd.xlane.f32.xlu0 %v2514_v36  ;;  %v1217_v36 = vld [vmem:[%s5644_s2 + $0x108] sm:$0xff]  ;;  %v1871_v19 = vmul.f32 %v4592_v41, %v5754_v53  ;;  %v1504_v39 = vunpack.c.l.bf16 %v1408_v35  ;;  %v1410_v41 = vld [vmem:[%s5645_s3 + $0x110] sm:$0xff]  ;;  %v1313_v29 = vunpack.c.h.bf16 %v1216_v44  ;;  %v1505_v47 = vunpack.c.h.bf16 %v1408_v35 }
 0x216   :  { %v1005_v55 = vpop.f32.mrf.mxu2  ;;  %v782_v14 = vpop.f32.mrf.mxu0  ;;  %v1314_v4 = vunpack.c.l.bf16 %v1217_v36  ;;  %v1507_v31 = vunpack.c.h.bf16 %v1409_v37  ;;  %v1874_v26 = vmul.f32 %v4598_v22, %v5757_v16  ;;  %v1875_v50 = vmul.f32 %v4617_v11, %v5758_v32  ;;  %v1220_v22 = vld [vmem:[%s5644_s2 + $0x120] sm:$0xff]  ;;  %v1415_v32 = vld [vmem:[%s5645_s3 + $0x138] sm:$0xff] }
 0x217   :  { %v1118_v3 = vpop.f32.mrf.mxu3  ;;  %v1994_v23 = vmul.f32 %v1866_v45, %v1005_v55  ;;  %v895_v9 = vpop.f32.mrf.mxu1  ;;  %v1996_v1 = vmul.f32 %v1868_v2, %v782_v14  ;;  %v1873_v45 = vmul.f32 %v4596_v21, %v5756_v54  ;;  %v728_v21 = vld [vmem:[%s5643_s1 + $0xe0] sm:$0xff]  ;;  %v1506_v55 = vunpack.c.l.bf16 %v1409_v37  ;;  %v1413_v37 = vld [vmem:[%s5645_s3 + $0x128] sm:$0xff] }
 0x218   :  { %v1995_v17 = vmul.f32 %v1867_v20, %v1118_v3  ;;  %v1997_v59 = vmul.f32 %v1869_v5, %v895_v9  ;;  %v1315_v3 = vunpack.c.h.bf16 %v1217_v36  ;;  %v1316_v5 = vunpack.c.l.bf16 %v1218_v43  ;;  %v1219_v9 = vld [vmem:[%s5644_s2 + $0x118] sm:$0xff] }
 0x219   :  { %v2518_v62 = vadd.f32 %v2517_v13, %v1994_v23  ;;  %829 = vmatmul.f32.gmra.mxu0 %v727_v49  ;;  %v1508_v13 = vunpack.c.l.bf16 %v1410_v41  ;;  %v1317_v23 = vunpack.c.h.bf16 %v1218_v43  ;;  %v1509_v14 = vunpack.c.h.bf16 %v1410_v41 }
 0x21a   :  { %942 = vmatmul.f32.gmra.mxu1 %v727_v49  ;;  %v2522_v20 = vadd.f32 %v1997_v59, %v1996_v1  ;;  %v4715_v27 = vmul.f32 %v1504_v39, %v1312_v38  ;;  %v5759_v1 = vld [vmem:[#allocation18_spill] sm:$0xff]  ;;  %v4727_v35 = vmul.f32 %v1507_v31, %v1315_v3  ;;  %v1318_v36 = vunpack.c.l.bf16 %v1219_v9  ;;  %v729_v38 = vld [vmem:[%s5643_s1 + $0xe8] sm:$0xff] }
 0x21b   :  { %1055 = vmatmul.f32.gmra.mxu2 %v727_v49  ;;  %v2519_v51 = vadd.f32 %v2518_v62, %v1995_v17  ;;  %v4717_v62 = vmul.f32 %v1505_v47, %v1313_v29  ;;  %v4719_v17 = vmul.f32 %v1506_v55, %v1314_v4  ;;  %v1876_v59 = vmul.f32 %v4619_v60, %v5759_v1  ;;  %v5761_v29 = vld [vmem:[#allocation20_spill] sm:$0xff] }
 0x21c   :  { %1168 = vmatmul.f32.gmra.mxu3 %v727_v49  ;;  %v1411_v49 = vld [vmem:[%s5645_s3 + $0x118] sm:$0xff]  ;;  %v4737_v11 = vmul.f32 %v1509_v14, %v1317_v23  ;;  %v1319_v28 = vunpack.c.h.bf16 %v1219_v9  ;;  %v1320_v39 = vunpack.c.l.bf16 %v1220_v22  ;;  %v1512_v43 = vunpack.c.l.bf16 %v1412_v7  ;;  %v5764_v9 = vld [vmem:[#allocation23_spill] sm:$0xff] }
 0x21d   :  { %2520 = vadd.xlane.f32.xlu1 %v2519_v51  ;;  %v5760_v51 = vld [vmem:[#allocation19_spill] sm:$0xff]  ;;  %v1510_v60 = vunpack.c.l.bf16 %v1411_v49  ;;  %v1321_v41 = vunpack.c.h.bf16 %v1220_v22  ;;  %v1878_v47 = vmul.f32 %v4658_v24, %v5761_v29  ;;  %v1515_v3 = vunpack.c.h.bf16 %v1413_v37  ;;  %v5763_v23 = vld [vmem:[#allocation22_spill] sm:$0xff] }
 0x21e   :  { %v1008_v25 = vpop.f32.mrf.mxu2  ;;  %v785_v42 = vpop.f32.mrf.mxu0  ;;  %v1877_v44 = vmul.f32 %v4621_v0, %v5760_v51  ;;  %v1221_v0 = vld [vmem:[%s5644_s2 + $0x128] sm:$0xff]  ;;  %v1880_v14 = vmul.f32 %v4662_v52, %v5763_v23  ;;  %v1881_v24 = vmul.f32 %v4664_v15, %v5764_v9  ;;  %v1223_v15 = vld [vmem:[%s5644_s2 + $0x138] sm:$0xff]  ;;  %v5768_v51 = vld [vmem:[#allocation27_spill] sm:$0xff] }
 0x21f   :  { %v1121_v61 = vpop.f32.mrf.mxu3  ;;  %v1998_v46 = vmul.f32 %v1870_v12, %v1008_v25  ;;  %v898_v6 = vpop.f32.mrf.mxu1  ;;  %v2000_v33 = vmul.f32 %v1872_v57, %v785_v42  ;;  %v4735_v12 = vmul.f32 %v1508_v13, %v1316_v5  ;;  %v1511_v57 = vunpack.c.h.bf16 %v1411_v49  ;;  %v5762_v5 = vld [vmem:[#allocation21_spill] sm:$0xff]  ;;  %v5771_v9 = vld [vmem:[#allocation30_spill] sm:$0xff] }
 0x220   :  { %v1999_v40 = vmul.f32 %v1871_v19, %v1121_v61  ;;  %v2001_v34 = vmul.f32 %v1873_v45, %v898_v6  ;;  %v1514_v42 = vunpack.c.l.bf16 %v1413_v37  ;;  %v4750_v4 = vmul.f32 %v1510_v60, %v1318_v36  ;;  %v1224_v37 = vld [vmem:[%s5644_s2 + $0x140] sm:$0xff] }
 0x221   :  { %v2523_v2 = vadd.f32 %v2522_v20, %v1998_v46  ;;  %832 = vmatmul.f32.gmra.mxu0 %v728_v21  ;;  %v1513_v20 = vunpack.c.h.bf16 %v1412_v7  ;;  %v1322_v46 = vunpack.c.l.bf16 %v1221_v0  ;;  %v1323_v55 = vunpack.c.h.bf16 %v1221_v0 }
 0x222   :  { %945 = vmatmul.f32.gmra.mxu1 %v728_v21  ;;  %v2527_v54 = vadd.f32 %v2001_v34, %v2000_v33  ;;  %v1879_v13 = vmul.f32 %v4660_v18, %v5762_v5  ;;  %v4758_v49 = vmul.f32 %v1511_v57, %v1319_v28  ;;  %v1222_v33 = vld [vmem:[%s5644_s2 + $0x130] sm:$0xff]  ;;  %v4770_v18 = vmul.f32 %v1512_v43, %v1320_v39 }
 0x223   :  { %1058 = vmatmul.f32.gmra.mxu2 %v728_v21  ;;  %v2524_v56 = vadd.f32 %v2523_v2, %v1999_v40  ;;  %v1414_v34 = vld [vmem:[%s5645_s3 + $0x130] sm:$0xff]  ;;  %v4772_v52 = vmul.f32 %v1513_v20, %v1321_v41  ;;  %v4794_v22 = vmul.f32 %v1515_v3, %v1323_v55  ;;  %v1324_v60 = vunpack.c.l.bf16 %v1222_v33  ;;  %v5769_v3 = vld [vmem:[#allocation28_spill] sm:$0xff] }
 0x224   :  { %1171 = vmatmul.f32.gmra.mxu3 %v728_v21  ;;  %v1516_v0 = vunpack.c.l.bf16 %v1414_v34  ;;  %v1325_v57 = vunpack.c.h.bf16 %v1222_v33  ;;  %v1328_v41 = vunpack.c.l.bf16 %v1224_v37 }
 0x225   :  { %2525 = vadd.xlane.f32.xlu2 %v2524_v56  ;;  %v5765_v56 = vld [vmem:[#allocation24_spill] sm:$0xff] }
 0x226   :  { %v1011_v53 = vpop.f32.mrf.mxu2  ;;  %v788_v25 = vpop.f32.mrf.mxu0  ;;  %v4768_v16 = vmul.f32 %v4666_v58, %v5765_v56  ;;  %v5767_v58 = vld [vmem:[#allocation26_spill] sm:$0xff]  ;;  %v1418_v56 = vld [vmem:[%s5645_s3 + $0x150] sm:$0xff] }
 0x227   :  { %v1124_v19 = vpop.f32.mrf.mxu3  ;;  %v2002_v45 = vmul.f32 %v1874_v26, %v1011_v53  ;;  %v901_v61 = vpop.f32.mrf.mxu1  ;;  %v2004_v31 = vmul.f32 %v1876_v59, %v788_v25  ;;  %v4774_v26 = vmul.f32 %v1514_v42, %v1322_v46  ;;  %v4788_v59 = vmul.f32 %v4678_v30, %v5767_v58 }
 0x228   :  { %v2003_v21 = vmul.f32 %v1875_v50, %v1124_v19  ;;  %v2005_v2 = vmul.f32 %v1877_v44, %v901_v61  ;;  %v5766_v50 = vld [vmem:[#allocation25_spill] sm:$0xff]  ;;  %v4792_v44 = vmul.f32 %v4680_v48, %v5768_v51  ;;  %v1518_v25 = vunpack.c.l.bf16 %v1415_v32 }
 0x229   :  { %v2528_v6 = vadd.f32 %v2527_v54, %v2002_v45  ;;  %835 = vmatmul.f32.gmra.mxu0 %v729_v38  ;;  %v4784_v1 = vmul.f32 %v4668_v10, %v5766_v50  ;;  %v1416_v10 = vld [vmem:[%s5645_s3 + $0x140] sm:$0xff]  ;;  %v730_v48 = vld [vmem:[%s5643_s1 + $0xf0] sm:$0xff]  ;;  %v1517_v54 = vunpack.c.h.bf16 %v1414_v34  ;;  %v1326_v45 = vunpack.c.l.bf16 %v1223_v15  ;;  %v1419_v50 = vld [vmem:[%s5645_s3 + $0x158] sm:$0xff] }
 0x22a   :  { %948 = vmatmul.f32.gmra.mxu1 %v729_v38  ;;  %v2532_v30 = vadd.f32 %v2005_v2, %v2004_v31  ;;  %v1327_v61 = vunpack.c.h.bf16 %v1223_v15  ;;  %v1520_v20 = vunpack.c.l.bf16 %v1416_v10  ;;  %v1329_v46 = vunpack.c.h.bf16 %v1224_v37  ;;  %v1226_v34 = vld [vmem:[%s5644_s2 + $0x150] sm:$0xff] }
 0x22b   :  { %1061 = vmatmul.f32.gmra.mxu2 %v729_v38  ;;  %v2529_v40 = vadd.f32 %v2528_v6, %v2003_v21  ;;  %v1521_v42 = vunpack.c.h.bf16 %v1416_v10  ;;  %v1225_v6 = vld [vmem:[%s5644_s2 + $0x148] sm:$0xff]  ;;  %v4813_v31 = vmul.f32 %v4682_v63, %v5769_v3  ;;  %v4815_v2 = vmul.f32 %v1516_v0, %v1324_v60 }
 0x22c   :  { %1174 = vmatmul.f32.gmra.mxu3 %v729_v38  ;;  %v1519_v38 = vunpack.c.h.bf16 %v1415_v32  ;;  %v1417_v21 = vld [vmem:[%s5645_s3 + $0x148] sm:$0xff]  ;;  %v4819_v5 = vmul.f32 %v1518_v25, %v1326_v45 }
 0x22d   :  { %2530 = vadd.xlane.f32.xlu0 %v2529_v40  ;;  %v4817_v40 = vmul.f32 %v1517_v54, %v1325_v57  ;;  %v4843_v15 = vmul.f32 %v1521_v42, %v1329_v46  ;;  %v1522_v32 = vunpack.c.l.bf16 %v1417_v21  ;;  %v1526_v54 = vunpack.c.l.bf16 %v1419_v50  ;;  %v5774_v42 = vld [vmem:[#allocation33_spill] sm:$0xff] }
 0x22e   :  { %v1014_v7 = vpop.f32.mrf.mxu2  ;;  %v791_v19 = vpop.f32.mrf.mxu0  ;;  %v4833_v63 = vmul.f32 %v1519_v38, %v1327_v61  ;;  %v5773_v61 = vld [vmem:[#allocation32_spill] sm:$0xff] }
 0x22f   :  { %v1127_v36 = vpop.f32.mrf.mxu3  ;;  %v2006_v53 = vmul.f32 %v1878_v47, %v1014_v7  ;;  %v904_v28 = vpop.f32.mrf.mxu1  ;;  %v2008_v29 = vmul.f32 %v1880_v14, %v791_v19  ;;  %v4827_v14 = vmul.f32 %v4715_v27, %v5771_v9  ;;  %v1330_v27 = vunpack.c.l.bf16 %v1225_v6  ;;  %v1421_v9 = vld [vmem:[%s5645_s3 + $0x168] sm:$0xff] }
 0x230   :  { %v2007_v43 = vmul.f32 %v1879_v13, %v1127_v36  ;;  %v2009_v47 = vmul.f32 %v1881_v24, %v904_v28  ;;  %v5770_v13 = vld [vmem:[#allocation29_spill] sm:$0xff]  ;;  %v5772_v24 = vld [vmem:[#allocation31_spill] sm:$0xff]  ;;  %v1331_v7 = vunpack.c.h.bf16 %v1225_v6  ;;  %v1523_v36 = vunpack.c.h.bf16 %v1417_v21  ;;  %v5775_v6 = vld [vmem:[#allocation34_spill] sm:$0xff] }
 0x231   :  { %v2533_v39 = vadd.f32 %v2532_v30, %v2006_v53  ;;  %838 = vmatmul.f32.gmra.mxu0 %v730_v48  ;;  %v4823_v23 = vmul.f32 %v4696_v8, %v5770_v13  ;;  %v4831_v33 = vmul.f32 %v4717_v62, %v5772_v24  ;;  %v4841_v8 = vmul.f32 %v1520_v20, %v1328_v41  ;;  %v1227_v62 = vld [vmem:[%s5644_s2 + $0x158] sm:$0xff]  ;;  %v1228_v41 = vld [vmem:[%s5644_s2 + $0x160] sm:$0xff]  ;;  %v5778_v24 = vld [vmem:[#allocation37_spill] sm:$0xff] }
 0x232   :  { %951 = vmatmul.f32.gmra.mxu1 %v730_v48  ;;  %v2537_v60 = vadd.f32 %v2009_v47, %v2008_v29  ;;  %v731_v30 = vld [vmem:[%s5643_s1 + $0xf8] sm:$0xff]  ;;  %v1332_v53 = vunpack.c.l.bf16 %v1226_v34  ;;  %v1524_v19 = vunpack.c.l.bf16 %v1418_v56  ;;  %v1333_v28 = vunpack.c.h.bf16 %v1226_v34  ;;  %v5776_v29 = vld [vmem:[#allocation35_spill] sm:$0xff] }
 0x233   :  { %1064 = vmatmul.f32.gmra.mxu2 %v730_v48  ;;  %v2534_v55 = vadd.f32 %v2533_v39, %v2007_v43  ;;  %v1334_v57 = vunpack.c.l.bf16 %v1227_v62  ;;  %v4858_v38 = vmul.f32 %v4719_v17, %v5773_v61  ;;  %v1335_v39 = vunpack.c.h.bf16 %v1227_v62 }
 0x234   :  { %1177 = vmatmul.f32.gmra.mxu3 %v730_v48  ;;  %v1525_v48 = vunpack.c.h.bf16 %v1418_v56  ;;  %v1527_v43 = vunpack.c.h.bf16 %v1419_v50  ;;  %v4869_v17 = vmul.f32 %v4727_v35, %v5774_v42  ;;  %v4873_v21 = vmul.f32 %v4735_v12, %v5775_v6 }
 0x235   :  { %2535 = vadd.xlane.f32.xlu1 %v2534_v55  ;;  %v4877_v47 = vmul.f32 %v4737_v11, %v5776_v29  ;;  %v4879_v55 = vmul.f32 %v1523_v36, %v1331_v7  ;;  %v4888_v35 = vmul.f32 %v1524_v19, %v1332_v53  ;;  %v4892_v12 = vmul.f32 %v1526_v54, %v1334_v57  ;;  %v1229_v11 = vld [vmem:[%s5644_s2 + $0x168] sm:$0xff]  ;;  %v1230_v7 = vld [vmem:[%s5644_s2 + $0x170] sm:$0xff] }
 0x236   :  { %v1017_v58 = vpop.f32.mrf.mxu2  ;;  %v794_v37 = vpop.f32.mrf.mxu0  ;;  %v4890_v13 = vmul.f32 %v1525_v48, %v1333_v28  ;;  %v4902_v34 = vmul.f32 %v4758_v49, %v5778_v24  ;;  %v1422_v49 = vld [vmem:[%s5645_s3 + $0x170] sm:$0xff]  ;;  %v1339_v53 = vunpack.c.h.bf16 %v1229_v11  ;;  %v1531_v28 = vunpack.c.h.bf16 %v1421_v9  ;;  %v1232_v24 = vld [vmem:[%s5644_s2 + $0x180] sm:$0xff] }
 0x237   :  { %v1130_v51 = vpop.f32.mrf.mxu3  ;;  %v2010_v0 = vmul.f32 %v4768_v16, %v1017_v58  ;;  %v907_v10 = vpop.f32.mrf.mxu1  ;;  %v4860_v16 = vmul.f32 %v1522_v32, %v1330_v27  ;;  %v2012_v20 = vmul.f32 %v4788_v59, %v794_v37  ;;  %v1420_v59 = vld [vmem:[%s5645_s3 + $0x160] sm:$0xff]  ;;  %v4908_v27 = vmul.f32 %v1527_v43, %v1335_v39  ;;  %v1423_v43 = vld [vmem:[%s5645_s3 + $0x178] sm:$0xff] }
 0x238   :  { %v2011_v25 = vmul.f32 %v4784_v1, %v1130_v51  ;;  %v2013_v46 = vmul.f32 %v4792_v44, %v907_v10  ;;  %v5777_v44 = vld [vmem:[#allocation36_spill] sm:$0xff]  ;;  %v1336_v32 = vunpack.c.l.bf16 %v1228_v41  ;;  %v1528_v58 = vunpack.c.l.bf16 %v1420_v59 }
 0x239   :  { %v2538_v45 = vadd.f32 %v2537_v60, %v2010_v0  ;;  %841 = vmatmul.f32.gmra.mxu0 %v731_v30  ;;  %v4886_v3 = vmul.f32 %v4750_v4, %v5777_v44  ;;  %v5779_v4 = vld [vmem:[#allocation38_spill] sm:$0xff]  ;;  %v1337_v51 = vunpack.c.h.bf16 %v1228_v41  ;;  %v1529_v37 = vunpack.c.h.bf16 %v1420_v59  ;;  %v5781_v59 = vld [vmem:[#allocation40_spill] sm:$0xff] }
 0x23a   :  { %954 = vmatmul.f32.gmra.mxu1 %v731_v30  ;;  %v4906_v56 = vmul.f32 %v4770_v18, %v5779_v4  ;;  %v2542_v36 = vadd.f32 %v2013_v46, %v2012_v20  ;;  %v1338_v10 = vunpack.c.l.bf16 %v1229_v11  ;;  %v1341_v61 = vunpack.c.h.bf16 %v1230_v7  ;;  %v5782_v11 = vld [vmem:[#allocation41_spill] sm:$0xff]  ;;  %v1424_v4 = vld [vmem:[%s5645_s3 + $0x180] sm:$0xff] }
 0x23b   :  { %1067 = vmatmul.f32.gmra.mxu2 %v731_v30  ;;  %v2539_v1 = vadd.f32 %v2538_v45, %v2011_v25  ;;  %v1340_v45 = vunpack.c.l.bf16 %v1230_v7  ;;  %v1532_v25 = vunpack.c.l.bf16 %v1422_v49  ;;  %v1533_v39 = vunpack.c.h.bf16 %v1422_v49  ;;  %v1233_v49 = vld [vmem:[%s5644_s2 + $0x188] sm:$0xff] }
 0x23c   :  { %1180 = vmatmul.f32.gmra.mxu3 %v731_v30  ;;  %v1530_v30 = vunpack.c.l.bf16 %v1421_v9  ;;  %v4930_v42 = vmul.f32 %v1528_v58, %v1336_v32  ;;  %v4932_v6 = vmul.f32 %v1529_v37, %v1337_v51  ;;  %v4938_v44 = vmul.f32 %v4774_v26, %v5781_v59  ;;  %v5784_v26 = vld [vmem:[#allocation43_spill] sm:$0xff] }
 0x23d   :  { %2540 = vadd.xlane.f32.xlu2 %v2539_v1  ;;  %v4958_v32 = vmul.f32 %v4817_v40, %v5784_v26  ;;  %v4962_v51 = vmul.f32 %v1533_v39, %v1341_v61  ;;  %v1535_v37 = vunpack.c.h.bf16 %v1423_v43  ;;  %v1346_v61 = vunpack.c.l.bf16 %v1233_v49  ;;  %v5010_v26 = vld [vmem:[%s5644_s2 + $0x198] sm:$0xff] }
 0x23e   :  { %v1020_v62 = vpop.f32.mrf.mxu2  ;;  %v797_v0 = vpop.f32.mrf.mxu0  ;;  %v4934_v29 = vmul.f32 %v1530_v30, %v1338_v10  ;;  %v1344_v10 = vunpack.c.l.bf16 %v1232_v24  ;;  %v1536_v30 = vunpack.c.l.bf16 %v1424_v4 }
 0x23f   :  { %v1133_v50 = vpop.f32.mrf.mxu3  ;;  %v2014_v60 = vmul.f32 %v4813_v31, %v1020_v62  ;;  %v910_v18 = vpop.f32.mrf.mxu1  ;;  %v1231_v31 = vld [vmem:[%s5644_s2 + $0x178] sm:$0xff]  ;;  %v2016_v20 = vmul.f32 %v4827_v14, %v797_v0 }
 0x240   :  { %v2471_v19 = vpop.xlane.xlu0 %2470  ;;  %v2015_v57 = vmul.f32 %v4823_v23, %v1133_v50  ;;  %v2017_v41 = vmul.f32 %v4831_v33, %v910_v18  ;;  %v5780_v23 = vld [vmem:[#allocation39_spill] sm:$0xff]  ;;  %v4942_v33 = vmul.f32 %v4794_v22, %v5782_v11  ;;  %v5783_v14 = vld [vmem:[#allocation42_spill] sm:$0xff]  ;;  %v4960_v22 = vmul.f32 %v1532_v25, %v1340_v45  ;;  %v1234_v11 = vld [vmem:[%s5644_s2 + $0x190] sm:$0xff] }
 0x241   :  { %v2543_v48 = vadd.f32 %v2542_v36, %v2014_v60  ;;  %v3272_v54 = vmul.f32 -1.442695, %v2471_v19  ;;  %v4928_v1 = vmul.f32 %v4772_v52, %v5780_v23  ;;  %v4946_v9 = vmul.f32 %v4815_v2, %v5783_v14  ;;  %v1425_v36 = vld [vmem:[%s5645_s3 + $0x188] sm:$0xff]  ;;  %v5786_v23 = vld [vmem:[#allocation45_spill] sm:$0xff]  ;;  %v5788_v14 = vld [vmem:[#allocation47_spill] sm:$0xff] }
 0x242   :  { %v4948_v52 = vmul.f32 %v1531_v28, %v1339_v53  ;;  %v1342_v62 = vunpack.c.l.bf16 %v1231_v31  ;;  %v1534_v2 = vunpack.c.l.bf16 %v1423_v43  ;;  %v1343_v7 = vunpack.c.h.bf16 %v1231_v31 }
 0x243   :  { %3304 = vpow2.f32 %v3272_v54  ;;  %v2544_v46 = vadd.f32 %v2543_v48, %v2015_v57  ;;  %v2547_v60 = vadd.f32 %v2017_v41, %v2016_v20  ;;  %v1345_v53 = vunpack.c.h.bf16 %v1232_v24  ;;  %v5785_v20 = vld [vmem:[#allocation44_spill] sm:$0xff] }
 0x244   :  { %v1537_v48 = vunpack.c.h.bf16 %v1424_v4  ;;  %v4972_v25 = vmul.f32 %v1534_v2, %v1342_v62  ;;  %v1538_v39 = vunpack.c.l.bf16 %v1425_v36  ;;  %v4986_v59 = vmul.f32 %v1535_v37, %v1343_v7  ;;  %v1426_v4 = vld [vmem:[%s5645_s3 + $0x190] sm:$0xff] }
 0x245   :  { %2545 = vadd.xlane.f32.xlu0 %v2544_v46  ;;  %v4980_v46 = vmul.f32 %v4819_v5, %v5785_v20  ;;  %v4998_v5 = vmul.f32 %v4843_v15, %v5788_v14  ;;  %v5000_v24 = vmul.f32 %v1536_v30, %v1344_v10  ;;  %v1347_v2 = vunpack.c.h.bf16 %v1233_v49 }
 0x246   :  { %v1023_v50 = vpop.f32.mrf.mxu2  ;;  %v800_v0 = vpop.f32.mrf.mxu0  ;;  %v5016_v15 = vmul.f32 %v1538_v39, %v1346_v61  ;;  %v1349_v49 = vunpack.c.h.bf16 %v1234_v11  ;;  %v5791_v39 = vld [vmem:[#allocation50_spill] sm:$0xff] }
 0x247   :  { %v1136_v58 = vpop.f32.mrf.mxu3  ;;  %v2018_v40 = vmul.f32 %v4858_v38, %v1023_v50  ;;  %v913_v18 = vpop.f32.mrf.mxu1  ;;  %v2020_v43 = vmul.f32 %v4873_v21, %v800_v0  ;;  %v1539_v50 = vunpack.c.h.bf16 %v1425_v36  ;;  %v1348_v0 = vunpack.c.l.bf16 %v1234_v11 }
 0x248   :  { %v2476_v19 = vpop.xlane.xlu0 %2475  ;;  %v2019_v54 = vmul.f32 %v4869_v17, %v1136_v58  ;;  %v2021_v38 = vmul.f32 %v4877_v47, %v913_v18  ;;  %v4984_v17 = vmul.f32 %v4833_v63, %v5786_v23  ;;  %v5787_v47 = vld [vmem:[#allocation46_spill] sm:$0xff]  ;;  %v5002_v63 = vmul.f32 %v1537_v48, %v1345_v53 }
 0x249   :  { %v3305_v28 = vpop.eup %3304  ;;  %v2548_v57 = vadd.f32 %v2547_v60, %v2018_v40  ;;  %v3273_v45 = vmul.f32 -1.442695, %v2476_v19  ;;  %v4994_v21 = vmul.f32 %v4841_v8, %v5787_v47  ;;  %v5789_v8 = vld [vmem:[#allocation48_spill] sm:$0xff]  ;;  %v5021_v58 = vld [vmem:[%s5645_s3 + $0x198] sm:$0xff]  ;;  %v5790_v40 = vld [vmem:[#allocation49_spill] sm:$0xff]  ;;  %v1540_v53 = vunpack.c.l.bf16 %v1426_v4 }
 0x24a   :  { %v4974_v31 = vadd.f32 1.0, %v3305_v28  ;;  %v5014_v62 = vmul.f32 %v4860_v16, %v5789_v8  ;;  %v5025_v18 = vmul.f32 %v4879_v55, %v5790_v40  ;;  %v2552_v37 = vadd.f32 %v2021_v38, %v2020_v43  ;;  %v5792_v47 = vld [vmem:[#allocation51_spill] sm:$0xff] }
 0x24b   :  { %3306 = vpow2.f32 %v3273_v45  ;;  %v2549_v41 = vadd.f32 %v2548_v57, %v2019_v54  ;;  %v1541_v36 = vunpack.c.h.bf16 %v1426_v4  ;;  %v1350_v19 = vunpack.c.l.bf16 %v5010_v26  ;;  %v5057_v8 = vld [vmem:[%s5644_s2 + $0x1a0] sm:$0xff] }
 0x24c   :  { %3308 = vrcp.f32 %v4974_v31  ;;  %v1542_v57 = vunpack.c.l.bf16 %v5021_v58  ;;  %v5033_v38 = vmul.f32 %v4888_v35, %v5791_v39  ;;  %v5046_v14 = vmul.f32 %v1540_v53, %v1348_v0 }
 0x24d   :  { %2550 = vadd.xlane.f32.xlu1 %v2549_v41  ;;  %v5048_v35 = vmul.f32 %v1541_v36, %v1349_v49  ;;  %v1543_v40 = vunpack.c.h.bf16 %v5021_v58  ;;  %v2766_v0 = vand.u32 2147483648, %v4974_v31  ;;  %vm2760_vm2 = vweird.f32 %v4974_v31 }
 0x24e   :  { %v1026_v7 = vpop.f32.mrf.mxu2  ;;  %v803_v30 = vpop.f32.mrf.mxu0  ;;  %v5051_v4 = vmul.f32 %v1542_v57, %v1350_v19 }
 0x24f   :  { %v1139_v60 = vpop.f32.mrf.mxu3  ;;  %v2022_v16 = vmul.f32 %v4886_v3, %v1026_v7  ;;  %v916_v10 = vpop.f32.mrf.mxu1  ;;  %v5035_v3 = vmul.f32 %v1539_v50, %v1347_v2  ;;  %v2024_v23 = vmul.f32 %v4906_v56, %v803_v30  ;;  %v2764_v2 = vand.u32 2147483647, %v4974_v31  ;;  %v5793_v50 = vld [vmem:[#allocation52_spill] sm:$0xff] }
 0x250   :  { %v2481_v28 = vpop.xlane.xlu1 %2480  ;;  %v2023_v45 = vmul.f32 %v4902_v34, %v1139_v60  ;;  %v2025_v41 = vmul.f32 %v4928_v1, %v916_v10  ;;  %v5044_v34 = vmul.f32 %v4890_v13, %v5792_v47  ;;  %v1351_v1 = vunpack.c.h.bf16 %v5010_v26  ;;  %v1428_v13 = vld [vmem:[%s5645_s3 + $0x1a0] sm:$0xff]  ;;  %v5794_v60 = vld [vmem:[#allocation53_spill] sm:$0xff] }
 0x251   :  { %v3307_v48 = vpop.eup %3306  ;;  %v2553_v54 = vadd.f32 %v2552_v37, %v2022_v16  ;;  %v3274_v55 = vmul.f32 -1.442695, %v2481_v28  ;;  %v5065_v7 = vmul.f32 %v4892_v12, %v5793_v50  ;;  %v5069_v26 = vmul.f32 %v4908_v27, %v5794_v60  ;;  %v5798_v50 = vld [vmem:[#allocation55_spill] sm:$0xff] }
 0x252   :  { %v3309_v61 = vpop.eup %3308  ;;  %v5037_v43 = vadd.f32 1.0, %v3307_v48  ;;  %v2557_v30 = vadd.f32 %v2025_v41, %v2024_v23  ;;  %v1352_v12 = vunpack.c.l.bf16 %v5057_v8  ;;  %v1544_v19 = vunpack.c.l.bf16 %v1428_v13 }
 0x253   :  { %v2756_v20 = vmul.f32 %v3309_v61, %v4974_v31  ;;  %3310 = vpow2.f32 %v3274_v55  ;;  %v2554_v11 = vadd.f32 %v2553_v54, %v2023_v45  ;;  %vm2761_vm0 = vweird.f32 %v3309_v61 }
 0x254   :  { %3312 = vrcp.f32 %v5037_v43  ;;  %vm5076_vm3 = vcmp.eq.f32.partialorder %v2764_v2, 8.507059e+37  ;;  %vm2762_vm4 = vmor %vm2760_vm2, %vm2761_vm0  ;;  %v1545_v47 = vunpack.c.h.bf16 %v1428_v13  ;;  %v5091_v2 = vmul.f32 %v1543_v40, %v1351_v1 }
 0x255   :  { %v2757_v56 = vsub.f32 1.0, %v2756_v20  ;;  %2555 = vadd.xlane.f32.xlu2 %v2554_v11  ;;  %v1353_v11 = vunpack.c.h.bf16 %v5057_v8  ;;  %v5797_v8 = vld [vmem:[#allocation54_spill] sm:$0xff]  ;;  %v5114_v60 = vmul.f32 %v4932_v6, %v5798_v50  ;;  %v5116_v40 = vmul.f32 %v1544_v19, %v1352_v12 }
 0x256   :  { %v1029_v37 = vpop.f32.mrf.mxu2  ;;  %v806_v36 = vpop.f32.mrf.mxu0  ;;  %v5110_v13 = vmul.f32 %v4930_v42, %v5797_v8  ;;  %vm2775_vm6 = vweird.f32 %v5037_v43 }
 0x257   :  { %v1142_v16 = vpop.f32.mrf.mxu3  ;;  %v2758_v10 = vmul.f32 %v3309_v61, %v2757_v56  ;;  %v2026_v53 = vmul.f32 %v4938_v44, %v1029_v37  ;;  %v919_v49 = vpop.f32.mrf.mxu1  ;;  %v2767_v44 = vor.u32 1.1754944e-38, %v2766_v0  ;;  %v2028_v23 = vmul.f32 %v4946_v9, %v806_v36 }
 0x258   :  { %v2486_v27 = vpop.xlane.xlu1 %2485  ;;  %v2027_v39 = vmul.f32 %v4942_v33, %v1142_v16  ;;  %v2029_v41 = vmul.f32 %v4958_v32, %v919_v49  ;;  %v5096_v33 = vld [vmem:[%s5644_s2 + $0x1a8] sm:$0xff]  ;;  %v2781_v0 = vand.u32 2147483648, %v5037_v43  ;;  %v5120_v42 = vmul.f32 %v1545_v47, %v1353_v11 }
 0x259   :  { %v3311_v28 = vpop.eup %3310  ;;  %v2759_v58 = vadd.f32 %v3309_v61, %v2758_v10  ;;  %v2558_v57 = vadd.f32 %v2557_v30, %v2026_v53  ;;  %v3275_v54 = vmul.f32 -1.442695, %v2486_v27  ;;  %v5101_v32 = vld [vmem:[%s5645_s3 + $0x1a8] sm:$0xff]  ;;  %v1354_v27 = vunpack.c.l.bf16 %v5096_v33 }
 0x25a   :  { %v3313_v45 = vpop.eup %3312  ;;  %v5081_v55 = vadd.f32 1.0, %v3311_v28  ;;  %v2562_v30 = vadd.f32 %v2029_v41, %v2028_v23  ;;  %v1546_v6 = vunpack.c.l.bf16 %v5101_v32  ;;  %v1355_v47 = vunpack.c.h.bf16 %v5096_v33 }
 0x25b   :  { %v2763_v31 = vsel %vm2762_vm4, %v3309_v61, %v2759_v58  ;;  %v2771_v20 = vmul.f32 %v3313_v45, %v5037_v43  ;;  %3314 = vpow2.f32 %v3275_v54  ;;  %v2779_v61 = vand.u32 2147483647, %v5037_v43  ;;  %v5137_v43 = vld [vmem:[%s5644_s2 + $0x1b0] sm:$0xff] }
 0x25c   :  { %v2768_v56 = vsel %vm5076_vm3, %v2767_v44, %v2763_v31  ;;  %3316 = vrcp.f32 %v5081_v55  ;;  %v2559_v1 = vadd.f32 %v2558_v57, %v2027_v39  ;;  %vm2776_vm5 = vweird.f32 %v3313_v45 }
 0x25d   :  { %3236 = vst.msk [vmem:[%s5646_s5] sm:$0xff] %vm3235_vm1, %v2768_v56  ;;  %v2772_v9 = vsub.f32 1.0, %v2771_v20  ;;  %vm5125_vm7 = vcmp.eq.f32.partialorder %v2779_v61, 8.507059e+37  ;;  %vm2777_vm8 = vmor %vm2775_vm6, %vm2776_vm5  ;;  %v2782_v54 = vor.u32 1.1754944e-38, %v2781_v0  ;;  %v5141_v11 = vmul.f32 %v1546_v6, %v1354_v27 }
 0x25e   :  { %v1032_v37 = vpop.f32.mrf.mxu2  ;;  %2560 = vadd.xlane.f32.xlu0 %v2559_v1  ;;  %v809_v36 = vpop.f32.mrf.mxu0  ;;  %v2794_v56 = vand.u32 2147483647, %v5081_v55  ;;  %v5802_v1 = vld [vmem:[#allocation57_spill] sm:$0xff]  ;;  %v1356_v8 = vunpack.c.l.bf16 %v5137_v43  ;;  %v2796_v50 = vand.u32 2147483648, %v5081_v55  ;;  %vm2790_vm10 = vweird.f32 %v5081_v55 }
 0x25f   :  { %v1145_v16 = vpop.f32.mrf.mxu3  ;;  %v2773_v10 = vmul.f32 %v3313_v45, %v2772_v9  ;;  %v2030_v53 = vmul.f32 %v4980_v46, %v1032_v37  ;;  %v922_v49 = vpop.f32.mrf.mxu1  ;;  %v2032_v23 = vmul.f32 %v4994_v21, %v809_v36  ;;  %v5801_v9 = vld [vmem:[#allocation56_spill] sm:$0xff]  ;;  %v1357_v36 = vunpack.c.h.bf16 %v5137_v43 }
 0x260   :  { %v2491_v12 = vpop.xlane.xlu2 %2490  ;;  %v2031_v39 = vmul.f32 %v4984_v17, %v1145_v16  ;;  %v2033_v41 = vmul.f32 %v4998_v5, %v922_v49  ;;  %v1547_v5 = vunpack.c.h.bf16 %v5101_v32  ;;  %v5160_v61 = vmul.f32 %v4934_v29, %v5801_v9 }
 0x261   :  { %v3315_v19 = vpop.eup %3314  ;;  %v2774_v28 = vadd.f32 %v3313_v45, %v2773_v10  ;;  %v2563_v48 = vadd.f32 %v2562_v30, %v2030_v53  ;;  %v3276_v57 = vmul.f32 -1.442695, %v2491_v12  ;;  %v5164_v32 = vmul.f32 %v4948_v52, %v5802_v1  ;;  %v5176_v12 = vld [vmem:[%s5644_s2 + $0x1b8] sm:$0xff] }
 0x262   :  { %v3317_v46 = vpop.eup %3316  ;;  %v5130_v44 = vadd.f32 1.0, %v3315_v19  ;;  %v2567_v10 = vadd.f32 %v2033_v41, %v2032_v23  ;;  %vm2795_vm11 = vcmp.eq.f32.partialorder %v2794_v56, 8.507059e+37  ;;  %v5804_v56 = vld [vmem:[#allocation59_spill] sm:$0xff] }
 0x263   :  { %v2778_v31 = vsel %vm2777_vm8, %v3313_v45, %v2774_v28  ;;  %v2786_v20 = vmul.f32 %v3317_v46, %v5081_v55  ;;  %3318 = vpow2.f32 %v3276_v57  ;;  %v5151_v45 = vld [vmem:[%s5645_s3 + $0x1b0] sm:$0xff]  ;;  %v2564_v33 = vadd.f32 %v2563_v48, %v2031_v39 }
 0x264   :  { %v2783_v17 = vsel %vm5125_vm7, %v2782_v54, %v2778_v31  ;;  %3320 = vrcp.f32 %v5130_v44  ;;  %vm2791_vm9 = vweird.f32 %v3317_v46  ;;  %v1548_v29 = vunpack.c.l.bf16 %v5151_v45 }
 0x265   :  { %3237 = vst.msk [vmem:[%s5646_s5 + $0x8] sm:$0xff] %vm3235_vm1, %v2783_v17  ;;  %v2787_v21 = vsub.f32 1.0, %v2786_v20  ;;  %2565 = vadd.xlane.f32.xlu1 %v2564_v33  ;;  %v1549_v52 = vunpack.c.h.bf16 %v5151_v45  ;;  %vm2792_vm12 = vmor %vm2790_vm10, %vm2791_vm9  ;;  %v2797_v55 = vor.u32 1.1754944e-38, %v2796_v50  ;;  %v1358_v20 = vunpack.c.l.bf16 %v5176_v12 }
 0x266   :  { %v1035_v0 = vpop.f32.mrf.mxu2  ;;  %v812_v49 = vpop.f32.mrf.mxu0  ;;  %v5193_v45 = vmul.f32 %v1547_v5, %v1355_v47  ;;  %v5206_v33 = vmul.f32 %v4962_v51, %v5804_v56  ;;  %v5208_v9 = vmul.f32 %v1548_v29, %v1356_v8  ;;  %v2811_v47 = vand.u32 2147483648, %v5130_v44 }
 0x267   :  { %v1148_v37 = vpop.f32.mrf.mxu3  ;;  %v2788_v16 = vmul.f32 %v3317_v46, %v2787_v21  ;;  %v2034_v30 = vmul.f32 %v5014_v62, %v1035_v0  ;;  %v925_v53 = vpop.f32.mrf.mxu1  ;;  %v5181_v62 = vld [vmem:[%s5645_s3 + $0x1b8] sm:$0xff]  ;;  %v2036_v31 = vmul.f32 %v5033_v38, %v812_v49  ;;  %v1359_v51 = vunpack.c.h.bf16 %v5176_v12 }
 0x268   :  { %v2496_v27 = vpop.xlane.xlu2 %2495  ;;  %v2035_v54 = vmul.f32 %v5025_v18, %v1148_v37  ;;  %v2037_v39 = vmul.f32 %v5044_v34, %v925_v53  ;;  %v1550_v23 = vunpack.c.l.bf16 %v5181_v62  ;;  %v2809_v34 = vand.u32 2147483647, %v5130_v44  ;;  %v5803_v21 = vld [vmem:[#allocation58_spill] sm:$0xff] }
 0x269   :  { %v3319_v6 = vpop.eup %3318  ;;  %v2789_v19 = vadd.f32 %v3317_v46, %v2788_v16  ;;  %v2568_v28 = vadd.f32 %v2567_v10, %v2034_v30  ;;  %v3277_v58 = vmul.f32 -1.442695, %v2496_v27  ;;  %v5202_v38 = vmul.f32 %v4960_v22, %v5803_v21 }
 0x26a   :  { %v3321_v48 = vpop.eup %3320  ;;  %v5184_v57 = vadd.f32 1.0, %v3319_v6  ;;  %v2572_v0 = vadd.f32 %v2037_v39, %v2036_v31  ;;  %v5212_v22 = vmul.f32 %v1549_v52, %v1357_v36  ;;  %v5214_v30 = vmul.f32 %v1550_v23, %v1358_v20  ;;  %v5808_v31 = vld [vmem:[#allocation61_spill] sm:$0xff] }
 0x26b   :  { %v2793_v41 = vsel %vm2792_vm12, %v3317_v46, %v2789_v19  ;;  %v2801_v43 = vmul.f32 %v3321_v48, %v5130_v44  ;;  %3322 = vpow2.f32 %v3277_v58  ;;  %v2569_v46 = vadd.f32 %v2568_v28, %v2035_v54  ;;  %v1432_v58 = vld [vmem:[%s5645_s3 + $0x1c0] sm:$0xff] }
 0x26c   :  { %v2798_v17 = vsel %vm2795_vm11, %v2797_v55, %v2793_v41  ;;  %3324 = vrcp.f32 %v5184_v57  ;;  %vm2806_vm13 = vweird.f32 %v3321_v48  ;;  %vm2805_vm14 = vweird.f32 %v5130_v44  ;;  %v1240_v44 = vld [vmem:[%s5644_s2 + $0x1c0] sm:$0xff]  ;;  %v5807_v41 = vld [vmem:[#allocation60_spill] sm:$0xff] }
 0x26d   :  { %3238 = vst.msk [vmem:[%s5646_s5 + $0x10] sm:$0xff] %vm3235_vm1, %v2798_v17  ;;  %v2802_v18 = vsub.f32 1.0, %v2801_v43  ;;  %2570 = vadd.xlane.f32.xlu2 %v2569_v46  ;;  %vm5218_vm15 = vcmp.eq.f32.partialorder %v2809_v34, 8.507059e+37  ;;  %vm2807_vm0 = vmor %vm2805_vm14, %vm2806_vm13  ;;  %v2812_v36 = vor.u32 1.1754944e-38, %v2811_v47  ;;  %v5237_v43 = vmul.f32 %v4972_v25, %v5807_v41  ;;  %v5255_v25 = vld [vmem:[%s5645_s3 + $0x1c8] sm:$0xff]  ;;  %v5810_v41 = vld [vmem:[#allocation63_spill] sm:$0xff] }
 0x26e   :  { %v1038_v5 = vpop.f32.mrf.mxu2  ;;  %v815_v10 = vpop.f32.mrf.mxu0  ;;  %v5245_v20 = vmul.f32 %v4986_v59, %v5808_v31  ;;  %v1360_v23 = vunpack.c.l.bf16 %v1240_v44  ;;  %v1552_v17 = vunpack.c.l.bf16 %v1432_v58  ;;  %v2826_v34 = vand.u32 2147483648, %v5184_v57 }
 0x26f   :  { %v1151_v1 = vpop.f32.mrf.mxu3  ;;  %v2803_v50 = vmul.f32 %v3321_v48, %v2802_v18  ;;  %v2038_v37 = vmul.f32 %v5065_v7, %v1038_v5  ;;  %v928_v16 = vpop.f32.mrf.mxu1  ;;  %v2040_v39 = vmul.f32 %v5110_v13, %v815_v10  ;;  %v1361_v18 = vunpack.c.h.bf16 %v1240_v44 }
 0x270   :  { %v2501_v8 = vpop.xlane.xlu0 %2500  ;;  %v2039_v19 = vmul.f32 %v5069_v26, %v1151_v1  ;;  %v2041_v28 = vmul.f32 %v5114_v60, %v928_v16  ;;  %v1551_v26 = vunpack.c.h.bf16 %v5181_v62  ;;  %v2824_v62 = vand.u32 2147483647, %v5184_v57 }
 0x271   :  { %v3323_v53 = vpop.eup %3322  ;;  %v2804_v49 = vadd.f32 %v3321_v48, %v2803_v50  ;;  %v2573_v27 = vadd.f32 %v2572_v0, %v2038_v37  ;;  %v3278_v6 = vmul.f32 -1.442695, %v2501_v8  ;;  %v1553_v0 = vunpack.c.h.bf16 %v1432_v58  ;;  %v5809_v58 = vld [vmem:[#allocation62_spill] sm:$0xff] }
 0x272   :  { %v3325_v7 = vpop.eup %3324  ;;  %v5223_v52 = vadd.f32 1.0, %v3323_v53  ;;  %v2577_v47 = vadd.f32 %v2041_v28, %v2040_v39  ;;  %v1554_v16 = vunpack.c.l.bf16 %v5255_v25  ;;  %vm2820_vm3 = vweird.f32 %v5184_v57 }
 0x273   :  { %v2808_v55 = vsel %vm2807_vm0, %v3321_v48, %v2804_v49  ;;  %v2816_v54 = vmul.f32 %v3325_v7, %v5184_v57  ;;  %3326 = vpow2.f32 %v3278_v6  ;;  %v5250_v48 = vld [vmem:[%s5644_s2 + $0x1c8] sm:$0xff]  ;;  %v2574_v59 = vadd.f32 %v2573_v27, %v2039_v19 }
 0x274   :  { %v2813_v60 = vsel %vm5218_vm15, %v2812_v36, %v2808_v55  ;;  %3328 = vrcp.f32 %v5223_v52  ;;  %vm2821_vm2 = vweird.f32 %v3325_v7  ;;  %v1362_v37 = vunpack.c.l.bf16 %v5250_v48 }
 0x275   :  { %3239 = vst.msk [vmem:[%s5646_s5 + $0x18] sm:$0xff] %vm3235_vm1, %v2813_v60  ;;  %v2817_v13 = vsub.f32 1.0, %v2816_v54  ;;  %2575 = vadd.xlane.f32.xlu0 %v2574_v59  ;;  %vm2825_vm4 = vcmp.eq.f32.partialorder %v2824_v62, 8.507059e+37  ;;  %vm2822_vm5 = vmor %vm2820_vm3, %vm2821_vm2  ;;  %v2827_v6 = vor.u32 1.1754944e-38, %v2826_v34  ;;  %v1920_v55 = vmul.f32 %v5000_v24, %v5809_v58 }
 0x276   :  { %v1041_v46 = vpop.f32.mrf.mxu2  ;;  %v818_v50 = vpop.f32.mrf.mxu0  ;;  %v5278_v54 = vmul.f32 %v1551_v26, %v1359_v51  ;;  %v5288_v24 = vmul.f32 %v1552_v17, %v1360_v23  ;;  %v5290_v12 = vmul.f32 %v1553_v0, %v1361_v18  ;;  %v5292_v51 = vmul.f32 %v1554_v16, %v1362_v37 }
 0x277   :  { %v1154_v21 = vpop.f32.mrf.mxu3  ;;  %v2818_v56 = vmul.f32 %v3325_v7, %v2817_v13  ;;  %v2042_v5 = vmul.f32 %v5160_v61, %v1041_v46  ;;  %v931_v1 = vpop.f32.mrf.mxu1  ;;  %v2044_v57 = vmul.f32 %v5202_v38, %v818_v50  ;;  %v2839_v38 = vand.u32 2147483647, %v5223_v52  ;;  %v5811_v46 = vld [vmem:[#allocation64_spill] sm:$0xff] }
 0x278   :  { %v2506_v10 = vpop.xlane.xlu1 %2505  ;;  %v2043_v36 = vmul.f32 %v5164_v32, %v1154_v21  ;;  %v2045_v19 = vmul.f32 %v5206_v33, %v931_v1  ;;  %v1921_v32 = vmul.f32 %v5002_v63, %v5810_v41  ;;  %v2841_v26 = vand.u32 2147483648, %v5223_v52 }
 0x279   :  { %v3327_v8 = vpop.eup %3326  ;;  %v2819_v53 = vadd.f32 %v3325_v7, %v2818_v56  ;;  %v2578_v49 = vadd.f32 %v2577_v47, %v2042_v5  ;;  %v3279_v29 = vmul.f32 -1.442695, %v2506_v10  ;;  %v1922_v23 = vmul.f32 %v5016_v15, %v5811_v46  ;;  %v1242_v47 = vld [vmem:[%s5644_s2 + $0x1d0] sm:$0xff] }
 0x27a   :  { %v3329_v27 = vpop.eup %3328  ;;  %v5268_v61 = vadd.f32 1.0, %v3327_v8  ;;  %v2582_v13 = vadd.f32 %v2045_v19, %v2044_v57  ;;  %v1363_v17 = vunpack.c.h.bf16 %v5250_v48  ;;  %v1555_v18 = vunpack.c.h.bf16 %v5255_v25  ;;  %v5813_v19 = vld [vmem:[#allocation66_spill] sm:$0xff] }
 0x27b   :  { %v2823_v28 = vsel %vm2822_vm5, %v3325_v7, %v2819_v53  ;;  %v2831_v44 = vmul.f32 %v3329_v27, %v5223_v52  ;;  %3330 = vpow2.f32 %v3279_v29  ;;  %v2579_v7 = vadd.f32 %v2578_v49, %v2043_v36  ;;  %v5812_v29 = vld [vmem:[#allocation65_spill] sm:$0xff] }
 0x27c   :  { %v2828_v39 = vsel %vm2825_vm4, %v2827_v6, %v2823_v28  ;;  %3332 = vrcp.f32 %v5268_v61  ;;  %vm2836_vm6 = vweird.f32 %v3329_v27  ;;  %vm2835_vm7 = vweird.f32 %v5223_v52 }
 0x27d   :  { %3240 = vst.msk [vmem:[%s5646_s5 + $0x20] sm:$0xff] %vm3235_vm1, %v2828_v39  ;;  %v2832_v33 = vsub.f32 1.0, %v2831_v44  ;;  %2580 = vadd.xlane.f32.xlu1 %v2579_v7  ;;  %vm2840_vm8 = vcmp.eq.f32.partialorder %v2839_v38, 8.507059e+37  ;;  %vm2837_vm9 = vmor %vm2835_vm7, %vm2836_vm6  ;;  %v2842_v48 = vor.u32 1.1754944e-38, %v2841_v26  ;;  %v1364_v8 = vunpack.c.l.bf16 %v1242_v47  ;;  %v5814_v44 = vld [vmem:[#allocation67_spill] sm:$0xff] }
 0x27e   :  { %v1044_v60 = vpop.f32.mrf.mxu2  ;;  %v821_v34 = vpop.f32.mrf.mxu0  ;;  %v1923_v6 = vmul.f32 %v5035_v3, %v5812_v29  ;;  %v1924_v28 = vmul.f32 %v5046_v14, %v5813_v19  ;;  %v1925_v57 = vmul.f32 %v5048_v35, %v5814_v44  ;;  %v5324_v58 = vmul.f32 %v1555_v18, %v1363_v17  ;;  %v5818_v19 = vld [vmem:[#allocation69_spill] sm:$0xff]  ;;  %v5819_v44 = vld [vmem:[#allocation70_spill] sm:$0xff] }
 0x27f   :  { %v1157_v31 = vpop.f32.mrf.mxu3  ;;  %v2833_v63 = vmul.f32 %v3329_v27, %v2832_v33  ;;  %v2046_v62 = vmul.f32 %v5237_v43, %v1044_v60  ;;  %v934_v59 = vpop.f32.mrf.mxu1  ;;  %v1434_v43 = vld [vmem:[%s5645_s3 + $0x1d0] sm:$0xff]  ;;  %v2048_v10 = vmul.f32 %v1920_v55, %v821_v34  ;;  %v2856_v55 = vand.u32 2147483648, %v5268_v61 }
 0x280   :  { %v2511_v21 = vpop.xlane.xlu2 %2510  ;;  %v2047_v52 = vmul.f32 %v5245_v20, %v1157_v31  ;;  %v2049_v0 = vmul.f32 %v1921_v32, %v934_v59  ;;  %v1556_v53 = vunpack.c.l.bf16 %v1434_v43  ;;  %v1365_v60 = vunpack.c.h.bf16 %v1242_v47 }
 0x281   :  { %v3331_v56 = vpop.eup %3330  ;;  %v2834_v5 = vadd.f32 %v3329_v27, %v2833_v63  ;;  %v2583_v1 = vadd.f32 %v2582_v13, %v2046_v62  ;;  %v3280_v15 = vmul.f32 -1.442695, %v2511_v21  ;;  %v1557_v14 = vunpack.c.h.bf16 %v1434_v43  ;;  %v1243_v63 = vld [vmem:[%s5644_s2 + $0x1d8] sm:$0xff] }
 0x282   :  { %v3333_v50 = vpop.eup %3332  ;;  %v5308_v25 = vadd.f32 1.0, %v3331_v56  ;;  %v2587_v32 = vadd.f32 %v2049_v0, %v2048_v10  ;;  %v5327_v26 = vmul.f32 %v1556_v53, %v1364_v8  ;;  %vm2850_vm11 = vweird.f32 %v5268_v61  ;;  %v1435_v21 = vld [vmem:[%s5645_s3 + $0x1d8] sm:$0xff] }
 0x283   :  { %v2838_v37 = vsel %vm2837_vm9, %v3329_v27, %v2834_v5  ;;  %v2846_v16 = vmul.f32 %v3333_v50, %v5268_v61  ;;  %3334 = vpow2.f32 %v3280_v15  ;;  %v2854_v27 = vand.u32 2147483647, %v5268_v61 }
 0x284   :  { %v2843_v49 = vsel %vm2840_vm8, %v2842_v48, %v2838_v37  ;;  %3336 = vrcp.f32 %v5308_v25  ;;  %v2584_v36 = vadd.f32 %v2583_v1, %v2047_v52  ;;  %vm2851_vm10 = vweird.f32 %v3333_v50  ;;  %v5817_v48 = vld [vmem:[#allocation68_spill] sm:$0xff] }
 0x285   :  { %3241 = vst.msk [vmem:[%s5646_s5 + $0x28] sm:$0xff] %vm3235_vm1, %v2843_v49  ;;  %v2847_v20 = vsub.f32 1.0, %v2846_v16  ;;  %vm5333_vm12 = vcmp.eq.f32.partialorder %v2854_v27, 8.507059e+37  ;;  %vm2852_vm13 = vmor %vm2850_vm11, %vm2851_vm10  ;;  %v5344_v5 = vmul.f32 %v1557_v14, %v1365_v60  ;;  %v1366_v1 = vunpack.c.l.bf16 %v1243_v63 }
 0x286   :  { %v1047_v3 = vpop.f32.mrf.mxu2  ;;  %2585 = vadd.xlane.f32.xlu2 %v2584_v36  ;;  %v824_v7 = vpop.f32.mrf.mxu0  ;;  %v1926_v52 = vmul.f32 %v5051_v4, %v5817_v48  ;;  %v2869_v0 = vand.u32 2147483647, %v5308_v25  ;;  %v1558_v16 = vunpack.c.l.bf16 %v1435_v21  ;;  %v1367_v10 = vunpack.c.h.bf16 %v1243_v63 }
 0x287   :  { %v1160_v39 = vpop.f32.mrf.mxu3  ;;  %v2848_v41 = vmul.f32 %v3333_v50, %v2847_v20  ;;  %v2050_v33 = vmul.f32 %v1922_v23, %v1047_v3  ;;  %v937_v38 = vpop.f32.mrf.mxu1  ;;  %v2857_v23 = vor.u32 1.1754944e-38, %v2856_v55  ;;  %v2052_v43 = vmul.f32 %v1924_v28, %v824_v7  ;;  %v5820_v55 = vld [vmem:[#allocation71_spill] sm:$0xff] }
 0x288   :  { %v2516_v35 = vpop.xlane.xlu0 %2515  ;;  %v2051_v61 = vmul.f32 %v1923_v6, %v1160_v39  ;;  %v2053_v18 = vmul.f32 %v1925_v57, %v937_v38  ;;  %v1559_v8 = vunpack.c.h.bf16 %v1435_v21  ;;  %v2871_v53 = vand.u32 2147483648, %v5308_v25 }
 0x289   :  { %v3335_v31 = vpop.eup %3334  ;;  %v2849_v13 = vadd.f32 %v3333_v50, %v2848_v41  ;;  %v2588_v59 = vadd.f32 %v2587_v32, %v2050_v33  ;;  %v3281_v34 = vmul.f32 -1.442695, %v2516_v35  ;;  %v1927_v28 = vmul.f32 %v5091_v2, %v5818_v19 }
 0x28a   :  { %v3337_v46 = vpop.eup %3336  ;;  %v5338_v17 = vadd.f32 1.0, %v3335_v31  ;;  %v2592_v20 = vadd.f32 %v2053_v18, %v2052_v43  ;;  %v1928_v57 = vmul.f32 %v5116_v40, %v5819_v44  ;;  %v1929_v3 = vmul.f32 %v5120_v42, %v5820_v55  ;;  %v5374_v42 = vld [vmem:[%s5644_s2 + $0x1e0] sm:$0xff] }
 0x28b   :  { %v2853_v56 = vsel %vm2852_vm13, %v3333_v50, %v2849_v13  ;;  %v2861_v47 = vmul.f32 %v3337_v46, %v5308_v25  ;;  %3338 = vpow2.f32 %v3281_v34  ;;  %v2589_v37 = vadd.f32 %v2588_v59, %v2051_v61 }
 0x28c   :  { %v2858_v15 = vsel %vm5333_vm12, %v2857_v23, %v2853_v56  ;;  %3340 = vrcp.f32 %v5338_v17  ;;  %vm2866_vm14 = vweird.f32 %v3337_v46  ;;  %vm2865_vm15 = vweird.f32 %v5308_v25  ;;  %v5379_v25 = vld [vmem:[%s5645_s3 + $0x1e0] sm:$0xff]  ;;  %v5823_v23 = vld [vmem:[#allocation72_spill] sm:$0xff] }
 0x28d   :  { %3242 = vst.msk [vmem:[%s5646_s5 + $0x30] sm:$0xff] %vm3235_vm1, %v2858_v15  ;;  %v2862_v50 = vsub.f32 1.0, %v2861_v47  ;;  %2590 = vadd.xlane.f32.xlu0 %v2589_v37  ;;  %vm5364_vm0 = vcmp.eq.f32.partialorder %v2869_v0, 8.507059e+37  ;;  %vm2867_vm2 = vmor %vm2865_vm15, %vm2866_vm14  ;;  %v2872_v2 = vor.u32 1.1754944e-38, %v2871_v53  ;;  %v5382_v62 = vmul.f32 %v1558_v16, %v1366_v1  ;;  %v5824_v16 = vld [vmem:[#allocation73_spill] sm:$0xff] }
 0x28e   :  { %v1050_v49 = vpop.f32.mrf.mxu2  ;;  %v827_v36 = vpop.f32.mrf.mxu0  ;;  %v5384_v59 = vmul.f32 %v1559_v8, %v1367_v10  ;;  %v1930_v61 = vmul.f32 %v5141_v11, %v5823_v23  ;;  %v2884_v18 = vand.u32 2147483647, %v5338_v17  ;;  %v1368_v56 = vunpack.c.l.bf16 %v5374_v42  ;;  %v5825_v8 = vld [vmem:[#allocation74_spill] sm:$0xff] }
 0x28f   :  { %v1163_v29 = vpop.f32.mrf.mxu3  ;;  %v2863_v6 = vmul.f32 %v3337_v46, %v2862_v50  ;;  %v2054_v4 = vmul.f32 %v1926_v52, %v1050_v49  ;;  %v940_v27 = vpop.f32.mrf.mxu1  ;;  %v2056_v13 = vmul.f32 %v1928_v57, %v827_v36  ;;  %v1560_v47 = vunpack.c.l.bf16 %v5379_v25  ;;  %v5826_v49 = vld [vmem:[#allocation75_spill] sm:$0xff]  ;;  %v1437_v57 = vld [vmem:[%s5645_s3 + $0x1e8] sm:$0xff] }
 0x290   :  { %v2521_v39 = vpop.xlane.xlu1 %2520  ;;  %v2055_v40 = vmul.f32 %v1927_v28, %v1163_v29  ;;  %v2057_v35 = vmul.f32 %v1929_v3, %v940_v27  ;;  %v1369_v43 = vunpack.c.h.bf16 %v5374_v42  ;;  %v2886_v1 = vand.u32 2147483648, %v5338_v17 }
 0x291   :  { %v3339_v41 = vpop.eup %3338  ;;  %v2864_v32 = vadd.f32 %v3337_v46, %v2863_v6  ;;  %v2593_v38 = vadd.f32 %v2592_v20, %v2054_v4  ;;  %v3282_v7 = vmul.f32 -1.442695, %v2521_v39  ;;  %v1931_v10 = vmul.f32 %v5193_v45, %v5824_v16  ;;  %v5410_v4 = vld [vmem:[%s5644_s2 + $0x1e8] sm:$0xff] }
 0x292   :  { %v3341_v60 = vpop.eup %3340  ;;  %v5369_v14 = vadd.f32 1.0, %v3339_v41  ;;  %v2597_v52 = vadd.f32 %v2057_v35, %v2056_v13  ;;  %v1932_v53 = vmul.f32 %v5208_v9, %v5825_v8  ;;  %v1933_v29 = vmul.f32 %v5212_v22, %v5826_v49 }
 0x293   :  { %v2868_v31 = vsel %vm2867_vm2, %v3337_v46, %v2864_v32  ;;  %v2876_v63 = vmul.f32 %v3341_v60, %v5338_v17  ;;  %3342 = vpow2.f32 %v3282_v7  ;;  %v2594_v21 = vadd.f32 %v2593_v38, %v2055_v40  ;;  %v5829_v38 = vld [vmem:[#allocation76_spill] sm:$0xff] }
 0x294   :  { %v2873_v34 = vsel %vm5364_vm0, %v2872_v2, %v2868_v31  ;;  %3344 = vrcp.f32 %v5369_v14  ;;  %vm2881_vm3 = vweird.f32 %v3341_v60  ;;  %vm2880_vm4 = vweird.f32 %v5338_v17 }
 0x295   :  { %3243 = vst.msk [vmem:[%s5646_s5 + $0x38] sm:$0xff] %vm3235_vm1, %v2873_v34  ;;  %v2877_v46 = vsub.f32 1.0, %v2876_v63  ;;  %2595 = vadd.xlane.f32.xlu1 %v2594_v21  ;;  %vm5412_vm5 = vcmp.eq.f32.partialorder %v2884_v18, 8.507059e+37  ;;  %vm2882_vm6 = vmor %vm2880_vm4, %vm2881_vm3  ;;  %v2887_v22 = vor.u32 1.1754944e-38, %v2886_v1  ;;  %v1561_v41 = vunpack.c.h.bf16 %v5379_v25  ;;  %v5830_v1 = vld [vmem:[#allocation77_spill] sm:$0xff] }
 0x296   :  { %v1053_v15 = vpop.f32.mrf.mxu2  ;;  %v830_v37 = vpop.f32.mrf.mxu0  ;;  %v1370_v32 = vunpack.c.l.bf16 %v5410_v4  ;;  %v1934_v7 = vmul.f32 %v5214_v30, %v5829_v38  ;;  %v2899_v2 = vand.u32 2147483647, %v5369_v14  ;;  %v1562_v35 = vunpack.c.l.bf16 %v1437_v57 }
 0x297   :  { %v1166_v48 = vpop.f32.mrf.mxu3  ;;  %v2878_v11 = vmul.f32 %v3341_v60, %v2877_v46  ;;  %v2058_v50 = vmul.f32 %v1930_v61, %v1053_v15  ;;  %v943_v0 = vpop.f32.mrf.mxu1  ;;  %v2060_v39 = vmul.f32 %v1932_v53, %v830_v37  ;;  %v1371_v31 = vunpack.c.h.bf16 %v5410_v4 }
 0x298   :  { %v2526_v6 = vpop.xlane.xlu2 %2525  ;;  %v2059_v17 = vmul.f32 %v1931_v10, %v1166_v48  ;;  %v2061_v44 = vmul.f32 %v1933_v29, %v943_v0  ;;  %v1563_v63 = vunpack.c.h.bf16 %v1437_v57  ;;  %v2901_v13 = vand.u32 2147483648, %v5369_v14  ;;  %v5831_v48 = vld [vmem:[#allocation78_spill] sm:$0xff] }
 0x299   :  { %v3343_v20 = vpop.eup %3342  ;;  %v2879_v27 = vadd.f32 %v3341_v60, %v2878_v11  ;;  %v2598_v45 = vadd.f32 %v2597_v52, %v2058_v50  ;;  %v3283_v19 = vmul.f32 -1.442695, %v2526_v6  ;;  %v1935_v15 = vmul.f32 %v5278_v54, %v5830_v1  ;;  %v5832_v52 = vld [vmem:[#allocation79_spill] sm:$0xff] }
 0x29a   :  { %v3345_v9 = vpop.eup %3344  ;;  %v5417_v28 = vadd.f32 1.0, %v3343_v20  ;;  %v2602_v30 = vadd.f32 %v2061_v44, %v2060_v39  ;;  %v1936_v11 = vmul.f32 %v5288_v24, %v5831_v48  ;;  %v1937_v50 = vmul.f32 %v5290_v12, %v5832_v52  ;;  %v5454_v12 = vld [vmem:[%s5644_s2 + $0x1f0] sm:$0xff]  ;;  %v5841_v52 = vld [vmem:[#allocation84_spill] sm:$0xff] }
 0x29b   :  { %v2883_v55 = vsel %vm2882_vm6, %v3341_v60, %v2879_v27  ;;  %v2891_v3 = vmul.f32 %v3345_v9, %v5369_v14  ;;  %3346 = vpow2.f32 %v3283_v19  ;;  %v2599_v40 = vadd.f32 %v2598_v45, %v2059_v17  ;;  %v5835_v19 = vld [vmem:[#allocation80_spill] sm:$0xff] }
 0x29c   :  { %v2888_v33 = vsel %vm5412_vm5, %v2887_v22, %v2883_v55  ;;  %3348 = vrcp.f32 %v5417_v28  ;;  %vm2896_vm7 = vweird.f32 %v3345_v9  ;;  %vm2895_vm8 = vweird.f32 %v5369_v14 }
 0x29d   :  { %3244 = vst.msk [vmem:[%s5646_s5 + $0x40] sm:$0xff] %vm3235_vm1, %v2888_v33  ;;  %v2892_v60 = vsub.f32 1.0, %v2891_v3  ;;  %2600 = vadd.xlane.f32.xlu2 %v2599_v40  ;;  %vm5444_vm9 = vcmp.eq.f32.partialorder %v2899_v2, 8.507059e+37  ;;  %vm2897_vm10 = vmor %vm2895_vm8, %vm2896_vm7  ;;  %v2902_v54 = vor.u32 1.1754944e-38, %v2901_v13  ;;  %v5461_v27 = vmul.f32 %v1560_v47, %v1368_v56  ;;  %v5836_v33 = vld [vmem:[#allocation81_spill] sm:$0xff] }
 0x29e   :  { %v1056_v34 = vpop.f32.mrf.mxu2  ;;  %v833_v21 = vpop.f32.mrf.mxu0  ;;  %v5465_v36 = vmul.f32 %v1561_v41, %v1369_v43  ;;  %v2914_v56 = vand.u32 2147483647, %v5417_v28  ;;  %v5477_v42 = vmul.f32 %v1562_v35, %v1370_v32  ;;  %v5479_v43 = vmul.f32 %v1563_v63, %v1371_v31  ;;  %v5837_v32 = vld [vmem:[#allocation82_spill] sm:$0xff]  ;;  %v1438_v31 = vld [vmem:[%s5645_s3 + $0x1f0] sm:$0xff] }
 0x29f   :  { %v1169_v23 = vpop.f32.mrf.mxu3  ;;  %v2893_v61 = vmul.f32 %v3345_v9, %v2892_v60  ;;  %v2062_v46 = vmul.f32 %v1934_v7, %v1056_v34  ;;  %v946_v18 = vpop.f32.mrf.mxu1  ;;  %v2064_v4 = vmul.f32 %v1936_v11, %v833_v21  ;;  %v1372_v22 = vunpack.c.l.bf16 %v5454_v12  ;;  %v5838_v60 = vld [vmem:[#allocation83_spill] sm:$0xff] }
 0x2a0   :  { %v2531_v0 = vpop.xlane.xlu0 %2530  ;;  %v2063_v24 = vmul.f32 %v1935_v15, %v1169_v23  ;;  %v2065_v6 = vmul.f32 %v1937_v50, %v946_v18  ;;  %v2916_v17 = vand.u32 2147483648, %v5417_v28  ;;  %v1939_v38 = vmul.f32 %v5324_v58, %v5836_v33 }
 0x2a1   :  { %v3347_v37 = vpop.eup %3346  ;;  %v2894_v16 = vadd.f32 %v3345_v9, %v2893_v61  ;;  %v2603_v8 = vadd.f32 %v2602_v30, %v2062_v46  ;;  %v3284_v53 = vmul.f32 -1.442695, %v2531_v0  ;;  %v1940_v7 = vmul.f32 %v5327_v26, %v5837_v32  ;;  %v5503_v30 = vld [vmem:[%s5644_s2 + $0x1f8] sm:$0xff] }
 0x2a2   :  { %v3349_v49 = vpop.eup %3348  ;;  %v5449_v29 = vadd.f32 1.0, %v3347_v37  ;;  %v2607_v55 = vadd.f32 %v2065_v6, %v2064_v4  ;;  %v1941_v2 = vmul.f32 %v5344_v5, %v5838_v60  ;;  %vm2910_vm12 = vweird.f32 %v5417_v28  ;;  %v5508_v46 = vld [vmem:[%s5645_s3 + $0x1f8] sm:$0xff]  ;;  %v5845_v60 = vld [vmem:[#allocation88_spill] sm:$0xff] }
 0x2a3   :  { %v2898_v14 = vsel %vm2897_vm10, %v3345_v9, %v2894_v16  ;;  %v2906_v20 = vmul.f32 %v3349_v49, %v5417_v28  ;;  %3350 = vpow2.f32 %v3284_v53  ;;  %v1938_v9 = vmul.f32 %v5292_v51, %v5835_v19 }
 0x2a4   :  { %v2903_v45 = vsel %vm5444_vm9, %v2902_v54, %v2898_v14  ;;  %3352 = vrcp.f32 %v5449_v29  ;;  %v2604_v47 = vadd.f32 %v2603_v8, %v2063_v24  ;;  %vm2911_vm11 = vweird.f32 %v3349_v49 }
 0x2a5   :  { %3245 = vst.msk [vmem:[%s5646_s5 + $0x48] sm:$0xff] %vm3235_vm1, %v2903_v45  ;;  %v2907_v25 = vsub.f32 1.0, %v2906_v20  ;;  %vm5493_vm13 = vcmp.eq.f32.partialorder %v2914_v56, 8.507059e+37  ;;  %vm2912_vm14 = vmor %vm2910_vm12, %vm2911_vm11  ;;  %v2917_v26 = vor.u32 1.1754944e-38, %v2916_v17  ;;  %v1564_v15 = vunpack.c.l.bf16 %v1438_v31  ;;  %v5842_v45 = vld [vmem:[#allocation85_spill] sm:$0xff]  ;;  %v5844_v56 = vld [vmem:[#allocation87_spill] sm:$0xff] }
 0x2a6   :  { %v1059_v44 = vpop.f32.mrf.mxu2  ;;  %2605 = vadd.xlane.f32.xlu0 %v2604_v47  ;;  %v836_v41 = vpop.f32.mrf.mxu0  ;;  %v1373_v48 = vunpack.c.h.bf16 %v5454_v12  ;;  %v1942_v50 = vmul.f32 %v5382_v62, %v5841_v52  ;;  %v2929_v37 = vand.u32 2147483647, %v5449_v29  ;;  %v1565_v10 = vunpack.c.h.bf16 %v1438_v31 }
 0x2a7   :  { %v1172_v57 = vpop.f32.mrf.mxu3  ;;  %v2908_v51 = vmul.f32 %v3349_v49, %v2907_v25  ;;  %v2066_v3 = vmul.f32 %v1938_v9, %v1059_v44  ;;  %v949_v39 = vpop.f32.mrf.mxu1  ;;  %v2068_v1 = vmul.f32 %v1940_v7, %v836_v41  ;;  %v1374_v8 = vunpack.c.l.bf16 %v5503_v30  ;;  %v5843_v9 = vld [vmem:[#allocation86_spill] sm:$0xff] }
 0x2a8   :  { %v2536_v40 = vpop.xlane.xlu1 %2535  ;;  %v2067_v28 = vmul.f32 %v1939_v38, %v1172_v57  ;;  %v2069_v61 = vmul.f32 %v1941_v2, %v949_v39  ;;  %v1566_v53 = vunpack.c.l.bf16 %v5508_v46  ;;  %v1943_v19 = vmul.f32 %v5384_v59, %v5842_v45 }
 0x2a9   :  { %v3351_v35 = vpop.eup %3350  ;;  %v2909_v63 = vadd.f32 %v3349_v49, %v2908_v51  ;;  %v2608_v58 = vadd.f32 %v2607_v55, %v2066_v3  ;;  %v3285_v34 = vmul.f32 -1.442695, %v2536_v40  ;;  %v1944_v25 = vmul.f32 %v5461_v27, %v5843_v9 }
 0x2aa   :  { %v3353_v23 = vpop.eup %3352  ;;  %v5498_v5 = vadd.f32 1.0, %v3351_v35  ;;  %v2612_v62 = vadd.f32 %v2069_v61, %v2068_v1  ;;  %v1945_v47 = vmul.f32 %v5465_v36, %v5844_v56  ;;  %vm2925_vm0 = vweird.f32 %v5449_v29  ;;  %v5846_v61 = vld [vmem:[#allocation89_spill] sm:$0xff] }
 0x2ab   :  { %v2913_v18 = vsel %vm2912_vm14, %v3349_v49, %v2909_v63  ;;  %v2921_v21 = vmul.f32 %v3353_v23, %v5449_v29  ;;  %3354 = vpow2.f32 %v3285_v34  ;;  %v2609_v16 = vadd.f32 %v2608_v58, %v2067_v28 }
 0x2ac   :  { %v2918_v11 = vsel %vm5493_vm13, %v2917_v26, %v2913_v18  ;;  %3356 = vrcp.f32 %v5498_v5  ;;  %v2931_v49 = vand.u32 2147483648, %v5449_v29  ;;  %vm2926_vm15 = vweird.f32 %v3353_v23 }
 0x2ad   :  { %3246 = vst.msk [vmem:[%s5646_s5 + $0x50] sm:$0xff] %vm3235_vm1, %v2918_v11  ;;  %v2922_v0 = vsub.f32 1.0, %v2921_v21  ;;  %2610 = vadd.xlane.f32.xlu1 %v2609_v16  ;;  %vm2930_vm2 = vcmp.eq.f32.partialorder %v2929_v37, 8.507059e+37  ;;  %vm2927_vm3 = vmor %vm2925_vm0, %vm2926_vm15  ;;  %v1692_v29 = vmul.f32 %v1564_v15, %v1372_v22  ;;  %v1693_v32 = vmul.f32 %v1565_v10, %v1373_v48  ;;  %v5847_v21 = vld [vmem:[#allocation90_spill] sm:$0xff]  ;;  %v5848_v15 = vld [vmem:[#allocation91_spill] sm:$0xff] }
 0x2ae   :  { %v1062_v54 = vpop.f32.mrf.mxu2  ;;  %v839_v4 = vpop.f32.mrf.mxu0  ;;  %v2932_v39 = vor.u32 1.1754944e-38, %v2931_v49  ;;  %v1946_v2 = vmul.f32 %v5477_v42, %v5845_v60  ;;  %v2944_v35 = vand.u32 2147483647, %v5498_v5  ;;  %v1694_v63 = vmul.f32 %v1566_v53, %v1374_v8 }
 0x2af   :  { %v1175_v24 = vpop.f32.mrf.mxu3  ;;  %v2923_v6 = vmul.f32 %v3353_v23, %v2922_v0  ;;  %v2070_v14 = vmul.f32 %v1942_v50, %v1062_v54  ;;  %v952_v20 = vpop.f32.mrf.mxu1  ;;  %v2072_v36 = vmul.f32 %v1944_v25, %v839_v4  ;;  %v1375_v12 = vunpack.c.h.bf16 %v5503_v30 }
 0x2b0   :  { %v2541_v17 = vpop.xlane.xlu2 %2540  ;;  %v2071_v59 = vmul.f32 %v1943_v19, %v1175_v24  ;;  %v2073_v33 = vmul.f32 %v1945_v47, %v952_v20  ;;  %v1567_v22 = vunpack.c.h.bf16 %v5508_v46  ;;  %v2946_v13 = vand.u32 2147483648, %v5498_v5  ;;  %v5850_v47 = vld [vmem:[#allocation93_spill] sm:$0xff] }
 0x2b1   :  { %v3355_v44 = vpop.eup %3354  ;;  %v2924_v57 = vadd.f32 %v3353_v23, %v2923_v6  ;;  %v2613_v51 = vadd.f32 %v2612_v62, %v2070_v14  ;;  %v3286_v55 = vmul.f32 -1.442695, %v2541_v17  ;;  %v1947_v18 = vmul.f32 %v5479_v43, %v5846_v61  ;;  %v5849_v6 = vld [vmem:[#allocation92_spill] sm:$0xff] }
 0x2b2   :  { %v3357_v3 = vpop.eup %3356  ;;  %v5533_v41 = vadd.f32 1.0, %v3355_v44  ;;  %v2617_v42 = vadd.f32 %v2073_v33, %v2072_v36  ;;  %v1948_v1 = vmul.f32 %v1692_v29, %v5847_v21  ;;  %v1949_v48 = vmul.f32 %v1693_v32, %v5848_v15 }
 0x2b3   :  { %v2928_v27 = vsel %vm2927_vm3, %v3353_v23, %v2924_v57  ;;  %v2936_v38 = vmul.f32 %v3357_v3, %v5498_v5  ;;  %3358 = vpow2.f32 %v3286_v55  ;;  %v2614_v31 = vadd.f32 %v2613_v51, %v2071_v59 }
 0x2b4   :  { %v2933_v7 = vsel %vm2930_vm2, %v2932_v39, %v2928_v27  ;;  %3360 = vrcp.f32 %v5533_v41  ;;  %vm2941_vm4 = vweird.f32 %v3357_v3  ;;  %vm2940_vm5 = vweird.f32 %v5498_v5 }
 0x2b5   :  { %3247 = vst.msk [vmem:[%s5646_s5 + $0x58] sm:$0xff] %vm3235_vm1, %v2933_v7  ;;  %v2937_v40 = vsub.f32 1.0, %v2936_v38  ;;  %2615 = vadd.xlane.f32.xlu2 %v2614_v31  ;;  %vm2945_vm6 = vcmp.eq.f32.partialorder %v2944_v35, 8.507059e+37  ;;  %vm2942_vm7 = vmor %vm2940_vm5, %vm2941_vm4  ;;  %v2947_v16 = vor.u32 1.1754944e-38, %v2946_v13  ;;  %v1695_v5 = vmul.f32 %v1567_v22, %v1375_v12 }
 0x2b6   :  { %v1065_v58 = vpop.f32.mrf.mxu2  ;;  %v842_v46 = vpop.f32.mrf.mxu0  ;;  %v1950_v62 = vmul.f32 %v1694_v63, %v5849_v6  ;;  %v2959_v4 = vand.u32 2147483647, %v5533_v41  ;;  %v2961_v45 = vand.u32 2147483648, %v5533_v41  ;;  %vm2955_vm9 = vweird.f32 %v5533_v41 }
 0x2b7   :  { %v1178_v34 = vpop.f32.mrf.mxu3  ;;  %v2938_v23 = vmul.f32 %v3357_v3, %v2937_v40  ;;  %v2074_v26 = vmul.f32 %v1946_v2, %v1065_v58  ;;  %v955_v28 = vpop.f32.mrf.mxu1  ;;  %v2076_v54 = vmul.f32 %v1948_v1, %v842_v46  ;;  %v1951_v17 = vmul.f32 %v1695_v5, %v5850_v47 }
 0x2b8   :  { %v2546_v30 = vpop.xlane.xlu0 %2545  ;;  %v2075_v8 = vmul.f32 %v1947_v18, %v1178_v34  ;;  %v2077_v43 = vmul.f32 %v1949_v48, %v955_v28  ;;  %vm2960_vm11 = vcmp.eq.f32.partialorder %v2959_v4, 8.507059e+37  ;;  %v2962_v33 = vor.u32 1.1754944e-38, %v2961_v45 }
 0x2b9   :  { %v3359_v11 = vpop.eup %3358  ;;  %v2939_v52 = vadd.f32 %v3357_v3, %v2938_v23  ;;  %v2618_v50 = vadd.f32 %v2617_v42, %v2074_v26  ;;  %v3287_v0 = vmul.f32 -1.442695, %v2546_v30 }
 0x2ba   :  { %v3361_v37 = vpop.eup %3360  ;;  %v2737_v10 = vadd.f32 1.0, %v3359_v11  ;;  %v2622_v25 = vadd.f32 %v2077_v43, %v2076_v54 }
 0x2bb   :  { %v2943_v53 = vsel %vm2942_vm7, %v3357_v3, %v2939_v52  ;;  %v2951_v49 = vmul.f32 %v3361_v37, %v5533_v41  ;;  %3362 = vpow2.f32 %v3287_v0  ;;  %v2619_v20 = vadd.f32 %v2618_v50, %v2075_v8 }
 0x2bc   :  { %v2948_v24 = vsel %vm2945_vm6, %v2947_v16, %v2943_v53  ;;  %3364 = vrcp.f32 %v2737_v10  ;;  %vm2956_vm8 = vweird.f32 %v3361_v37  ;;  %v2976_v60 = vand.u32 2147483648, %v2737_v10 }
 0x2bd   :  { %3248 = vst.msk [vmem:[%s5646_s5 + $0x60] sm:$0xff] %vm3235_vm1, %v2948_v24  ;;  %v2952_v14 = vsub.f32 1.0, %v2951_v49  ;;  %2620 = vadd.xlane.f32.xlu0 %v2619_v20  ;;  %vm2957_vm10 = vmor %vm2955_vm9, %vm2956_vm8  ;;  %v2974_v40 = vand.u32 2147483647, %v2737_v10  ;;  %vm2970_vm13 = vweird.f32 %v2737_v10 }
 0x2be   :  { %v1068_v19 = vpop.f32.mrf.mxu2  ;;  %v2977_v13 = vor.u32 1.1754944e-38, %v2976_v60 }
 0x2bf   :  { %v2953_v9 = vmul.f32 %v3361_v37, %v2952_v14  ;;  %v2078_v56 = vmul.f32 %v1950_v62, %v1068_v19  ;;  %v1181_v44 = vpop.f32.mrf.mxu3  ;;  %vm2975_vm15 = vcmp.eq.f32.partialorder %v2974_v40, 8.507059e+37 }
 0x2c0   :  { %v2551_v57 = vpop.xlane.xlu1 %2550  ;;  %v2079_v29 = vmul.f32 %v1951_v17, %v1181_v44 }
 0x2c1   :  { %v3363_v51 = vpop.eup %3362  ;;  %v2954_v55 = vadd.f32 %v3361_v37, %v2953_v9  ;;  %v2623_v3 = vadd.f32 %v2622_v25, %v2078_v56  ;;  %v3288_v39 = vmul.f32 -1.442695, %v2551_v57 }
 0x2c2   :  { %v3365_v59 = vpop.eup %3364  ;;  %v2738_v27 = vadd.f32 1.0, %v3363_v51 }
 0x2c3   :  { %v2958_v38 = vsel %vm2957_vm10, %v3361_v37, %v2954_v55  ;;  %v2966_v36 = vmul.f32 %v3365_v59, %v2737_v10  ;;  %3366 = vpow2.f32 %v3288_v39  ;;  %v2624_v41 = vadd.f32 %v2623_v3, %v2079_v29 }
 0x2c4   :  { %v2963_v32 = vsel %vm2960_vm11, %v2962_v33, %v2958_v38  ;;  %3368 = vrcp.f32 %v2738_v27  ;;  %vm2971_vm12 = vweird.f32 %v3365_v59  ;;  %v2991_v28 = vand.u32 2147483648, %v2738_v27 }
 0x2c5   :  { %3249 = vst.msk [vmem:[%s5646_s5 + $0x68] sm:$0xff] %vm3235_vm1, %v2963_v32  ;;  %v2967_v7 = vsub.f32 1.0, %v2966_v36  ;;  %2625 = vadd.xlane.f32.xlu1 %v2624_v41  ;;  %vm2972_vm14 = vmor %vm2970_vm13, %vm2971_vm12  ;;  %v2989_v18 = vand.u32 2147483647, %v2738_v27  ;;  %vm2985_vm2 = vweird.f32 %v2738_v27 }
 0x2c6   :  { %v2992_v48 = vor.u32 1.1754944e-38, %v2991_v28 }
 0x2c7   :  { %v2968_v2 = vmul.f32 %v3365_v59, %v2967_v7  ;;  %vm2990_vm4 = vcmp.eq.f32.partialorder %v2989_v18, 8.507059e+37 }
 0x2c8   :  { %v2556_v35 = vpop.xlane.xlu2 %2555 }
 0x2c9   :  { %v3367_v31 = vpop.eup %3366  ;;  %v2969_v63 = vadd.f32 %v3365_v59, %v2968_v2  ;;  %v3289_v12 = vmul.f32 -1.442695, %v2556_v35 }
 0x2ca   :  { %v3369_v22 = vpop.eup %3368  ;;  %v2739_v58 = vadd.f32 1.0, %v3367_v31 }
 0x2cb   :  { %v2973_v34 = vsel %vm2972_vm14, %v3365_v59, %v2969_v63  ;;  %v2981_v23 = vmul.f32 %v3369_v22, %v2738_v27  ;;  %3370 = vpow2.f32 %v3289_v12  ;;  %vm2986_vm0 = vweird.f32 %v3369_v22 }
 0x2cc   :  { %v2978_v42 = vsel %vm2975_vm15, %v2977_v13, %v2973_v34  ;;  %3372 = vrcp.f32 %v2739_v58  ;;  %vm2987_vm3 = vmor %vm2985_vm2, %vm2986_vm0  ;;  %v3006_v16 = vand.u32 2147483648, %v2739_v58  ;;  %v3004_v8 = vand.u32 2147483647, %v2739_v58 }
 0x2cd   :  { %3250 = vst.msk [vmem:[%s5646_s5 + $0x70] sm:$0xff] %vm3235_vm1, %v2978_v42  ;;  %v2982_v26 = vsub.f32 1.0, %v2981_v23  ;;  %vm3000_vm6 = vweird.f32 %v2739_v58 }
 0x2ce   :  { %v3007_v49 = vor.u32 1.1754944e-38, %v3006_v16  ;;  %vm3005_vm8 = vcmp.eq.f32.partialorder %v3004_v8, 8.507059e+37 }
 0x2cf   :  { %v2983_v61 = vmul.f32 %v3369_v22, %v2982_v26 }
 0x2d1   :  { %v3371_v21 = vpop.eup %3370  ;;  %v2984_v1 = vadd.f32 %v3369_v22, %v2983_v61  ;;  %v2561_v46 = vpop.xlane.xlu0 %2560 }
 0x2d2   :  { %v3373_v15 = vpop.eup %3372  ;;  %v2740_v30 = vadd.f32 1.0, %v3371_v21  ;;  %v3290_v50 = vmul.f32 -1.442695, %v2561_v46 }
 0x2d3   :  { %v2988_v11 = vsel %vm2987_vm3, %v3369_v22, %v2984_v1  ;;  %v2996_v52 = vmul.f32 %v3373_v15, %v2739_v58  ;;  %vm3001_vm5 = vweird.f32 %v3373_v15 }
 0x2d4   :  { %v2993_v0 = vsel %vm2990_vm4, %v2992_v48, %v2988_v11  ;;  %3374 = vrcp.f32 %v2740_v30  ;;  %vm3002_vm7 = vmor %vm3000_vm6, %vm3001_vm5  ;;  %v3021_v45 = vand.u32 2147483648, %v2740_v30  ;;  %v3019_v9 = vand.u32 2147483647, %v2740_v30 }
 0x2d5   :  { %3251 = vst.msk [vmem:[%s5646_s5 + $0x78] sm:$0xff] %vm3235_vm1, %v2993_v0  ;;  %v2997_v37 = vsub.f32 1.0, %v2996_v52  ;;  %3376 = vpow2.f32 %v3290_v50  ;;  %vm3015_vm10 = vweird.f32 %v2740_v30 }
 0x2d6   :  { %v3022_v56 = vor.u32 1.1754944e-38, %v3021_v45  ;;  %vm3020_vm12 = vcmp.eq.f32.partialorder %v3019_v9, 8.507059e+37 }
 0x2d7   :  { %v2998_v10 = vmul.f32 %v3373_v15, %v2997_v37 }
 0x2d8   :  { %v2566_v54 = vpop.xlane.xlu1 %2565 }
 0x2d9   :  { %v2999_v43 = vadd.f32 %v3373_v15, %v2998_v10  ;;  %v3291_v62 = vmul.f32 -1.442695, %v2566_v54 }
 0x2da   :  { %v3375_v53 = vpop.eup %3374 }
 0x2db   :  { %v3377_v5 = vpop.eup %3376  ;;  %v3003_v24 = vsel %vm3002_vm7, %v3373_v15, %v2999_v43  ;;  %v3011_v6 = vmul.f32 %v3375_v53, %v2740_v30  ;;  %3378 = vpow2.f32 %v3291_v62  ;;  %vm3016_vm9 = vweird.f32 %v3375_v53 }
 0x2dc   :  { %v3008_v14 = vsel %vm3005_vm8, %v3007_v49, %v3003_v24  ;;  %v2741_v20 = vadd.f32 1.0, %v3377_v5  ;;  %vm3017_vm11 = vmor %vm3015_vm10, %vm3016_vm9 }
 0x2dd   :  { %3252 = vst.msk [vmem:[%s5646_s5 + $0x80] sm:$0xff] %vm3235_vm1, %v3008_v14  ;;  %v3012_v4 = vsub.f32 1.0, %v3011_v6 }
 0x2de   :  { %3380 = vrcp.f32 %v2741_v20  ;;  %v3036_v33 = vand.u32 2147483648, %v2741_v20  ;;  %v3034_v38 = vand.u32 2147483647, %v2741_v20  ;;  %vm3030_vm14 = vweird.f32 %v2741_v20 }
 0x2df   :  { %v3013_v19 = vmul.f32 %v3375_v53, %v3012_v4 }
 0x2e0   :  { %v2571_v47 = vpop.xlane.xlu2 %2570  ;;  %v3037_v60 = vor.u32 1.1754944e-38, %v3036_v33  ;;  %vm3035_vm0 = vcmp.eq.f32.partialorder %v3034_v38, 8.507059e+37 }
 0x2e1   :  { %v3014_v25 = vadd.f32 %v3375_v53, %v3013_v19  ;;  %v3379_v17 = vpop.eup %3378  ;;  %v3292_v57 = vmul.f32 -1.442695, %v2571_v47 }
 0x2e2   :  { %v2742_v3 = vadd.f32 1.0, %v3379_v17 }
 0x2e3   :  { %v3018_v44 = vsel %vm3017_vm11, %v3375_v53, %v3014_v25  ;;  %3382 = vpow2.f32 %v3292_v57 }
 0x2e4   :  { %v3381_v51 = vpop.eup %3380  ;;  %v3023_v55 = vsel %vm3020_vm12, %v3022_v56, %v3018_v44  ;;  %3384 = vrcp.f32 %v2742_v3  ;;  %v3051_v12 = vand.u32 2147483648, %v2742_v3  ;;  %v3049_v13 = vand.u32 2147483647, %v2742_v3 }
 0x2e5   :  { %3253 = vst.msk [vmem:[%s5646_s5 + $0x88] sm:$0xff] %vm3235_vm1, %v3023_v55  ;;  %v3026_v39 = vmul.f32 %v3381_v51, %v2741_v20  ;;  %vm3031_vm13 = vweird.f32 %v3381_v51  ;;  %vm3045_vm3 = vweird.f32 %v2742_v3 }
 0x2e6   :  { %vm3032_vm15 = vmor %vm3030_vm14, %vm3031_vm13  ;;  %v3052_v28 = vor.u32 1.1754944e-38, %v3051_v12  ;;  %vm3050_vm5 = vcmp.eq.f32.partialorder %v3049_v13, 8.507059e+37 }
 0x2e7   :  { %v3027_v59 = vsub.f32 1.0, %v3026_v39 }
 0x2e8   :  { %v2576_v36 = vpop.xlane.xlu0 %2575 }
 0x2e9   :  { %v3028_v27 = vmul.f32 %v3381_v51, %v3027_v59  ;;  %v3383_v29 = vpop.eup %3382  ;;  %v3293_v7 = vmul.f32 -1.442695, %v2576_v36 }
 0x2ea   :  { %v3385_v41 = vpop.eup %3384  ;;  %v2743_v2 = vadd.f32 1.0, %v3383_v29 }
 0x2eb   :  { %v3029_v32 = vadd.f32 %v3381_v51, %v3028_v27  ;;  %v3041_v35 = vmul.f32 %v3385_v41, %v2742_v3  ;;  %3386 = vpow2.f32 %v3293_v7  ;;  %vm3046_vm2 = vweird.f32 %v3385_v41 }
 0x2ec   :  { %3388 = vrcp.f32 %v2743_v2  ;;  %vm3047_vm4 = vmor %vm3045_vm3, %vm3046_vm2  ;;  %v3066_v48 = vand.u32 2147483648, %v2743_v2  ;;  %v3064_v46 = vand.u32 2147483647, %v2743_v2  ;;  %vm3060_vm7 = vweird.f32 %v2743_v2 }
 0x2ed   :  { %v3033_v40 = vsel %vm3032_vm15, %v3381_v51, %v3029_v32  ;;  %v3042_v63 = vsub.f32 1.0, %v3041_v35 }
 0x2ee   :  { %v3038_v31 = vsel %vm3035_vm0, %v3037_v60, %v3033_v40  ;;  %v3067_v16 = vor.u32 1.1754944e-38, %v3066_v48  ;;  %vm3065_vm9 = vcmp.eq.f32.partialorder %v3064_v46, 8.507059e+37 }
 0x2ef   :  { %3254 = vst.msk [vmem:[%s5646_s5 + $0x90] sm:$0xff] %vm3235_vm1, %v3038_v31  ;;  %v3043_v22 = vmul.f32 %v3385_v41, %v3042_v63 }
 0x2f0   :  { %v2581_v58 = vpop.xlane.xlu1 %2580 }
 0x2f1   :  { %v3387_v34 = vpop.eup %3386  ;;  %v3044_v23 = vadd.f32 %v3385_v41, %v3043_v22  ;;  %v3294_v42 = vmul.f32 -1.442695, %v2581_v58 }
 0x2f2   :  { %v3389_v26 = vpop.eup %3388  ;;  %v2744_v61 = vadd.f32 1.0, %v3387_v34 }
 0x2f3   :  { %v3048_v18 = vsel %vm3047_vm4, %v3385_v41, %v3044_v23  ;;  %v3056_v21 = vmul.f32 %v3389_v26, %v2743_v2  ;;  %3390 = vpow2.f32 %v3294_v42  ;;  %vm3061_vm6 = vweird.f32 %v3389_v26 }
 0x2f4   :  { %v3053_v1 = vsel %vm3050_vm5, %v3052_v28, %v3048_v18  ;;  %3392 = vrcp.f32 %v2744_v61  ;;  %vm3062_vm8 = vmor %vm3060_vm7, %vm3061_vm6  ;;  %v3081_v54 = vand.u32 2147483648, %v2744_v61  ;;  %v3079_v24 = vand.u32 2147483647, %v2744_v61 }
 0x2f5   :  { %3255 = vst.msk [vmem:[%s5646_s5 + $0x98] sm:$0xff] %vm3235_vm1, %v3053_v1  ;;  %v3057_v15 = vsub.f32 1.0, %v3056_v21  ;;  %vm3075_vm11 = vweird.f32 %v2744_v61 }
 0x2f6   :  { %v3082_v45 = vor.u32 1.1754944e-38, %v3081_v54  ;;  %vm3080_vm13 = vcmp.eq.f32.partialorder %v3079_v24, 8.507059e+37 }
 0x2f7   :  { %v3058_v30 = vmul.f32 %v3389_v26, %v3057_v15 }
 0x2f9   :  { %v2586_v11 = vpop.xlane.xlu2 %2585  ;;  %v3391_v52 = vpop.eup %3390  ;;  %v3059_v50 = vadd.f32 %v3389_v26, %v3058_v30 }
 0x2fa   :  { %v3295_v0 = vmul.f32 -1.442695, %v2586_v11  ;;  %v3393_v37 = vpop.eup %3392  ;;  %v2745_v10 = vadd.f32 1.0, %v3391_v52 }
 0x2fb   :  { %v3063_v8 = vsel %vm3062_vm8, %v3389_v26, %v3059_v50  ;;  %v3071_v43 = vmul.f32 %v3393_v37, %v2744_v61  ;;  %vm3076_vm10 = vweird.f32 %v3393_v37 }
 0x2fc   :  { %3394 = vpow2.f32 %v3295_v0  ;;  %v3068_v53 = vsel %vm3065_vm9, %v3067_v16, %v3063_v8  ;;  %vm3077_vm12 = vmor %vm3075_vm11, %vm3076_vm10  ;;  %v3096_v17 = vand.u32 2147483648, %v2745_v10  ;;  %v3094_v57 = vand.u32 2147483647, %v2745_v10 }
 0x2fd   :  { %3396 = vrcp.f32 %v2745_v10  ;;  %3256 = vst.msk [vmem:[%s5646_s5 + $0xa0] sm:$0xff] %vm3235_vm1, %v3068_v53  ;;  %v3072_v49 = vsub.f32 1.0, %v3071_v43  ;;  %vm3090_vm15 = vweird.f32 %v2745_v10 }
 0x2fe   :  { %v3097_v33 = vor.u32 1.1754944e-38, %v3096_v17  ;;  %vm3095_vm2 = vcmp.eq.f32.partialorder %v3094_v57, 8.507059e+37 }
 0x2ff   :  { %v3073_v5 = vmul.f32 %v3393_v37, %v3072_v49 }
 0x300   :  { %v2591_v6 = vpop.xlane.xlu0 %2590 }
 0x301   :  { %v3074_v14 = vadd.f32 %v3393_v37, %v3073_v5  ;;  %v3296_v20 = vmul.f32 -1.442695, %v2591_v6 }
 0x302   :  { %v3395_v62 = vpop.eup %3394 }
 0x303   :  { %v3397_v4 = vpop.eup %3396  ;;  %v2746_v19 = vadd.f32 1.0, %v3395_v62  ;;  %v3078_v9 = vsel %vm3077_vm12, %v3393_v37, %v3074_v14  ;;  %3398 = vpow2.f32 %v3296_v20 }
 0x304   :  { %v3086_v25 = vmul.f32 %v3397_v4, %v2745_v10  ;;  %v3083_v56 = vsel %vm3080_vm13, %v3082_v45, %v3078_v9  ;;  %vm3091_vm14 = vweird.f32 %v3397_v4 }
 0x305   :  { %3400 = vrcp.f32 %v2746_v19  ;;  %3257 = vst.msk [vmem:[%s5646_s5 + $0xa8] sm:$0xff] %vm3235_vm1, %v3083_v56  ;;  %vm3092_vm0 = vmor %vm3090_vm15, %vm3091_vm14  ;;  %v3111_v7 = vand.u32 2147483648, %v2746_v19  ;;  %v3109_v60 = vand.u32 2147483647, %v2746_v19  ;;  %vm3105_vm4 = vweird.f32 %v2746_v19 }
 0x306   :  { %v3087_v47 = vsub.f32 1.0, %v3086_v25 }
 0x307   :  { %v3112_v12 = vor.u32 1.1754944e-38, %v3111_v7  ;;  %vm3110_vm6 = vcmp.eq.f32.partialorder %v3109_v60, 8.507059e+37 }
 0x308   :  { %v3088_v44 = vmul.f32 %v3397_v4, %v3087_v47  ;;  %v2596_v51 = vpop.xlane.xlu1 %2595 }
 0x309   :  { %v3399_v55 = vpop.eup %3398  ;;  %v3297_v39 = vmul.f32 -1.442695, %v2596_v51 }
 0x30a   :  { %v3089_v3 = vadd.f32 %v3397_v4, %v3088_v44  ;;  %v2747_v27 = vadd.f32 1.0, %v3399_v55 }
 0x30b   :  { %v3401_v59 = vpop.eup %3400  ;;  %3402 = vpow2.f32 %v3297_v39 }
 0x30c   :  { %v3093_v38 = vsel %vm3092_vm0, %v3397_v4, %v3089_v3  ;;  %v3101_v36 = vmul.f32 %v3401_v59, %v2746_v19  ;;  %3404 = vrcp.f32 %v2747_v27  ;;  %vm3106_vm3 = vweird.f32 %v3401_v59 }
 0x30d   :  { %v3098_v29 = vsel %vm3095_vm2, %v3097_v33, %v3093_v38  ;;  %vm3107_vm5 = vmor %vm3105_vm4, %vm3106_vm3  ;;  %v3126_v42 = vand.u32 2147483648, %v2747_v27  ;;  %v3124_v28 = vand.u32 2147483647, %v2747_v27  ;;  %vm3120_vm8 = vweird.f32 %v2747_v27 }
 0x30e   :  { %3258 = vst.msk [vmem:[%s5646_s5 + $0xb0] sm:$0xff] %vm3235_vm1, %v3098_v29  ;;  %v3102_v32 = vsub.f32 1.0, %v3101_v36 }
 0x30f   :  { %v3127_v48 = vor.u32 1.1754944e-38, %v3126_v42  ;;  %vm3125_vm10 = vcmp.eq.f32.partialorder %v3124_v28, 8.507059e+37 }
 0x310   :  { %v3103_v41 = vmul.f32 %v3401_v59, %v3102_v32  ;;  %v2601_v2 = vpop.xlane.xlu2 %2600 }
 0x311   :  { %v3403_v40 = vpop.eup %3402  ;;  %v3298_v31 = vmul.f32 -1.442695, %v2601_v2 }
 0x312   :  { %v3104_v35 = vadd.f32 %v3401_v59, %v3103_v41  ;;  %v3405_v63 = vpop.eup %3404  ;;  %v2748_v22 = vadd.f32 1.0, %v3403_v40 }
 0x313   :  { %v3116_v58 = vmul.f32 %v3405_v63, %v2747_v27  ;;  %3406 = vpow2.f32 %v3298_v31  ;;  %vm3121_vm7 = vweird.f32 %v3405_v63 }
 0x314   :  { %v3108_v13 = vsel %vm3107_vm5, %v3401_v59, %v3104_v35  ;;  %3408 = vrcp.f32 %v2748_v22  ;;  %vm3122_vm9 = vmor %vm3120_vm8, %vm3121_vm7  ;;  %v3141_v0 = vand.u32 2147483648, %v2748_v22  ;;  %v3139_v16 = vand.u32 2147483647, %v2748_v22 }
 0x315   :  { %v3113_v34 = vsel %vm3110_vm6, %v3112_v12, %v3108_v13  ;;  %v3117_v23 = vsub.f32 1.0, %v3116_v58  ;;  %vm3135_vm12 = vweird.f32 %v2748_v22 }
 0x316   :  { %3259 = vst.msk [vmem:[%s5646_s5 + $0xb8] sm:$0xff] %vm3235_vm1, %v3113_v34  ;;  %v3142_v54 = vor.u32 1.1754944e-38, %v3141_v0  ;;  %vm3140_vm14 = vcmp.eq.f32.partialorder %v3139_v16, 8.507059e+37 }
 0x317   :  { %v3118_v26 = vmul.f32 %v3405_v63, %v3117_v23 }
 0x319   :  { %v2606_v61 = vpop.xlane.xlu0 %2605  ;;  %v3407_v18 = vpop.eup %3406  ;;  %v3119_v21 = vadd.f32 %v3405_v63, %v3118_v26 }
 0x31a   :  { %v3299_v1 = vmul.f32 -1.442695, %v2606_v61  ;;  %v3409_v15 = vpop.eup %3408  ;;  %v2749_v30 = vadd.f32 1.0, %v3407_v18 }
 0x31b   :  { %v3123_v46 = vsel %vm3122_vm9, %v3405_v63, %v3119_v21  ;;  %v3131_v11 = vmul.f32 %v3409_v15, %v2748_v22  ;;  %vm3136_vm11 = vweird.f32 %v3409_v15 }
 0x31c   :  { %3410 = vpow2.f32 %v3299_v1  ;;  %v3128_v52 = vsel %vm3125_vm10, %v3127_v48, %v3123_v46  ;;  %vm3137_vm13 = vmor %vm3135_vm12, %vm3136_vm11  ;;  %v3156_v20 = vand.u32 2147483648, %v2749_v30  ;;  %v3154_v45 = vand.u32 2147483647, %v2749_v30 }
 0x31d   :  { %3412 = vrcp.f32 %v2749_v30  ;;  %3260 = vst.msk [vmem:[%s5646_s5 + $0xc0] sm:$0xff] %vm3235_vm1, %v3128_v52  ;;  %v3132_v50 = vsub.f32 1.0, %v3131_v11  ;;  %vm3150_vm0 = vweird.f32 %v2749_v30 }
 0x31e   :  { %v3157_v17 = vor.u32 1.1754944e-38, %v3156_v20  ;;  %vm3155_vm3 = vcmp.eq.f32.partialorder %v3154_v45, 8.507059e+37 }
 0x31f   :  { %v3133_v37 = vmul.f32 %v3409_v15, %v3132_v50 }
 0x320   :  { %v2611_v10 = vpop.xlane.xlu1 %2610 }
 0x321   :  { %v3134_v43 = vadd.f32 %v3409_v15, %v3133_v37  ;;  %v3300_v53 = vmul.f32 -1.442695, %v2611_v10 }
 0x322   :  { %v3411_v8 = vpop.eup %3410 }
 0x323   :  { %v3413_v49 = vpop.eup %3412  ;;  %v2750_v5 = vadd.f32 1.0, %v3411_v8  ;;  %v3138_v24 = vsel %vm3137_vm13, %v3409_v15, %v3134_v43  ;;  %3414 = vpow2.f32 %v3300_v53 }
 0x324   :  { %v3146_v6 = vmul.f32 %v3413_v49, %v2749_v30  ;;  %v3143_v62 = vsel %vm3140_vm14, %v3142_v54, %v3138_v24  ;;  %vm3151_vm15 = vweird.f32 %v3413_v49 }
 0x325   :  { %3416 = vrcp.f32 %v2750_v5  ;;  %3261 = vst.msk [vmem:[%s5646_s5 + $0xc8] sm:$0xff] %vm3235_vm1, %v3143_v62  ;;  %vm3152_vm2 = vmor %vm3150_vm0, %vm3151_vm15  ;;  %v3171_v39 = vand.u32 2147483648, %v2750_v5  ;;  %v3169_v33 = vand.u32 2147483647, %v2750_v5  ;;  %vm3165_vm5 = vweird.f32 %v2750_v5 }
 0x326   :  { %v3147_v14 = vsub.f32 1.0, %v3146_v6 }
 0x327   :  { %v3172_v7 = vor.u32 1.1754944e-38, %v3171_v39  ;;  %vm3170_vm7 = vcmp.eq.f32.partialorder %v3169_v33, 8.507059e+37 }
 0x328   :  { %v3148_v4 = vmul.f32 %v3413_v49, %v3147_v14  ;;  %v2616_v19 = vpop.xlane.xlu2 %2615 }
 0x329   :  { %v3415_v9 = vpop.eup %3414  ;;  %v3301_v56 = vmul.f32 -1.442695, %v2616_v19 }
 0x32a   :  { %v3149_v25 = vadd.f32 %v3413_v49, %v3148_v4  ;;  %v2751_v44 = vadd.f32 1.0, %v3415_v9 }
 0x32b   :  { %v3417_v47 = vpop.eup %3416  ;;  %3418 = vpow2.f32 %v3301_v56 }
 0x32c   :  { %v3153_v57 = vsel %vm3152_vm2, %v3413_v49, %v3149_v25  ;;  %v3161_v51 = vmul.f32 %v3417_v47, %v2750_v5  ;;  %3420 = vrcp.f32 %v2751_v44  ;;  %vm3166_vm4 = vweird.f32 %v3417_v47 }
 0x32d   :  { %v3158_v55 = vsel %vm3155_vm3, %v3157_v17, %v3153_v57  ;;  %vm3167_vm6 = vmor %vm3165_vm5, %vm3166_vm4  ;;  %v3186_v31 = vand.u32 2147483648, %v2751_v44  ;;  %v3184_v12 = vand.u32 2147483647, %v2751_v44  ;;  %vm3180_vm9 = vweird.f32 %v2751_v44 }
 0x32e   :  { %3262 = vst.msk [vmem:[%s5646_s5 + $0xd0] sm:$0xff] %vm3235_vm1, %v3158_v55  ;;  %v3162_v3 = vsub.f32 1.0, %v3161_v51 }
 0x32f   :  { %v3187_v42 = vor.u32 1.1754944e-38, %v3186_v31  ;;  %vm3185_vm11 = vcmp.eq.f32.partialorder %v3184_v12, 8.507059e+37 }
 0x330   :  { %v3163_v59 = vmul.f32 %v3417_v47, %v3162_v3  ;;  %v2621_v27 = vpop.xlane.xlu0 %2620 }
 0x331   :  { %v3419_v38 = vpop.eup %3418  ;;  %v3302_v29 = vmul.f32 -1.442695, %v2621_v27 }
 0x332   :  { %v3164_v36 = vadd.f32 %v3417_v47, %v3163_v59  ;;  %v3421_v32 = vpop.eup %3420  ;;  %v2752_v41 = vadd.f32 1.0, %v3419_v38 }
 0x333   :  { %v3176_v2 = vmul.f32 %v3421_v32, %v2751_v44  ;;  %3422 = vpow2.f32 %v3302_v29  ;;  %vm3181_vm8 = vweird.f32 %v3421_v32 }
 0x334   :  { %v3168_v60 = vsel %vm3167_vm6, %v3417_v47, %v3164_v36  ;;  %3424 = vrcp.f32 %v2752_v41  ;;  %vm3182_vm10 = vmor %vm3180_vm9, %vm3181_vm8  ;;  %v3201_v1 = vand.u32 2147483648, %v2752_v41  ;;  %v3199_v48 = vand.u32 2147483647, %v2752_v41 }
 0x335   :  { %v3173_v40 = vsel %vm3170_vm7, %v3172_v7, %v3168_v60  ;;  %v3177_v35 = vsub.f32 1.0, %v3176_v2  ;;  %vm3195_vm13 = vweird.f32 %v2752_v41 }
 0x336   :  { %3263 = vst.msk [vmem:[%s5646_s5 + $0xd8] sm:$0xff] %vm3235_vm1, %v3173_v40  ;;  %v3202_v52 = vor.u32 1.1754944e-38, %v3201_v1  ;;  %vm3200_vm15 = vcmp.eq.f32.partialorder %v3199_v48, 8.507059e+37 }
 0x337   :  { %v3178_v63 = vmul.f32 %v3421_v32, %v3177_v35 }
 0x338   :  { %v2626_v22 = vpop.xlane.xlu1 %2625 }
 0x339   :  { %v3423_v13 = vpop.eup %3422  ;;  %v3179_v58 = vadd.f32 %v3421_v32, %v3178_v63  ;;  %v3303_v34 = vmul.f32 -1.442695, %v2626_v22 }
 0x33a   :  { %v3425_v23 = vpop.eup %3424  ;;  %v2753_v26 = vadd.f32 1.0, %v3423_v13 }
 0x33b   :  { %v3183_v28 = vsel %vm3182_vm10, %v3421_v32, %v3179_v58  ;;  %v3191_v61 = vmul.f32 %v3425_v23, %v2752_v41  ;;  %3426 = vpow2.f32 %v3303_v34  ;;  %vm3196_vm12 = vweird.f32 %v3425_v23 }
 0x33c   :  { %v3188_v18 = vsel %vm3185_vm11, %v3187_v42, %v3183_v28  ;;  %3428 = vrcp.f32 %v2753_v26  ;;  %vm3197_vm14 = vmor %vm3195_vm13, %vm3196_vm12  ;;  %v3216_v8 = vand.u32 2147483648, %v2753_v26  ;;  %v3214_v53 = vand.u32 2147483647, %v2753_v26 }
 0x33d   :  { %3264 = vst.msk [vmem:[%s5646_s5 + $0xe0] sm:$0xff] %vm3235_vm1, %v3188_v18  ;;  %v3192_v21 = vsub.f32 1.0, %v3191_v61  ;;  %vm3210_vm2 = vweird.f32 %v2753_v26 }
 0x33e   :  { %v3217_v5 = vor.u32 1.1754944e-38, %v3216_v8  ;;  %vm3215_vm4 = vcmp.eq.f32.partialorder %v3214_v53, 8.507059e+37 }
 0x33f   :  { %v3193_v15 = vmul.f32 %v3425_v23, %v3192_v21 }
 0x341   :  { %v3427_v30 = vpop.eup %3426  ;;  %v3194_v46 = vadd.f32 %v3425_v23, %v3193_v15 }
 0x342   :  { %v3429_v11 = vpop.eup %3428  ;;  %v2754_v50 = vadd.f32 1.0, %v3427_v30 }
 0x343   :  { %v3198_v0 = vsel %vm3197_vm14, %v3425_v23, %v3194_v46  ;;  %v3206_v37 = vmul.f32 %v3429_v11, %v2753_v26  ;;  %vm3211_vm0 = vweird.f32 %v3429_v11 }
 0x344   :  { %v3203_v16 = vsel %vm3200_vm15, %v3202_v52, %v3198_v0  ;;  %3430 = vrcp.f32 %v2754_v50  ;;  %vm3212_vm3 = vmor %vm3210_vm2, %vm3211_vm0  ;;  %v3231_v20 = vand.u32 2147483648, %v2754_v50  ;;  %v3229_v45 = vand.u32 2147483647, %v2754_v50 }
 0x345   :  { %3265 = vst.msk [vmem:[%s5646_s5 + $0xe8] sm:$0xff] %vm3235_vm1, %v3203_v16  ;;  %v3207_v10 = vsub.f32 1.0, %v3206_v37  ;;  %vm3225_vm6 = vweird.f32 %v2754_v50 }
 0x346   :  { %v3232_v9 = vor.u32 1.1754944e-38, %v3231_v20  ;;  %vm3230_vm8 = vcmp.eq.f32.partialorder %v3229_v45, 8.507059e+37 }
 0x347   :  { %v3208_v43 = vmul.f32 %v3429_v11, %v3207_v10 }
 0x349   :  { %v3209_v49 = vadd.f32 %v3429_v11, %v3208_v43 }
 0x34a   :  { %v3431_v54 = vpop.eup %3430 }
 0x34b   :  { %v3213_v24 = vsel %vm3212_vm3, %v3429_v11, %v3209_v49  ;;  %v3221_v6 = vmul.f32 %v3431_v54, %v2754_v50  ;;  %vm3226_vm5 = vweird.f32 %v3431_v54 }
 0x34c   :  { %v3218_v62 = vsel %vm3215_vm4, %v3217_v5, %v3213_v24  ;;  %vm3227_vm7 = vmor %vm3225_vm6, %vm3226_vm5 }
 0x34d   :  { %3266 = vst.msk [vmem:[%s5646_s5 + $0xf0] sm:$0xff] %vm3235_vm1, %v3218_v62  ;;  %v3222_v14 = vsub.f32 1.0, %v3221_v6 }
 0x34f   :  { %v3223_v4 = vmul.f32 %v3431_v54, %v3222_v14 }
 0x351   :  { %v3224_v19 = vadd.f32 %v3431_v54, %v3223_v4 }
 0x353   :  { %v3228_v25 = vsel %vm3227_vm7, %v3431_v54, %v3224_v19 }
 0x354   :  { %v3233_v56 = vsel %vm3230_vm8, %v3232_v9, %v3228_v25 }
 0x355   :  { %3267 = vst.msk [vmem:[%s5646_s5 + $0xf8] sm:$0xff] %vm3235_vm1, %v3233_v56 }

// kernel: link_gnn_forward.2
= control target key start
LH: loop header
LB: loop body
LE: loop exit
PB: predicated region body
PF: predicated region fallthrough
CT: control target
= control target key end

     0   :  { %vm82_vm0 = vcmask 7168   ;;  %s9220_s1 = inlined_call_operand.vmem [shape: bf16[512,128], index: 1, kind: input, shape index: {}]   ;;  %s9221_s0 = inlined_call_operand.vmem [shape: bf16[512,512], index: 0, kind: input, shape index: {}]   ;;  %s9222_s2 = inlined_call_operand.vmem [shape: f32[512,128], index: 2, kind: input, shape index: {}]   ;;  %s9223_s3 = inlined_call_operand.vmem [shape: f32[512,128], index: 3, kind: output, shape index: {}]  }
   0x1   :  { %v5382_v0 = vld [vmem:[%s9220_s1 + $0x38] sm:$0xff]  ;;  %v5381_v4 = vld [vmem:[%s9220_s1 + $0x30] sm:$0xff]  ;;  %v155_v8 = vld [vmem:[%s9221_s0 + $0x40] sm:$0xff] }
   0x2   :  { %v5390_v1 = vld [vmem:[%s9220_s1 + $0x78] sm:$0xff]  ;;  %v5389_v5 = vld [vmem:[%s9220_s1 + $0x70] sm:$0xff]  ;;  %1235 = vmatpush.bf16.msra.mxu0 %v5382_v0  ;;  %v156_v9 = vld [vmem:[%s9221_s0 + $0x48] sm:$0xff]  ;;  %v2119_v10 = vunpack.c.l.bf16 %v155_v8  ;;  %v2120_v11 = vunpack.c.h.bf16 %v155_v8 }
   0x3   :  { %v5398_v2 = vld [vmem:[%s9220_s1 + $0xb8] sm:$0xff]  ;;  %1404 = vmatpush.bf16.msra.mxu1 %v5390_v1  ;;  %v5397_v6 = vld [vmem:[%s9220_s1 + $0xb0] sm:$0xff]  ;;  %v151_v12 = vld [vmem:[%s9221_s0 + $0x20] sm:$0xff]  ;;  %v2121_v14 = vunpack.c.l.bf16 %v156_v9  ;;  %v2122_v19 = vunpack.c.h.bf16 %v156_v9 }
   0x4   :  { %v5406_v3 = vld [vmem:[%s9220_s1 + $0xf8] sm:$0xff]  ;;  %v5405_v7 = vld [vmem:[%s9220_s1 + $0xf0] sm:$0xff]  ;;  %1573 = vmatpush.bf16.msra.mxu2 %v5398_v2  ;;  %v152_v13 = vld [vmem:[%s9221_s0 + $0x28] sm:$0xff]  ;;  %v2111_v15 = vunpack.c.l.bf16 %v151_v12  ;;  %v2112_v16 = vunpack.c.h.bf16 %v151_v12  ;;  %v2379_v20 = vadd.f32 %v2120_v11, %v2119_v10 }
   0x5   :  { %1742 = vmatpush.bf16.msra.mxu3 %v5406_v3  ;;  %v147_v17 = vld [vmem:[%s9221_s0] sm:$0xff]  ;;  %v148_v18 = vld [vmem:[%s9221_s0 + $0x8] sm:$0xff]  ;;  %v2113_v21 = vunpack.c.l.bf16 %v152_v13  ;;  %v2114_v23 = vunpack.c.h.bf16 %v152_v13  ;;  %v157_v33 = vld [vmem:[%s9221_s0 + $0x50] sm:$0xff] }
   0x6   :  { %v2103_v22 = vunpack.c.l.bf16 %v147_v17  ;;  %1236 = vmatpush.bf16.msra.mxu0 %v5381_v4  ;;  %v2369_v24 = vadd.f32 %v2112_v16, %v2111_v15  ;;  %v2104_v25 = vunpack.c.h.bf16 %v147_v17  ;;  %v2105_v26 = vunpack.c.l.bf16 %v148_v18  ;;  %v5380_v27 = vld [vmem:[%s9220_s1 + $0x28] sm:$0xff]  ;;  %v158_v34 = vld [vmem:[%s9221_s0 + $0x58] sm:$0xff]  ;;  %v153_v39 = vld [vmem:[%s9221_s0 + $0x30] sm:$0xff] }
   0x7   :  { %1405 = vmatpush.bf16.msra.mxu1 %v5389_v5  ;;  %v5388_v28 = vld [vmem:[%s9220_s1 + $0x68] sm:$0xff]  ;;  %v2380_v30 = vadd.f32 %v2379_v20, %v2121_v14  ;;  %v2106_v31 = vunpack.c.h.bf16 %v148_v18  ;;  %v2123_v37 = vunpack.c.l.bf16 %v157_v33  ;;  %v2124_v38 = vunpack.c.h.bf16 %v157_v33  ;;  %v154_v40 = vld [vmem:[%s9221_s0 + $0x38] sm:$0xff]  ;;  %v149_v41 = vld [vmem:[%s9221_s0 + $0x10] sm:$0xff] }
   0x8   :  { %v5396_v29 = vld [vmem:[%s9220_s1 + $0xa8] sm:$0xff]  ;;  %1574 = vmatpush.bf16.msra.mxu2 %v5397_v6  ;;  %v2370_v35 = vadd.f32 %v2369_v24, %v2113_v21  ;;  %v2359_v36 = vadd.f32 %v2104_v25, %v2103_v22  ;;  %v2125_v43 = vunpack.c.l.bf16 %v158_v34  ;;  %v2126_v44 = vunpack.c.h.bf16 %v158_v34  ;;  %v150_v46 = vld [vmem:[%s9221_s0 + $0x18] sm:$0xff]  ;;  %v5379_v49 = vld [vmem:[%s9220_s1 + $0x20] sm:$0xff] }
   0x9   :  { %1743 = vmatpush.bf16.msra.mxu3 %v5405_v7  ;;  %v5404_v32 = vld [vmem:[%s9220_s1 + $0xe8] sm:$0xff]  ;;  %v2381_v42 = vadd.f32 %v2380_v30, %v2122_v19  ;;  %v2115_v45 = vunpack.c.l.bf16 %v153_v39  ;;  %v2384_v50 = vadd.f32 %v2124_v38, %v2123_v37  ;;  %v2116_v51 = vunpack.c.h.bf16 %v153_v39  ;;  %v5387_v52 = vld [vmem:[%s9220_s1 + $0x60] sm:$0xff]  ;;  %v161_v1 = vld [vmem:[%s9221_s0 + $0x70] sm:$0xff] }
   0xa   :  { %v2371_v47 = vadd.f32 %v2370_v35, %v2114_v23  ;;  %v2360_v48 = vadd.f32 %v2359_v36, %v2105_v26  ;;  %1237 = vmatpush.bf16.msra.mxu0 %v5380_v27  ;;  %v5395_v53 = vld [vmem:[%s9220_s1 + $0xa0] sm:$0xff]  ;;  %v2117_v55 = vunpack.c.l.bf16 %v154_v40  ;;  %v2118_v56 = vunpack.c.h.bf16 %v154_v40  ;;  %v5780_v0 = vld [vmem:[%s9221_s0 + $0x88] sm:$0xff]  ;;  %v5788_v5 = vld [vmem:[%s9221_s0 + $0x78] sm:$0xff] }
   0xb   :  { %1406 = vmatpush.bf16.msra.mxu1 %v5388_v28  ;;  %2382 = vadd.xlane.f32.xlu2 %v2381_v42  ;;  %v5403_v54 = vld [vmem:[%s9220_s1 + $0xe0] sm:$0xff]  ;;  %v2107_v57 = vunpack.c.l.bf16 %v149_v41  ;;  %v2108_v58 = vunpack.c.h.bf16 %v149_v41  ;;  %v2385_v60 = vadd.f32 %v2384_v50, %v2125_v43  ;;  %v2374_v61 = vadd.f32 %v2116_v51, %v2115_v45  ;;  %v5378_v10 = vld [vmem:[%s9220_s1 + $0x18] sm:$0xff]  ;;  %v160_v17 = vld [vmem:[%s9221_s0 + $0x68] sm:$0xff] }
   0xc   :  { %1575 = vmatpush.bf16.msra.mxu2 %v5396_v29  ;;  %2372 = vadd.xlane.f32.xlu1 %v2371_v47  ;;  %v2361_v59 = vadd.f32 %v2360_v48, %v2106_v31  ;;  %v2109_v62 = vunpack.c.l.bf16 %v150_v46  ;;  %v163_v63 = vld [vmem:[%s9221_s0 + $0x80] sm:$0xff]  ;;  %v2110_v9 = vunpack.c.h.bf16 %v150_v46  ;;  %v2137_v11 = vunpack.c.l.bf16 %v5780_v0  ;;  %v5386_v13 = vld [vmem:[%s9220_s1 + $0x58] sm:$0xff]  ;;  %v169_v22 = vld [vmem:[%s9221_s0 + $0xb0] sm:$0xff] }
   0xd   :  { %1744 = vmatpush.bf16.msra.mxu3 %v5404_v32  ;;  %v2364_v2 = vadd.f32 %v2108_v58, %v2107_v57  ;;  %v2135_v3 = vunpack.c.l.bf16 %v163_v63  ;;  %v2136_v4 = vunpack.c.h.bf16 %v163_v63  ;;  %v159_v6 = vld [vmem:[%s9221_s0 + $0x60] sm:$0xff]  ;;  %v2386_v7 = vadd.f32 %v2385_v60, %v2126_v44  ;;  %v5394_v19 = vld [vmem:[%s9220_s1 + $0x98] sm:$0xff]  ;;  %v5377_v28 = vld [vmem:[%s9220_s1 + $0x10] sm:$0xff] }
   0xe   :  { %2362 = vadd.xlane.f32.xlu0 %v2361_v59  ;;  %1238 = vmatpush.bf16.msra.mxu0 %v5379_v49  ;;  %v2375_v8 = vadd.f32 %v2374_v61, %v2117_v55  ;;  %v2131_v15 = vunpack.c.l.bf16 %v161_v1  ;;  %v2132_v16 = vunpack.c.h.bf16 %v161_v1  ;;  %v2133_v20 = vunpack.c.l.bf16 %v5788_v5  ;;  %v5402_v23 = vld [vmem:[%s9220_s1 + $0xd8] sm:$0xff]  ;;  %v167_v26 = vld [vmem:[%s9221_s0 + $0xa0] sm:$0xff]  ;;  %v5385_v31 = vld [vmem:[%s9220_s1 + $0x50] sm:$0xff] }
   0xf   :  { %1407 = vmatpush.bf16.msra.mxu1 %v5387_v52  ;;  %v2365_v12 = vadd.f32 %v2364_v2, %v2109_v62  ;;  %v2399_v14 = vadd.f32 %v2136_v4, %v2135_v3  ;;  %v2127_v21 = vunpack.c.l.bf16 %v159_v6  ;;  %v2128_v25 = vunpack.c.h.bf16 %v159_v6  ;;  %v165_v36 = vld [vmem:[%s9221_s0 + $0x90] sm:$0xff]  ;;  %v5833_v40 = vld [vmem:[%s9221_s0 + $0xb8] sm:$0xff]  ;;  %v5841_v44 = vld [vmem:[%s9221_s0 + $0xa8] sm:$0xff] }
  0x10   :  { %1576 = vmatpush.bf16.msra.mxu2 %v5395_v53  ;;  %v2376_v18 = vadd.f32 %v2375_v8, %v2118_v56  ;;  %v2394_v24 = vadd.f32 %v2132_v16, %v2131_v15  ;;  %v2138_v29 = vunpack.c.h.bf16 %v5780_v0  ;;  %v2129_v30 = vunpack.c.l.bf16 %v160_v17  ;;  %v5393_v37 = vld [vmem:[%s9220_s1 + $0x90] sm:$0xff]  ;;  %v5376_v47 = vld [vmem:[%s9220_s1 + $0x8] sm:$0xff]  ;;  %v175_v60 = vld [vmem:[%s9221_s0 + $0xe0] sm:$0xff] }
  0x11   :  { %1745 = vmatpush.bf16.msra.mxu3 %v5403_v54  ;;  %v2366_v27 = vadd.f32 %v2365_v12, %v2110_v9  ;;  %v2400_v32 = vadd.f32 %v2399_v14, %v2137_v11  ;;  %v2389_v33 = vadd.f32 %v2128_v25, %v2127_v21  ;;  %v2147_v34 = vunpack.c.l.bf16 %v169_v22  ;;  %v5401_v43 = vld [vmem:[%s9220_s1 + $0xd0] sm:$0xff]  ;;  %v5384_v51 = vld [vmem:[%s9220_s1 + $0x48] sm:$0xff]  ;;  %v5853_v54 = vld [vmem:[%s9221_s0 + $0x98] sm:$0xff] }
  0x12   :  { %1239 = vmatpush.bf16.msra.mxu0 %v5378_v10  ;;  %v2148_v35 = vunpack.c.h.bf16 %v169_v22  ;;  %v2134_v38 = vunpack.c.h.bf16 %v5788_v5  ;;  %v2395_v39 = vadd.f32 %v2394_v24, %v2133_v20  ;;  %v2143_v41 = vunpack.c.l.bf16 %v167_v26  ;;  %v5392_v56 = vld [vmem:[%s9220_s1 + $0x88] sm:$0xff]  ;;  %v5375_v61 = vld [vmem:[%s9220_s1] sm:$0xff]  ;;  %v173_v63 = vld [vmem:[%s9221_s0 + $0xd0] sm:$0xff] }
  0x13   :  { %2387 = vadd.xlane.f32.xlu2 %v2386_v7  ;;  %1408 = vmatpush.bf16.msra.mxu1 %v5386_v13  ;;  %v2144_v42 = vunpack.c.h.bf16 %v167_v26  ;;  %v2130_v45 = vunpack.c.h.bf16 %v160_v17  ;;  %v2390_v46 = vadd.f32 %v2389_v33, %v2129_v30  ;;  %v2139_v48 = vunpack.c.l.bf16 %v165_v36  ;;  %v5400_v57 = vld [vmem:[%s9220_s1 + $0xc8] sm:$0xff]  ;;  %v5383_v62 = vld [vmem:[%s9220_s1 + $0x40] sm:$0xff]  ;;  %v5249_v5 = vld [vmem:[%s9221_s0 + $0xc] sm:$0xf0] }
  0x14   :  { %2377 = vadd.xlane.f32.xlu1 %v2376_v18  ;;  %1577 = vmatpush.bf16.msra.mxu2 %v5394_v19  ;;  %v2140_v49 = vunpack.c.h.bf16 %v165_v36  ;;  %v2401_v50 = vadd.f32 %v2400_v32, %v2138_v29  ;;  %v2149_v52 = vunpack.c.l.bf16 %v5833_v40  ;;  %v2414_v53 = vadd.f32 %v2148_v35, %v2147_v34  ;;  %v5391_v1 = vld [vmem:[%s9220_s1 + $0x80] sm:$0xff]  ;;  %v4611_v10 = vld [vmem:[%s9221_s0 + $0x10] sm:$0xf0]  ;;  %v4617_v16 = vld [vmem:[%s9221_s0 + $0x8] sm:$0xf] }
  0x15   :  { %1746 = vmatpush.bf16.msra.mxu3 %v5402_v23  ;;  %v2396_v55 = vadd.f32 %v2395_v39, %v2134_v38  ;;  %v2145_v58 = vunpack.c.l.bf16 %v5841_v44  ;;  %v2409_v59 = vadd.f32 %v2144_v42, %v2143_v41  ;;  %v2391_v0 = vadd.f32 %v2390_v46, %v2130_v45  ;;  %v4609_v4 = vld [vmem:[%s9221_s0] sm:$0xf]  ;;  %v5247_v9 = vld [vmem:[%s9221_s0 + $0x4] sm:$0xf]  ;;  %v5250_v17 = vld [vmem:[%s9221_s0 + $0x14] sm:$0xf0] }
  0x16   :  { %2367 = vadd.xlane.f32.xlu0 %v2366_v27  ;;  %1240 = vmatpush.bf16.msra.mxu0 %v5377_v28  ;;  %v2141_v2 = vunpack.c.l.bf16 %v5853_v54  ;;  %v2404_v3 = vadd.f32 %v2140_v49, %v2139_v48  ;;  %v5399_v6 = vld [vmem:[%s9220_s1 + $0xc0] sm:$0xff]  ;;  %v2150_v7 = vunpack.c.h.bf16 %v5833_v40  ;;  %v2415_v8 = vadd.f32 %v2414_v53, %v2149_v52  ;;  %v176_v18 = vld [vmem:[%s9221_s0 + $0xe8] sm:$0xff]  ;;  %v4619_v24 = vld [vmem:[%s9221_s0 + $0x18] sm:$0xf0] }
  0x17   :  { %1409 = vmatpush.bf16.msra.mxu1 %v5385_v31  ;;  %v2159_v11 = vunpack.c.l.bf16 %v175_v60  ;;  %v2160_v12 = vunpack.c.h.bf16 %v175_v60  ;;  %v171_v13 = vld [vmem:[%s9221_s0 + $0xc0] sm:$0xff]  ;;  %v2146_v14 = vunpack.c.h.bf16 %v5841_v44  ;;  %v2410_v15 = vadd.f32 %v2409_v59, %v2145_v58  ;;  %v5248_v23 = vld [vmem:[%s9221_s0 + $0xc] sm:$0xf]  ;;  %v174_v25 = vld [vmem:[%s9221_s0 + $0xd8] sm:$0xff] }
  0x18   :  { %1578 = vmatpush.bf16.msra.mxu2 %v5393_v37  ;;  %v2155_v19 = vunpack.c.l.bf16 %v173_v63  ;;  %v2156_v20 = vunpack.c.h.bf16 %v173_v63  ;;  %v2142_v21 = vunpack.c.h.bf16 %v5853_v54  ;;  %v4610_v22 = vor.u32 %v5249_v5, %v4609_v4  ;;  %v172_v34 = vld [vmem:[%s9221_s0 + $0xc8] sm:$0xff]  ;;  %v181_v39 = vld [vmem:[%s9221_s0 + $0x110] sm:$0xff]  ;;  %v179_v40 = vld [vmem:[%s9221_s0 + $0x100] sm:$0xff] }
  0x19   :  { %1747 = vmatpush.bf16.msra.mxu3 %v5401_v43  ;;  %v2405_v26 = vadd.f32 %v2404_v3, %v2141_v2  ;;  %v4614_v27 = vor.u32 %v5247_v9, %v4611_v10  ;;  %v2151_v28 = vunpack.c.l.bf16 %v171_v13  ;;  %v2152_v29 = vunpack.c.h.bf16 %v171_v13  ;;  %v177_v48 = vld [vmem:[%s9221_s0 + $0xf0] sm:$0xff]  ;;  %v180_v54 = vld [vmem:[%s9221_s0 + $0x108] sm:$0xff]  ;;  %v187_v2 = vld [vmem:[%s9221_s0 + $0x140] sm:$0xff] }
  0x1a   :  { %1241 = vmatpush.bf16.msra.mxu0 %v5376_v47  ;;  %v2416_v30 = vadd.f32 %v2415_v8, %v2150_v7  ;;  %v4618_v31 = vor.u32 %v5250_v17, %v4617_v16  ;;  %v2161_v32 = vunpack.c.l.bf16 %v176_v18  ;;  %v2429_v33 = vadd.f32 %v2160_v12, %v2159_v11  ;;  %v185_v3 = vld [vmem:[%s9221_s0 + $0x130] sm:$0xff]  ;;  %v4625_v7 = vld [vmem:[%s9221_s0 + $0x20] sm:$0xf]  ;;  %v5251_v11 = vld [vmem:[%s9221_s0 + $0x24] sm:$0xf] }
  0x1b   :  { %2402 = vadd.xlane.f32.xlu2 %v2401_v50  ;;  %1410 = vmatpush.bf16.msra.mxu1 %v5384_v51  ;;  %v2411_v35 = vadd.f32 %v2410_v15, %v2146_v14  ;;  %v4622_v36 = vor.u32 %v5248_v23, %v4619_v24  ;;  %v2157_v37 = vunpack.c.l.bf16 %v174_v25  ;;  %v2424_v38 = vadd.f32 %v2156_v20, %v2155_v19  ;;  %v182_v51 = vld [vmem:[%s9221_s0 + $0x118] sm:$0xff]  ;;  %v5253_v8 = vld [vmem:[%s9221_s0 + $0x2c] sm:$0xf0]  ;;  %v4627_v12 = vld [vmem:[%s9221_s0 + $0x30] sm:$0xf0] }
  0x1c   :  { %2397 = vadd.xlane.f32.xlu1 %v2396_v55  ;;  %1579 = vmatpush.bf16.msra.mxu2 %v5392_v56  ;;  %v2406_v41 = vadd.f32 %v2405_v26, %v2142_v21  ;;  %v2153_v42 = vunpack.c.l.bf16 %v172_v34  ;;  %v2419_v43 = vadd.f32 %v2152_v29, %v2151_v28  ;;  %v2162_v44 = vunpack.c.h.bf16 %v176_v18  ;;  %v183_v15 = vld [vmem:[%s9221_s0 + $0x120] sm:$0xff]  ;;  %v4633_v18 = vld [vmem:[%s9221_s0 + $0x28] sm:$0xf]  ;;  %v5254_v19 = vld [vmem:[%s9221_s0 + $0x34] sm:$0xf0] }
  0x1d   :  { %1748 = vmatpush.bf16.msra.mxu3 %v5400_v57  ;;  %v2430_v45 = vadd.f32 %v2429_v33, %v2161_v32  ;;  %v2171_v46 = vunpack.c.l.bf16 %v181_v39  ;;  %v2172_v47 = vunpack.c.h.bf16 %v181_v39  ;;  %v2158_v49 = vunpack.c.h.bf16 %v174_v25  ;;  %v188_v20 = vld [vmem:[%s9221_s0 + $0x148] sm:$0xff]  ;;  %v4635_v26 = vld [vmem:[%s9221_s0 + $0x38] sm:$0xf0] }
  0x1e   :  { %2392 = vadd.xlane.f32.xlu0 %v2391_v0  ;;  %1242 = vmatpush.bf16.msra.mxu0 %v5375_v61  ;;  %v2425_v50 = vadd.f32 %v2424_v38, %v2157_v37  ;;  %v2167_v52 = vunpack.c.l.bf16 %v179_v40  ;;  %v2168_v53 = vunpack.c.h.bf16 %v179_v40  ;;  %v2154_v55 = vunpack.c.h.bf16 %v172_v34  ;;  %v5252_v25 = vld [vmem:[%s9221_s0 + $0x2c] sm:$0xf] }
  0x1f   :  { %1411 = vmatpush.bf16.msra.mxu1 %v5383_v62  ;;  %v2420_v56 = vadd.f32 %v2419_v43, %v2153_v42  ;;  %v2163_v57 = vunpack.c.l.bf16 %v177_v48  ;;  %v2164_v58 = vunpack.c.h.bf16 %v177_v48  ;;  %v2431_v59 = vadd.f32 %v2430_v45, %v2162_v44  ;;  %v178_v62 = vld [vmem:[%s9221_s0 + $0xf8] sm:$0xff]  ;;  %v191_v42 = vld [vmem:[%s9221_s0 + $0x160] sm:$0xff] }
  0x20   :  { %1580 = vmatpush.bf16.msra.mxu2 %v5391_v1  ;;  %v2173_v60 = vunpack.c.l.bf16 %v182_v51  ;;  %v2444_v61 = vadd.f32 %v2172_v47, %v2171_v46  ;;  %v2426_v63 = vadd.f32 %v2425_v50, %v2158_v49  ;;  %v2169_v0 = vunpack.c.l.bf16 %v180_v54  ;;  %v189_v50 = vld [vmem:[%s9221_s0 + $0x150] sm:$0xff] }
  0x21   :  { %1749 = vmatpush.bf16.msra.mxu3 %v5399_v6  ;;  %1243 = vmatmul.bf16.vlgmr.msra.gmra.mxu0 %v4610_v22  ;;  %v2439_v1 = vadd.f32 %v2168_v53, %v2167_v52  ;;  %v2421_v4 = vadd.f32 %v2420_v56, %v2154_v55  ;;  %v2165_v5 = vunpack.c.l.bf16 %v178_v62  ;;  %v2434_v6 = vadd.f32 %v2164_v58, %v2163_v57  ;;  %v194_v53 = vld [vmem:[%s9221_s0 + $0x178] sm:$0xff]  ;;  %v192_v56 = vld [vmem:[%s9221_s0 + $0x168] sm:$0xff] }
  0x22   :  { %1412 = vmatmul.bf16.vlgmr.msra.gmra.mxu1 %v4614_v27  ;;  %v2174_v9 = vunpack.c.h.bf16 %v182_v51  ;;  %v2445_v10 = vadd.f32 %v2444_v61, %v2173_v60  ;;  %v2183_v13 = vunpack.c.l.bf16 %v187_v2  ;;  %v2184_v14 = vunpack.c.h.bf16 %v187_v2  ;;  %v186_v27 = vld [vmem:[%s9221_s0 + $0x138] sm:$0xff] }
  0x23   :  { %2417 = vadd.xlane.f32.xlu2 %v2416_v30  ;;  %1581 = vmatmul.bf16.vlgmr.msra.gmra.mxu2 %v4618_v31  ;;  %v2170_v16 = vunpack.c.h.bf16 %v180_v54  ;;  %v2440_v17 = vadd.f32 %v2439_v1, %v2169_v0  ;;  %v2179_v21 = vunpack.c.l.bf16 %v185_v3  ;;  %v2180_v22 = vunpack.c.h.bf16 %v185_v3  ;;  %v190_v0 = vld [vmem:[%s9221_s0 + $0x158] sm:$0xff] }
  0x24   :  { %2412 = vadd.xlane.f32.xlu1 %v2411_v35  ;;  %1750 = vmatmul.bf16.vlgmr.msra.gmra.mxu3 %v4622_v36  ;;  %v2166_v23 = vunpack.c.h.bf16 %v178_v62  ;;  %v4626_v24 = vor.u32 %v5253_v8, %v4625_v7  ;;  %v2435_v28 = vadd.f32 %v2434_v6, %v2165_v5  ;;  %v4630_v29 = vor.u32 %v5251_v11, %v4627_v12  ;;  %v184_v36 = vld [vmem:[%s9221_s0 + $0x128] sm:$0xff]  ;;  %v197_v5 = vld [vmem:[%s9221_s0 + $0x190] sm:$0xff] }
  0x25   :  { %v2175_v30 = vunpack.c.l.bf16 %v183_v15  ;;  %v2176_v31 = vunpack.c.h.bf16 %v183_v15  ;;  %v2446_v32 = vadd.f32 %v2445_v10, %v2174_v9  ;;  %v4634_v33 = vor.u32 %v5254_v19, %v4633_v18  ;;  %v4641_v9 = vld [vmem:[%s9221_s0 + $0x40] sm:$0xf]  ;;  %v5257_v10 = vld [vmem:[%s9221_s0 + $0x4c] sm:$0xf0] }
  0x26   :  { %2407 = vadd.xlane.f32.xlu0 %v2406_v41  ;;  %v2185_v34 = vunpack.c.l.bf16 %v188_v20  ;;  %v2459_v35 = vadd.f32 %v2184_v14, %v2183_v13  ;;  %v2441_v37 = vadd.f32 %v2440_v17, %v2170_v16  ;;  %v4638_v38 = vor.u32 %v5252_v25, %v4635_v26  ;;  %v193_v41 = vld [vmem:[%s9221_s0 + $0x170] sm:$0xff]  ;;  %v5255_v13 = vld [vmem:[%s9221_s0 + $0x44] sm:$0xf] }
  0x27   :  { %v2181_v39 = vunpack.c.l.bf16 %v186_v27  ;;  %v2454_v40 = vadd.f32 %v2180_v22, %v2179_v21  ;;  %v2436_v43 = vadd.f32 %v2435_v28, %v2166_v23  ;;  %v2177_v44 = vunpack.c.l.bf16 %v184_v36  ;;  %v4643_v14 = vld [vmem:[%s9221_s0 + $0x50] sm:$0xf0]  ;;  %v195_v17 = vld [vmem:[%s9221_s0 + $0x180] sm:$0xff]  ;;  %v5258_v21 = vld [vmem:[%s9221_s0 + $0x54] sm:$0xf0] }
  0x28   :  { %v2449_v45 = vadd.f32 %v2176_v31, %v2175_v30  ;;  %v2186_v46 = vunpack.c.h.bf16 %v188_v20  ;;  %v2460_v47 = vadd.f32 %v2459_v35, %v2185_v34  ;;  %v2195_v48 = vunpack.c.l.bf16 %v193_v41  ;;  %v4649_v20 = vld [vmem:[%s9221_s0 + $0x48] sm:$0xf]  ;;  %v4651_v28 = vld [vmem:[%s9221_s0 + $0x58] sm:$0xf0] }
  0x29   :  { %v2196_v49 = vunpack.c.h.bf16 %v193_v41  ;;  %v2182_v51 = vunpack.c.h.bf16 %v186_v27  ;;  %v2455_v52 = vadd.f32 %v2454_v40, %v2181_v39  ;;  %v2191_v54 = vunpack.c.l.bf16 %v191_v42  ;;  %v200_v22 = vld [vmem:[%s9221_s0 + $0x1a8] sm:$0xff] }
  0x2a   :  { %v2192_v55 = vunpack.c.h.bf16 %v191_v42  ;;  %v2178_v57 = vunpack.c.h.bf16 %v184_v36  ;;  %v2450_v58 = vadd.f32 %v2449_v45, %v2177_v44  ;;  %v2188_v60 = vunpack.c.h.bf16 %v189_v50  ;;  %v5256_v27 = vld [vmem:[%s9221_s0 + $0x4c] sm:$0xf]  ;;  %v203_v44 = vld [vmem:[%s9221_s0 + $0x1c0] sm:$0xff] }
  0x2b   :  { %2432 = vadd.xlane.f32.xlu2 %v2431_v59  ;;  %v2187_v59 = vunpack.c.l.bf16 %v189_v50  ;;  %v2461_v61 = vadd.f32 %v2460_v47, %v2186_v46  ;;  %v2197_v62 = vunpack.c.l.bf16 %v194_v53  ;;  %v2456_v1 = vadd.f32 %v2455_v52, %v2182_v51  ;;  %v201_v52 = vld [vmem:[%s9221_s0 + $0x1b0] sm:$0xff] }
  0x2c   :  { %2427 = vadd.xlane.f32.xlu1 %v2426_v63  ;;  %v2474_v63 = vadd.f32 %v2196_v49, %v2195_v48  ;;  %v2193_v2 = vunpack.c.l.bf16 %v192_v56  ;;  %v2469_v3 = vadd.f32 %v2192_v55, %v2191_v54  ;;  %v2451_v6 = vadd.f32 %v2450_v58, %v2178_v57  ;;  %v206_v55 = vld [vmem:[%s9221_s0 + $0x1d8] sm:$0xff]  ;;  %v204_v58 = vld [vmem:[%s9221_s0 + $0x1c8] sm:$0xff] }
  0x2d   :  { %v2189_v7 = vunpack.c.l.bf16 %v190_v0  ;;  %v2464_v8 = vadd.f32 %v2188_v60, %v2187_v59  ;;  %v2198_v11 = vunpack.c.h.bf16 %v194_v53  ;;  %v2194_v18 = vunpack.c.h.bf16 %v192_v56 }
  0x2e   :  { %2422 = vadd.xlane.f32.xlu0 %v2421_v4  ;;  %v199_v4 = vld [vmem:[%s9221_s0 + $0x1a0] sm:$0xff]  ;;  %v2475_v12 = vadd.f32 %v2474_v63, %v2197_v62  ;;  %v2470_v19 = vadd.f32 %v2469_v3, %v2193_v2  ;;  %v2203_v23 = vunpack.c.l.bf16 %v197_v5  ;;  %v2190_v25 = vunpack.c.h.bf16 %v190_v0  ;;  %v202_v2 = vld [vmem:[%s9221_s0 + $0x1b8] sm:$0xff] }
  0x2f   :  { %v2207_v15 = vunpack.c.l.bf16 %v199_v4  ;;  %v2208_v16 = vunpack.c.h.bf16 %v199_v4  ;;  %v4642_v26 = vor.u32 %v5257_v10, %v4641_v9  ;;  %v2465_v30 = vadd.f32 %v2464_v8, %v2189_v7  ;;  %v209_v7 = vld [vmem:[%s9221_s0 + $0x1f0] sm:$0xff] }
  0x30   :  { %v4646_v31 = vor.u32 %v5255_v13, %v4643_v14  ;;  %v2476_v34 = vadd.f32 %v2475_v12, %v2198_v11  ;;  %v4650_v35 = vor.u32 %v5258_v21, %v4649_v20  ;;  %v2209_v36 = vunpack.c.l.bf16 %v200_v22  ;;  %v4657_v11 = vld [vmem:[%s9221_s0 + $0x60] sm:$0xf]  ;;  %v5261_v12 = vld [vmem:[%s9221_s0 + $0x6c] sm:$0xf0] }
  0x31   :  { %1248 = vmatmul.bf16.gmra.mxu0 %v4626_v24  ;;  %v2204_v24 = vunpack.c.h.bf16 %v197_v5  ;;  %v2471_v39 = vadd.f32 %v2470_v19, %v2194_v18  ;;  %v4654_v40 = vor.u32 %v5256_v27, %v4651_v28  ;;  %v2466_v45 = vadd.f32 %v2465_v30, %v2190_v25  ;;  %v207_v19 = vld [vmem:[%s9221_s0 + $0x1e0] sm:$0xff]  ;;  %v4667_v30 = vld [vmem:[%s9221_s0 + $0x78] sm:$0xf0] }
  0x32   :  { %1417 = vmatmul.bf16.gmra.mxu1 %v4630_v29  ;;  %v198_v29 = vld [vmem:[%s9221_s0 + $0x198] sm:$0xff]  ;;  %v2210_v48 = vunpack.c.h.bf16 %v200_v22  ;;  %v2215_v56 = vunpack.c.l.bf16 %v203_v44  ;;  %v2216_v57 = vunpack.c.h.bf16 %v203_v44  ;;  %v2212_v62 = vunpack.c.h.bf16 %v201_v52  ;;  %v4665_v22 = vld [vmem:[%s9221_s0 + $0x68] sm:$0xf] }
  0x33   :  { %2447 = vadd.xlane.f32.xlu2 %v2446_v32  ;;  %1586 = vmatmul.bf16.gmra.mxu2 %v4634_v33  ;;  %v2199_v32 = vunpack.c.l.bf16 %v195_v17  ;;  %v2200_v33 = vunpack.c.h.bf16 %v195_v17  ;;  %v2205_v41 = vunpack.c.l.bf16 %v198_v29  ;;  %v2484_v42 = vadd.f32 %v2204_v24, %v2203_v23  ;;  %v5262_v23 = vld [vmem:[%s9221_s0 + $0x74] sm:$0xf0]  ;;  %v212_v24 = vld [vmem:[%s9221_s0 + $0x208] sm:$0xff] }
  0x34   :  { %2442 = vadd.xlane.f32.xlu1 %v2441_v37  ;;  %1755 = vmatmul.bf16.gmra.mxu3 %v4638_v38  ;;  %v2489_v37 = vadd.f32 %v2208_v16, %v2207_v15  ;;  %v196_v38 = vld [vmem:[%s9221_s0 + $0x188] sm:$0xff]  ;;  %v2206_v53 = vunpack.c.h.bf16 %v198_v29  ;;  %v2221_v0 = vunpack.c.l.bf16 %v206_v55  ;;  %v2217_v4 = vunpack.c.l.bf16 %v204_v58  ;;  %v5259_v15 = vld [vmem:[%s9221_s0 + $0x64] sm:$0xf]  ;;  %v4659_v16 = vld [vmem:[%s9221_s0 + $0x70] sm:$0xf0] }
  0x35   :  { %v2201_v46 = vunpack.c.l.bf16 %v196_v38  ;;  %v2479_v47 = vadd.f32 %v2200_v33, %v2199_v32  ;;  %v2485_v54 = vadd.f32 %v2484_v42, %v2205_v41  ;;  %v2202_v59 = vunpack.c.h.bf16 %v196_v38  ;;  %v5260_v29 = vld [vmem:[%s9221_s0 + $0x6c] sm:$0xf] }
  0x36   :  { %2437 = vadd.xlane.f32.xlu0 %v2436_v43  ;;  %v205_v43 = vld [vmem:[%s9221_s0 + $0x1d0] sm:$0xff]  ;;  %v2490_v49 = vadd.f32 %v2489_v37, %v2209_v36  ;;  %v2499_v5 = vadd.f32 %v2216_v57, %v2215_v56  ;;  %v2213_v9 = vunpack.c.l.bf16 %v202_v2  ;;  %v2222_v13 = vunpack.c.h.bf16 %v206_v55  ;;  %v218_v57 = vld [vmem:[%s9221_s0 + $0x238] sm:$0xff] }
  0x37   :  { %v2219_v50 = vunpack.c.l.bf16 %v205_v43  ;;  %v2220_v51 = vunpack.c.h.bf16 %v205_v43  ;;  %v2480_v60 = vadd.f32 %v2479_v47, %v2201_v46  ;;  %v2486_v3 = vadd.f32 %v2485_v54, %v2206_v53  ;;  %v215_v46 = vld [vmem:[%s9221_s0 + $0x220] sm:$0xff] }
  0x38   :  { %v2491_v63 = vadd.f32 %v2490_v49, %v2210_v48  ;;  %v2218_v20 = vunpack.c.h.bf16 %v204_v58  ;;  %v2500_v21 = vadd.f32 %v2499_v5, %v2217_v4  ;;  %v2227_v25 = vunpack.c.l.bf16 %v209_v7 }
  0x39   :  { %v2481_v8 = vadd.f32 %v2480_v60, %v2202_v59  ;;  %v2214_v27 = vunpack.c.h.bf16 %v202_v2  ;;  %v4658_v28 = vor.u32 %v5261_v12, %v4657_v11  ;;  %v4662_v33 = vor.u32 %v5259_v15, %v4659_v16  ;;  %v216_v60 = vld [vmem:[%s9221_s0 + $0x228] sm:$0xff]  ;;  %v4673_v11 = vld [vmem:[%s9221_s0 + $0x80] sm:$0xf]  ;;  %v221_v12 = vld [vmem:[%s9221_s0 + $0x250] sm:$0xff] }
  0x3a   :  { %v4666_v37 = vor.u32 %v5262_v23, %v4665_v22  ;;  %v2233_v38 = vunpack.c.l.bf16 %v212_v24  ;;  %v2501_v41 = vadd.f32 %v2500_v21, %v2218_v20  ;;  %v4670_v42 = vor.u32 %v5260_v29, %v4667_v30  ;;  %v5263_v15 = vld [vmem:[%s9221_s0 + $0x84] sm:$0xf]  ;;  %v4675_v16 = vld [vmem:[%s9221_s0 + $0x90] sm:$0xf0] }
  0x3b   :  { %2462 = vadd.xlane.f32.xlu2 %v2461_v61  ;;  %v2211_v61 = vunpack.c.l.bf16 %v201_v52  ;;  %v2239_v58 = vunpack.c.l.bf16 %v215_v46  ;;  %v2240_v59 = vunpack.c.h.bf16 %v215_v46  ;;  %v219_v21 = vld [vmem:[%s9221_s0 + $0x240] sm:$0xff]  ;;  %v2242_v22 = vunpack.c.h.bf16 %v216_v60 }
  0x3c   :  { %2457 = vadd.xlane.f32.xlu1 %v2456_v1  ;;  %v2504_v1 = vadd.f32 %v2220_v51, %v2219_v50  ;;  %v213_v50 = vld [vmem:[%s9221_s0 + $0x210] sm:$0xff]  ;;  %v2234_v51 = vunpack.c.h.bf16 %v212_v24  ;;  %v4681_v24 = vld [vmem:[%s9221_s0 + $0x88] sm:$0xf] }
  0x3d   :  { %v2494_v10 = vadd.f32 %v2212_v62, %v2211_v61  ;;  %v2235_v61 = vunpack.c.l.bf16 %v213_v50  ;;  %v2236_v62 = vunpack.c.h.bf16 %v213_v50 }
  0x3e   :  { %2452 = vadd.xlane.f32.xlu0 %v2451_v6  ;;  %v211_v6 = vld [vmem:[%s9221_s0 + $0x200] sm:$0xff]  ;;  %v2505_v14 = vadd.f32 %v2504_v1, %v2221_v0  ;;  %v214_v1 = vld [vmem:[%s9221_s0 + $0x218] sm:$0xff] }
  0x3f   :  { %v2231_v17 = vunpack.c.l.bf16 %v211_v6  ;;  %v2232_v18 = vunpack.c.h.bf16 %v211_v6  ;;  %v2495_v32 = vadd.f32 %v2494_v10, %v2213_v9  ;;  %v2241_v6 = vunpack.c.l.bf16 %v216_v60  ;;  %v230_v60 = vld [vmem:[%s9221_s0 + $0x298] sm:$0xff] }
  0x40   :  { %v2506_v36 = vadd.f32 %v2505_v14, %v2222_v13  ;;  %v2237_v9 = vunpack.c.l.bf16 %v214_v1  ;;  %v2524_v10 = vadd.f32 %v2236_v62, %v2235_v61  ;;  %v5265_v14 = vld [vmem:[%s9221_s0 + $0x8c] sm:$0xf0]  ;;  %v2238_v29 = vunpack.c.h.bf16 %v214_v1 }
  0x41   :  { %1253 = vmatmul.bf16.gmra.mxu0 %v4642_v26  ;;  %v2228_v26 = vunpack.c.h.bf16 %v209_v7  ;;  %v2496_v47 = vadd.f32 %v2495_v32, %v2214_v27  ;;  %v2529_v7 = vadd.f32 %v2240_v59, %v2239_v58  ;;  %v2251_v27 = vunpack.c.l.bf16 %v221_v12 }
  0x42   :  { %1422 = vmatmul.bf16.gmra.mxu1 %v4646_v31  ;;  %v210_v31 = vld [vmem:[%s9221_s0 + $0x1f8] sm:$0xff]  ;;  %v2525_v30 = vadd.f32 %v2524_v10, %v2237_v9  ;;  %v4678_v32 = vor.u32 %v5263_v15, %v4675_v16  ;;  %v4689_v16 = vld [vmem:[%s9221_s0 + $0xa0] sm:$0xf] }
  0x43   :  { %2477 = vadd.xlane.f32.xlu2 %v2476_v34  ;;  %1591 = vmatmul.bf16.gmra.mxu2 %v4650_v35  ;;  %v2223_v34 = vunpack.c.l.bf16 %v207_v19  ;;  %v2224_v35 = vunpack.c.h.bf16 %v207_v19  ;;  %v2229_v43 = vunpack.c.l.bf16 %v210_v31  ;;  %v2514_v44 = vadd.f32 %v2228_v26, %v2227_v25  ;;  %v5266_v25 = vld [vmem:[%s9221_s0 + $0x94] sm:$0xf0]  ;;  %v224_v26 = vld [vmem:[%s9221_s0 + $0x268] sm:$0xff] }
  0x44   :  { %2472 = vadd.xlane.f32.xlu1 %v2471_v39  ;;  %1760 = vmatmul.bf16.gmra.mxu3 %v4654_v40  ;;  %v2519_v39 = vadd.f32 %v2232_v18, %v2231_v17  ;;  %v208_v40 = vld [vmem:[%s9221_s0 + $0x1e8] sm:$0xff]  ;;  %v2230_v55 = vunpack.c.h.bf16 %v210_v31  ;;  %v2246_v17 = vunpack.c.h.bf16 %v218_v57  ;;  %v2530_v23 = vadd.f32 %v2529_v7, %v2241_v6 }
  0x45   :  { %v2225_v48 = vunpack.c.l.bf16 %v208_v40  ;;  %v2509_v49 = vadd.f32 %v2224_v35, %v2223_v34  ;;  %v2515_v56 = vadd.f32 %v2514_v44, %v2229_v43  ;;  %v4674_v31 = vor.u32 %v5265_v14, %v4673_v11  ;;  %v4683_v34 = vld [vmem:[%s9221_s0 + $0x98] sm:$0xf0]  ;;  %v235_v11 = vld [vmem:[%s9221_s0 + $0x2c0] sm:$0xff]  ;;  %v233_v14 = vld [vmem:[%s9221_s0 + $0x2b0] sm:$0xff] }
  0x46   :  { %2467 = vadd.xlane.f32.xlu0 %v2466_v45  ;;  %v217_v45 = vld [vmem:[%s9221_s0 + $0x230] sm:$0xff]  ;;  %v2520_v52 = vadd.f32 %v2519_v39, %v2233_v38  ;;  %v222_v35 = vld [vmem:[%s9221_s0 + $0x258] sm:$0xff]  ;;  %v4682_v39 = vor.u32 %v5266_v25, %v4681_v24  ;;  %v5668_v43 = vmov 0.0   ;;  %v2531_v44 = vadd.f32 %v2530_v23, %v2242_v22  ;;  %v231_v24 = vld [vmem:[%s9221_s0 + $0x2a0] sm:$0xff] }
  0x47   :  { %v2243_v53 = vunpack.c.l.bf16 %v217_v45  ;;  %v2244_v54 = vunpack.c.h.bf16 %v217_v45  ;;  %v2510_v0 = vadd.f32 %v2509_v49, %v2225_v48  ;;  %v2516_v5 = vadd.f32 %v2515_v56, %v2230_v55  ;;  %87 = vst.msk [vmem:[#allocation3 + $0x20] sm:$0xff] %vm82_vm0, %v5668_v43  ;;  %v229_v48 = vld [vmem:[%s9221_s0 + $0x290] sm:$0xff]  ;;  %v227_v49 = vld [vmem:[%s9221_s0 + $0x280] sm:$0xff] }
  0x48   :  { %v2521_v2 = vadd.f32 %v2520_v52, %v2234_v51  ;;  %v2253_v46 = vunpack.c.l.bf16 %v222_v35  ;;  %83 = vst.msk [vmem:[#allocation3] sm:$0xff] %vm82_vm0, %v5668_v43  ;;  %v2526_v50 = vadd.f32 %v2525_v30, %v2238_v29  ;;  %v2267_v56 = vunpack.c.l.bf16 %v229_v48  ;;  %v6238_v29 = vld [vmem:[%s9221_s0 + $0x2c8] sm:$0xff] }
  0x49   :  { %v2534_v4 = vadd.f32 %v2244_v54, %v2243_v53  ;;  %84 = vst.msk [vmem:[#allocation3 + $0x8] sm:$0xff] %vm82_vm0, %v5668_v43  ;;  %v225_v53 = vld [vmem:[%s9221_s0 + $0x270] sm:$0xff]  ;;  %v2258_v54 = vunpack.c.h.bf16 %v224_v26  ;;  %v2254_v58 = vunpack.c.h.bf16 %v222_v35  ;;  %v2263_v61 = vunpack.c.l.bf16 %v227_v49  ;;  %v5268_v35 = vld [vmem:[%s9221_s0 + $0xac] sm:$0xf] }
  0x4a   :  { %85 = vst.msk [vmem:[#allocation3 + $0x10] sm:$0xff] %vm82_vm0, %v5668_v43  ;;  %v2264_v62 = vunpack.c.h.bf16 %v227_v49  ;;  %v2260_v1 = vunpack.c.h.bf16 %v225_v53  ;;  %v2269_v6 = vunpack.c.l.bf16 %v230_v60  ;;  %v2279_v22 = vunpack.c.l.bf16 %v235_v11 }
  0x4b   :  { %2492 = vadd.xlane.f32.xlu2 %v2491_v63  ;;  %v2226_v63 = vunpack.c.h.bf16 %v208_v40  ;;  %v2257_v40 = vunpack.c.l.bf16 %v224_v26  ;;  %86 = vst.msk [vmem:[#allocation3 + $0x18] sm:$0xff] %vm82_vm0, %v5668_v43  ;;  %v2280_v23 = vunpack.c.h.bf16 %v235_v11  ;;  %v2275_v30 = vunpack.c.l.bf16 %v233_v14 }
  0x4c   :  { %2487 = vadd.xlane.f32.xlu1 %v2486_v3  ;;  %v2245_v3 = vunpack.c.l.bf16 %v218_v57  ;;  %v2268_v57 = vunpack.c.h.bf16 %v229_v48  ;;  %88 = vst.msk [vmem:[#allocation3 + $0x28] sm:$0xff] %vm82_vm0, %v5668_v43  ;;  %v2559_v10 = vadd.f32 %v2264_v62, %v2263_v61  ;;  %v6282_v61 = vld [vmem:[%s9221_s0 + $0x2f8] sm:$0xff] }
  0x4d   :  { %v2511_v13 = vadd.f32 %v2510_v0, %v2226_v63  ;;  %v6187_v63 = vld [vmem:[%s9221_s0 + $0x288] sm:$0xff]  ;;  %v2259_v0 = vunpack.c.l.bf16 %v225_v53  ;;  %89 = vst.msk [vmem:[#allocation3 + $0x30] sm:$0xff] %vm82_vm0, %v5668_v43  ;;  %v239_v53 = vld [vmem:[%s9221_s0 + $0x2e0] sm:$0xff] }
  0x4e   :  { %2482 = vadd.xlane.f32.xlu0 %v2481_v8  ;;  %v223_v8 = vld [vmem:[%s9221_s0 + $0x260] sm:$0xff]  ;;  %v2535_v18 = vadd.f32 %v2534_v4, %v2245_v3  ;;  %v226_v4 = vld [vmem:[%s9221_s0 + $0x278] sm:$0xff]  ;;  %90 = vst.msk [vmem:[#allocation3 + $0x38] sm:$0xff] %vm82_vm0, %v5668_v43  ;;  %v2564_v7 = vadd.f32 %v2268_v57, %v2267_v56  ;;  %v2265_v9 = vunpack.c.l.bf16 %v6187_v63  ;;  %v2266_v25 = vunpack.c.h.bf16 %v6187_v63 }
  0x4f   :  { %v2255_v19 = vunpack.c.l.bf16 %v223_v8  ;;  %v2256_v20 = vunpack.c.h.bf16 %v223_v8  ;;  %91 = vst.msk [vmem:[#allocation3 + $0x40] sm:$0xff] %vm82_vm0, %v5668_v43 }
  0x50   :  { %v2536_v38 = vadd.f32 %v2535_v18, %v2246_v17  ;;  %92 = vst.msk [vmem:[#allocation3 + $0x48] sm:$0xff] %vm82_vm0, %v5668_v43  ;;  %v5269_v17 = vld [vmem:[%s9221_s0 + $0xac] sm:$0xf0]  ;;  %v2270_v18 = vunpack.c.h.bf16 %v230_v60  ;;  %v2560_v26 = vadd.f32 %v2559_v10, %v2265_v9  ;;  %v6299_v9 = vld [vmem:[%s9221_s0 + $0x2d8] sm:$0xff] }
  0x51   :  { %1258 = vmatmul.bf16.gmra.mxu0 %v4658_v28  ;;  %v2252_v28 = vunpack.c.h.bf16 %v221_v12  ;;  %v2261_v12 = vunpack.c.l.bf16 %v226_v4  ;;  %93 = vst.msk [vmem:[#allocation3 + $0x50] sm:$0xff] %vm82_vm0, %v5668_v43 }
  0x52   :  { %1427 = vmatmul.bf16.gmra.mxu1 %v4662_v33  ;;  %v5264_v33 = vld [vmem:[%s9221_s0 + $0x8c] sm:$0xf]  ;;  %94 = vst.msk [vmem:[#allocation3 + $0x58] sm:$0xff] %vm82_vm0, %v5668_v43  ;;  %v2561_v48 = vadd.f32 %v2560_v26, %v2266_v25  ;;  %v4713_v25 = vld [vmem:[%s9221_s0 + $0xc8] sm:$0xf] }
  0x53   :  { %2507 = vadd.xlane.f32.xlu2 %v2506_v36  ;;  %1596 = vmatmul.bf16.gmra.mxu2 %v4666_v37  ;;  %v2247_v36 = vunpack.c.l.bf16 %v219_v21  ;;  %v2248_v37 = vunpack.c.h.bf16 %v219_v21  ;;  %v4686_v45 = vor.u32 %v5264_v33, %v4683_v34  ;;  %v4691_v21 = vld [vmem:[%s9221_s0 + $0xb0] sm:$0xf0]  ;;  %95 = vst.msk [vmem:[#allocation3 + $0x60] sm:$0xff] %vm82_vm0, %v5668_v43  ;;  %v4690_v34 = vor.u32 %v5269_v17, %v4689_v16  ;;  %v4705_v17 = vld [vmem:[%s9221_s0 + $0xc0] sm:$0xf] }
  0x54   :  { %2502 = vadd.xlane.f32.xlu1 %v2501_v41  ;;  %1765 = vmatmul.bf16.gmra.mxu3 %v4670_v42  ;;  %v2549_v41 = vadd.f32 %v2256_v20, %v2255_v19  ;;  %v220_v42 = vld [vmem:[%s9221_s0 + $0x248] sm:$0xff]  ;;  %v2565_v19 = vadd.f32 %v2564_v7, %v2269_v6  ;;  %v5267_v20 = vld [vmem:[%s9221_s0 + $0xa4] sm:$0xf]  ;;  %96 = vst.msk [vmem:[#allocation3 + $0x68] sm:$0xff] %vm82_vm0, %v5668_v43  ;;  %v2293_v7 = vunpack.c.l.bf16 %v6282_v61 }
  0x55   :  { %v2249_v51 = vunpack.c.l.bf16 %v220_v42  ;;  %v2539_v52 = vadd.f32 %v2248_v37, %v2247_v36  ;;  %v4699_v36 = vld [vmem:[%s9221_s0 + $0xb8] sm:$0xf0]  ;;  %97 = vst.msk [vmem:[#allocation3 + $0x70] sm:$0xff] %vm82_vm0, %v5668_v43 }
  0x56   :  { %2497 = vadd.xlane.f32.xlu0 %v2496_v47  ;;  %v2544_v47 = vadd.f32 %v2252_v28, %v2251_v27  ;;  %v2550_v55 = vadd.f32 %v2549_v41, %v2257_v40  ;;  %v4697_v27 = vld [vmem:[%s9221_s0 + $0xa8] sm:$0xf]  ;;  %v5270_v28 = vld [vmem:[%s9221_s0 + $0xb4] sm:$0xf0]  ;;  %v2272_v40 = vunpack.c.h.bf16 %v231_v24  ;;  %98 = vst.msk [vmem:[#allocation3 + $0x78] sm:$0xff] %vm82_vm0, %v5668_v43  ;;  %v2566_v41 = vadd.f32 %v2565_v19, %v2270_v18  ;;  %v245_v18 = vld [vmem:[%s9221_s0 + $0x310] sm:$0xff] }
  0x57   :  { %v2540_v3 = vadd.f32 %v2539_v52, %v2249_v51  ;;  %v234_v37 = vld [vmem:[%s9221_s0 + $0x2b8] sm:$0xff]  ;;  %99 = vst.msk [vmem:[#allocation3 + $0x80] sm:$0xff] %vm82_vm0, %v5668_v43  ;;  %v4702_v49 = vor.u32 %v5268_v35, %v4699_v36  ;;  %v2300_v35 = vunpack.c.h.bf16 %v245_v18  ;;  %v2286_v36 = vunpack.c.h.bf16 %v6299_v9 }
  0x58   :  { %v2545_v59 = vadd.f32 %v2544_v47, %v2253_v46  ;;  %v232_v46 = vld [vmem:[%s9221_s0 + $0x2a8] sm:$0xff]  ;;  %v241_v47 = vld [vmem:[%s9221_s0 + $0x2f0] sm:$0xff]  ;;  %100 = vst.msk [vmem:[#allocation3 + $0x88] sm:$0xff] %vm82_vm0, %v5668_v43  ;;  %v2278_v62 = vunpack.c.h.bf16 %v234_v37 }
  0x59   :  { %101 = vst.msk [vmem:[#allocation3 + $0x90] sm:$0xff] %vm82_vm0, %v5668_v43  ;;  %v2291_v56 = vunpack.c.l.bf16 %v241_v47  ;;  %v2292_v57 = vunpack.c.h.bf16 %v241_v47 }
  0x5a   :  { %v2546_v8 = vadd.f32 %v2545_v59, %v2254_v58  ;;  %102 = vst.msk [vmem:[#allocation3 + $0x98] sm:$0xff] %vm82_vm0, %v5668_v43  ;;  %v237_v58 = vld [vmem:[%s9221_s0 + $0x2d0] sm:$0xff]  ;;  %v2282_v59 = vunpack.c.h.bf16 %v6238_v29 }
  0x5b   :  { %2522 = vadd.xlane.f32.xlu2 %v2521_v2  ;;  %v2250_v2 = vunpack.c.h.bf16 %v220_v42  ;;  %v4698_v42 = vor.u32 %v5270_v28, %v4697_v27  ;;  %103 = vst.msk [vmem:[#allocation3 + $0xa0] sm:$0xff] %vm82_vm0, %v5668_v43  ;;  %v243_v28 = vld [vmem:[%s9221_s0 + $0x300] sm:$0xff] }
  0x5c   :  { %2517 = vadd.xlane.f32.xlu1 %v2516_v5  ;;  %v2551_v5 = vadd.f32 %v2550_v55, %v2258_v54  ;;  %v2273_v54 = vunpack.c.l.bf16 %v232_v46  ;;  %104 = vst.msk [vmem:[#allocation3 + $0xa8] sm:$0xff] %vm82_vm0, %v5668_v43  ;;  %v2296_v47 = vunpack.c.h.bf16 %v243_v28 }
  0x5d   :  { %v2541_v15 = vadd.f32 %v2540_v3, %v2250_v2  ;;  %105 = vst.msk [vmem:[#allocation3 + $0xb0] sm:$0xff] %vm82_vm0, %v5668_v43  ;;  %v6291_v2 = vld [vmem:[%s9221_s0 + $0x2e8] sm:$0xff]  ;;  %v2283_v3 = vunpack.c.l.bf16 %v237_v58 }
  0x5e   :  { %2512 = vadd.xlane.f32.xlu0 %v2511_v13  ;;  %v2554_v13 = vadd.f32 %v2260_v1, %v2259_v0  ;;  %v2287_v0 = vunpack.c.l.bf16 %v239_v53  ;;  %v2288_v1 = vunpack.c.h.bf16 %v239_v53  ;;  %106 = vst.msk [vmem:[#allocation3 + $0xb8] sm:$0xff] %vm82_vm0, %v5668_v43 }
  0x5f   :  { %107 = vst.msk [vmem:[#allocation3 + $0xc0] sm:$0xff] %vm82_vm0, %v5668_v43 }
  0x60   :  { %v2555_v33 = vadd.f32 %v2554_v13, %v2261_v12  ;;  %108 = vst.msk [vmem:[#allocation3 + $0xc8] sm:$0xff] %vm82_vm0, %v5668_v43  ;;  %v2289_v12 = vunpack.c.l.bf16 %v6291_v2  ;;  %v2589_v13 = vadd.f32 %v2288_v1, %v2287_v0 }
  0x61   :  { %1263 = vmatmul.bf16.gmra.mxu0 %v4674_v31  ;;  %v2276_v31 = vunpack.c.h.bf16 %v233_v14  ;;  %v247_v14 = vld [vmem:[%s9221_s0 + $0x320] sm:$0xff]  ;;  %109 = vst.msk [vmem:[#allocation3 + $0xd0] sm:$0xff] %vm82_vm0, %v5668_v43 }
  0x62   :  { %1432 = vmatmul.bf16.gmra.mxu1 %v4678_v32  ;;  %v2262_v32 = vunpack.c.h.bf16 %v226_v4  ;;  %v2284_v4 = vunpack.c.h.bf16 %v237_v58  ;;  %110 = vst.msk [vmem:[#allocation3 + $0xd8] sm:$0xff] %vm82_vm0, %v5668_v43  ;;  %v2303_v26 = vunpack.c.l.bf16 %v247_v14  ;;  %v2304_v27 = vunpack.c.h.bf16 %v247_v14  ;;  %v253_v58 = vld [vmem:[%s9221_s0 + $0x350] sm:$0xff] }
  0x63   :  { %2537 = vadd.xlane.f32.xlu2 %v2536_v38  ;;  %1601 = vmatmul.bf16.gmra.mxu2 %v4682_v39  ;;  %v4694_v38 = vor.u32 %v5267_v20, %v4691_v21  ;;  %v2271_v39 = vunpack.c.l.bf16 %v231_v24  ;;  %v2574_v51 = vadd.f32 %v2276_v31, %v2275_v30  ;;  %v2294_v20 = vunpack.c.h.bf16 %v6282_v61  ;;  %111 = vst.msk [vmem:[#allocation3 + $0xe0] sm:$0xff] %vm82_vm0, %v5668_v43  ;;  %v4707_v24 = vld [vmem:[%s9221_s0 + $0xd0] sm:$0xf0] }
  0x64   :  { %2532 = vadd.xlane.f32.xlu1 %v2531_v44  ;;  %1770 = vmatmul.bf16.gmra.mxu3 %v4686_v45  ;;  %v2281_v44 = vunpack.c.l.bf16 %v6238_v29  ;;  %v2579_v45 = vadd.f32 %v2280_v23, %v2279_v22  ;;  %v2556_v52 = vadd.f32 %v2555_v33, %v2262_v32  ;;  %v2584_v16 = vadd.f32 %v2284_v4, %v2283_v3  ;;  %v5273_v22 = vld [vmem:[%s9221_s0 + $0xcc] sm:$0xf0]  ;;  %v5271_v23 = vld [vmem:[%s9221_s0 + $0xc4] sm:$0xf]  ;;  %v5274_v32 = vld [vmem:[%s9221_s0 + $0xd4] sm:$0xf0] }
  0x65   :  { %v2569_v55 = vadd.f32 %v2272_v40, %v2271_v39  ;;  %v2043_v29 = vld [vmem:[#allocation3 + $0x20] sm:$0xff]  ;;  %112 = vst.msk [vmem:[#allocation3 + $0xe8] sm:$0xff] %vm82_vm0, %v5668_v43  ;;  %v2290_v30 = vunpack.c.h.bf16 %v6291_v2  ;;  %v2590_v31 = vadd.f32 %v2589_v13, %v2289_v12  ;;  %v6347_v33 = vld [vmem:[%s9221_s0 + $0x328] sm:$0xff]  ;;  %v4715_v40 = vld [vmem:[%s9221_s0 + $0xd8] sm:$0xf0]  ;;  %v2315_v2 = vunpack.c.l.bf16 %v253_v58 }
  0x66   :  { %2527 = vadd.xlane.f32.xlu0 %v2526_v50  ;;  %v2277_v50 = vunpack.c.l.bf16 %v234_v37  ;;  %v2580_v60 = vadd.f32 %v2579_v45, %v2281_v44  ;;  %113 = vst.msk [vmem:[#allocation3 + $0xf0] sm:$0xff] %vm82_vm0, %v5668_v43  ;;  %v5272_v39 = vld [vmem:[%s9221_s0 + $0xcc] sm:$0xf]  ;;  %v4710_v45 = vor.u32 %v5271_v23, %v4707_v24  ;;  %v2306_v0 = vunpack.c.h.bf16 %v6347_v33  ;;  %v249_v4 = vld [vmem:[%s9221_s0 + $0x330] sm:$0xff]  ;;  %v259_v24 = vld [vmem:[%s9221_s0 + $0x380] sm:$0xff] }
  0x67   :  { %v2570_v6 = vadd.f32 %v2569_v55, %v2273_v54  ;;  %114 = vst.msk [vmem:[#allocation3 + $0xf8] sm:$0xff] %vm82_vm0, %v5668_v43  ;;  %v2591_v54 = vadd.f32 %v2590_v31, %v2290_v30  ;;  %v4718_v55 = vor.u32 %v5272_v39, %v4715_v40  ;;  %v2316_v3 = vunpack.c.h.bf16 %v253_v58  ;;  %v4721_v30 = vld [vmem:[%s9221_s0 + $0xe0] sm:$0xf]  ;;  %v5277_v31 = vld [vmem:[%s9221_s0 + $0xec] sm:$0xf0] }
  0x68   :  { %v2575_v63 = vadd.f32 %v2574_v51, %v2277_v50  ;;  %v2581_v10 = vadd.f32 %v2580_v60, %v2282_v59  ;;  %115 = vst.msk [vmem:[#allocation3 + $0x100] sm:$0xff] %vm82_vm0, %v5668_v43  ;;  %v2305_v50 = vunpack.c.l.bf16 %v6347_v33  ;;  %v2609_v51 = vadd.f32 %v2304_v27, %v2303_v26  ;;  %v251_v60 = vld [vmem:[%s9221_s0 + $0x340] sm:$0xff]  ;;  %v257_v26 = vld [vmem:[%s9221_s0 + $0x370] sm:$0xff] }
  0x69   :  { %116 = vst.msk [vmem:[#allocation3 + $0x108] sm:$0xff] %vm82_vm0, %v5668_v43  ;;  %v2307_v14 = vunpack.c.l.bf16 %v249_v4  ;;  %v265_v58 = vld [vmem:[%s9221_s0 + $0x3b0] sm:$0xff] }
  0x6a   :  { %v2576_v11 = vadd.f32 %v2575_v63, %v2278_v62  ;;  %117 = vst.msk [vmem:[#allocation3 + $0x110] sm:$0xff] %vm82_vm0, %v5668_v43  ;;  %v2610_v1 = vadd.f32 %v2609_v51, %v2305_v50  ;;  %v4731_v50 = vld [vmem:[%s9221_s0 + $0xf8] sm:$0xf0] }
  0x6b   :  { %2552 = vadd.xlane.f32.xlu2 %v2551_v5  ;;  %v2274_v5 = vunpack.c.h.bf16 %v232_v46  ;;  %v2295_v46 = vunpack.c.l.bf16 %v243_v28  ;;  %118 = vst.msk [vmem:[#allocation3 + $0x118] sm:$0xff] %vm82_vm0, %v5668_v43  ;;  %v6482_v51 = vld [vmem:[%s9221_s0 + $0x378] sm:$0xff] }
  0x6c   :  { %2547 = vadd.xlane.f32.xlu1 %v2546_v8  ;;  %v2594_v8 = vadd.f32 %v2292_v57, %v2291_v56  ;;  %119 = vst.msk [vmem:[#allocation3 + $0x120] sm:$0xff] %vm82_vm0, %v5668_v43 }
  0x6d   :  { %v2571_v19 = vadd.f32 %v2570_v6, %v2274_v5  ;;  %v2599_v63 = vadd.f32 %v2296_v47, %v2295_v46  ;;  %120 = vst.msk [vmem:[#allocation3 + $0x128] sm:$0xff] %vm82_vm0, %v5668_v43  ;;  %v2324_v46 = vunpack.c.h.bf16 %v257_v26 }
  0x6e   :  { %2542 = vadd.xlane.f32.xlu0 %v2541_v15  ;;  %v2285_v15 = vunpack.c.l.bf16 %v6299_v9  ;;  %v2595_v21 = vadd.f32 %v2594_v8, %v2293_v7  ;;  %v6399_v7 = vld [vmem:[%s9221_s0 + $0x358] sm:$0xff]  ;;  %v2311_v8 = vunpack.c.l.bf16 %v251_v60  ;;  %v2312_v9 = vunpack.c.h.bf16 %v251_v60  ;;  %121 = vst.msk [vmem:[#allocation3 + $0x130] sm:$0xff] %vm82_vm0, %v5668_v43  ;;  %v263_v60 = vld [vmem:[%s9221_s0 + $0x3a0] sm:$0xff] }
  0x6f   :  { %122 = vst.msk [vmem:[#allocation3 + $0x138] sm:$0xff] %vm82_vm0, %v5668_v43 }
  0x70   :  { %v2585_v37 = vadd.f32 %v2584_v16, %v2285_v15  ;;  %v2596_v44 = vadd.f32 %v2595_v21, %v2294_v20  ;;  %v2308_v15 = vunpack.c.h.bf16 %v249_v4  ;;  %v2611_v16 = vadd.f32 %v2610_v1, %v2306_v0  ;;  %123 = vst.msk [vmem:[#allocation3 + $0x140] sm:$0xff] %vm82_vm0, %v5668_v43  ;;  %v6500_v1 = vld [vmem:[%s9221_s0 + $0x368] sm:$0xff] }
  0x71   :  { %1268 = vmatmul.bf16.gmra.mxu0 %v4690_v34  ;;  %v2299_v34 = vunpack.c.l.bf16 %v245_v18  ;;  %v2624_v18 = vadd.f32 %v2316_v3, %v2315_v2  ;;  %v2619_v23 = vadd.f32 %v2312_v9, %v2311_v8  ;;  %124 = vst.msk [vmem:[#allocation3 + $0x148] sm:$0xff] %vm82_vm0, %v5668_v43  ;;  %v2339_v8 = vunpack.c.l.bf16 %v265_v58 }
  0x72   :  { %1437 = vmatmul.bf16.gmra.mxu1 %v4694_v38  ;;  %v4706_v38 = vor.u32 %v5273_v22, %v4705_v17  ;;  %v2586_v61 = vadd.f32 %v2585_v37, %v2286_v36  ;;  %v2317_v17 = vunpack.c.l.bf16 %v6399_v7  ;;  %125 = vst.msk [vmem:[#allocation3 + $0x150] sm:$0xff] %vm82_vm0, %v5668_v43  ;;  %v2327_v36 = vunpack.c.l.bf16 %v259_v24 }
  0x73   :  { %2567 = vadd.xlane.f32.xlu2 %v2566_v41  ;;  %1606 = vmatmul.bf16.gmra.mxu2 %v4698_v42  ;;  %v6361_v41 = vld [vmem:[%s9221_s0 + $0x318] sm:$0xff]  ;;  %v2604_v57 = vadd.f32 %v2300_v35, %v2299_v34  ;;  %126 = vst.msk [vmem:[#allocation3 + $0x158] sm:$0xff] %vm82_vm0, %v5668_v43  ;;  %v5275_v34 = vld [vmem:[%s9221_s0 + $0xe4] sm:$0xf]  ;;  %v4723_v35 = vld [vmem:[%s9221_s0 + $0xf0] sm:$0xf0]  ;;  %v2328_v37 = vunpack.c.h.bf16 %v259_v24  ;;  %v2340_v9 = vunpack.c.h.bf16 %v265_v58 }
  0x74   :  { %2562 = vadd.xlane.f32.xlu1 %v2561_v48  ;;  %1775 = vmatmul.bf16.gmra.mxu3 %v4702_v49  ;;  %v4714_v49 = vor.u32 %v5274_v32, %v4713_v25  ;;  %v2301_v56 = vunpack.c.l.bf16 %v6361_v41  ;;  %v2302_v5 = vunpack.c.h.bf16 %v6361_v41  ;;  %v2318_v32 = vunpack.c.h.bf16 %v6399_v7  ;;  %127 = vst.msk [vmem:[#allocation3 + $0x160] sm:$0xff] %vm82_vm0, %v5668_v43  ;;  %v4729_v41 = vld [vmem:[%s9221_s0 + $0xe8] sm:$0xf]  ;;  %v4739_v58 = vld [vmem:[%s9221_s0 + $0x110] sm:$0xf0] }
  0x75   :  { %v2625_v33 = vadd.f32 %v2624_v18, %v2317_v17  ;;  %128 = vst.msk [vmem:[#allocation3 + $0x168] sm:$0xff] %vm82_vm0, %v5668_v43  ;;  %v2639_v0 = vadd.f32 %v2328_v37, %v2327_v36  ;;  %v6520_v17 = vld [vmem:[%s9221_s0 + $0x3b8] sm:$0xff]  ;;  %v6525_v18 = vld [vmem:[%s9221_s0 + $0x3a8] sm:$0xff] }
  0x76   :  { %2557 = vadd.xlane.f32.xlu0 %v2556_v52  ;;  %v244_v52 = vld [vmem:[%s9221_s0 + $0x308] sm:$0xff]  ;;  %v2605_v6 = vadd.f32 %v2604_v57, %v2301_v56  ;;  %129 = vst.msk [vmem:[#allocation3 + $0x170] sm:$0xff] %vm82_vm0, %v5668_v43 }
  0x77   :  { %v2297_v62 = vunpack.c.l.bf16 %v244_v52  ;;  %v2298_v12 = vunpack.c.h.bf16 %v244_v52  ;;  %130 = vst.msk [vmem:[#allocation3 + $0x178] sm:$0xff] %vm82_vm0, %v5668_v43 }
  0x78   :  { %v2606_v21 = vadd.f32 %v2605_v6, %v2302_v5  ;;  %131 = vst.msk [vmem:[#allocation3 + $0x180] sm:$0xff] %vm82_vm0, %v5668_v43  ;;  %v2325_v5 = vunpack.c.l.bf16 %v6482_v51 }
  0x79   :  { %v2600_v13 = vadd.f32 %v2599_v63, %v2297_v62  ;;  %132 = vst.msk [vmem:[#allocation3 + $0x188] sm:$0xff] %vm82_vm0, %v5668_v43 }
  0x7a   :  { %133 = vst.msk [vmem:[#allocation3 + $0x190] sm:$0xff] %vm82_vm0, %v5668_v43 }
  0x7b   :  { %2582 = vadd.xlane.f32.xlu2 %v2581_v10  ;;  %v6406_v10 = vld [vmem:[%s9221_s0 + $0x348] sm:$0xff]  ;;  %v2601_v27 = vadd.f32 %v2600_v13, %v2298_v12  ;;  %v2336_v12 = vunpack.c.h.bf16 %v263_v60  ;;  %v261_v13 = vld [vmem:[%s9221_s0 + $0x390] sm:$0xff]  ;;  %134 = vst.msk [vmem:[#allocation3 + $0x198] sm:$0xff] %vm82_vm0, %v5668_v43 }
  0x7c   :  { %2577 = vadd.xlane.f32.xlu1 %v2576_v11  ;;  %v2313_v22 = vunpack.c.l.bf16 %v6406_v10  ;;  %v2314_v39 = vunpack.c.h.bf16 %v6406_v10  ;;  %v2335_v10 = vunpack.c.l.bf16 %v263_v60  ;;  %135 = vst.msk [vmem:[#allocation3 + $0x1a0] sm:$0xff] %vm82_vm0, %v5668_v43  ;;  %v2331_v24 = vunpack.c.l.bf16 %v261_v13 }
  0x7d   :  { %136 = vst.msk [vmem:[#allocation3 + $0x1a8] sm:$0xff] %vm82_vm0, %v5668_v43 }
  0x7e   :  { %2572 = vadd.xlane.f32.xlu0 %v2571_v19  ;;  %v2383_v42 = vpop.xlane.xlu2 %2382  ;;  %v6418_v19 = vld [vmem:[%s9221_s0 + $0x338] sm:$0xff]  ;;  %v2620_v40 = vadd.f32 %v2619_v23, %v2313_v22  ;;  %v2326_v22 = vunpack.c.h.bf16 %v6482_v51  ;;  %137 = vst.msk [vmem:[#allocation3 + $0x1b0] sm:$0xff] %vm82_vm0, %v5668_v43  ;;  %v5281_v51 = vld [vmem:[%s9221_s0 + $0x10c] sm:$0xf0] }
  0x7f   :  { %v2683_v48 = vadd.f32 %v2383_v42, %v2043_v29  ;;  %v6371_v53 = vpop.xlane.xlu1 %2372  ;;  %v2309_v28 = vunpack.c.l.bf16 %v6418_v19  ;;  %v2614_v29 = vadd.f32 %v2308_v15, %v2307_v14  ;;  %v5278_v42 = vld [vmem:[%s9221_s0 + $0xf4] sm:$0xf0]  ;;  %v2310_v47 = vunpack.c.h.bf16 %v6418_v19  ;;  %138 = vst.msk [vmem:[#allocation3 + $0x1b8] sm:$0xff] %vm82_vm0, %v5668_v43 }
  0x80   :  { %v4730_v62 = vor.u32 %v5278_v42, %v4729_v41  ;;  %v2621_v3 = vadd.f32 %v2620_v40, %v2314_v39  ;;  %v2321_v15 = vunpack.c.l.bf16 %v6500_v1  ;;  %139 = vst.msk [vmem:[#allocation3 + $0x1c0] sm:$0xff] %vm82_vm0, %v5668_v43  ;;  %v2041_v39 = vld [vmem:[#allocation3 + $0x10] sm:$0xff] }
  0x81   :  { %2748 = vst.msk [vmem:[#allocation3 + $0x20] sm:$0xff] %vm82_vm0, %v2683_v48  ;;  %1273 = vmatmul.bf16.gmra.mxu0 %v4706_v38  ;;  %v6380_v59 = vpop.xlane.xlu0 %2362  ;;  %v255_v38 = vld [vmem:[%s9221_s0 + $0x360] sm:$0xff]  ;;  %v4722_v48 = vor.u32 %v5277_v31, %v4721_v30  ;;  %v2649_v30 = vadd.f32 %v2336_v12, %v2335_v10  ;;  %v6540_v31 = vld [vmem:[%s9221_s0 + $0x398] sm:$0xff] }
  0x82   :  { %1442 = vmatmul.bf16.gmra.mxu1 %v4710_v45  ;;  %v2323_v45 = vunpack.c.l.bf16 %v257_v26  ;;  %v2319_v56 = vunpack.c.l.bf16 %v255_v38  ;;  %v2320_v57 = vunpack.c.h.bf16 %v255_v38  ;;  %v2332_v26 = vunpack.c.h.bf16 %v261_v13  ;;  %v2039_v38 = vld [vmem:[#allocation3] sm:$0xff]  ;;  %140 = vst.msk [vmem:[#allocation3 + $0x1c8] sm:$0xff] %vm82_vm0, %v5668_v43 }
  0x83   :  { %2597 = vadd.xlane.f32.xlu2 %v2596_v44  ;;  %1611 = vmatmul.bf16.gmra.mxu2 %v4714_v49  ;;  %v6468_v44 = vld [vmem:[%s9221_s0 + $0x388] sm:$0xff]  ;;  %v2333_v41 = vunpack.c.l.bf16 %v6540_v31  ;;  %141 = vst.msk [vmem:[#allocation3 + $0x1d0] sm:$0xff] %vm82_vm0, %v5668_v43  ;;  %v2679_v60 = vadd.f32 %v6380_v59, %v2039_v38  ;;  %v2334_v59 = vunpack.c.h.bf16 %v6540_v31 }
  0x84   :  { %2592 = vadd.xlane.f32.xlu1 %v2591_v54  ;;  %1780 = vmatmul.bf16.gmra.mxu3 %v4718_v55  ;;  %v5276_v49 = vld [vmem:[%s9221_s0 + $0xec] sm:$0xf]  ;;  %v2615_v54 = vadd.f32 %v2614_v29, %v2309_v28  ;;  %v4726_v55 = vor.u32 %v5275_v34, %v4723_v35  ;;  %v2329_v63 = vunpack.c.l.bf16 %v6468_v44  ;;  %v2634_v6 = vadd.f32 %v2324_v46, %v2323_v45 }
  0x85   :  { %v4734_v4 = vor.u32 %v5276_v49, %v4731_v50  ;;  %v2330_v19 = vunpack.c.h.bf16 %v6468_v44  ;;  %v2654_v28 = vadd.f32 %v2340_v9, %v2339_v8  ;;  %v2337_v29 = vunpack.c.l.bf16 %v6525_v18  ;;  %v2044_v35 = vld [vmem:[#allocation3 + $0x28] sm:$0xff]  ;;  %v271_v44 = vld [vmem:[%s9221_s0 + $0x3e0] sm:$0xff]  ;;  %142 = vst.msk [vmem:[#allocation3 + $0x1d8] sm:$0xff] %vm82_vm0, %v5668_v43 }
  0x86   :  { %2587 = vadd.xlane.f32.xlu0 %v2586_v61  ;;  %v6410_v11 = vpop.xlane.xlu2 %2387  ;;  %v2626_v61 = vadd.f32 %v2625_v33, %v2318_v32  ;;  %v2616_v14 = vadd.f32 %v2615_v54, %v2310_v47  ;;  %v2635_v23 = vadd.f32 %v2634_v6, %v2325_v5  ;;  %v2322_v33 = vunpack.c.h.bf16 %v6500_v1  ;;  %v4737_v50 = vld [vmem:[%s9221_s0 + $0x100] sm:$0xf]  ;;  %v269_v54 = vld [vmem:[%s9221_s0 + $0x3d0] sm:$0xff]  ;;  %143 = vst.msk [vmem:[#allocation3 + $0x1e0] sm:$0xff] %vm82_vm0, %v5668_v43  ;;  %v4747_v5 = vld [vmem:[%s9221_s0 + $0x118] sm:$0xf0] }
  0x87   :  { %v6420_v20 = vpop.xlane.xlu1 %2377  ;;  %v2644_v42 = vadd.f32 %v2332_v26, %v2331_v24  ;;  %v2342_v46 = vunpack.c.h.bf16 %v6520_v17  ;;  %v2650_v49 = vadd.f32 %v2649_v30, %v2337_v29  ;;  %v2352_v1 = vunpack.c.h.bf16 %v271_v44  ;;  %v6608_v6 = vld [vmem:[%s9221_s0 + $0x3e8] sm:$0xff]  ;;  %144 = vst.msk [vmem:[#allocation3 + $0x1e8] sm:$0xff] %vm82_vm0, %v5668_v43  ;;  %v2042_v24 = vld [vmem:[#allocation3 + $0x18] sm:$0xff] }
  0x88   :  { %v2636_v40 = vadd.f32 %v2635_v23, %v2326_v22  ;;  %v2347_v8 = vunpack.c.l.bf16 %v269_v54  ;;  %v2348_v9 = vunpack.c.h.bf16 %v269_v54  ;;  %145 = vst.msk [vmem:[#allocation3 + $0x1f0] sm:$0xff] %vm82_vm0, %v5668_v43  ;;  %v2353_v29 = vunpack.c.l.bf16 %v6608_v6  ;;  %v2056_v54 = vld [vmem:[#allocation3 + $0x88] sm:$0xff] }
  0x89   :  { %v6430_v25 = vpop.xlane.xlu0 %2367  ;;  %v2645_v13 = vadd.f32 %v2644_v42, %v2333_v41  ;;  %146 = vst.msk [vmem:[#allocation3 + $0x1f8] sm:$0xff] %vm82_vm0, %v5668_v43  ;;  %v2045_v43 = vld [vmem:[#allocation3 + $0x30] sm:$0xff]  ;;  %v2682_v42 = vadd.f32 %v6420_v20, %v2042_v24 }
  0x8a   :  { %2744 = vst.msk [vmem:[#allocation3] sm:$0xff] %vm82_vm0, %v2679_v60  ;;  %v273_v20 = vld [vmem:[%s9221_s0 + $0x3f0] sm:$0xff] }
  0x8b   :  { %2612 = vadd.xlane.f32.xlu2 %v2611_v16  ;;  %v2629_v16 = vadd.f32 %v2320_v57, %v2319_v56  ;;  %v5279_v57 = vld [vmem:[%s9221_s0 + $0x104] sm:$0xf]  ;;  %2747 = vst.msk [vmem:[#allocation3 + $0x18] sm:$0xff] %vm82_vm0, %v2682_v42 }
  0x8c   :  { %2607 = vadd.xlane.f32.xlu1 %v2606_v21  ;;  %v2640_v21 = vadd.f32 %v2639_v0, %v2329_v63  ;;  %v5282_v63 = vld [vmem:[%s9221_s0 + $0x114] sm:$0xf0]  ;;  %v2351_v0 = vunpack.c.l.bf16 %v271_v44 }
  0x8d   :  { %v2630_v34 = vadd.f32 %v2629_v16, %v2321_v15  ;;  %v6615_v15 = vld [vmem:[%s9221_s0 + $0x3d8] sm:$0xff] }
  0x8e   :  { %2602 = vadd.xlane.f32.xlu0 %v2601_v27  ;;  %v6486_v52 = vpop.xlane.xlu2 %2402  ;;  %v2341_v27 = vunpack.c.l.bf16 %v6520_v17  ;;  %v2641_v36 = vadd.f32 %v2640_v21, %v2330_v19  ;;  %v2050_v17 = vld [vmem:[#allocation3 + $0x58] sm:$0xff]  ;;  %v4742_v21 = vor.u32 %v5279_v57, %v4739_v58  ;;  %v2669_v30 = vadd.f32 %v2352_v1, %v2351_v0  ;;  %v2049_v57 = vld [vmem:[#allocation3 + $0x50] sm:$0xff] }
  0x8f   :  { %v6502_v2 = vpop.xlane.xlu1 %2397  ;;  %v2631_v56 = vadd.f32 %v2630_v34, %v2322_v33  ;;  %v2046_v44 = vld [vmem:[#allocation3 + $0x38] sm:$0xff]  ;;  %v2355_v1 = vunpack.c.l.bf16 %v273_v20 }
  0x90   :  { %v2655_v47 = vadd.f32 %v2654_v28, %v2341_v27 }
  0x91   :  { %1278 = vmatmul.bf16.gmra.mxu0 %v4722_v48  ;;  %v6509_v7 = vpop.xlane.xlu0 %2392  ;;  %v2338_v48 = vunpack.c.h.bf16 %v6525_v18 }
  0x92   :  { %1447 = vmatmul.bf16.gmra.mxu1 %v4726_v55  ;;  %v2047_v55 = vld [vmem:[#allocation3 + $0x40] sm:$0xff]  ;;  %v2656_v10 = vadd.f32 %v2655_v47, %v2342_v46  ;;  %v5669_v47 = vmov 0  }
  0x93   :  { %2627 = vadd.xlane.f32.xlu2 %v2626_v61  ;;  %1616 = vmatmul.bf16.gmra.mxu2 %v4730_v62  ;;  %v2681_v61 = vadd.f32 %v6371_v53, %v2041_v39  ;;  %v6587_v62 = vld [vmem:[%s9221_s0 + $0x108] sm:$0xf]  ;;  %v2684_v53 = vadd.f32 %v6410_v11, %v2044_v35  ;;  %v2651_v12 = vadd.f32 %v2650_v49, %v2338_v48  ;;  %v2349_v35 = vunpack.c.l.bf16 %v6615_v15  ;;  %v2053_v39 = vld [vmem:[#allocation3 + $0x70] sm:$0xff] }
  0x94   :  { %2622 = vadd.xlane.f32.xlu1 %v2621_v3  ;;  %1785 = vmatmul.bf16.gmra.mxu3 %v4734_v4  ;;  %v267_v3 = vld [vmem:[%s9221_s0 + $0x3c0] sm:$0xff]  ;;  %v5280_v4 = vld [vmem:[%s9221_s0 + $0x10c] sm:$0xf]  ;;  %v2687_v16 = vadd.f32 %v6486_v52, %v2047_v55  ;;  %v4746_v27 = vor.u32 %v5282_v63, %v6587_v62  ;;  %v2685_v48 = vadd.f32 %v6509_v7, %v2045_v43  ;;  %v2354_v49 = vunpack.c.h.bf16 %v6608_v6  ;;  %v4763_v43 = vld [vmem:[%s9221_s0 + $0x138] sm:$0xf0] }
  0x95   :  { %v2040_v11 = vld [vmem:[#allocation3 + $0x8] sm:$0xff]  ;;  %v2343_v22 = vunpack.c.l.bf16 %v267_v3  ;;  %v2344_v23 = vunpack.c.h.bf16 %v267_v3  ;;  %v4750_v28 = vor.u32 %v5280_v4, %v4747_v5  ;;  %2749 = vst.msk [vmem:[#allocation3 + $0x28] sm:$0xff] %vm82_vm0, %v2684_v53  ;;  %5410 = vset.pattern.permute.xlu2 %v5669_v47  ;;  %v2350_v55 = vunpack.c.h.bf16 %v6615_v15  ;;  %5409 = vset.pattern.permute.xlu1 %v5669_v47  ;;  %v2051_v63 = vld [vmem:[#allocation3 + $0x60] sm:$0xff] }
  0x96   :  { %2617 = vadd.xlane.f32.xlu0 %v2616_v14  ;;  %v6544_v32 = vpop.xlane.xlu2 %2417  ;;  %v4738_v14 = vor.u32 %v5281_v51, %v4737_v50  ;;  %v6627_v52 = vld [vmem:[%s9221_s0 + $0x3c8] sm:$0xff]  ;;  %v2680_v33 = vadd.f32 %v6430_v25, %v2040_v11  ;;  %2752 = vst.msk [vmem:[#allocation3 + $0x40] sm:$0xff] %vm82_vm0, %v2687_v16  ;;  %v2670_v50 = vadd.f32 %v2669_v30, %v2353_v29  ;;  %v2356_v3 = vunpack.c.h.bf16 %v273_v20  ;;  %v5286_v30 = vld [vmem:[%s9221_s0 + $0x134] sm:$0xf0] }
  0x97   :  { %v6549_v37 = vpop.xlane.xlu1 %2412  ;;  %v2690_v38 = vadd.f32 %v6544_v32, %v2050_v17  ;;  %v2345_v25 = vunpack.c.l.bf16 %v6627_v52  ;;  %v2659_v46 = vadd.f32 %v2344_v23, %v2343_v22  ;;  %2746 = vst.msk [vmem:[#allocation3 + $0x10] sm:$0xff] %vm82_vm0, %v2681_v61  ;;  %v2048_v32 = vld [vmem:[#allocation3 + $0x48] sm:$0xff]  ;;  %v2686_v7 = vadd.f32 %v6502_v2, %v2046_v44  ;;  %5411 = vset.pattern.permute.xlu0 %v5669_v47  ;;  %v2055_v17 = vld [vmem:[#allocation3 + $0x80] sm:$0xff]  ;;  %v5285_v23 = vld [vmem:[%s9221_s0 + $0x12c] sm:$0xf0] }
  0x98   :  { %2745 = vst.msk [vmem:[#allocation3 + $0x8] sm:$0xff] %vm82_vm0, %v2680_v33  ;;  %v2346_v58 = vunpack.c.h.bf16 %v6627_v52  ;;  %v2671_v5 = vadd.f32 %v2670_v50, %v2354_v49  ;;  %v2052_v6 = vld [vmem:[#allocation3 + $0x68] sm:$0xff]  ;;  %v2674_v22 = vadd.f32 %v2356_v3, %v2355_v1  ;;  %v2057_v47 = vld [vmem:[#allocation3 + $0x90] sm:$0xff] }
  0x99   :  { %v6559_v45 = vpop.xlane.xlu0 %2407  ;;  %2755 = vst.msk [vmem:[#allocation3 + $0x58] sm:$0xff] %vm82_vm0, %v2690_v38  ;;  %v2660_v0 = vadd.f32 %v2659_v46, %v2345_v25  ;;  %v4761_v29 = vld [vmem:[%s9221_s0 + $0x128] sm:$0xf]  ;;  %v5284_v33 = vld [vmem:[%s9221_s0 + $0x12c] sm:$0xf] }
  0x9a   :  { %v2688_v60 = vadd.f32 %v6559_v45, %v2048_v32  ;;  %2750 = vst.msk [vmem:[#allocation3 + $0x30] sm:$0xff] %vm82_vm0, %v2685_v48  ;;  %v2689_v45 = vadd.f32 %v6549_v37, %v2049_v57  ;;  %v4753_v37 = vld [vmem:[%s9221_s0 + $0x120] sm:$0xf]  ;;  %v4762_v46 = vor.u32 %v5286_v30, %v4761_v29  ;;  %v4766_v32 = vor.u32 %v5284_v33, %v4763_v43  ;;  %v2062_v57 = vld [vmem:[#allocation3 + $0xb8] sm:$0xff] }
  0x9b   :  { %2642 = vadd.xlane.f32.xlu2 %v2641_v36  ;;  %v2664_v36 = vadd.f32 %v2348_v9, %v2347_v8  ;;  %v274_v8 = vld [vmem:[%s9221_s0 + $0x3f8] sm:$0xff]  ;;  %2751 = vst.msk [vmem:[#allocation3 + $0x38] sm:$0xff] %vm82_vm0, %v2686_v7 }
  0x9c   :  { %2637 = vadd.xlane.f32.xlu1 %v2636_v40  ;;  %v2646_v40 = vadd.f32 %v2645_v13, %v2334_v59  ;;  %2753 = vst.msk [vmem:[#allocation3 + $0x48] sm:$0xff] %vm82_vm0, %v2688_v60 }
  0x9d   :  { %2754 = vst.msk [vmem:[#allocation3 + $0x50] sm:$0xff] %vm82_vm0, %v2689_v45 }
  0x9e   :  { %2632 = vadd.xlane.f32.xlu0 %v2631_v56  ;;  %v2433_v18 = vpop.xlane.xlu2 %2432  ;;  %v1244_v19 = vpop.f32.mrf.mxu0  ;;  %v2665_v56 = vadd.f32 %v2664_v36, %v2349_v35  ;;  %v2358_v36 = vunpack.c.h.bf16 %v274_v8 }
  0x9f   :  { %v1413_v26 = vpop.f32.mrf.mxu1  ;;  %v6629_v31 = vpop.xlane.xlu1 %2427  ;;  %v2693_v51 = vadd.f32 %v2433_v18, %v2053_v39  ;;  %v2661_v18 = vadd.f32 %v2660_v0, %v2346_v58  ;;  %v2812_v7 = vld [vmem:[#allocation3 + $0x8] sm:$0xff]  ;;  %v2811_v58 = vld [vmem:[#allocation3] sm:$0xff] }
  0xa0   :  { %v1414_v34 = vadd.f32 %v1413_v26, %v1244_v19  ;;  %v2666_v11 = vadd.f32 %v2665_v56, %v2350_v55  ;;  %v2692_v19 = vadd.f32 %v6629_v31, %v2052_v6  ;;  %v5283_v26 = vld [vmem:[%s9221_s0 + $0x124] sm:$0xf]  ;;  %v4754_v31 = vor.u32 %v5285_v23, %v4753_v37  ;;  %v4779_v23 = vld [vmem:[%s9221_s0 + $0x158] sm:$0xf0] }
  0xa1   :  { %1283 = vmatmul.bf16.gmra.mxu0 %v4738_v14  ;;  %v2423_v41 = vpop.xlane.xlu0 %2422  ;;  %2758 = vst.msk [vmem:[#allocation3 + $0x70] sm:$0xff] %vm82_vm0, %v2693_v51 }
  0xa2   :  { %1452 = vmatmul.bf16.gmra.mxu1 %v4742_v21  ;;  %v2691_v15 = vadd.f32 %v2423_v41, %v2051_v63  ;;  %v2357_v21 = vunpack.c.l.bf16 %v274_v8  ;;  %2757 = vst.msk [vmem:[#allocation3 + $0x68] sm:$0xff] %vm82_vm0, %v2692_v19  ;;  %v2061_v63 = vld [vmem:[#allocation3 + $0xb0] sm:$0xff] }
  0xa3   :  { %2657 = vadd.xlane.f32.xlu2 %v2656_v10  ;;  %1621 = vmatmul.bf16.gmra.mxu2 %v4746_v27  ;;  %v2054_v10 = vld [vmem:[#allocation3 + $0x78] sm:$0xff]  ;;  %v4755_v27 = vld [vmem:[%s9221_s0 + $0x130] sm:$0xf0] }
  0xa4   :  { %2652 = vadd.xlane.f32.xlu1 %v2651_v12  ;;  %1790 = vmatmul.bf16.gmra.mxu3 %v4750_v28  ;;  %v2059_v28 = vld [vmem:[#allocation3 + $0xa0] sm:$0xff]  ;;  %2756 = vst.msk [vmem:[#allocation3 + $0x60] sm:$0xff] %vm82_vm0, %v2691_v15  ;;  %v2675_v38 = vadd.f32 %v2674_v22, %v2357_v21  ;;  %v4758_v39 = vor.u32 %v5283_v26, %v4755_v27  ;;  %v2813_v15 = vld [vmem:[#allocation3 + $0x10] sm:$0xff]  ;;  %v5290_v21 = vld [vmem:[%s9221_s0 + $0x154] sm:$0xf0] }
  0xa5   :  { %v2065_v19 = vld [vmem:[#allocation3 + $0xd0] sm:$0xff]  ;;  %v5288_v22 = vld [vmem:[%s9221_s0 + $0x14c] sm:$0xf]  ;;  %v2815_v26 = vld [vmem:[#allocation3 + $0x20] sm:$0xff] }
  0xa6   :  { %2647 = vadd.xlane.f32.xlu0 %v2646_v40  ;;  %v2448_v61 = vpop.xlane.xlu2 %2447  ;;  %v1582_v62 = vpop.f32.mrf.mxu2  ;;  %v2058_v40 = vld [vmem:[#allocation3 + $0x98] sm:$0xff]  ;;  %v2676_v55 = vadd.f32 %v2675_v38, %v2358_v36  ;;  %v2063_v36 = vld [vmem:[#allocation3 + $0xc0] sm:$0xff] }
  0xa7   :  { %v2696_v53 = vadd.f32 %v2448_v61, %v2056_v54  ;;  %v1583_v2 = vadd.f32 %v1582_v62, %v1414_v34  ;;  %v1751_v59 = vpop.f32.mrf.mxu3  ;;  %v1246_v4 = vpop.f32.mrf.mxu0  ;;  %v2876_v62 = vadd.f32 1e-06, %v2812_v7 }
  0xa8   :  { %v1415_v9 = vpop.f32.mrf.mxu1  ;;  %v2443_v12 = vpop.xlane.xlu1 %2442 }
  0xa9   :  { %v6659_v13 = vadd.f32 %v1751_v59, %v1583_v2  ;;  %v1416_v14 = vadd.f32 %v1415_v9, %v1246_v4  ;;  %v2438_v16 = vpop.xlane.xlu0 %2437  ;;  %2761 = vst.msk [vmem:[#allocation3 + $0x88] sm:$0xff] %vm82_vm0, %v2696_v53  ;;  %v2695_v52 = vadd.f32 %v2443_v12, %v2055_v17  ;;  %v2060_v2 = vld [vmem:[#allocation3 + $0xa8] sm:$0xff]  ;;  %v2875_v4 = vadd.f32 1e-06, %v2811_v58  ;;  %v4769_v9 = vld [vmem:[%s9221_s0 + $0x140] sm:$0xf] }
  0xaa   :  { %v2694_v24 = vadd.f32 %v2438_v16, %v2054_v10  ;;  %5412 = vrcp.f32 %v2876_v62  ;;  %v5289_v12 = vld [vmem:[%s9221_s0 + $0x14c] sm:$0xf0]  ;;  %v4771_v16 = vld [vmem:[%s9221_s0 + $0x150] sm:$0xf0]  ;;  %v4777_v17 = vld [vmem:[%s9221_s0 + $0x148] sm:$0xf] }
  0xab   :  { %2672 = vadd.xlane.f32.xlu2 %v2671_v5  ;;  %2760 = vst.msk [vmem:[#allocation3 + $0x80] sm:$0xff] %vm82_vm0, %v2695_v52  ;;  %5414 = vrcp.f32 %v2875_v4  ;;  %v4770_v37 = vor.u32 %v5289_v12, %v4769_v9  ;;  %v2064_v52 = vld [vmem:[#allocation3 + $0xc8] sm:$0xff]  ;;  %v2067_v58 = vld [vmem:[#allocation3 + $0xe0] sm:$0xff]  ;;  %v5293_v12 = vld [vmem:[%s9221_s0 + $0x16c] sm:$0xf0] }
  0xac   :  { %2667 = vadd.xlane.f32.xlu1 %v2666_v11  ;;  %2759 = vst.msk [vmem:[#allocation3 + $0x78] sm:$0xff] %vm82_vm0, %v2694_v24  ;;  %v2877_v24 = vadd.f32 1e-06, %v2813_v15  ;;  %v2823_v15 = vld [vmem:[#allocation3 + $0x60] sm:$0xff] }
  0xae   :  { %2662 = vadd.xlane.f32.xlu0 %v2661_v18  ;;  %v2463_v34 = vpop.xlane.xlu2 %2462  ;;  %v1584_v35 = vpop.f32.mrf.mxu2  ;;  %v2814_v18 = vld [vmem:[#allocation3 + $0x18] sm:$0xff]  ;;  %5416 = vrcp.f32 %v2877_v24  ;;  %v2887_v24 = vadd.f32 1e-06, %v2823_v15 }
  0xaf   :  { %v2699_v41 = vadd.f32 %v2463_v34, %v2059_v28  ;;  %v1585_v42 = vadd.f32 %v1584_v35, %v1416_v14  ;;  %v1753_v44 = vpop.f32.mrf.mxu3  ;;  %v1249_v25 = vpop.f32.mrf.mxu0  ;;  %v5287_v14 = vld [vmem:[%s9221_s0 + $0x144] sm:$0xf]  ;;  %v2878_v30 = vadd.f32 1e-06, %v2814_v18  ;;  %v4778_v35 = vor.u32 %v5290_v21, %v4777_v17  ;;  %v4793_v17 = vld [vmem:[%s9221_s0 + $0x168] sm:$0xf] }
  0xb0   :  { %v1418_v48 = vpop.f32.mrf.mxu1  ;;  %v2458_v49 = vpop.xlane.xlu1 %2457  ;;  %v4774_v29 = vor.u32 %v5287_v14, %v4771_v16  ;;  %v5291_v14 = vld [vmem:[%s9221_s0 + $0x164] sm:$0xf]  ;;  %v4787_v16 = vld [vmem:[%s9221_s0 + $0x170] sm:$0xf0]  ;;  %v2818_v18 = vld [vmem:[#allocation3 + $0x38] sm:$0xff] }
  0xb1   :  { %2764 = vst.msk [vmem:[#allocation3 + $0xa0] sm:$0xff] %vm82_vm0, %v2699_v41  ;;  %v6694_v50 = vadd.f32 %v1753_v44, %v1585_v42  ;;  %v1419_v20 = vadd.f32 %v1418_v48, %v1249_v25  ;;  %1288 = vmatmul.bf16.gmra.mxu0 %v4754_v31  ;;  %v2453_v51 = vpop.xlane.xlu0 %2452  ;;  %v2698_v54 = vadd.f32 %v2458_v49, %v2058_v40  ;;  %v5413_v38 = vpop.eup %5412  ;;  %v2879_v41 = vadd.f32 1e-06, %v2815_v26  ;;  %v2820_v49 = vld [vmem:[#allocation3 + $0x48] sm:$0xff]  ;;  %v5294_v21 = vld [vmem:[%s9221_s0 + $0x174] sm:$0xf0] }
  0xb2   :  { %1457 = vmatmul.bf16.gmra.mxu1 %v4758_v39  ;;  %v2697_v56 = vadd.f32 %v2453_v51, %v2057_v47  ;;  %v4782_v40 = vor.u32 %v5288_v22, %v4779_v23  ;;  %v5415_v48 = vpop.eup %5414  ;;  %5418 = vrcp.f32 %v2878_v30  ;;  %v2068_v51 = vld [vmem:[#allocation3 + $0xe8] sm:$0xff]  ;;  %v4795_v23 = vld [vmem:[%s9221_s0 + $0x178] sm:$0xf0]  ;;  %v2819_v26 = vld [vmem:[#allocation3 + $0x40] sm:$0xff]  ;;  %v2882_v30 = vadd.f32 1e-06, %v2818_v18 }
  0xb3   :  { %1626 = vmatmul.bf16.gmra.mxu2 %v4762_v46  ;;  %2763 = vst.msk [vmem:[#allocation3 + $0x98] sm:$0xff] %vm82_vm0, %v2698_v54  ;;  %5420 = vrcp.f32 %v2879_v41  ;;  %v2884_v54 = vadd.f32 1e-06, %v2820_v49  ;;  %v5292_v22 = vld [vmem:[%s9221_s0 + $0x16c] sm:$0xf] }
  0xb4   :  { %1795 = vmatmul.bf16.gmra.mxu3 %v4766_v32  ;;  %2762 = vst.msk [vmem:[#allocation3 + $0x90] sm:$0xff] %vm82_vm0, %v2697_v56  ;;  %v4798_v41 = vor.u32 %v5292_v22, %v4795_v23  ;;  %v2824_v22 = vld [vmem:[#allocation3 + $0x68] sm:$0xff] }
  0xb5   :  { %5422 = vrcp.f32 %v2884_v54  ;;  %v2821_v54 = vld [vmem:[#allocation3 + $0x50] sm:$0xff]  ;;  %v4809_v23 = vld [vmem:[%s9221_s0 + $0x188] sm:$0xf] }
  0xb6   :  { %2677 = vadd.xlane.f32.xlu0 %v2676_v55  ;;  %v2478_v60 = vpop.xlane.xlu2 %2477  ;;  %v1587_v61 = vpop.f32.mrf.mxu2  ;;  %v2817_v55 = vld [vmem:[#allocation3 + $0x30] sm:$0xff] }
  0xb7   :  { %v2702_v0 = vadd.f32 %v2478_v60, %v2062_v57  ;;  %v1588_v1 = vadd.f32 %v1587_v61, %v1419_v20  ;;  %v1756_v3 = vpop.f32.mrf.mxu3  ;;  %v1251_v53 = vpop.f32.mrf.mxu0  ;;  %v2816_v20 = vld [vmem:[#allocation3 + $0x28] sm:$0xff] }
  0xb8   :  { %v1420_v59 = vpop.f32.mrf.mxu1  ;;  %v2473_v5 = vpop.xlane.xlu1 %2472  ;;  %v2880_v57 = vadd.f32 1e-06, %v2816_v20 }
  0xb9   :  { %2767 = vst.msk [vmem:[#allocation3 + $0xb8] sm:$0xff] %vm82_vm0, %v2702_v0  ;;  %v6699_v6 = vadd.f32 %v1756_v3, %v1588_v1  ;;  %v1421_v8 = vadd.f32 %v1420_v59, %v1251_v53  ;;  %v2468_v45 = vpop.xlane.xlu0 %2467  ;;  %v2701_v11 = vadd.f32 %v2473_v5, %v2061_v63  ;;  %v5417_v60 = vpop.eup %5416  ;;  %v2066_v1 = vld [vmem:[#allocation3 + $0xd8] sm:$0xff] }
  0xba   :  { %v2700_v10 = vadd.f32 %v2468_v45, %v2060_v2  ;;  %v5419_v3 = vpop.eup %5418  ;;  %v2881_v2 = vadd.f32 1e-06, %v2817_v55  ;;  %v4785_v45 = vld [vmem:[%s9221_s0 + $0x160] sm:$0xf]  ;;  %5424 = vrcp.f32 %v2880_v57  ;;  %v2074_v55 = vld [vmem:[#allocation3 + $0x118] sm:$0xff] }
  0xbb   :  { %2766 = vst.msk [vmem:[#allocation3 + $0xb0] sm:$0xff] %vm82_vm0, %v2701_v11  ;;  %v5421_v11 = vpop.eup %5420 }
  0xbc   :  { %2765 = vst.msk [vmem:[#allocation3 + $0xa8] sm:$0xff] %vm82_vm0, %v2700_v10  ;;  %5426 = vrcp.f32 %v2881_v2  ;;  %v2829_v2 = vld [vmem:[#allocation3 + $0x90] sm:$0xff] }
  0xbd   :  { %5428 = vrcp.f32 %v2887_v24  ;;  %v2893_v18 = vadd.f32 1e-06, %v2829_v2  ;;  %v5298_v24 = vld [vmem:[%s9221_s0 + $0x194] sm:$0xf0] }
  0xbe   :  { %v2493_v27 = vpop.xlane.xlu2 %2492  ;;  %v1589_v28 = vpop.f32.mrf.mxu2  ;;  %5430 = vrcp.f32 %v2882_v30 }
  0xbf   :  { %v2705_v31 = vadd.f32 %v2493_v27, %v2065_v19  ;;  %v1590_v33 = vadd.f32 %v1589_v28, %v1421_v8  ;;  %v1758_v43 = vpop.f32.mrf.mxu3  ;;  %v1254_v34 = vpop.f32.mrf.mxu0  ;;  %v2071_v19 = vld [vmem:[#allocation3 + $0x100] sm:$0xff] }
  0xc0   :  { %v1423_v39 = vpop.f32.mrf.mxu1  ;;  %v2488_v42 = vpop.xlane.xlu1 %2487 }
  0xc1   :  { %2770 = vst.msk [vmem:[#allocation3 + $0xd0] sm:$0xff] %vm82_vm0, %v2705_v31  ;;  %v6728_v44 = vadd.f32 %v1758_v43, %v1590_v33  ;;  %v1424_v25 = vadd.f32 %v1423_v39, %v1254_v34  ;;  %1293 = vmatmul.bf16.gmra.mxu0 %v4770_v37  ;;  %v2483_v46 = vpop.xlane.xlu0 %2482  ;;  %v2704_v47 = vadd.f32 %v2488_v42, %v2064_v52  ;;  %v2070_v52 = vld [vmem:[#allocation3 + $0xf8] sm:$0xff]  ;;  %v5423_v31 = vpop.eup %5422  ;;  %v2883_v42 = vadd.f32 1e-06, %v2819_v26 }
  0xc2   :  { %1462 = vmatmul.bf16.gmra.mxu1 %v4774_v29  ;;  %v2703_v32 = vadd.f32 %v2483_v46, %v2063_v36  ;;  %v4786_v37 = vor.u32 %v5293_v12, %v4785_v45  ;;  %v4790_v29 = vor.u32 %v5291_v14, %v4787_v16  ;;  %v4794_v36 = vor.u32 %v5294_v21, %v4793_v17  ;;  %v5425_v39 = vpop.eup %5424  ;;  %v4801_v16 = vld [vmem:[%s9221_s0 + $0x180] sm:$0xf]  ;;  %v5297_v17 = vld [vmem:[%s9221_s0 + $0x18c] sm:$0xf0]  ;;  %v4803_v21 = vld [vmem:[%s9221_s0 + $0x190] sm:$0xf0] }
  0xc3   :  { %3138 = vperm.xlu2 %5410, %v5413_v38   ;;  %1631 = vmatmul.bf16.gmra.mxu2 %v4778_v35  ;;  %2769 = vst.msk [vmem:[#allocation3 + $0xc8] sm:$0xff] %vm82_vm0, %v2704_v47  ;;  %v2069_v38 = vld [vmem:[#allocation3 + $0xf0] sm:$0xff]  ;;  %v5427_v49 = vpop.eup %5426  ;;  %5432 = vrcp.f32 %v2883_v42  ;;  %v4802_v26 = vor.u32 %v5297_v17, %v4801_v16 }
  0xc4   :  { %1800 = vmatmul.bf16.gmra.mxu3 %v4782_v40  ;;  %2768 = vst.msk [vmem:[#allocation3 + $0xc0] sm:$0xff] %vm82_vm0, %v2703_v32 }
  0xc5   :  { %3133 = vperm.xlu1 %5409, %v5415_v48  }
  0xc6   :  { %v2508_v56 = vpop.xlane.xlu2 %2507  ;;  %v1592_v7 = vpop.f32.mrf.mxu2 }
  0xc7   :  { %v2708_v61 = vadd.f32 %v2508_v56, %v2068_v51  ;;  %v1593_v62 = vadd.f32 %v1592_v7, %v1424_v25  ;;  %v1761_v63 = vpop.f32.mrf.mxu3  ;;  %v1256_v0 = vpop.f32.mrf.mxu0  ;;  %v2826_v51 = vld [vmem:[#allocation3 + $0x78] sm:$0xff] }
  0xc8   :  { %v1425_v53 = vpop.f32.mrf.mxu1  ;;  %v2503_v59 = vpop.xlane.xlu1 %2502  ;;  %v2890_v56 = vadd.f32 1e-06, %v2826_v51  ;;  %v2822_v7 = vld [vmem:[#allocation3 + $0x58] sm:$0xff] }
  0xc9   :  { %2773 = vst.msk [vmem:[#allocation3 + $0xe8] sm:$0xff] %vm82_vm0, %v2708_v61  ;;  %v6733_v4 = vadd.f32 %v1761_v63, %v1593_v62  ;;  %v1426_v5 = vadd.f32 %v1425_v53, %v1256_v0  ;;  %v2498_v8 = vpop.xlane.xlu0 %2497  ;;  %v2707_v9 = vadd.f32 %v2503_v59, %v2067_v58  ;;  %v2073_v61 = vld [vmem:[#allocation3 + $0x110] sm:$0xff]  ;;  %v5429_v62 = vpop.eup %5428  ;;  %v2072_v53 = vld [vmem:[#allocation3 + $0x108] sm:$0xff] }
  0xca   :  { %3143 = vperm.xlu0 %5411, %v5417_v60   ;;  %v2706_v10 = vadd.f32 %v2498_v8, %v2066_v1  ;;  %v2885_v60 = vadd.f32 1e-06, %v2821_v54  ;;  %v5431_v59 = vpop.eup %5430  ;;  %v2886_v8 = vadd.f32 1e-06, %v2822_v7  ;;  %5434 = vrcp.f32 %v2890_v56  ;;  %v2832_v7 = vld [vmem:[#allocation3 + $0xa8] sm:$0xff] }
  0xcb   :  { %3148 = vperm.xlu2 %5410, %v5419_v3   ;;  %2772 = vst.msk [vmem:[#allocation3 + $0xe0] sm:$0xff] %vm82_vm0, %v2707_v9  ;;  %v5433_v14 = vpop.eup %5432 }
  0xcc   :  { %2771 = vst.msk [vmem:[#allocation3 + $0xd8] sm:$0xff] %vm82_vm0, %v2706_v10  ;;  %5436 = vrcp.f32 %v2885_v60  ;;  %v2896_v60 = vadd.f32 1e-06, %v2832_v7 }
  0xcd   :  { %3153 = vperm.xlu1 %5409, %v5421_v11   ;;  %5438 = vrcp.f32 %v2886_v8  ;;  %v2078_v8 = vld [vmem:[#allocation3 + $0x138] sm:$0xff] }
  0xce   :  { %v2523_v27 = vpop.xlane.xlu2 %2522  ;;  %v1594_v28 = vpop.f32.mrf.mxu2  ;;  %5440 = vrcp.f32 %v2893_v18 }
  0xcf   :  { %v2711_v33 = vadd.f32 %v2523_v27, %v2071_v19  ;;  %v1595_v43 = vadd.f32 %v1594_v28, %v1426_v5  ;;  %v1763_v34 = vpop.f32.mrf.mxu3  ;;  %v1259_v35 = vpop.f32.mrf.mxu0  ;;  %v5295_v19 = vld [vmem:[%s9221_s0 + $0x184] sm:$0xf]  ;;  %v5296_v27 = vld [vmem:[%s9221_s0 + $0x18c] sm:$0xf]  ;;  %v4811_v28 = vld [vmem:[%s9221_s0 + $0x198] sm:$0xf0] }
  0xd0   :  { %v1428_v40 = vpop.f32.mrf.mxu1  ;;  %v2518_v25 = vpop.xlane.xlu1 %2517 }
  0xd1   :  { %2776 = vst.msk [vmem:[#allocation3 + $0x100] sm:$0xff] %vm82_vm0, %v2711_v33  ;;  %v6762_v46 = vadd.f32 %v1763_v34, %v1595_v43  ;;  %v1429_v47 = vadd.f32 %v1428_v40, %v1259_v35  ;;  %1298 = vmatmul.bf16.gmra.mxu0 %v4786_v37  ;;  %v2513_v48 = vpop.xlane.xlu0 %2512  ;;  %v2710_v32 = vadd.f32 %v2518_v25, %v2070_v52  ;;  %v2077_v37 = vld [vmem:[#allocation3 + $0x130] sm:$0xff]  ;;  %v2888_v33 = vadd.f32 1e-06, %v2824_v22  ;;  %v2076_v43 = vld [vmem:[#allocation3 + $0x128] sm:$0xff]  ;;  %v5435_v34 = vpop.eup %5434 }
  0xd2   :  { %3178 = vperm.xlu0 %5411, %v5423_v31   ;;  %1467 = vmatmul.bf16.gmra.mxu1 %v4790_v29  ;;  %v2709_v20 = vadd.f32 %v2513_v48, %v2069_v38  ;;  %v2825_v29 = vld [vmem:[#allocation3 + $0x70] sm:$0xff]  ;;  %v4806_v31 = vor.u32 %v5295_v19, %v4803_v21  ;;  %v4810_v40 = vor.u32 %v5298_v24, %v4809_v23  ;;  %v5437_v42 = vpop.eup %5436  ;;  %v4817_v22 = vld [vmem:[%s9221_s0 + $0x1a0] sm:$0xf]  ;;  %v5299_v24 = vld [vmem:[%s9221_s0 + $0x1a4] sm:$0xf] }
  0xd3   :  { %3158 = vperm.xlu2 %5410, %v5425_v39   ;;  %1636 = vmatmul.bf16.gmra.mxu2 %v4794_v36  ;;  %2775 = vst.msk [vmem:[#allocation3 + $0xf8] sm:$0xff] %vm82_vm0, %v2710_v32  ;;  %v2889_v48 = vadd.f32 1e-06, %v2825_v29  ;;  %5442 = vrcp.f32 %v2888_v33  ;;  %v4825_v29 = vld [vmem:[%s9221_s0 + $0x1a8] sm:$0xf] }
  0xd4   :  { %1805 = vmatmul.bf16.gmra.mxu3 %v4798_v41  ;;  %2774 = vst.msk [vmem:[#allocation3 + $0xf0] sm:$0xff] %vm82_vm0, %v2709_v20  ;;  %v2075_v41 = vld [vmem:[#allocation3 + $0x120] sm:$0xff]  ;;  %v4827_v33 = vld [vmem:[%s9221_s0 + $0x1b8] sm:$0xf0] }
  0xd5   :  { %3163 = vperm.xlu1 %5409, %v5427_v49   ;;  %5444 = vrcp.f32 %v2889_v48 }
  0xd6   :  { %v2538_v57 = vpop.xlane.xlu2 %2537  ;;  %v1597_v58 = vpop.f32.mrf.mxu2  ;;  %5446 = vrcp.f32 %v2896_v60 }
  0xd7   :  { %v2714_v63 = vadd.f32 %v2538_v57, %v2074_v55  ;;  %v1598_v0 = vadd.f32 %v1597_v58, %v1429_v47  ;;  %v1766_v1 = vpop.f32.mrf.mxu3  ;;  %v1261_v3 = vpop.f32.mrf.mxu0  ;;  %v4814_v47 = vor.u32 %v5296_v27, %v4811_v28  ;;  %v2827_v57 = vld [vmem:[#allocation3 + $0x80] sm:$0xff]  ;;  %v2080_v58 = vld [vmem:[#allocation3 + $0x148] sm:$0xff]  ;;  %v2830_v27 = vld [vmem:[#allocation3 + $0x98] sm:$0xff] }
  0xd8   :  { %v1430_v5 = vpop.f32.mrf.mxu1  ;;  %v2533_v45 = vpop.xlane.xlu1 %2532  ;;  %v2083_v28 = vld [vmem:[#allocation3 + $0x160] sm:$0xff] }
  0xd9   :  { %2779 = vst.msk [vmem:[#allocation3 + $0x118] sm:$0xff] %vm82_vm0, %v2714_v63  ;;  %v6767_v9 = vadd.f32 %v1766_v1, %v1598_v0  ;;  %v1431_v11 = vadd.f32 %v1430_v5, %v1261_v3  ;;  %v2528_v10 = vpop.xlane.xlu0 %2527  ;;  %v2713_v12 = vadd.f32 %v2533_v45, %v2073_v61  ;;  %v5439_v55 = vpop.eup %5438  ;;  %v2828_v61 = vld [vmem:[#allocation3 + $0x88] sm:$0xff]  ;;  %v2891_v0 = vadd.f32 1e-06, %v2827_v57  ;;  %v2079_v1 = vld [vmem:[#allocation3 + $0x140] sm:$0xff] }
  0xda   :  { %3193 = vperm.xlu0 %5411, %v5429_v62   ;;  %v2712_v15 = vadd.f32 %v2528_v10, %v2072_v53  ;;  %v5441_v3 = vpop.eup %5440  ;;  %v2835_v45 = vld [vmem:[#allocation3 + $0xc0] sm:$0xff] }
  0xdb   :  { %3168 = vperm.xlu2 %5410, %v5431_v59   ;;  %2778 = vst.msk [vmem:[#allocation3 + $0x110] sm:$0xff] %vm82_vm0, %v2713_v12  ;;  %v2892_v12 = vadd.f32 1e-06, %v2828_v61  ;;  %5448 = vrcp.f32 %v2891_v0  ;;  %v2899_v23 = vadd.f32 1e-06, %v2835_v45  ;;  %v2833_v0 = vld [vmem:[#allocation3 + $0xb0] sm:$0xff] }
  0xdc   :  { %2777 = vst.msk [vmem:[#allocation3 + $0x108] sm:$0xff] %vm82_vm0, %v2712_v15 }
  0xdd   :  { %3173 = vperm.xlu1 %5409, %v5433_v14   ;;  %5450 = vrcp.f32 %v2892_v12 }
  0xde   :  { %v2553_v30 = vpop.xlane.xlu2 %2552  ;;  %v1599_v52 = vpop.f32.mrf.mxu2  ;;  %5452 = vrcp.f32 %v2899_v23 }
  0xdf   :  { %v2717_v35 = vadd.f32 %v2553_v30, %v2077_v37  ;;  %v1600_v36 = vadd.f32 %v1599_v52, %v1431_v11  ;;  %v1768_v38 = vpop.f32.mrf.mxu3  ;;  %v1264_v39 = vpop.f32.mrf.mxu0  ;;  %v5301_v37 = vld [vmem:[%s9221_s0 + $0x1ac] sm:$0xf0]  ;;  %v5302_v30 = vld [vmem:[%s9221_s0 + $0x1b4] sm:$0xf0] }
  0xe0   :  { %v1433_v25 = vpop.f32.mrf.mxu1  ;;  %v2548_v32 = vpop.xlane.xlu1 %2547  ;;  %v4818_v52 = vor.u32 %v5301_v37, %v4817_v22  ;;  %v4826_v48 = vor.u32 %v5302_v30, %v4825_v29  ;;  %v4833_v29 = vld [vmem:[%s9221_s0 + $0x1c0] sm:$0xf]  ;;  %v5305_v30 = vld [vmem:[%s9221_s0 + $0x1cc] sm:$0xf0] }
  0xe1   :  { %2782 = vst.msk [vmem:[#allocation3 + $0x130] sm:$0xff] %vm82_vm0, %v2717_v35  ;;  %v6796_v49 = vadd.f32 %v1768_v38, %v1600_v36  ;;  %v1434_v20 = vadd.f32 %v1433_v25, %v1264_v39  ;;  %1303 = vmatmul.bf16.gmra.mxu0 %v4802_v26  ;;  %v2543_v51 = vpop.xlane.xlu0 %2542  ;;  %v2716_v54 = vadd.f32 %v2548_v32, %v2076_v43  ;;  %v5443_v11 = vpop.eup %5442  ;;  %v4819_v26 = vld [vmem:[%s9221_s0 + $0x1b0] sm:$0xf0]  ;;  %v2831_v43 = vld [vmem:[#allocation3 + $0xa0] sm:$0xff]  ;;  %v2894_v38 = vadd.f32 1e-06, %v2830_v27 }
  0xe2   :  { %3208 = vperm.xlu0 %5411, %v5435_v34   ;;  %1472 = vmatmul.bf16.gmra.mxu1 %v4806_v31  ;;  %v2715_v56 = vadd.f32 %v2543_v51, %v2075_v41  ;;  %v5445_v19 = vpop.eup %5444  ;;  %v5300_v31 = vld [vmem:[%s9221_s0 + $0x1ac] sm:$0xf]  ;;  %v4822_v36 = vor.u32 %v5299_v24, %v4819_v26  ;;  %v2082_v39 = vld [vmem:[#allocation3 + $0x158] sm:$0xff]  ;;  %v2081_v32 = vld [vmem:[#allocation3 + $0x150] sm:$0xff] }
  0xe3   :  { %3183 = vperm.xlu2 %5410, %v5437_v42   ;;  %1641 = vmatmul.bf16.gmra.mxu2 %v4810_v40  ;;  %2781 = vst.msk [vmem:[#allocation3 + $0x128] sm:$0xff] %vm82_vm0, %v2716_v54  ;;  %v5447_v40 = vpop.eup %5446  ;;  %v4830_v54 = vor.u32 %v5300_v31, %v4827_v33  ;;  %5454 = vrcp.f32 %v2894_v38  ;;  %v5303_v31 = vld [vmem:[%s9221_s0 + $0x1c4] sm:$0xf]  ;;  %v4835_v33 = vld [vmem:[%s9221_s0 + $0x1d0] sm:$0xf0]  ;;  %v4834_v38 = vor.u32 %v5305_v30, %v4833_v29 }
  0xe4   :  { %1810 = vmatmul.bf16.gmra.mxu3 %v4814_v47  ;;  %2780 = vst.msk [vmem:[#allocation3 + $0x120] sm:$0xff] %vm82_vm0, %v2715_v56 }
  0xe5   :  { %3188 = vperm.xlu1 %5409, %v5439_v55   ;;  %v2895_v55 = vadd.f32 1e-06, %v2831_v43  ;;  %v2836_v43 = vld [vmem:[#allocation3 + $0xc8] sm:$0xff] }
  0xe6   :  { %v2568_v62 = vpop.xlane.xlu2 %2567  ;;  %v1602_v63 = vpop.f32.mrf.mxu2 }
  0xe7   :  { %v2720_v53 = vadd.f32 %v2568_v62, %v2080_v58  ;;  %v1603_v2 = vadd.f32 %v1602_v63, %v1434_v20  ;;  %v1771_v59 = vpop.f32.mrf.mxu3  ;;  %v1266_v5 = vpop.f32.mrf.mxu0  ;;  %v2838_v63 = vld [vmem:[#allocation3 + $0xd8] sm:$0xff]  ;;  %5456 = vrcp.f32 %v2895_v55 }
  0xe8   :  { %v1435_v10 = vpop.f32.mrf.mxu1  ;;  %v2563_v14 = vpop.xlane.xlu1 %2562 }
  0xe9   :  { %2785 = vst.msk [vmem:[#allocation3 + $0x148] sm:$0xff] %vm82_vm0, %v2720_v53  ;;  %v6801_v15 = vadd.f32 %v1771_v59, %v1603_v2  ;;  %v1436_v16 = vadd.f32 %v1435_v10, %v1266_v5  ;;  %v2558_v17 = vpop.xlane.xlu0 %2557  ;;  %v2719_v18 = vadd.f32 %v2563_v14, %v2079_v1  ;;  %v5449_v20 = vpop.eup %5448  ;;  %v2086_v1 = vld [vmem:[#allocation3 + $0x178] sm:$0xff]  ;;  %v2897_v5 = vadd.f32 1e-06, %v2833_v0 }
  0xea   :  { %3223 = vperm.xlu0 %5411, %v5441_v3   ;;  %v2718_v21 = vadd.f32 %v2558_v17, %v2078_v8  ;;  %v5451_v61 = vpop.eup %5450  ;;  %v2902_v3 = vadd.f32 1e-06, %v2838_v63  ;;  %v2834_v53 = vld [vmem:[#allocation3 + $0xb8] sm:$0xff]  ;;  %v2085_v8 = vld [vmem:[#allocation3 + $0x170] sm:$0xff] }
  0xeb   :  { %3198 = vperm.xlu2 %5410, %v5443_v11   ;;  %2784 = vst.msk [vmem:[#allocation3 + $0x140] sm:$0xff] %vm82_vm0, %v2719_v18  ;;  %v5453_v45 = vpop.eup %5452  ;;  %v2841_v17 = vld [vmem:[#allocation3 + $0xf0] sm:$0xff] }
  0xec   :  { %2783 = vst.msk [vmem:[#allocation3 + $0x138] sm:$0xff] %vm82_vm0, %v2718_v21  ;;  %v5455_v18 = vpop.eup %5454  ;;  %v2898_v21 = vadd.f32 1e-06, %v2834_v53  ;;  %5458 = vrcp.f32 %v2902_v3 }
  0xed   :  { %3203 = vperm.xlu1 %5409, %v5445_v19   ;;  %v5457_v27 = vpop.eup %5456  ;;  %5460 = vrcp.f32 %v2897_v5 }
  0xee   :  { %v2583_v34 = vpop.xlane.xlu2 %2582  ;;  %v1604_v35 = vpop.f32.mrf.mxu2  ;;  %5462 = vrcp.f32 %v2898_v21 }
  0xef   :  { %v2723_v41 = vadd.f32 %v2583_v34, %v2083_v28  ;;  %v1605_v42 = vadd.f32 %v1604_v35, %v1436_v16  ;;  %v1773_v25 = vpop.f32.mrf.mxu3  ;;  %v1269_v47 = vpop.f32.mrf.mxu0  ;;  %v2084_v16 = vld [vmem:[#allocation3 + $0x168] sm:$0xff]  ;;  %v2089_v34 = vld [vmem:[#allocation3 + $0x190] sm:$0xff] }
  0xf0   :  { %v1438_v51 = vpop.f32.mrf.mxu1  ;;  %v2578_v56 = vpop.xlane.xlu1 %2577  ;;  %v4841_v35 = vld [vmem:[%s9221_s0 + $0x1c8] sm:$0xf] }
  0xf1   :  { %2788 = vst.msk [vmem:[#allocation3 + $0x160] sm:$0xff] %vm82_vm0, %v2723_v41  ;;  %v6830_v7 = vadd.f32 %v1773_v25, %v1605_v42  ;;  %v1439_v57 = vadd.f32 %v1438_v51, %v1269_v47  ;;  %1308 = vmatmul.bf16.gmra.mxu0 %v4818_v52  ;;  %v2573_v58 = vpop.xlane.xlu0 %2572  ;;  %v2722_v60 = vadd.f32 %v2578_v56, %v2082_v39  ;;  %v2905_v52 = vadd.f32 1e-06, %v2841_v17  ;;  %v5304_v39 = vld [vmem:[%s9221_s0 + $0x1cc] sm:$0xf]  ;;  %v2837_v41 = vld [vmem:[#allocation3 + $0xd0] sm:$0xff] }
  0xf2   :  { %3238 = vperm.xlu0 %5411, %v5447_v40   ;;  %1477 = vmatmul.bf16.gmra.mxu1 %v4822_v36  ;;  %v2721_v62 = vadd.f32 %v2573_v58, %v2081_v32  ;;  %v5306_v36 = vld [vmem:[%s9221_s0 + $0x1d4] sm:$0xf0]  ;;  %v4843_v40 = vld [vmem:[%s9221_s0 + $0x1d8] sm:$0xf0]  ;;  %v4838_v47 = vor.u32 %v5303_v31, %v4835_v33  ;;  %v2088_v32 = vld [vmem:[#allocation3 + $0x188] sm:$0xff] }
  0xf3   :  { %3213 = vperm.xlu2 %5410, %v5449_v20   ;;  %1646 = vmatmul.bf16.gmra.mxu2 %v4826_v48  ;;  %2787 = vst.msk [vmem:[#allocation3 + $0x158] sm:$0xff] %vm82_vm0, %v2722_v60  ;;  %v2900_v48 = vadd.f32 1e-06, %v2836_v43  ;;  %v5459_v20 = vpop.eup %5458  ;;  %v2087_v58 = vld [vmem:[#allocation3 + $0x180] sm:$0xff]  ;;  %v2901_v63 = vadd.f32 1e-06, %v2837_v41  ;;  %5464 = vrcp.f32 %v2905_v52 }
  0xf4   :  { %1815 = vmatmul.bf16.gmra.mxu3 %v4830_v54  ;;  %2786 = vst.msk [vmem:[#allocation3 + $0x150] sm:$0xff] %vm82_vm0, %v2721_v62  ;;  %v5461_v60 = vpop.eup %5460  ;;  %v4846_v62 = vor.u32 %v5304_v39, %v4843_v40  ;;  %v5309_v39 = vld [vmem:[%s9221_s0 + $0x1ec] sm:$0xf0]  ;;  %v5307_v41 = vld [vmem:[%s9221_s0 + $0x1e4] sm:$0xf] }
  0xf5   :  { %3218 = vperm.xlu1 %5409, %v5451_v61   ;;  %5466 = vrcp.f32 %v2900_v48  ;;  %v4857_v48 = vld [vmem:[%s9221_s0 + $0x1e8] sm:$0xf] }
  0xf6   :  { %v2598_v2 = vpop.xlane.xlu2 %2597  ;;  %v1607_v59 = vpop.f32.mrf.mxu2  ;;  %5468 = vrcp.f32 %v2901_v63 }
  0xf7   :  { %v2726_v11 = vadd.f32 %v2598_v2, %v2086_v1  ;;  %v1608_v10 = vadd.f32 %v1607_v59, %v1439_v57  ;;  %v1776_v12 = vpop.f32.mrf.mxu3  ;;  %v1271_v14 = vpop.f32.mrf.mxu0  ;;  %v4842_v57 = vor.u32 %v5306_v36, %v4841_v35 }
  0xf8   :  { %v1440_v19 = vpop.f32.mrf.mxu1  ;;  %v2593_v22 = vpop.xlane.xlu1 %2592 }
  0xf9   :  { %2791 = vst.msk [vmem:[#allocation3 + $0x178] sm:$0xff] %vm82_vm0, %v2726_v11  ;;  %v6835_v37 = vadd.f32 %v1776_v12, %v1608_v10  ;;  %v1441_v23 = vadd.f32 %v1440_v19, %v1271_v14  ;;  %v2588_v24 = vpop.xlane.xlu0 %2587  ;;  %v2725_v26 = vadd.f32 %v2593_v22, %v2085_v8  ;;  %v5463_v59 = vpop.eup %5462  ;;  %v2844_v8 = vld [vmem:[#allocation3 + $0x108] sm:$0xff] }
  0xfa   :  { %3253 = vperm.xlu0 %5411, %v5453_v45   ;;  %v2724_v28 = vadd.f32 %v2588_v24, %v2084_v16  ;;  %v2839_v45 = vld [vmem:[#allocation3 + $0xe0] sm:$0xff]  ;;  %v2092_v11 = vld [vmem:[#allocation3 + $0x1a8] sm:$0xff]  ;;  %v2908_v10 = vadd.f32 1e-06, %v2844_v8  ;;  %v5465_v19 = vpop.eup %5464 }
  0xfb   :  { %3228 = vperm.xlu2 %5410, %v5455_v18   ;;  %2790 = vst.msk [vmem:[#allocation3 + $0x170] sm:$0xff] %vm82_vm0, %v2725_v26  ;;  %v2840_v12 = vld [vmem:[#allocation3 + $0xe8] sm:$0xff]  ;;  %v2903_v17 = vadd.f32 1e-06, %v2839_v45  ;;  %v2091_v18 = vld [vmem:[#allocation3 + $0x1a0] sm:$0xff]  ;;  %v2090_v26 = vld [vmem:[#allocation3 + $0x198] sm:$0xff] }
  0xfc   :  { %2789 = vst.msk [vmem:[#allocation3 + $0x168] sm:$0xff] %vm82_vm0, %v2724_v28  ;;  %v5467_v28 = vpop.eup %5466  ;;  %v2904_v30 = vadd.f32 1e-06, %v2840_v12  ;;  %5470 = vrcp.f32 %v2908_v10 }
  0xfd   :  { %3233 = vperm.xlu1 %5409, %v5457_v27   ;;  %v2847_v27 = vld [vmem:[#allocation3 + $0x120] sm:$0xff]  ;;  %v5469_v35 = vpop.eup %5468  ;;  %5472 = vrcp.f32 %v2903_v17 }
  0xfe   :  { %v2613_v42 = vpop.xlane.xlu2 %2612  ;;  %v1609_v25 = vpop.f32.mrf.mxu2  ;;  %v2911_v40 = vadd.f32 1e-06, %v2847_v27  ;;  %5474 = vrcp.f32 %v2904_v30  ;;  %v2097_v30 = vld [vmem:[#allocation3 + $0x1d0] sm:$0xff] }
  0xff   :  { %v2729_v51 = vadd.f32 %v2613_v42, %v2089_v34  ;;  %v1610_v54 = vadd.f32 %v1609_v25, %v1441_v23  ;;  %v1778_v55 = vpop.f32.mrf.mxu3  ;;  %v1274_v56 = vpop.f32.mrf.mxu0  ;;  %v4851_v42 = vld [vmem:[%s9221_s0 + $0x1f0] sm:$0xf0]  ;;  %v2842_v25 = vld [vmem:[#allocation3 + $0xf8] sm:$0xff] }
 0x100   :  { %v1443_v61 = vpop.f32.mrf.mxu1  ;;  %v2608_v0 = vpop.xlane.xlu1 %2607  ;;  %5476 = vrcp.f32 %v2911_v40 }
 0x101   :  { %2794 = vst.msk [vmem:[#allocation3 + $0x190] sm:$0xff] %vm82_vm0, %v2729_v51  ;;  %v6864_v1 = vadd.f32 %v1778_v55, %v1610_v54  ;;  %v1444_v3 = vadd.f32 %v1443_v61, %v1274_v56  ;;  %1313 = vmatmul.bf16.gmra.mxu0 %v4834_v38  ;;  %v2603_v53 = vpop.xlane.xlu0 %2602  ;;  %v2728_v2 = vadd.f32 %v2608_v0, %v2088_v32  ;;  %v4849_v38 = vld [vmem:[%s9221_s0 + $0x1e0] sm:$0xf]  ;;  %v5310_v32 = vld [vmem:[%s9221_s0 + $0x1f4] sm:$0xf0] }
 0x102   :  { %3268 = vperm.xlu0 %5411, %v5459_v20   ;;  %1482 = vmatmul.bf16.gmra.mxu1 %v4838_v47  ;;  %v2727_v5 = vadd.f32 %v2603_v53, %v2087_v58  ;;  %v2095_v47 = vld [vmem:[#allocation3 + $0x1c0] sm:$0xff]  ;;  %v4850_v20 = vor.u32 %v5309_v39, %v4849_v38  ;;  %v5308_v51 = vld [vmem:[%s9221_s0 + $0x1ec] sm:$0xf]  ;;  %v4859_v54 = vld [vmem:[%s9221_s0 + $0x1f8] sm:$0xf0]  ;;  %v4854_v58 = vor.u32 %v5307_v41, %v4851_v42 }
 0x103   :  { %3243 = vperm.xlu2 %5410, %v5461_v60   ;;  %1651 = vmatmul.bf16.gmra.mxu2 %v4842_v57  ;;  %2793 = vst.msk [vmem:[#allocation3 + $0x188] sm:$0xff] %vm82_vm0, %v2728_v2  ;;  %v2843_v55 = vld [vmem:[#allocation3 + $0x100] sm:$0xff]  ;;  %v2906_v60 = vadd.f32 1e-06, %v2842_v25  ;;  %v2094_v61 = vld [vmem:[#allocation3 + $0x1b8] sm:$0xff]  ;;  %v4858_v2 = vor.u32 %v5310_v32, %v4857_v48  ;;  %v4862_v45 = vor.u32 %v5308_v51, %v4859_v54  ;;  %v2853_v38 = vld [vmem:[#allocation3 + $0x150] sm:$0xff] }
 0x104   :  { %1820 = vmatmul.bf16.gmra.mxu3 %v4846_v62  ;;  %2792 = vst.msk [vmem:[#allocation3 + $0x180] sm:$0xff] %vm82_vm0, %v2727_v5  ;;  %v5471_v62 = vpop.eup %5470  ;;  %v4865_v54 = vld [vmem:[%s9221_s0 + $0x200] sm:$0xf] }
 0x105   :  { %3248 = vperm.xlu1 %5409, %v5463_v59   ;;  %v2093_v59 = vld [vmem:[#allocation3 + $0x1b0] sm:$0xff]  ;;  %v5473_v5 = vpop.eup %5472  ;;  %5478 = vrcp.f32 %v2906_v60  ;;  %v2848_v60 = vld [vmem:[#allocation3 + $0x128] sm:$0xff] }
 0x106   :  { %v2628_v14 = vpop.xlane.xlu2 %2627  ;;  %v1612_v16 = vpop.f32.mrf.mxu2 }
 0x107   :  { %v2732_v21 = vadd.f32 %v2628_v14, %v2092_v11  ;;  %v1613_v22 = vadd.f32 %v1612_v16, %v1444_v3  ;;  %v1781_v23 = vpop.f32.mrf.mxu3  ;;  %v1276_v24 = vpop.f32.mrf.mxu0  ;;  %v2907_v11 = vadd.f32 1e-06, %v2843_v55  ;;  %v5313_v55 = vld [vmem:[%s9221_s0 + $0x20c] sm:$0xf0] }
 0x108   :  { %v1445_v29 = vpop.f32.mrf.mxu1  ;;  %v2623_v52 = vpop.xlane.xlu1 %2622 }
 0x109   :  { %2797 = vst.msk [vmem:[#allocation3 + $0x1a8] sm:$0xff] %vm82_vm0, %v2732_v21  ;;  %v6869_v31 = vadd.f32 %v1781_v23, %v1613_v22  ;;  %v1446_v33 = vadd.f32 %v1445_v29, %v1276_v24  ;;  %v2618_v43 = vpop.xlane.xlu0 %2617  ;;  %v2731_v34 = vadd.f32 %v2623_v52, %v2091_v18  ;;  %v5475_v18 = vpop.eup %5474  ;;  %v2850_v21 = vld [vmem:[#allocation3 + $0x138] sm:$0xff]  ;;  %v2845_v22 = vld [vmem:[#allocation3 + $0x110] sm:$0xff]  ;;  %5480 = vrcp.f32 %v2907_v11  ;;  %v2100_v11 = vld [vmem:[#allocation3 + $0x1e8] sm:$0xff] }
 0x10a   :  { %3283 = vperm.xlu0 %5411, %v5465_v19   ;;  %v2730_v36 = vadd.f32 %v2618_v43, %v2090_v26  ;;  %v2098_v23 = vld [vmem:[#allocation3 + $0x1d8] sm:$0xff]  ;;  %v2914_v24 = vadd.f32 1e-06, %v2850_v21  ;;  %v2909_v29 = vadd.f32 1e-06, %v2845_v22  ;;  %v5477_v52 = vpop.eup %5476  ;;  %v2099_v21 = vld [vmem:[#allocation3 + $0x1e0] sm:$0xff] }
 0x10b   :  { %3258 = vperm.xlu2 %5410, %v5467_v28   ;;  %2796 = vst.msk [vmem:[#allocation3 + $0x1a0] sm:$0xff] %vm82_vm0, %v2731_v34  ;;  %v2846_v26 = vld [vmem:[#allocation3 + $0x118] sm:$0xff]  ;;  %v5479_v39 = vpop.eup %5478 }
 0x10c   :  { %2795 = vst.msk [vmem:[#allocation3 + $0x198] sm:$0xff] %vm82_vm0, %v2730_v36  ;;  %v2096_v36 = vld [vmem:[#allocation3 + $0x1c8] sm:$0xff]  ;;  %v2910_v41 = vadd.f32 1e-06, %v2846_v26  ;;  %5482 = vrcp.f32 %v2914_v24 }
 0x10d   :  { %3263 = vperm.xlu1 %5409, %v5469_v35   ;;  %5484 = vrcp.f32 %v2909_v29 }
 0x10e   :  { %v2643_v56 = vpop.xlane.xlu2 %2642  ;;  %v1614_v57 = vpop.f32.mrf.mxu2  ;;  %5486 = vrcp.f32 %v2910_v41 }
 0x10f   :  { %v2735_v63 = vadd.f32 %v2643_v56, %v2095_v47  ;;  %v1615_v0 = vadd.f32 %v1614_v57, %v1446_v33  ;;  %v1783_v3 = vpop.f32.mrf.mxu3  ;;  %v1279_v53 = vpop.f32.mrf.mxu0  ;;  %v2917_v56 = vadd.f32 1e-06, %v2853_v38  ;;  %v5311_v57 = vld [vmem:[%s9221_s0 + $0x204] sm:$0xf]  ;;  %v2852_v38 = vld [vmem:[#allocation3 + $0x148] sm:$0xff] }
 0x110   :  { %v1448_v8 = vpop.f32.mrf.mxu1  ;;  %v2638_v10 = vpop.xlane.xlu1 %2637 }
 0x111   :  { %2800 = vst.msk [vmem:[#allocation3 + $0x1c0] sm:$0xff] %vm82_vm0, %v2735_v63  ;;  %v6898_v12 = vadd.f32 %v1783_v3, %v1615_v0  ;;  %v1449_v14 = vadd.f32 %v1448_v8, %v1279_v53  ;;  %1318 = vmatmul.bf16.gmra.mxu0 %v4850_v20  ;;  %v2633_v16 = vpop.xlane.xlu0 %2632  ;;  %v2734_v17 = vadd.f32 %v2638_v10, %v2094_v61  ;;  %v5481_v20 = vpop.eup %5480  ;;  %v2101_v61 = vld [vmem:[#allocation3 + $0x1f0] sm:$0xff]  ;;  %v5314_v63 = vld [vmem:[%s9221_s0 + $0x214] sm:$0xf0]  ;;  %v5312_v3 = vld [vmem:[%s9221_s0 + $0x20c] sm:$0xf]  ;;  %5488 = vrcp.f32 %v2917_v56 }
 0x112   :  { %3298 = vperm.xlu0 %5411, %v5471_v62   ;;  %1487 = vmatmul.bf16.gmra.mxu1 %v4854_v58  ;;  %v2733_v19 = vadd.f32 %v2633_v16, %v2093_v59  ;;  %v4867_v58 = vld [vmem:[%s9221_s0 + $0x210] sm:$0xf0]  ;;  %v4873_v62 = vld [vmem:[%s9221_s0 + $0x208] sm:$0xf]  ;;  %v4866_v0 = vor.u32 %v5313_v55, %v4865_v54  ;;  %v4875_v53 = vld [vmem:[%s9221_s0 + $0x218] sm:$0xf0]  ;;  %v5483_v10 = vpop.eup %5482 }
 0x113   :  { %3273 = vperm.xlu2 %5410, %v5473_v5   ;;  %1656 = vmatmul.bf16.gmra.mxu2 %v4858_v2  ;;  %2799 = vst.msk [vmem:[#allocation3 + $0x1b8] sm:$0xff] %vm82_vm0, %v2734_v17  ;;  %v2849_v2 = vld [vmem:[#allocation3 + $0x130] sm:$0xff]  ;;  %v4870_v8 = vor.u32 %v5311_v57, %v4867_v58  ;;  %v5485_v22 = vpop.eup %5484  ;;  %v4878_v24 = vor.u32 %v5312_v3, %v4875_v53  ;;  %v2916_v55 = vadd.f32 1e-06, %v2852_v38  ;;  %v5315_v53 = vld [vmem:[%s9221_s0 + $0x224] sm:$0xf] }
 0x114   :  { %1825 = vmatmul.bf16.gmra.mxu3 %v4862_v45  ;;  %2798 = vst.msk [vmem:[#allocation3 + $0x1b0] sm:$0xff] %vm82_vm0, %v2733_v19  ;;  %v2912_v45 = vadd.f32 1e-06, %v2848_v60  ;;  %v4874_v19 = vor.u32 %v5314_v63, %v4873_v62  ;;  %v2913_v26 = vadd.f32 1e-06, %v2849_v2 }
 0x115   :  { %3278 = vperm.xlu1 %5409, %v5475_v18   ;;  %v4881_v63 = vld [vmem:[%s9221_s0 + $0x220] sm:$0xf]  ;;  %v4883_v2 = vld [vmem:[%s9221_s0 + $0x230] sm:$0xf0] }
 0x116   :  { %v2658_v27 = vpop.xlane.xlu2 %2657  ;;  %v1617_v28 = vpop.f32.mrf.mxu2  ;;  %5490 = vrcp.f32 %v2912_v45 }
 0x117   :  { %v2738_v33 = vadd.f32 %v2658_v27, %v2098_v23  ;;  %v1618_v43 = vadd.f32 %v1617_v28, %v1449_v14  ;;  %v1786_v34 = vpop.f32.mrf.mxu3  ;;  %v1281_v35 = vpop.f32.mrf.mxu0  ;;  %5492 = vrcp.f32 %v2913_v26 }
 0x118   :  { %v1450_v40 = vpop.f32.mrf.mxu1  ;;  %v2653_v42 = vpop.xlane.xlu1 %2652 }
 0x119   :  { %2803 = vst.msk [vmem:[#allocation3 + $0x1d8] sm:$0xff] %vm82_vm0, %v2738_v33  ;;  %v6903_v25 = vadd.f32 %v1786_v34, %v1618_v43  ;;  %v1451_v47 = vadd.f32 %v1450_v40, %v1281_v35  ;;  %v2648_v48 = vpop.xlane.xlu0 %2647  ;;  %v2737_v32 = vadd.f32 %v2653_v42, %v2097_v30  ;;  %v5487_v33 = vpop.eup %5486  ;;  %v2856_v34 = vld [vmem:[#allocation3 + $0x168] sm:$0xff]  ;;  %v2851_v35 = vld [vmem:[#allocation3 + $0x140] sm:$0xff] }
 0x11a   :  { %3313 = vperm.xlu0 %5411, %v5477_v52   ;;  %v2736_v51 = vadd.f32 %v2648_v48, %v2096_v36  ;;  %v2920_v36 = vadd.f32 1e-06, %v2856_v34  ;;  %v2915_v40 = vadd.f32 1e-06, %v2851_v35  ;;  %v5489_v41 = vpop.eup %5488  ;;  %v2862_v34 = vld [vmem:[#allocation3 + $0x198] sm:$0xff]  ;;  %v2857_v35 = vld [vmem:[#allocation3 + $0x170] sm:$0xff] }
 0x11b   :  { %3288 = vperm.xlu2 %5410, %v5479_v39   ;;  %2802 = vst.msk [vmem:[#allocation3 + $0x1d0] sm:$0xff] %vm82_vm0, %v2737_v32  ;;  %v2102_v32 = vld [vmem:[#allocation3 + $0x1f8] sm:$0xff]  ;;  %v2926_v38 = vadd.f32 1e-06, %v2862_v34 }
 0x11c   :  { %2801 = vst.msk [vmem:[#allocation3 + $0x1c8] sm:$0xff] %vm82_vm0, %v2736_v51  ;;  %v5491_v51 = vpop.eup %5490  ;;  %5494 = vrcp.f32 %v2920_v36 }
 0x11d   :  { %3293 = vperm.xlu1 %5409, %v5481_v20   ;;  %v2859_v20 = vld [vmem:[#allocation3 + $0x180] sm:$0xff]  ;;  %v5493_v60 = vpop.eup %5492  ;;  %5496 = vrcp.f32 %v2915_v40 }
 0x11e   :  { %v2673_v59 = vpop.xlane.xlu2 %2672  ;;  %v1619_v5 = vpop.f32.mrf.mxu2  ;;  %v2923_v3 = vadd.f32 1e-06, %v2859_v20  ;;  %5498 = vrcp.f32 %v2916_v55 }
 0x11f   :  { %v2741_v14 = vadd.f32 %v2673_v59, %v2101_v61  ;;  %v1620_v16 = vadd.f32 %v1619_v5, %v1451_v47  ;;  %v1788_v17 = vpop.f32.mrf.mxu3  ;;  %v1284_v18 = vpop.f32.mrf.mxu0  ;;  %v2854_v59 = vld [vmem:[#allocation3 + $0x158] sm:$0xff]  ;;  %v4889_v5 = vld [vmem:[%s9221_s0 + $0x228] sm:$0xf] }
 0x120   :  { %v1453_v23 = vpop.f32.mrf.mxu1  ;;  %v2668_v27 = vpop.xlane.xlu1 %2667  ;;  %5500 = vrcp.f32 %v2923_v3  ;;  %v5319_v3 = vld [vmem:[%s9221_s0 + $0x244] sm:$0xf] }
 0x121   :  { %2806 = vst.msk [vmem:[#allocation3 + $0x1f0] sm:$0xff] %vm82_vm0, %v2741_v14  ;;  %v6932_v28 = vadd.f32 %v1788_v17, %v1620_v16  ;;  %v1454_v29 = vadd.f32 %v1453_v23, %v1284_v18  ;;  %1323 = vmatmul.bf16.gmra.mxu0 %v4866_v0  ;;  %v2663_v30 = vpop.xlane.xlu0 %2662  ;;  %v2740_v52 = vadd.f32 %v2668_v27, %v2100_v11  ;;  %v5317_v0 = vld [vmem:[%s9221_s0 + $0x22c] sm:$0xf0]  ;;  %v5316_v11 = vld [vmem:[%s9221_s0 + $0x22c] sm:$0xf]  ;;  %v2855_v14 = vld [vmem:[#allocation3 + $0x160] sm:$0xff] }
 0x122   :  { %3328 = vperm.xlu0 %5411, %v5483_v10   ;;  %1492 = vmatmul.bf16.gmra.mxu1 %v4870_v8  ;;  %v2739_v43 = vadd.f32 %v2663_v30, %v2099_v21  ;;  %v5318_v8 = vld [vmem:[%s9221_s0 + $0x234] sm:$0xf0]  ;;  %v4882_v45 = vor.u32 %v5317_v0, %v4881_v63  ;;  %v4891_v10 = vld [vmem:[%s9221_s0 + $0x238] sm:$0xf0]  ;;  %v4886_v17 = vor.u32 %v5315_v53, %v4883_v2  ;;  %v2918_v18 = vadd.f32 1e-06, %v2854_v59 }
 0x123   :  { %3303 = vperm.xlu2 %5410, %v5485_v22   ;;  %1661 = vmatmul.bf16.gmra.mxu2 %v4874_v19  ;;  %2805 = vst.msk [vmem:[#allocation3 + $0x1e8] sm:$0xff] %vm82_vm0, %v2740_v52  ;;  %v5495_v19 = vpop.eup %5494  ;;  %v2919_v30 = vadd.f32 1e-06, %v2855_v14  ;;  %v4897_v63 = vld [vmem:[%s9221_s0 + $0x240] sm:$0xf]  ;;  %v2860_v2 = vld [vmem:[#allocation3 + $0x188] sm:$0xff] }
 0x124   :  { %1830 = vmatmul.bf16.gmra.mxu3 %v4878_v24  ;;  %2804 = vst.msk [vmem:[#allocation3 + $0x1e0] sm:$0xff] %vm82_vm0, %v2739_v43  ;;  %v4890_v24 = vor.u32 %v5318_v8, %v4889_v5  ;;  %v5497_v26 = vpop.eup %5496  ;;  %5502 = vrcp.f32 %v2918_v18  ;;  %v5321_v0 = vld [vmem:[%s9221_s0 + $0x24c] sm:$0xf0]  ;;  %v4899_v53 = vld [vmem:[%s9221_s0 + $0x250] sm:$0xf0] }
 0x125   :  { %3308 = vperm.xlu1 %5409, %v5487_v33   ;;  %v5499_v43 = vpop.eup %5498  ;;  %5504 = vrcp.f32 %v2919_v30  ;;  %v4905_v5 = vld [vmem:[%s9221_s0 + $0x248] sm:$0xf]  ;;  %v5322_v8 = vld [vmem:[%s9221_s0 + $0x254] sm:$0xf0]  ;;  %v4907_v14 = vld [vmem:[%s9221_s0 + $0x258] sm:$0xf0] }
 0x126   :  { %v1622_v39 = vpop.f32.mrf.mxu2  ;;  %v6938_v61 = vpop.permute.xlu2 %3138  ;;  %5506 = vrcp.f32 %v2926_v38 }
 0x127   :  { %v1623_v42 = vadd.f32 %v1622_v39, %v1454_v29  ;;  %v1791_v47 = vpop.f32.mrf.mxu3  ;;  %v1286_v48 = vpop.f32.mrf.mxu0  ;;  %v4894_v29 = vor.u32 %v5316_v11, %v4891_v10  ;;  %v2858_v39 = vld [vmem:[#allocation3 + $0x178] sm:$0xff]  ;;  %v4898_v11 = vor.u32 %v5321_v0, %v4897_v63  ;;  %v5320_v10 = vld [vmem:[%s9221_s0 + $0x24c] sm:$0xf] }
 0x128   :  { %v1455_v54 = vpop.f32.mrf.mxu1  ;;  %v2922_v55 = vadd.f32 1e-06, %v2858_v39 }
 0x129   :  { %v6936_v56 = vadd.f32 %v1791_v47, %v1623_v42  ;;  %v1456_v57 = vadd.f32 %v1455_v54, %v1286_v48  ;;  %v2678_v58 = vpop.xlane.xlu0 %2677  ;;  %v5501_v42 = vpop.eup %5500 }
 0x12a   :  { %3343 = vperm.xlu0 %5411, %v5489_v41   ;;  %v2742_v62 = vadd.f32 %v2678_v58, %v2102_v32  ;;  %v2921_v41 = vadd.f32 1e-06, %v2857_v35  ;;  %v5503_v20 = vpop.eup %5502 }
 0x12b   :  { %3318 = vperm.xlu2 %5410, %v5491_v51  }
 0x12c   :  { %2807 = vst.msk [vmem:[#allocation3 + $0x1f8] sm:$0xff] %vm82_vm0, %v2742_v62  ;;  %v5505_v62 = vpop.eup %5504  ;;  %5508 = vrcp.f32 %v2921_v41  ;;  %v2863_v41 = vld [vmem:[#allocation3 + $0x1a0] sm:$0xff] }
 0x12d   :  { %3323 = vperm.xlu1 %5409, %v5493_v60   ;;  %v2865_v60 = vld [vmem:[#allocation3 + $0x1b0] sm:$0xff]  ;;  %5510 = vrcp.f32 %v2922_v55 }
 0x12e   :  { %v1624_v16 = vpop.f32.mrf.mxu2  ;;  %v6967_v36 = vpop.permute.xlu2 %3148 }
 0x12f   :  { %v1625_v21 = vadd.f32 %v1624_v16, %v1456_v57  ;;  %v1793_v22 = vpop.f32.mrf.mxu3  ;;  %v1289_v23 = vpop.f32.mrf.mxu0  ;;  %v2861_v16 = vld [vmem:[#allocation3 + $0x190] sm:$0xff] }
 0x130   :  { %v1458_v27 = vpop.f32.mrf.mxu1  ;;  %v2925_v34 = vadd.f32 1e-06, %v2861_v16  ;;  %v4915_v16 = vld [vmem:[%s9221_s0 + $0x270] sm:$0xf0] }
 0x131   :  { %v6965_v52 = vadd.f32 %v1793_v22, %v1625_v21  ;;  %v1459_v33 = vadd.f32 %v1458_v27, %v1289_v23  ;;  %1328 = vmatmul.bf16.gmra.mxu0 %v4882_v45  ;;  %v2929_v45 = vadd.f32 1e-06, %v2865_v60  ;;  %v2924_v21 = vadd.f32 1e-06, %v2860_v2  ;;  %v5507_v22 = vpop.eup %5506 }
 0x132   :  { %3358 = vperm.xlu0 %5411, %v5495_v19   ;;  %1497 = vmatmul.bf16.gmra.mxu1 %v4886_v17  ;;  %v4902_v19 = vor.u32 %v5319_v3, %v4899_v53  ;;  %v4906_v27 = vor.u32 %v5322_v8, %v4905_v5  ;;  %v2871_v8 = vld [vmem:[#allocation3 + $0x1e0] sm:$0xff] }
 0x133   :  { %3333 = vperm.xlu2 %5410, %v5497_v26   ;;  %1666 = vmatmul.bf16.gmra.mxu2 %v4890_v24  ;;  %5512 = vrcp.f32 %v2929_v45 }
 0x134   :  { %1835 = vmatmul.bf16.gmra.mxu3 %v4894_v29  ;;  %v5509_v29 = vpop.eup %5508  ;;  %5514 = vrcp.f32 %v2924_v21  ;;  %v4921_v21 = vld [vmem:[%s9221_s0 + $0x268] sm:$0xf] }
 0x135   :  { %3338 = vperm.xlu1 %5409, %v5499_v43   ;;  %v4910_v43 = vor.u32 %v5320_v10, %v4907_v14  ;;  %v5511_v39 = vpop.eup %5510  ;;  %5516 = vrcp.f32 %v2925_v34  ;;  %v5325_v10 = vld [vmem:[%s9221_s0 + $0x26c] sm:$0xf0]  ;;  %v5323_v14 = vld [vmem:[%s9221_s0 + $0x264] sm:$0xf] }
 0x136   :  { %v1627_v40 = vpop.f32.mrf.mxu2  ;;  %v6999_v17 = vpop.permute.xlu2 %3158 }
 0x137   :  { %v6969_v47 = vpop.permute.xlu1 %3133  ;;  %v1628_v48 = vadd.f32 %v1627_v40, %v1459_v33  ;;  %v1796_v32 = vpop.f32.mrf.mxu3  ;;  %v2868_v40 = vld [vmem:[#allocation3 + $0x1c8] sm:$0xff] }
 0x138   :  { %v1291_v51 = vpop.f32.mrf.mxu0  ;;  %v1460_v54 = vpop.f32.mrf.mxu1 }
 0x139   :  { %v6971_v57 = vadd.f32 %v1796_v32, %v1628_v48  ;;  %v1461_v58 = vadd.f32 %v1460_v54, %v1291_v51  ;;  %v2932_v48 = vadd.f32 1e-06, %v2868_v40  ;;  %v2864_v32 = vld [vmem:[#allocation3 + $0x1a8] sm:$0xff]  ;;  %v2927_v51 = vadd.f32 1e-06, %v2863_v41  ;;  %v5513_v54 = vpop.eup %5512 }
 0x13a   :  { %3373 = vperm.xlu0 %5411, %v5501_v42   ;;  %v2928_v3 = vadd.f32 1e-06, %v2864_v32 }
 0x13b   :  { %3348 = vperm.xlu2 %5410, %v5503_v20   ;;  %5518 = vrcp.f32 %v2932_v48 }
 0x13c   :  { %v6985_v59 = vpop.permute.xlu0 %3143  ;;  %5520 = vrcp.f32 %v2927_v51 }
 0x13d   :  { %3353 = vperm.xlu1 %5409, %v5505_v62   ;;  %v5515_v62 = vpop.eup %5514  ;;  %5522 = vrcp.f32 %v2928_v3 }
 0x13e   :  { %v1629_v18 = vpop.f32.mrf.mxu2  ;;  %v7009_v53 = vpop.permute.xlu2 %3168 }
 0x13f   :  { %v7001_v23 = vpop.permute.xlu1 %3153  ;;  %v1630_v24 = vadd.f32 %v1629_v18, %v1461_v58  ;;  %v1798_v26 = vpop.f32.mrf.mxu3  ;;  %v2866_v18 = vld [vmem:[#allocation3 + $0x1b8] sm:$0xff] }
 0x140   :  { %v1294_v30 = vpop.f32.mrf.mxu0  ;;  %v1463_v33 = vpop.f32.mrf.mxu1  ;;  %v2930_v34 = vadd.f32 1e-06, %v2866_v18 }
 0x141   :  { %v7003_v35 = vadd.f32 %v1798_v26, %v1630_v24  ;;  %v1464_v38 = vadd.f32 %v1463_v33, %v1294_v30  ;;  %1333 = vmatmul.bf16.gmra.mxu0 %v4898_v11  ;;  %v5517_v45 = vpop.eup %5516  ;;  %v4913_v11 = vld [vmem:[%s9221_s0 + $0x260] sm:$0xf]  ;;  %v2935_v24 = vadd.f32 1e-06, %v2871_v8 }
 0x142   :  { %3388 = vperm.xlu0 %5411, %v5507_v22   ;;  %1502 = vmatmul.bf16.gmra.mxu1 %v4902_v19  ;;  %v5326_v22 = vld [vmem:[%s9221_s0 + $0x274] sm:$0xf0]  ;;  %v4914_v26 = vor.u32 %v5325_v10, %v4913_v11  ;;  %v2867_v30 = vld [vmem:[#allocation3 + $0x1c0] sm:$0xff] }
 0x143   :  { %3363 = vperm.xlu2 %5410, %v5509_v29   ;;  %1671 = vmatmul.bf16.gmra.mxu2 %v4906_v27  ;;  %v5324_v27 = vld [vmem:[%s9221_s0 + $0x26c] sm:$0xf]  ;;  %v4923_v29 = vld [vmem:[%s9221_s0 + $0x278] sm:$0xf0]  ;;  %v4922_v48 = vor.u32 %v5326_v22, %v4921_v21  ;;  %5524 = vrcp.f32 %v2935_v24 }
 0x144   :  { %v7005_v42 = vpop.permute.xlu0 %3178  ;;  %1840 = vmatmul.bf16.gmra.mxu3 %v4910_v43  ;;  %v4918_v43 = vor.u32 %v5323_v14, %v4915_v16  ;;  %5526 = vrcp.f32 %v2930_v34  ;;  %v2870_v11 = vld [vmem:[#allocation3 + $0x1d8] sm:$0xff]  ;;  %v4929_v34 = vld [vmem:[%s9221_s0 + $0x280] sm:$0xf] }
 0x145   :  { %3368 = vperm.xlu1 %5409, %v5511_v39  }
 0x146   :  { %v1632_v20 = vpop.f32.mrf.mxu2  ;;  %v7043_v3 = vpop.permute.xlu2 %3183 }
 0x147   :  { %v7007_v55 = vpop.permute.xlu1 %3163  ;;  %v1633_v58 = vadd.f32 %v1632_v20, %v1464_v38  ;;  %v1801_v60 = vpop.f32.mrf.mxu3 }
 0x148   :  { %v1296_v63 = vpop.f32.mrf.mxu0  ;;  %v1465_v0 = vpop.f32.mrf.mxu1 }
 0x149   :  { %v7011_v2 = vadd.f32 %v1801_v60, %v1633_v58  ;;  %v1466_v5 = vadd.f32 %v1465_v0, %v1296_v63  ;;  %v5519_v38 = vpop.eup %5518  ;;  %v2931_v58 = vadd.f32 1e-06, %v2867_v30  ;;  %v2874_v0 = vld [vmem:[#allocation3 + $0x1f8] sm:$0xff] }
 0x14a   :  { %3403 = vperm.xlu0 %5411, %v5513_v54   ;;  %v5521_v32 = vpop.eup %5520  ;;  %v4926_v54 = vor.u32 %v5324_v27, %v4923_v29  ;;  %v2934_v29 = vadd.f32 1e-06, %v2870_v11 }
 0x14b   :  { %9258 = vst [vmem:[#allocation4_spill] sm:$0xff] %v7011_v2  ;;  %3378 = vperm.xlu2 %5410, %v5515_v62   ;;  %v5523_v63 = vpop.eup %5522  ;;  %5528 = vrcp.f32 %v2931_v58  ;;  %v5328_v58 = vld [vmem:[%s9221_s0 + $0x28c] sm:$0xf] }
 0x14c   :  { %v7025_v19 = vpop.permute.xlu0 %3193  ;;  %v5525_v16 = vpop.eup %5524 }
 0x14d   :  { %3383 = vperm.xlu1 %5409, %v5517_v45   ;;  %v2938_v45 = vadd.f32 1e-06, %v2874_v0  ;;  %v5527_v24 = vpop.eup %5526 }
 0x14e   :  { %v1634_v33 = vpop.f32.mrf.mxu2 }
 0x14f   :  { %v7039_v39 = vpop.permute.xlu1 %3173  ;;  %v1635_v40 = vadd.f32 %v1634_v33, %v1466_v5  ;;  %v1803_v41 = vpop.f32.mrf.mxu3  ;;  %v2869_v5 = vld [vmem:[#allocation3 + $0x1d0] sm:$0xff]  ;;  %5530 = vrcp.f32 %v2938_v45 }
 0x150   :  { %v1299_v20 = vpop.f32.mrf.mxu0  ;;  %v1468_v51 = vpop.f32.mrf.mxu1  ;;  %v2933_v14 = vadd.f32 1e-06, %v2869_v5 }
 0x151   :  { %v7041_v60 = vadd.f32 %v1803_v41, %v1635_v40  ;;  %v1469_v62 = vadd.f32 %v1468_v51, %v1299_v20  ;;  %1338 = vmatmul.bf16.gmra.mxu0 %v4914_v26  ;;  %v5327_v40 = vld [vmem:[%s9221_s0 + $0x284] sm:$0xf]  ;;  %v4931_v41 = vld [vmem:[%s9221_s0 + $0x290] sm:$0xf0]  ;;  %v5330_v20 = vld [vmem:[%s9221_s0 + $0x294] sm:$0xf0]  ;;  %v7069_v51 = vpop.permute.xlu2 %3198 }
 0x152   :  { %3418 = vperm.xlu0 %5411, %v5519_v38   ;;  %1507 = vmatmul.bf16.gmra.mxu1 %v4918_v43  ;;  %v5529_v43 = vpop.eup %5528  ;;  %5532 = vrcp.f32 %v2933_v14  ;;  %v5329_v38 = vld [vmem:[%s9221_s0 + $0x28c] sm:$0xf0]  ;;  %v4934_v5 = vor.u32 %v5327_v40, %v4931_v41 }
 0x153   :  { %3393 = vperm.xlu2 %5410, %v5521_v32   ;;  %1676 = vmatmul.bf16.gmra.mxu2 %v4922_v48  ;;  %v2872_v48 = vld [vmem:[#allocation3 + $0x1e8] sm:$0xff]  ;;  %5534 = vrcp.f32 %v2934_v29 }
 0x154   :  { %1845 = vmatmul.bf16.gmra.mxu3 %v4926_v54  ;;  %v7045_v8 = vpop.permute.xlu0 %3208  ;;  %v4937_v32 = vld [vmem:[%s9221_s0 + $0x288] sm:$0xf]  ;;  %v4930_v54 = vor.u32 %v5329_v38, %v4929_v34  ;;  %v2936_v45 = vadd.f32 1e-06, %v2872_v48 }
 0x155   :  { %3398 = vperm.xlu1 %5409, %v5523_v63   ;;  %v2873_v63 = vld [vmem:[#allocation3 + $0x1f0] sm:$0xff]  ;;  %v5531_v11 = vpop.eup %5530 }
 0x156   :  { %v1637_v10 = vpop.f32.mrf.mxu2  ;;  %v2937_v29 = vadd.f32 1e-06, %v2873_v63  ;;  %5536 = vrcp.f32 %v2936_v45 }
 0x157   :  { %v7047_v18 = vpop.permute.xlu1 %3188  ;;  %v1638_v21 = vadd.f32 %v1637_v10, %v1469_v62  ;;  %v1806_v22 = vpop.f32.mrf.mxu3  ;;  %v4939_v62 = vld [vmem:[%s9221_s0 + $0x298] sm:$0xf0] }
 0x158   :  { %v1301_v26 = vpop.f32.mrf.mxu0  ;;  %v1470_v27 = vpop.f32.mrf.mxu1  ;;  %5538 = vrcp.f32 %v2937_v29 }
 0x159   :  { %v7049_v30 = vadd.f32 %v1806_v22, %v1638_v21  ;;  %v1471_v33 = vadd.f32 %v1470_v27, %v1301_v26  ;;  %v4938_v21 = vor.u32 %v5330_v20, %v4937_v32  ;;  %v5533_v22 = vpop.eup %5532  ;;  %v4942_v27 = vor.u32 %v5328_v58, %v4939_v62  ;;  %v7083_v40 = vpop.permute.xlu2 %3213 }
 0x15a   :  { %3433 = vperm.xlu0 %5411, %v5525_v16  }
 0x15b   :  { %9259 = vst [vmem:[#allocation5_spill] sm:$0xff] %v7049_v30  ;;  %3408 = vperm.xlu2 %5410, %v5527_v24   ;;  %v5535_v30 = vpop.eup %5534 }
 0x15c   :  { %v7077_v10 = vpop.permute.xlu0 %3223  ;;  %v5537_v32 = vpop.eup %5536 }
 0x15d   :  { %3413 = vperm.xlu1 %5409, %v5529_v43  }
 0x15e   :  { %v1639_v0 = vpop.f32.mrf.mxu2 }
 0x15f   :  { %v1640_v14 = vadd.f32 %v1639_v0, %v1471_v33  ;;  %v1808_v16 = vpop.f32.mrf.mxu3  ;;  %v7079_v43 = vpop.permute.xlu1 %3203 }
 0x160   :  { %v1304_v24 = vpop.f32.mrf.mxu0  ;;  %v1473_v26 = vpop.f32.mrf.mxu1 }
 0x161   :  { %v7081_v34 = vadd.f32 %v1808_v16, %v1640_v14  ;;  %v1474_v38 = vadd.f32 %v1473_v26, %v1304_v24  ;;  %1343 = vmatmul.bf16.gmra.mxu0 %v4930_v54  ;;  %v5539_v0 = vpop.eup %5538  ;;  %v4947_v14 = vld [vmem:[%s9221_s0 + $0x2b0] sm:$0xf0]  ;;  %v4953_v16 = vld [vmem:[%s9221_s0 + $0x2a8] sm:$0xf]  ;;  %v5332_v24 = vld [vmem:[%s9221_s0 + $0x2ac] sm:$0xf] }
 0x162   :  { %3448 = vperm.xlu0 %5411, %v5531_v11   ;;  %1512 = vmatmul.bf16.gmra.mxu1 %v4934_v5  ;;  %v4945_v5 = vld [vmem:[%s9221_s0 + $0x2a0] sm:$0xf]  ;;  %v5331_v11 = vld [vmem:[%s9221_s0 + $0x2a4] sm:$0xf]  ;;  %v4955_v26 = vld [vmem:[%s9221_s0 + $0x2b8] sm:$0xf0] }
 0x163   :  { %9260 = vst [vmem:[#allocation6_spill] sm:$0xff] %v7081_v34  ;;  %3423 = vperm.xlu2 %5410, %v5533_v22   ;;  %1681 = vmatmul.bf16.gmra.mxu2 %v4938_v21  ;;  %v5334_v21 = vld [vmem:[%s9221_s0 + $0x2b4] sm:$0xf0]  ;;  %v4950_v29 = vor.u32 %v5331_v11, %v4947_v14 }
 0x164   :  { %1850 = vmatmul.bf16.gmra.mxu3 %v4942_v27  ;;  %v7085_v62 = vpop.permute.xlu0 %3238 }
 0x165   :  { %3428 = vperm.xlu1 %5409, %v5535_v30   ;;  %v5333_v30 = vld [vmem:[%s9221_s0 + $0x2ac] sm:$0xf0] }
 0x166   :  { %v1642_v33 = vpop.f32.mrf.mxu2  ;;  %v4946_v22 = vor.u32 %v5333_v30, %v4945_v5 }
 0x167   :  { %v1643_v41 = vadd.f32 %v1642_v33, %v1474_v38  ;;  %v1811_v48 = vpop.f32.mrf.mxu3  ;;  %v7095_v45 = vpop.permute.xlu1 %3218 }
 0x168   :  { %v1306_v20 = vpop.f32.mrf.mxu0  ;;  %v1475_v58 = vpop.f32.mrf.mxu1 }
 0x169   :  { %v7087_v54 = vadd.f32 %v1811_v48, %v1643_v41  ;;  %v1476_v63 = vadd.f32 %v1475_v58, %v1306_v20  ;;  %v4954_v41 = vor.u32 %v5334_v21, %v4953_v16  ;;  %v4958_v20 = vor.u32 %v5332_v24, %v4955_v26  ;;  %v7115_v58 = vpop.permute.xlu2 %3228  ;;  %v4961_v26 = vld [vmem:[%s9221_s0 + $0x2c0] sm:$0xf] }
 0x16b   :  { %3438 = vperm.xlu2 %5410, %v5537_v32  }
 0x16c   :  { %v7119_v30 = vpop.permute.xlu0 %3253 }
 0x16d   :  { %3443 = vperm.xlu1 %5409, %v5539_v0  }
 0x16e   :  { %v1644_v27 = vpop.f32.mrf.mxu2 }
 0x16f   :  { %v1645_v38 = vadd.f32 %v1644_v27, %v1476_v63  ;;  %v1813_v33 = vpop.f32.mrf.mxu3  ;;  %v7121_v34 = vpop.permute.xlu1 %3233 }
 0x170   :  { %v1309_v48 = vpop.f32.mrf.mxu0  ;;  %v1478_v32 = vpop.f32.mrf.mxu1  ;;  %9262 = vst [vmem:[#allocation8_spill] sm:$0xff] %v7121_v34 }
 0x171   :  { %v7117_v0 = vadd.f32 %v1813_v33, %v1645_v38  ;;  %v1479_v5 = vadd.f32 %v1478_v32, %v1309_v48  ;;  %1348 = vmatmul.bf16.gmra.mxu0 %v4946_v22  ;;  %v5337_v22 = vld [vmem:[%s9221_s0 + $0x2cc] sm:$0xf0]  ;;  %v5335_v38 = vld [vmem:[%s9221_s0 + $0x2c4] sm:$0xf]  ;;  %v4963_v33 = vld [vmem:[%s9221_s0 + $0x2d0] sm:$0xf0] }
 0x172   :  { %1517 = vmatmul.bf16.gmra.mxu1 %v4950_v29  ;;  %v7131_v29 = vpop.permute.xlu2 %3243  ;;  %v5338_v48 = vld [vmem:[%s9221_s0 + $0x2d4] sm:$0xf0] }
 0x173   :  { %9261 = vst [vmem:[#allocation7_spill] sm:$0xff] %v7117_v0  ;;  %1686 = vmatmul.bf16.gmra.mxu2 %v4954_v41  ;;  %v4969_v41 = vld [vmem:[%s9221_s0 + $0x2c8] sm:$0xf] }
 0x174   :  { %1855 = vmatmul.bf16.gmra.mxu3 %v4958_v20  ;;  %9264 = vst [vmem:[#allocation10_spill] sm:$0xff] %v7131_v29  ;;  %v7145_v32 = vpop.permute.xlu0 %3268  ;;  %v4962_v20 = vor.u32 %v5337_v22, %v4961_v26  ;;  %v4970_v0 = vor.u32 %v5338_v48, %v4969_v41  ;;  %v3453_v22 = vmul.f32 %v6985_v59, %v6699_v6 }
 0x175   :  { %9265 = vst [vmem:[#allocation11_spill] sm:$0xff] %v7145_v32 }
 0x176   :  { %v1647_v11 = vpop.f32.mrf.mxu2 }
 0x177   :  { %v1648_v63 = vadd.f32 %v1647_v11, %v1479_v5  ;;  %v1816_v14 = vpop.f32.mrf.mxu3  ;;  %v5336_v5 = vld [vmem:[%s9221_s0 + $0x2cc] sm:$0xf]  ;;  %v4971_v11 = vld [vmem:[%s9221_s0 + $0x2d8] sm:$0xf0] }
 0x178   :  { %v1311_v16 = vpop.f32.mrf.mxu0  ;;  %v1480_v21 = vpop.f32.mrf.mxu1  ;;  %v4974_v2 = vor.u32 %v5336_v5, %v4971_v11  ;;  %v4977_v11 = vld [vmem:[%s9221_s0 + $0x2e0] sm:$0xf] }
 0x179   :  { %v7123_v27 = vadd.f32 %v1816_v14, %v1648_v63  ;;  %v1481_v24 = vadd.f32 %v1480_v21, %v1311_v16  ;;  %v4966_v14 = vor.u32 %v5335_v38, %v4963_v33  ;;  %v7153_v16 = vpop.permute.xlu1 %3248  ;;  %v3005_v38 = vld [vmem:[%s9222_s2 + $0x10] sm:$0xff] }
 0x17a   :  { %9266 = vst [vmem:[#allocation12_spill] sm:$0xff] %v7153_v16  ;;  %v7164_v33 = vadd.f32 %v3453_v22, %v3005_v38  ;;  %v3452_v22 = vmul.f32 %v6938_v61, %v6694_v50 }
 0x17b   :  { %9263 = vst [vmem:[#allocation9_spill] sm:$0xff] %v7123_v27 }
 0x17c   :  { %9268 = vst [vmem:[#allocation14_spill] sm:$0xff] %v7164_v33  ;;  %v7166_v48 = vpop.permute.xlu0 %3283 }
 0x17d   :  { %9269 = vst [vmem:[#allocation15_spill] sm:$0xff] %v7166_v48 }
 0x17e   :  { %v1649_v63 = vpop.f32.mrf.mxu2 }
 0x17f   :  { %v1650_v21 = vadd.f32 %v1649_v63, %v1481_v24  ;;  %v1818_v27 = vpop.f32.mrf.mxu3  ;;  %v7162_v24 = vpop.permute.xlu2 %3258  ;;  %v5341_v63 = vld [vmem:[%s9221_s0 + $0x2ec] sm:$0xf0] }
 0x180   :  { %v1314_v29 = vpop.f32.mrf.mxu0  ;;  %v1483_v34 = vpop.f32.mrf.mxu1  ;;  %9267 = vst [vmem:[#allocation13_spill] sm:$0xff] %v7162_v24  ;;  %v4978_v38 = vor.u32 %v5341_v63, %v4977_v11 }
 0x181   :  { %v7155_v32 = vadd.f32 %v1818_v27, %v1650_v21  ;;  %v1484_v26 = vadd.f32 %v1483_v34, %v1314_v29  ;;  %1353 = vmatmul.bf16.gmra.mxu0 %v4962_v20  ;;  %v7168_v5 = vpop.permute.xlu1 %3263  ;;  %v3009_v21 = vld [vmem:[%s9222_s2 + $0x30] sm:$0xff] }
 0x182   :  { %1522 = vmatmul.bf16.gmra.mxu1 %v4966_v14  ;;  %9270 = vst [vmem:[#allocation16_spill] sm:$0xff] %v7168_v5  ;;  %v3451_v14 = vmul.f32 %v6969_v47, %v6659_v13  ;;  %v4985_v13 = vld [vmem:[%s9221_s0 + $0x2e8] sm:$0xf]  ;;  %v5342_v47 = vld [vmem:[%s9221_s0 + $0x2f4] sm:$0xf0] }
 0x183   :  { %1691 = vmatmul.bf16.gmra.mxu2 %v4970_v0  ;;  %v3457_v0 = vmul.f32 %v7007_v55, %v6767_v9  ;;  %v5339_v9 = vld [vmem:[%s9221_s0 + $0x2e4] sm:$0xf]  ;;  %v4979_v55 = vld [vmem:[%s9221_s0 + $0x2f0] sm:$0xf0]  ;;  %v4986_v63 = vor.u32 %v5342_v47, %v4985_v13 }
 0x184   :  { %1860 = vmatmul.bf16.gmra.mxu3 %v4974_v2  ;;  %v3581_v2 = vmul.f32 %v7164_v33, %v7164_v33  ;;  %v7225_v48 = vpop.permute.xlu0 %3298 }
 0x186   :  { %v1652_v41 = vpop.f32.mrf.mxu2 }
 0x187   :  { %v1653_v27 = vadd.f32 %v1652_v41, %v1484_v26  ;;  %v1821_v34 = vpop.f32.mrf.mxu3  ;;  %v3003_v26 = vld [vmem:[%s9222_s2] sm:$0xff]  ;;  %v5340_v41 = vld [vmem:[%s9221_s0 + $0x2ec] sm:$0xf]  ;;  %v7217_v50 = vpop.permute.xlu2 %3273 }
 0x188   :  { %v1316_v29 = vpop.f32.mrf.mxu0  ;;  %v1485_v20 = vpop.f32.mrf.mxu1  ;;  %v7215_v33 = vadd.f32 %v3451_v14, %v3003_v26  ;;  %v3460_v14 = vmul.f32 %v7005_v42, %v6830_v7  ;;  %v3006_v7 = vld [vmem:[%s9222_s2 + $0x18] sm:$0xff]  ;;  %v3455_v42 = vmul.f32 %v7001_v23, %v6733_v4 }
 0x189   :  { %v7170_v6 = vadd.f32 %v1821_v34, %v1653_v27  ;;  %v1486_v59 = vadd.f32 %v1485_v20, %v1316_v29  ;;  %v4987_v27 = vld [vmem:[%s9221_s0 + $0x2f8] sm:$0xf0]  ;;  %v3004_v34 = vld [vmem:[%s9222_s2 + $0x8] sm:$0xff]  ;;  %v7213_v29 = vadd.f32 %v3457_v0, %v3009_v21  ;;  %v3454_v21 = vmul.f32 %v6967_v36, %v6728_v44  ;;  %v3007_v36 = vld [vmem:[%s9222_s2 + $0x20] sm:$0xff] }
 0x18a   :  { %9273 = vst [vmem:[#allocation19_spill] sm:$0xff] %v7215_v33  ;;  %v4990_v24 = vor.u32 %v5340_v41, %v4987_v27  ;;  %v7223_v16 = vadd.f32 %v3452_v22, %v3004_v34  ;;  %v3579_v26 = vmul.f32 %v7215_v33, %v7215_v33  ;;  %v7264_v23 = vadd.f32 %v3455_v42, %v3007_v36  ;;  %v5344_v42 = vld [vmem:[%s9221_s0 + $0x30c] sm:$0xf]  ;;  %v3010_v36 = vld [vmem:[%s9222_s2 + $0x38] sm:$0xff] }
 0x18b   :  { %9271 = vst [vmem:[#allocation17_spill] sm:$0xff] %v7170_v6  ;;  %v7256_v22 = vadd.f32 %v3454_v21, %v3006_v7  ;;  %v3463_v27 = vmul.f32 %v7025_v19, %v6869_v31  ;;  %v5343_v19 = vld [vmem:[%s9221_s0 + $0x304] sm:$0xf]  ;;  %v3458_v21 = vmul.f32 %v7009_v53, %v6796_v49 }
 0x18c   :  { %3647 = vadd.xlane.f32.xlu0 %v3581_v2  ;;  %9272 = vst [vmem:[#allocation18_spill] sm:$0xff] %v7213_v29  ;;  %v4982_v2 = vor.u32 %v5339_v9, %v4979_v55  ;;  %v3012_v9 = vld [vmem:[%s9222_s2 + $0x48] sm:$0xff]  ;;  %v7238_v55 = vpop.permute.xlu1 %3278  ;;  %v3580_v44 = vmul.f32 %v7223_v16, %v7223_v16 }
 0x18d   :  { %9274 = vst [vmem:[#allocation20_spill] sm:$0xff] %v7223_v16  ;;  %v7252_v13 = vadd.f32 %v3460_v14, %v3012_v9  ;;  %v3582_v31 = vmul.f32 %v7256_v22, %v7256_v22  ;;  %v4995_v14 = vld [vmem:[%s9221_s0 + $0x310] sm:$0xf0]  ;;  %v7329_v16 = vadd.f32 %v3458_v21, %v3010_v36 }
 0x18e   :  { %v1654_v20 = vpop.f32.mrf.mxu2  ;;  %9276 = vst [vmem:[#allocation22_spill] sm:$0xff] %v7256_v22 }
 0x18f   :  { %v1655_v61 = vadd.f32 %v1654_v20, %v1486_v59  ;;  %v1823_v11 = vpop.f32.mrf.mxu3  ;;  %v3585_v59 = vmul.f32 %v7213_v29, %v7213_v29  ;;  %9275 = vst [vmem:[#allocation21_spill] sm:$0xff] %v7252_v13  ;;  %v7266_v41 = vpop.permute.xlu2 %3288  ;;  %v3588_v34 = vmul.f32 %v7252_v13, %v7252_v13  ;;  %v4993_v20 = vld [vmem:[%s9221_s0 + $0x300] sm:$0xf] }
 0x190   :  { %v7219_v6 = vpop.f32.mrf.mxu0  ;;  %v7221_v5 = vpop.f32.mrf.mxu1  ;;  %9277 = vst [vmem:[#allocation23_spill] sm:$0xff] %v7264_v23 }
 0x191   :  { %v7227_v0 = vadd.f32 %v1823_v11, %v1655_v61  ;;  %1358 = vmatmul.bf16.gmra.mxu0 %v4978_v38  ;;  %v3456_v61 = vmul.f32 %v6999_v17, %v6762_v46  ;;  %v3015_v11 = vld [vmem:[%s9222_s2 + $0x60] sm:$0xff]  ;;  %v3008_v46 = vld [vmem:[%s9222_s2 + $0x28] sm:$0xff]  ;;  %9280 = vst [vmem:[#allocation26_spill] sm:$0xff] %v7329_v16 }
 0x192   :  { %1527 = vmatmul.bf16.gmra.mxu1 %v4982_v2  ;;  %v5345_v2 = vld [vmem:[%s9221_s0 + $0x30c] sm:$0xf0]  ;;  %v5001_v17 = vld [vmem:[%s9221_s0 + $0x308] sm:$0xf]  ;;  %v7317_v49 = vadd.f32 %v3463_v27, %v3015_v11  ;;  %v3466_v27 = vmul.f32 %v7045_v8, %v6932_v28  ;;  %v3011_v28 = vld [vmem:[%s9222_s2 + $0x40] sm:$0xff]  ;;  %v3461_v8 = vmul.f32 %v7043_v3, %v6835_v37 }
 0x193   :  { %1696 = vmatmul.bf16.gmra.mxu2 %v4986_v63  ;;  %v7283_v63 = vpop.permute.xlu0 %3313  ;;  %v4994_v7 = vor.u32 %v5345_v2, %v4993_v20 }
 0x194   :  { %3655 = vadd.xlane.f32.xlu0 %v3585_v59  ;;  %1865 = vmatmul.bf16.gmra.mxu3 %v4990_v24  ;;  %v5346_v59 = vld [vmem:[%s9221_s0 + $0x314] sm:$0xf0]  ;;  %v7304_v9 = vpop.permute.xlu1 %3293  ;;  %9278 = vst [vmem:[#allocation24_spill] sm:$0xff] %v7317_v49  ;;  %v3591_v11 = vmul.f32 %v7317_v49, %v7317_v49 }
 0x195   :  { %3643 = vadd.xlane.f32.xlu2 %v3579_v26  ;;  %v3583_v26 = vmul.f32 %v7264_v23, %v7264_v23  ;;  %v5002_v2 = vor.u32 %v5346_v59, %v5001_v17  ;;  %v3013_v17 = vld [vmem:[%s9222_s2 + $0x50] sm:$0xff] }
 0x196   :  { %v7254_v47 = vpop.f32.mrf.mxu2 }
 0x197   :  { %3645 = vadd.xlane.f32.xlu1 %v3580_v44  ;;  %v7258_v38 = vpop.f32.mrf.mxu3  ;;  %v5003_v44 = vld [vmem:[%s9221_s0 + $0x318] sm:$0xf0] }
 0x198   :  { %v7260_v24 = vpop.f32.mrf.mxu0  ;;  %v7262_v4 = vpop.f32.mrf.mxu1  ;;  %v5006_v13 = vor.u32 %v5344_v42, %v5003_v44  ;;  %v7370_v42 = vadd.f32 %v3461_v8, %v3013_v17  ;;  %v3469_v44 = vmul.f32 %v7077_v10, %v6971_v57  ;;  %v5347_v10 = vld [vmem:[%s9221_s0 + $0x324] sm:$0xf]  ;;  %v5348_v17 = vld [vmem:[%s9221_s0 + $0x32c] sm:$0xf] }
 0x19a   :  { %9283 = vst [vmem:[#allocation29_spill] sm:$0xff] %v7370_v42  ;;  %v3589_v8 = vmul.f32 %v7370_v42, %v7370_v42 }
 0x19c   :  { %3661 = vadd.xlane.f32.xlu0 %v3588_v34  ;;  %v4998_v34 = vor.u32 %v5343_v19, %v4995_v14  ;;  %v3018_v19 = vld [vmem:[%s9222_s2 + $0x78] sm:$0xff]  ;;  %v7340_v14 = vpop.permute.xlu2 %3303 }
 0x19d   :  { %3649 = vadd.xlane.f32.xlu2 %v3582_v31  ;;  %v7321_v31 = vadd.f32 %v3456_v61, %v3008_v46  ;;  %v3459_v61 = vmul.f32 %v7039_v39, %v6801_v15  ;;  %v7349_v15 = vpop.permute.xlu0 %3328  ;;  %v3586_v39 = vmul.f32 %v7329_v16, %v7329_v16  ;;  %v7356_v59 = vadd.f32 %v3466_v27, %v3018_v19  ;;  %v3014_v19 = vld [vmem:[%s9222_s2 + $0x58] sm:$0xff] }
 0x19e   :  { %v7319_v53 = vpop.f32.mrf.mxu2  ;;  %v3462_v27 = vmul.f32 %v7047_v18, %v6864_v1  ;;  %v5017_v1 = vld [vmem:[%s9221_s0 + $0x328] sm:$0xf]  ;;  %v5350_v18 = vld [vmem:[%s9221_s0 + $0x334] sm:$0xf0] }
 0x19f   :  { %9279 = vst [vmem:[#allocation25_spill] sm:$0xff] %v7321_v31  ;;  %3651 = vadd.xlane.f32.xlu1 %v3583_v26  ;;  %v7323_v20 = vpop.f32.mrf.mxu3  ;;  %v3584_v46 = vmul.f32 %v7321_v31, %v7321_v31  ;;  %v7360_v26 = vadd.f32 %v3459_v61, %v3011_v28  ;;  %v3594_v36 = vmul.f32 %v7356_v59, %v7356_v59  ;;  %v5011_v61 = vld [vmem:[%s9221_s0 + $0x330] sm:$0xf0] }
 0x1a0   :  { %v7325_v23 = vpop.f32.mrf.mxu0  ;;  %v7327_v22 = vpop.f32.mrf.mxu1  ;;  %9281 = vst [vmem:[#allocation27_spill] sm:$0xff] %v7356_v59  ;;  %v7423_v59 = vadd.f32 %v3462_v27, %v3014_v19  ;;  %v5018_v42 = vor.u32 %v5350_v18, %v5017_v1  ;;  %v3472_v27 = vmul.f32 %v7085_v62, %v7041_v60  ;;  %v3017_v19 = vld [vmem:[%s9222_s2 + $0x70] sm:$0xff]  ;;  %v3467_v60 = vmul.f32 %v7083_v40, %v6936_v56 }
 0x1a1   :  { %1363 = vmatmul.bf16.gmra.mxu0 %v4994_v7  ;;  %9282 = vst [vmem:[#allocation28_spill] sm:$0xff] %v7360_v26  ;;  %v3587_v57 = vmul.f32 %v7360_v26, %v7360_v26  ;;  %v3016_v26 = vld [vmem:[%s9222_s2 + $0x68] sm:$0xff] }
 0x1a2   :  { %1532 = vmatmul.bf16.gmra.mxu1 %v4998_v34  ;;  %v5009_v34 = vld [vmem:[%s9221_s0 + $0x320] sm:$0xf]  ;;  %9285 = vst [vmem:[#allocation31_spill] sm:$0xff] %v7423_v59 }
 0x1a3   :  { %1701 = vmatmul.bf16.gmra.mxu2 %v5002_v2  ;;  %v5349_v2 = vld [vmem:[%s9221_s0 + $0x32c] sm:$0xf0] }
 0x1a4   :  { %3667 = vadd.xlane.f32.xlu0 %v3591_v11  ;;  %1870 = vmatmul.bf16.gmra.mxu3 %v5006_v13  ;;  %v7362_v13 = vpop.permute.xlu1 %3308  ;;  %v3021_v11 = vld [vmem:[%s9222_s2 + $0x90] sm:$0xff]  ;;  %v7406_v28 = vpop.permute.xlu2 %3318 }
 0x1a5   :  { %3653 = vadd.xlane.f32.xlu2 %v3584_v46  ;;  %v3464_v46 = vmul.f32 %v7069_v51, %v6898_v12  ;;  %v7419_v12 = vadd.f32 %v3469_v44, %v3021_v11 }
 0x1a6   :  { %v7358_v21 = vpop.f32.mrf.mxu2 }
 0x1a7   :  { %3657 = vadd.xlane.f32.xlu1 %v3586_v39  ;;  %v7364_v37 = vpop.f32.mrf.mxu3  ;;  %v5010_v39 = vor.u32 %v5349_v2, %v5009_v34  ;;  %9284 = vst [vmem:[#allocation30_spill] sm:$0xff] %v7419_v12  ;;  %v7425_v34 = vpop.permute.xlu0 %3343  ;;  %v7433_v33 = vadd.f32 %v3464_v46, %v3016_v26  ;;  %v3597_v11 = vmul.f32 %v7419_v12, %v7419_v12 }
 0x1a8   :  { %v7366_v3 = vpop.f32.mrf.mxu0  ;;  %v7368_v7 = vpop.f32.mrf.mxu1  ;;  %v3590_v26 = vmul.f32 %v7423_v59, %v7423_v59 }
 0x1a9   :  { %9286 = vst [vmem:[#allocation32_spill] sm:$0xff] %v7433_v33 }
 0x1ac   :  { %3673 = vadd.xlane.f32.xlu0 %v3594_v36  ;;  %v5019_v36 = vld [vmem:[%s9221_s0 + $0x338] sm:$0xf0]  ;;  %v7435_v44 = vpop.permute.xlu1 %3323  ;;  %v7464_v18 = vpop.permute.xlu2 %3333 }
 0x1ad   :  { %3659 = vadd.xlane.f32.xlu2 %v3587_v57  ;;  %v5014_v57 = vor.u32 %v5347_v10, %v5011_v61  ;;  %v5022_v49 = vor.u32 %v5348_v17, %v5019_v36  ;;  %v3465_v10 = vmul.f32 %v7079_v43, %v6903_v25  ;;  %v3024_v61 = vld [vmem:[%s9222_s2 + $0xa8] sm:$0xff]  ;;  %v3592_v25 = vmul.f32 %v7433_v33, %v7433_v33  ;;  %v3019_v43 = vld [vmem:[%s9222_s2 + $0x80] sm:$0xff] }
 0x1ae   :  { %v7421_v51 = vpop.f32.mrf.mxu2  ;;  %v7458_v62 = vadd.f32 %v3472_v27, %v3024_v61  ;;  %v7472_v46 = vadd.f32 %v3467_v60, %v3019_v43  ;;  %v5025_v36 = vld [vmem:[%s9221_s0 + $0x340] sm:$0xf]  ;;  %v3468_v27 = vmul.f32 %v7095_v45, %v6965_v52  ;;  %v5027_v61 = vld [vmem:[%s9221_s0 + $0x350] sm:$0xf0]  ;;  %v3020_v52 = vld [vmem:[%s9222_s2 + $0x88] sm:$0xff] }
 0x1af   :  { %3663 = vadd.xlane.f32.xlu1 %v3589_v8  ;;  %v7427_v2 = vpop.f32.mrf.mxu3  ;;  %v7462_v1 = vadd.f32 %v3465_v10, %v3017_v19  ;;  %v7474_v8 = vpop.permute.xlu0 %3358  ;;  %v5033_v45 = vld [vmem:[%s9221_s0 + $0x348] sm:$0xf]  ;;  %v3470_v19 = vmul.f32 %v7115_v58, %v7003_v35  ;;  %v5352_v43 = vld [vmem:[%s9221_s0 + $0x34c] sm:$0xf]  ;;  %v1489_v35 = vadd.f32 %v7221_v5, %v7219_v6 }
 0x1b0   :  { %v7429_v16 = vpop.f32.mrf.mxu0  ;;  %v7431_v31 = vpop.f32.mrf.mxu1  ;;  %9287 = vst [vmem:[#allocation33_spill] sm:$0xff] %v7458_v62  ;;  %v3600_v17 = vmul.f32 %v7458_v62, %v7458_v62  ;;  %v3595_v60 = vmul.f32 %v7472_v46, %v7472_v46 }
 0x1b1   :  { %1368 = vmatmul.bf16.gmra.mxu0 %v5010_v39  ;;  %9288 = vst [vmem:[#allocation34_spill] sm:$0xff] %v7462_v1  ;;  %v3475_v39 = vmul.f32 %v7119_v30, %v7087_v54  ;;  %v3593_v54 = vmul.f32 %v7462_v1, %v7462_v1  ;;  %v5351_v30 = vld [vmem:[%s9221_s0 + $0x344] sm:$0xf]  ;;  %v3022_v1 = vld [vmem:[%s9222_s2 + $0x98] sm:$0xff]  ;;  %v1658_v6 = vadd.f32 %v7254_v47, %v1489_v35  ;;  %v9299_v47 = vld [vmem:[#allocation5_spill] sm:$0xff] }
 0x1b2   :  { %1537 = vmatmul.bf16.gmra.mxu1 %v5014_v57  ;;  %9289 = vst [vmem:[#allocation35_spill] sm:$0xff] %v7472_v46  ;;  %v5353_v57 = vld [vmem:[%s9221_s0 + $0x34c] sm:$0xf0]  ;;  %v7533_v29 = vadd.f32 %v3470_v19, %v3022_v1  ;;  %v3030_v1 = vld [vmem:[%s9222_s2 + $0xd8] sm:$0xff] }
 0x1b3   :  { %1706 = vmatmul.bf16.gmra.mxu2 %v5018_v42  ;;  %9290 = vst [vmem:[#allocation36_spill] sm:$0xff] %v7474_v8 }
 0x1b4   :  { %3679 = vadd.xlane.f32.xlu0 %v3597_v11  ;;  %1875 = vmatmul.bf16.gmra.mxu3 %v5022_v49  ;;  %v3027_v11 = vld [vmem:[%s9222_s2 + $0xc0] sm:$0xff]  ;;  %v7491_v10 = vpop.permute.xlu1 %3338  ;;  %9293 = vst [vmem:[#allocation39_spill] sm:$0xff] %v7533_v29  ;;  %v7535_v8 = vpop.permute.xlu2 %3348 }
 0x1b5   :  { %3665 = vadd.xlane.f32.xlu2 %v3590_v26  ;;  %v5354_v26 = vld [vmem:[%s9221_s0 + $0x354] sm:$0xf0]  ;;  %v7523_v62 = vadd.f32 %v3475_v39, %v3027_v11  ;;  %9294 = vst [vmem:[#allocation40_spill] sm:$0xff] %v7535_v8  ;;  %v9296_v11 = vld [vmem:[#allocation4_spill] sm:$0xff] }
 0x1b6   :  { %v7460_v42 = vpop.f32.mrf.mxu2  ;;  %v5034_v46 = vor.u32 %v5354_v26, %v5033_v45  ;;  %v9295_v39 = vld [vmem:[#allocation11_spill] sm:$0xff]  ;;  %v9300_v26 = vld [vmem:[#allocation10_spill] sm:$0xff] }
 0x1b7   :  { %3669 = vadd.xlane.f32.xlu1 %v3592_v25  ;;  %v7466_v49 = vpop.f32.mrf.mxu3  ;;  %v5026_v25 = vor.u32 %v5353_v57, %v5025_v36  ;;  %9291 = vst [vmem:[#allocation37_spill] sm:$0xff] %v7523_v62  ;;  %v5030_v36 = vor.u32 %v5351_v30, %v5027_v61  ;;  %v7529_v57 = vadd.f32 %v3468_v27, %v3020_v52  ;;  %v9297_v30 = vld [vmem:[#allocation8_spill] sm:$0xff]  ;;  %v7547_v52 = vpop.permute.xlu0 %3373 }
 0x1b8   :  { %v7468_v56 = vpop.f32.mrf.mxu0  ;;  %v7470_v40 = vpop.f32.mrf.mxu1  ;;  %v3478_v5 = vmul.f32 %v9295_v39, %v7155_v32  ;;  %v3603_v27 = vmul.f32 %v7523_v62, %v7523_v62  ;;  %v3471_v61 = vmul.f32 %v9297_v30, %v9296_v11  ;;  %9298 = vst [vmem:[#allocation11_spill] sm:$0xff] %v7547_v52  ;;  %v3023_v32 = vld [vmem:[%s9222_s2 + $0xa0] sm:$0xff]  ;;  %v3473_v19 = vmul.f32 %v9300_v26, %v9299_v47  ;;  %v3028_v62 = vld [vmem:[%s9222_s2 + $0xc8] sm:$0xff] }
 0x1b9   :  { %9292 = vst [vmem:[#allocation38_spill] sm:$0xff] %v7529_v57  ;;  %v3596_v45 = vmul.f32 %v7529_v57, %v7529_v57  ;;  %v1496_v39 = vadd.f32 %v7368_v7, %v7366_v3  ;;  %v5357_v3 = vld [vmem:[%s9221_s0 + $0x36c] sm:$0xf0]  ;;  %v5051_v57 = vld [vmem:[%s9221_s0 + $0x378] sm:$0xf0] }
 0x1ba   :  { %v9306_v7 = vld [vmem:[#allocation6_spill] sm:$0xff] }
 0x1bc   :  { %3685 = vadd.xlane.f32.xlu0 %v3600_v17  ;;  %v5035_v17 = vld [vmem:[%s9221_s0 + $0x358] sm:$0xf0]  ;;  %v7591_v26 = vpop.permute.xlu2 %3363 }
 0x1bd   :  { %3671 = vadd.xlane.f32.xlu2 %v3593_v54  ;;  %v5038_v12 = vor.u32 %v5352_v43, %v5035_v17  ;;  %v7563_v43 = vadd.f32 %v3478_v5, %v3030_v1  ;;  %v1827_v17 = vadd.f32 %v7258_v38, %v1658_v6  ;;  %v1665_v5 = vadd.f32 %v7421_v51, %v1496_v39  ;;  %v5041_v6 = vld [vmem:[%s9221_s0 + $0x360] sm:$0xf]  ;;  %v5358_v39 = vld [vmem:[%s9221_s0 + $0x374] sm:$0xf0] }
 0x1be   :  { %v7527_v58 = vpop.f32.mrf.mxu2 }
 0x1bf   :  { %3675 = vadd.xlane.f32.xlu1 %v3595_v60  ;;  %v7531_v54 = vpop.f32.mrf.mxu3  ;;  %v7556_v60 = vpop.permute.xlu1 %3353  ;;  %9302 = vst [vmem:[#allocation8_spill] sm:$0xff] %v7563_v43  ;;  %v3606_v38 = vmul.f32 %v7563_v43, %v7563_v43 }
 0x1c0   :  { %v1334_v33 = vpop.f32.mrf.mxu0  ;;  %v1503_v59 = vpop.f32.mrf.mxu1  ;;  %9301 = vst [vmem:[#allocation4_spill] sm:$0xff] %v7556_v60 }
 0x1c1   :  { %1373 = vmatmul.bf16.gmra.mxu0 %v5026_v25  ;;  %v3598_v25 = vmul.f32 %v7533_v29, %v7533_v29  ;;  %v5042_v29 = vor.u32 %v5357_v3, %v5041_v6 }
 0x1c2   :  { %1542 = vmatmul.bf16.gmra.mxu1 %v5030_v36  ;;  %v7566_v36 = vadd.f32 %v3471_v61, %v3023_v32  ;;  %v9307_v61 = vld [vmem:[#allocation12_spill] sm:$0xff]  ;;  %v3033_v32 = vld [vmem:[%s9222_s2 + $0xf0] sm:$0xff] }
 0x1c3   :  { %1711 = vmatmul.bf16.gmra.mxu2 %v5034_v46  ;;  %v3025_v46 = vld [vmem:[%s9222_s2 + $0xb0] sm:$0xff]  ;;  %v3474_v1 = vmul.f32 %v9307_v61, %v9306_v7  ;;  %v9310_v7 = vld [vmem:[#allocation13_spill] sm:$0xff] }
 0x1c4   :  { %3691 = vadd.xlane.f32.xlu0 %v3603_v27  ;;  %1880 = vmatmul.bf16.gmra.mxu3 %v5038_v12  ;;  %9303 = vst [vmem:[#allocation5_spill] sm:$0xff] %v7566_v36  ;;  %v7574_v30 = vadd.f32 %v3473_v19, %v3025_v46  ;;  %v3599_v51 = vmul.f32 %v7566_v36, %v7566_v36  ;;  %v5355_v19 = vld [vmem:[%s9221_s0 + $0x364] sm:$0xf]  ;;  %v3026_v46 = vld [vmem:[%s9222_s2 + $0xb8] sm:$0xff]  ;;  %v7612_v36 = vpop.permute.xlu0 %3388 }
 0x1c5   :  { %3677 = vadd.xlane.f32.xlu2 %v3596_v45  ;;  %v9305_v45 = vld [vmem:[#allocation15_spill] sm:$0xff]  ;;  %9311 = vst [vmem:[#allocation6_spill] sm:$0xff] %v7612_v36  ;;  %v7630_v3 = vadd.f32 %v3474_v1, %v3026_v46 }
 0x1c6   :  { %v1672_v35 = vpop.f32.mrf.mxu2  ;;  %9304 = vst [vmem:[#allocation10_spill] sm:$0xff] %v7574_v30  ;;  %v3481_v47 = vmul.f32 %v9305_v45, %v1827_v17  ;;  %v5049_v17 = vld [vmem:[%s9221_s0 + $0x368] sm:$0xf]  ;;  %v9309_v45 = vld [vmem:[#allocation7_spill] sm:$0xff]  ;;  %v3601_v43 = vmul.f32 %v7574_v30, %v7574_v30 }
 0x1c7   :  { %3681 = vadd.xlane.f32.xlu1 %v3598_v25  ;;  %v1841_v12 = vpop.f32.mrf.mxu3  ;;  %9308 = vst [vmem:[#allocation15_spill] sm:$0xff] %v7591_v26  ;;  %v5043_v25 = vld [vmem:[%s9221_s0 + $0x370] sm:$0xf0]  ;;  %v3476_v61 = vmul.f32 %v9310_v7, %v9309_v45  ;;  %v1504_v7 = vadd.f32 %v1503_v59, %v1334_v33  ;;  %v7632_v30 = vpop.permute.xlu1 %3368  ;;  %v5050_v26 = vor.u32 %v5358_v39, %v5049_v17 }
 0x1c8   :  { %v7570_v27 = vpop.f32.mrf.mxu0  ;;  %v7572_v11 = vpop.f32.mrf.mxu1  ;;  %v7625_v45 = vadd.f32 %v3481_v47, %v3033_v32  ;;  %v5046_v6 = vor.u32 %v5355_v19, %v5043_v25  ;;  %v1491_v19 = vadd.f32 %v7262_v4, %v7260_v24  ;;  %v3031_v24 = vld [vmem:[%s9222_s2 + $0xe0] sm:$0xff] }
 0x1c9   :  { %v7640_v32 = vadd.f32 %v3476_v61, %v3028_v62  ;;  %v1673_v59 = vadd.f32 %v1672_v35, %v1504_v7  ;;  %v9314_v62 = vld [vmem:[#allocation17_spill] sm:$0xff]  ;;  %v7663_v25 = vpop.permute.xlu2 %3378  ;;  %v1494_v61 = vadd.f32 %v7327_v22, %v7325_v23  ;;  %v3480_v23 = vmul.f32 %v7238_v55, %v7227_v0  ;;  %v5359_v55 = vld [vmem:[%s9221_s0 + $0x384] sm:$0xf] }
 0x1ca   :  { %v3479_v35 = vmul.f32 %v7217_v50, %v9314_v62  ;;  %v1660_v4 = vadd.f32 %v7319_v53, %v1491_v19  ;;  %v3032_v22 = vld [vmem:[%s9222_s2 + $0xe8] sm:$0xff] }
 0x1cb   :  { %v1842_v17 = vadd.f32 %v1841_v12, %v1673_v59  ;;  %v1499_v12 = vadd.f32 %v7431_v31, %v7429_v16  ;;  %v5361_v16 = vld [vmem:[%s9221_s0 + $0x38c] sm:$0xf0]  ;;  %v1663_v31 = vadd.f32 %v7358_v21, %v1494_v61  ;;  %v5065_v21 = vld [vmem:[%s9221_s0 + $0x388] sm:$0xf]  ;;  %v5360_v62 = vld [vmem:[%s9221_s0 + $0x38c] sm:$0xf] }
 0x1cc   :  { %3697 = vadd.xlane.f32.xlu0 %v3606_v38  ;;  %v5356_v38 = vld [vmem:[%s9221_s0 + $0x36c] sm:$0xf] }
 0x1cd   :  { %3683 = vadd.xlane.f32.xlu2 %v3599_v51  ;;  %v1834_v51 = vadd.f32 %v7427_v2, %v1665_v5  ;;  %v5054_v47 = vor.u32 %v5356_v38, %v5051_v57  ;;  %v3609_v2 = vmul.f32 %v7625_v45, %v7625_v45  ;;  %v9312_v5 = vld [vmem:[#allocation9_spill] sm:$0xff]  ;;  %v7675_v38 = vpop.permute.xlu0 %3403  ;;  %v3487_v59 = vmul.f32 %v7283_v63, %v1842_v17  ;;  %v5059_v63 = vld [vmem:[%s9221_s0 + $0x390] sm:$0xf0] }
 0x1ce   :  { %v7628_v36 = vpop.f32.mrf.mxu2  ;;  %v3036_v57 = vld [vmem:[%s9222_s2 + $0x108] sm:$0xff]  ;;  %v1832_v17 = vadd.f32 %v7364_v37, %v1663_v31  ;;  %v3042_v37 = vld [vmem:[%s9222_s2 + $0x138] sm:$0xff] }
 0x1cf   :  { %3687 = vadd.xlane.f32.xlu1 %v3601_v43  ;;  %v7634_v52 = vpop.f32.mrf.mxu3  ;;  %v3484_v33 = vmul.f32 %v7225_v48, %v1834_v51  ;;  %v9313_v43 = vld [vmem:[#allocation16_spill] sm:$0xff]  ;;  %v3029_v48 = vld [vmem:[%s9222_s2 + $0xd0] sm:$0xff]  ;;  %v7679_v51 = vadd.f32 %v3479_v35, %v3031_v24  ;;  %v5067_v35 = vld [vmem:[%s9221_s0 + $0x398] sm:$0xf0]  ;;  %v7728_v24 = vadd.f32 %v3480_v23, %v3032_v22 }
 0x1d0   :  { %v7636_v60 = vpop.f32.mrf.mxu0  ;;  %v7638_v8 = vpop.f32.mrf.mxu1  ;;  %v3477_v1 = vmul.f32 %v9313_v43, %v9312_v5  ;;  %v3039_v5 = vld [vmem:[%s9222_s2 + $0x120] sm:$0xff]  ;;  %v5070_v22 = vor.u32 %v5360_v62, %v5067_v35 }
 0x1d1   :  { %1378 = vmatmul.bf16.gmra.mxu0 %v5042_v29  ;;  %v3602_v29 = vmul.f32 %v7630_v3, %v7630_v3  ;;  %v7667_v46 = vadd.f32 %v3484_v33, %v3036_v57  ;;  %v7684_v33 = vpop.permute.xlu1 %3383  ;;  %v3607_v43 = vmul.f32 %v7679_v51, %v7679_v51  ;;  %v1668_v57 = vadd.f32 %v7460_v42, %v1499_v12  ;;  %v7736_v61 = vpop.permute.xlu2 %3393 }
 0x1d2   :  { %1547 = vmatmul.bf16.gmra.mxu1 %v5046_v6  ;;  %v7671_v50 = vadd.f32 %v3477_v1, %v3029_v48  ;;  %v5362_v1 = vld [vmem:[%s9221_s0 + $0x394] sm:$0xf0] }
 0x1d3   :  { %1716 = vmatmul.bf16.gmra.mxu2 %v5050_v26  ;;  %v3604_v26 = vmul.f32 %v7640_v32, %v7640_v32 }
 0x1d4   :  { %3703 = vadd.xlane.f32.xlu0 %v3609_v2  ;;  %1885 = vmatmul.bf16.gmra.mxu3 %v5054_v47  ;;  %v1829_v47 = vadd.f32 %v7323_v20, %v1660_v4  ;;  %v3612_v2 = vmul.f32 %v7667_v46, %v7667_v46  ;;  %v5057_v20 = vld [vmem:[%s9221_s0 + $0x380] sm:$0xf]  ;;  %v3605_v0 = vmul.f32 %v7671_v50, %v7671_v50  ;;  %v3034_v4 = vld [vmem:[%s9222_s2 + $0xf8] sm:$0xff] }
 0x1d5   :  { %3689 = vadd.xlane.f32.xlu2 %v3602_v29  ;;  %v5058_v48 = vor.u32 %v5361_v16, %v5057_v20  ;;  %v1837_v20 = vadd.f32 %v7466_v49, %v1668_v57  ;;  %v3483_v49 = vmul.f32 %v7304_v9, %v1832_v17 }
 0x1d6   :  { %v7669_v39 = vpop.f32.mrf.mxu2  ;;  %v3482_v19 = vmul.f32 %v7266_v41, %v1829_v47  ;;  %v7733_v41 = vadd.f32 %v3487_v59, %v3039_v5  ;;  %v5066_v47 = vor.u32 %v5362_v1, %v5065_v21  ;;  %v1501_v59 = vadd.f32 %v7470_v40, %v7468_v56  ;;  %v7743_v5 = vpop.permute.xlu0 %3418 }
 0x1d7   :  { %3693 = vadd.xlane.f32.xlu1 %v3604_v26  ;;  %v7677_v53 = vpop.f32.mrf.mxu3  ;;  %v5062_v26 = vor.u32 %v5359_v55, %v5059_v63  ;;  %v1506_v40 = vadd.f32 %v7572_v11, %v7570_v27  ;;  %v3485_v21 = vmul.f32 %v7340_v14, %v1837_v20  ;;  %v1509_v14 = vadd.f32 %v7638_v8, %v7636_v60  ;;  %v5365_v8 = vld [vmem:[%s9221_s0 + $0x3ac] sm:$0xf0] }
 0x1d8   :  { %v1341_v7 = vpop.f32.mrf.mxu0  ;;  %v1510_v6 = vpop.f32.mrf.mxu1  ;;  %v7738_v23 = vadd.f32 %v3482_v19, %v3034_v4  ;;  %v3615_v31 = vmul.f32 %v7733_v41, %v7733_v41  ;;  %v1670_v55 = vadd.f32 %v7527_v58, %v1501_v59 }
 0x1d9   :  { %v1511_v29 = vadd.f32 %v1510_v6, %v1341_v7  ;;  %v7754_v56 = vpop.permute.xlu1 %3398  ;;  %v1675_v9 = vadd.f32 %v7628_v36, %v1506_v40 }
 0x1da   :  { %v3610_v58 = vmul.f32 %v7738_v23, %v7738_v23  ;;  %v1839_v19 = vadd.f32 %v7531_v54, %v1670_v55  ;;  %v5073_v54 = vld [vmem:[%s9221_s0 + $0x3a0] sm:$0xf] }
 0x1db   :  { %v1844_v35 = vadd.f32 %v7634_v52, %v1675_v9  ;;  %v5363_v52 = vld [vmem:[%s9221_s0 + $0x3a4] sm:$0xf]  ;;  %v5074_v59 = vor.u32 %v5365_v8, %v5073_v54 }
 0x1dc   :  { %3709 = vadd.xlane.f32.xlu0 %v3612_v2  ;;  %v3486_v60 = vmul.f32 %v7362_v13, %v1839_v19  ;;  %v5081_v13 = vld [vmem:[%s9221_s0 + $0x3a8] sm:$0xf] }
 0x1dd   :  { %3695 = vadd.xlane.f32.xlu2 %v3605_v0  ;;  %v3608_v0 = vmul.f32 %v7728_v24, %v7728_v24 }
 0x1de   :  { %v1679_v42 = vpop.f32.mrf.mxu2 }
 0x1df   :  { %3699 = vadd.xlane.f32.xlu1 %v3607_v43  ;;  %v1680_v7 = vadd.f32 %v1679_v42, %v1511_v29  ;;  %v1848_v6 = vpop.f32.mrf.mxu3  ;;  %v3035_v43 = vld [vmem:[%s9222_s2 + $0x100] sm:$0xff]  ;;  %v7781_v42 = vpop.permute.xlu2 %3408 }
 0x1e0   :  { %v1344_v12 = vpop.f32.mrf.mxu0  ;;  %v1513_v2 = vpop.f32.mrf.mxu1  ;;  %v7771_v11 = vadd.f32 %v3483_v49, %v3035_v43 }
 0x1e1   :  { %v1849_v16 = vadd.f32 %v1848_v6, %v1680_v7  ;;  %1383 = vmatmul.bf16.gmra.mxu0 %v5058_v48  ;;  %v1514_v4 = vadd.f32 %v1513_v2, %v1344_v12  ;;  %v5075_v7 = vld [vmem:[%s9221_s0 + $0x3b0] sm:$0xf0]  ;;  %v3038_v6 = vld [vmem:[%s9222_s2 + $0x118] sm:$0xff]  ;;  %v7810_v12 = vpop.permute.xlu1 %3413  ;;  %v3488_v2 = vmul.f32 %v7406_v28, %v1844_v35 }
 0x1e2   :  { %1552 = vmatmul.bf16.gmra.mxu1 %v5062_v26  ;;  %v1678_v26 = vadd.f32 %v7669_v39, %v1509_v14  ;;  %v3611_v17 = vmul.f32 %v7771_v11, %v7771_v11  ;;  %v5366_v39 = vld [vmem:[%s9221_s0 + $0x3b4] sm:$0xf0]  ;;  %v5078_v28 = vor.u32 %v5363_v52, %v5075_v7  ;;  %v7824_v49 = vadd.f32 %v3486_v60, %v3038_v6 }
 0x1e3   :  { %v3490_v63 = vmul.f32 %v7349_v15, %v1849_v16  ;;  %1721 = vmatmul.bf16.gmra.mxu2 %v5066_v47  ;;  %v3037_v15 = vld [vmem:[%s9222_s2 + $0x110] sm:$0xff]  ;;  %v7802_v47 = vpop.permute.xlu0 %3433  ;;  %v5364_v16 = vld [vmem:[%s9221_s0 + $0x3ac] sm:$0xf] }
 0x1e4   :  { %3715 = vadd.xlane.f32.xlu0 %v3615_v31  ;;  %1890 = vmatmul.bf16.gmra.mxu3 %v5070_v22  ;;  %v7778_v62 = vadd.f32 %v3485_v21, %v3037_v15  ;;  %9315 = vst [vmem:[#allocation12_spill] sm:$0xff] %v7802_v47  ;;  %v3040_v31 = vld [vmem:[%s9222_s2 + $0x128] sm:$0xff]  ;;  %v1847_v55 = vadd.f32 %v7677_v53, %v1678_v26 }
 0x1e5   :  { %v7764_v1 = vadd.f32 %v3490_v63, %v3042_v37  ;;  %3701 = vadd.xlane.f32.xlu2 %v3608_v0  ;;  %v5083_v37 = vld [vmem:[%s9221_s0 + $0x3b8] sm:$0xf0]  ;;  %v5082_v63 = vor.u32 %v5366_v39, %v5081_v13  ;;  %v3614_v53 = vmul.f32 %v7824_v49, %v7824_v49  ;;  %v3045_v39 = vld [vmem:[%s9222_s2 + $0x150] sm:$0xff] }
 0x1e6   :  { %v1682_v27 = vpop.f32.mrf.mxu2  ;;  %v3613_v20 = vmul.f32 %v7778_v62, %v7778_v62  ;;  %v5086_v9 = vor.u32 %v5364_v16, %v5083_v37  ;;  %v3489_v19 = vmul.f32 %v7435_v44, %v1847_v55  ;;  %v5367_v37 = vld [vmem:[%s9221_s0 + $0x3c4] sm:$0xf] }
 0x1e7   :  { %3705 = vadd.xlane.f32.xlu1 %v3610_v58  ;;  %v1851_v36 = vpop.f32.mrf.mxu3  ;;  %v3618_v48 = vmul.f32 %v7764_v1, %v7764_v1  ;;  %v1683_v22 = vadd.f32 %v1682_v27, %v1514_v4  ;;  %v7827_v58 = vadd.f32 %v3488_v2, %v3040_v31  ;;  %v7832_v35 = vpop.permute.xlu2 %3423  ;;  %v3041_v4 = vld [vmem:[%s9222_s2 + $0x130] sm:$0xff]  ;;  %v5089_v2 = vld [vmem:[%s9221_s0 + $0x3c0] sm:$0xf] }
 0x1e8   :  { %v1346_v57 = vpop.f32.mrf.mxu0  ;;  %v1515_v29 = vpop.f32.mrf.mxu1  ;;  %v7847_v60 = vadd.f32 %v3489_v19, %v3041_v4  ;;  %v5091_v31 = vld [vmem:[%s9221_s0 + $0x3d0] sm:$0xf0] }
 0x1e9   :  { %v1852_v15 = vadd.f32 %v1851_v36, %v1683_v22  ;;  %v1516_v27 = vadd.f32 %v1515_v29, %v1346_v57  ;;  %v3616_v57 = vmul.f32 %v7827_v58, %v7827_v58  ;;  %v3043_v29 = vld [vmem:[%s9222_s2 + $0x140] sm:$0xff]  ;;  %v7845_v8 = vpop.permute.xlu1 %3428  ;;  %v5369_v22 = vld [vmem:[%s9221_s0 + $0x3cc] sm:$0xf0] }
 0x1ea   :  { %v3617_v16 = vmul.f32 %v7847_v60, %v7847_v60 }
 0x1eb   :  { %v3491_v36 = vmul.f32 %v7464_v18, %v1852_v15  ;;  %v7840_v44 = vpop.permute.xlu0 %3448 }
 0x1ec   :  { %3721 = vadd.xlane.f32.xlu0 %v3618_v48  ;;  %9316 = vst [vmem:[#allocation7_spill] sm:$0xff] %v7840_v44 }
 0x1ed   :  { %3707 = vadd.xlane.f32.xlu2 %v3611_v17  ;;  %v7849_v6 = vadd.f32 %v3491_v36, %v3043_v29 }
 0x1ee   :  { %v1684_v0 = vpop.f32.mrf.mxu2 }
 0x1ef   :  { %3711 = vadd.xlane.f32.xlu1 %v3613_v20  ;;  %v1853_v40 = vpop.f32.mrf.mxu3  ;;  %v1685_v14 = vadd.f32 %v1684_v0, %v1516_v27  ;;  %v3044_v0 = vld [vmem:[%s9222_s2 + $0x148] sm:$0xff]  ;;  %v5094_v27 = vor.u32 %v5367_v37, %v5091_v31 }
 0x1f0   :  { %v1349_v43 = vpop.f32.mrf.mxu0  ;;  %v1518_v21 = vpop.f32.mrf.mxu1 }
 0x1f1   :  { %1388 = vmatmul.bf16.gmra.mxu0 %v5074_v59  ;;  %v1519_v48 = vadd.f32 %v1518_v21, %v1349_v43  ;;  %v1854_v26 = vadd.f32 %v1853_v40, %v1685_v14  ;;  %v3619_v40 = vmul.f32 %v7849_v6, %v7849_v6  ;;  %v5368_v43 = vld [vmem:[%s9221_s0 + $0x3cc] sm:$0xf]  ;;  %v5099_v21 = vld [vmem:[%s9221_s0 + $0x3d8] sm:$0xf0] }
 0x1f2   :  { %1557 = vmatmul.bf16.gmra.mxu1 %v5078_v28 }
 0x1f3   :  { %1726 = vmatmul.bf16.gmra.mxu2 %v5082_v63  ;;  %v3492_v20 = vmul.f32 %v7491_v10, %v1854_v26  ;;  %v5097_v10 = vld [vmem:[%s9221_s0 + $0x3c8] sm:$0xf]  ;;  %v5090_v63 = vor.u32 %v5369_v22, %v5089_v2  ;;  %v5102_v26 = vor.u32 %v5368_v43, %v5099_v21  ;;  %v3047_v43 = vld [vmem:[%s9222_s2 + $0x160] sm:$0xff] }
 0x1f4   :  { %1895 = vmatmul.bf16.gmra.mxu3 %v5086_v9  ;;  %v7889_v9 = vpop.permute.xlu2 %3438 }
 0x1f5   :  { %3713 = vadd.xlane.f32.xlu2 %v3614_v53  ;;  %9317 = vst [vmem:[#allocation13_spill] sm:$0xff] %v7889_v9  ;;  %v7891_v19 = vadd.f32 %v3492_v20, %v3044_v0 }
 0x1f6   :  { %v1687_v54 = vpop.f32.mrf.mxu2 }
 0x1f7   :  { %3717 = vadd.xlane.f32.xlu1 %v3616_v57  ;;  %v1688_v17 = vadd.f32 %v1687_v54, %v1519_v48  ;;  %v1856_v52 = vpop.f32.mrf.mxu3  ;;  %9318 = vst [vmem:[#allocation9_spill] sm:$0xff] %v7891_v19  ;;  %v3620_v2 = vmul.f32 %v7891_v19, %v7891_v19 }
 0x1f8   :  { %v1351_v18 = vpop.f32.mrf.mxu0  ;;  %v1520_v7 = vpop.f32.mrf.mxu1 }
 0x1f9   :  { %v1857_v13 = vadd.f32 %v1856_v52, %v1688_v17  ;;  %v1521_v55 = vadd.f32 %v1520_v7, %v1351_v18  ;;  %v7897_v52 = vpop.permute.xlu1 %3443  ;;  %v3046_v18 = vld [vmem:[%s9222_s2 + $0x158] sm:$0xff]  ;;  %v9320_v7 = vld [vmem:[#allocation40_spill] sm:$0xff] }
 0x1fa   :  { %9319 = vst [vmem:[#allocation16_spill] sm:$0xff] %v7897_v52 }
 0x1fb   :  { %v3493_v59 = vmul.f32 %v7425_v34, %v1857_v13  ;;  %v5370_v34 = vld [vmem:[%s9221_s0 + $0x3d4] sm:$0xf0] }
 0x1fc   :  { %v5098_v36 = vor.u32 %v5370_v34, %v5097_v10 }
 0x1fd   :  { %v7879_v28 = vadd.f32 %v3493_v59, %v3045_v39  ;;  %3719 = vadd.xlane.f32.xlu2 %v3617_v16 }
 0x1fe   :  { %v1689_v15 = vpop.f32.mrf.mxu2 }
 0x1ff   :  { %v3648_v14 = vpop.xlane.xlu0 %3647  ;;  %3723 = vadd.xlane.f32.xlu1 %v3619_v40  ;;  %v1690_v48 = vadd.f32 %v1689_v15, %v1521_v55  ;;  %v1858_v53 = vpop.f32.mrf.mxu3  ;;  %v3621_v4 = vmul.f32 %v7879_v28, %v7879_v28 }
 0x200   :  { %v7895_v57 = vmax.f32 %v3648_v14, 1e-16  ;;  %v1354_v29 = vpop.f32.mrf.mxu0  ;;  %v1523_v54 = vpop.f32.mrf.mxu1  ;;  %v5105_v14 = vld [vmem:[%s9221_s0 + $0x3e0] sm:$0xf] }
 0x201   :  { %v1859_v17 = vadd.f32 %v1858_v53, %v1690_v48  ;;  %3727 = vadd.xlane.f32.xlu0 %v3621_v4  ;;  %1393 = vmatmul.bf16.gmra.mxu0 %v5090_v63  ;;  %v1524_v39 = vadd.f32 %v1523_v54, %v1354_v29  ;;  %v5373_v48 = vld [vmem:[%s9221_s0 + $0x3ec] sm:$0xf0]  ;;  %v5371_v53 = vld [vmem:[%s9221_s0 + $0x3e4] sm:$0xf]  ;;  %v5107_v54 = vld [vmem:[%s9221_s0 + $0x3f0] sm:$0xf0] }
 0x202   :  { %5540 = vrsqrt.f32 %v7895_v57  ;;  %1562 = vmatmul.bf16.gmra.mxu1 %v5094_v27  ;;  %vm3861_vm2 = vweird.f32 %v7895_v57 }
 0x203   :  { %v3494_v13 = vmul.f32 %v9320_v7, %v1859_v17  ;;  %1731 = vmatmul.bf16.gmra.mxu2 %v5098_v36  ;;  %v9322_v36 = vld [vmem:[#allocation4_spill] sm:$0xff]  ;;  %v5374_v17 = vld [vmem:[%s9221_s0 + $0x3f4] sm:$0xf0] }
 0x204   :  { %1900 = vmatmul.bf16.gmra.mxu3 %v5102_v26  ;;  %v5113_v26 = vld [vmem:[%s9221_s0 + $0x3e8] sm:$0xf] }
 0x205   :  { %v7906_v22 = vadd.f32 %v3494_v13, %v3046_v18  ;;  %3725 = vadd.xlane.f32.xlu2 %v3620_v2  ;;  %v5106_v2 = vor.u32 %v5373_v48, %v5105_v14 }
 0x206   :  { %v1692_v20 = vpop.f32.mrf.mxu2 }
 0x207   :  { %9321 = vst [vmem:[#allocation17_spill] sm:$0xff] %v7906_v22  ;;  %v3656_v59 = vpop.xlane.xlu0 %3655  ;;  %v1693_v16 = vadd.f32 %v1692_v20, %v1524_v39  ;;  %v1861_v37 = vpop.f32.mrf.mxu3  ;;  %v3622_v31 = vmul.f32 %v7906_v22, %v7906_v22  ;;  %v5372_v20 = vld [vmem:[%s9221_s0 + $0x3ec] sm:$0xf] }
 0x208   :  { %v7910_v0 = vpop.eup %5540  ;;  %v7912_v10 = vmax.f32 %v3656_v59, 1e-16  ;;  %v3644_v34 = vpop.xlane.xlu2 %3643  ;;  %v5115_v59 = vld [vmem:[%s9221_s0 + $0x3f8] sm:$0xf0] }
 0x209   :  { %v1356_v55 = vpop.f32.mrf.mxu0  ;;  %v3856_v40 = vmul.f32 %v7910_v0, %v7895_v57  ;;  %v1862_v63 = vadd.f32 %v1861_v37, %v1693_v16  ;;  %v7919_v21 = vmax.f32 %v3644_v34, 1e-16  ;;  %v1525_v15 = vpop.f32.mrf.mxu1  ;;  %3729 = vadd.xlane.f32.xlu1 %v3622_v31  ;;  %v5110_v37 = vor.u32 %v5371_v53, %v5107_v54 }
 0x20a   :  { %5542 = vrsqrt.f32 %v7912_v10  ;;  %v3646_v27 = vpop.xlane.xlu1 %3645  ;;  %v1526_v39 = vadd.f32 %v1525_v15, %v1356_v55  ;;  %v5114_v31 = vor.u32 %v5374_v17, %v5113_v26  ;;  %vm3862_vm1 = vweird.f32 %v7910_v0 }
 0x20b   :  { %v3857_v4 = vmul.f32 %v7910_v0, %v3856_v40  ;;  %v3495_v29 = vmul.f32 %v9322_v36, %v1862_v63  ;;  %5544 = vrsqrt.f32 %v7919_v21  ;;  %v7943_v18 = vmax.f32 %v3646_v27, 1e-16  ;;  %vm3863_vm3 = vmor %vm3861_vm2, %vm3862_vm1 }
 0x20c   :  { %vm3901_vm4 = vweird.f32 %v7912_v10  ;;  %vm3841_vm7 = vweird.f32 %v7919_v21 }
 0x20d   :  { %v3858_v7 = vmul.f32 0.5, %v3857_v4  ;;  %v7945_v13 = vadd.f32 %v3495_v29, %v3047_v43  ;;  %5546 = vrsqrt.f32 %v7943_v18  ;;  %v5118_v4 = vor.u32 %v5372_v20, %v5115_v59  ;;  %v9324_v59 = vld [vmem:[#allocation36_spill] sm:$0xff] }
 0x20e   :  { %v1694_v16 = vpop.f32.mrf.mxu2  ;;  %vm3851_vm9 = vweird.f32 %v7943_v18 }
 0x20f   :  { %9323 = vst [vmem:[#allocation40_spill] sm:$0xff] %v7945_v13  ;;  %v3859_v34 = vsub.f32 1.5, %v3858_v7  ;;  %v3662_v40 = vpop.xlane.xlu0 %3661  ;;  %v1695_v63 = vadd.f32 %v1694_v16, %v1526_v39  ;;  %v1863_v55 = vpop.f32.mrf.mxu3  ;;  %v3623_v43 = vmul.f32 %v7945_v13, %v7945_v13  ;;  %v3048_v7 = vld [vmem:[%s9222_s2 + $0x168] sm:$0xff] }
 0x210   :  { %v7957_v15 = vpop.eup %5542  ;;  %v7959_v27 = vmax.f32 %v3662_v40, 1e-16  ;;  %v3650_v14 = vpop.xlane.xlu2 %3649  ;;  %v9325_v40 = vld [vmem:[#allocation14_spill] sm:$0xff] }
 0x211   :  { %v1359_v48 = vpop.f32.mrf.mxu0  ;;  %v7961_v36 = vpop.eup %5544  ;;  %v3860_v53 = vmul.f32 %v7910_v0, %v3859_v34  ;;  %v3896_v29 = vmul.f32 %v7957_v15, %v7912_v10  ;;  %v1864_v54 = vadd.f32 %v1863_v55, %v1695_v63  ;;  %3731 = vadd.xlane.f32.xlu2 %v3623_v43  ;;  %1398 = vmatmul.bf16.gmra.mxu0 %v5106_v2  ;;  %v7978_v16 = vmax.f32 %v3650_v14, 1e-16 }
 0x212   :  { %v1528_v26 = vpop.f32.mrf.mxu1  ;;  %v3836_v17 = vmul.f32 %v7961_v36, %v7919_v21  ;;  %5548 = vrsqrt.f32 %v7959_v27  ;;  %v3652_v57 = vpop.xlane.xlu1 %3651  ;;  %1567 = vmatmul.bf16.gmra.mxu1 %v5110_v37  ;;  %vm3902_vm5 = vweird.f32 %v7957_v15  ;;  %vm3842_vm6 = vweird.f32 %v7961_v36 }
 0x213   :  { %v3864_v39 = vsel %vm3863_vm3, %v7910_v0, %v3860_v53  ;;  %v3897_v20 = vmul.f32 %v7957_v15, %v3896_v29  ;;  %v3496_v2 = vmul.f32 %v9324_v59, %v1864_v54  ;;  %1736 = vmatmul.bf16.gmra.mxu2 %v5114_v31  ;;  %v7980_v34 = vpop.eup %5546  ;;  %v1529_v43 = vadd.f32 %v1528_v26, %v1359_v48  ;;  %vm3903_vm8 = vmor %vm3901_vm4, %vm3902_vm5 }
 0x214   :  { %v4477_v63 = vmul.f32 %v3864_v39, %v9325_v40  ;;  %v3837_v55 = vmul.f32 %v7961_v36, %v3836_v17  ;;  %v7984_v13 = vmax.f32 %v3652_v57, 1e-16  ;;  %1905 = vmatmul.bf16.gmra.mxu3 %v5118_v4  ;;  %v3846_v0 = vmul.f32 %v7980_v34, %v7943_v18  ;;  %vm3843_vm11 = vmor %vm3841_vm7, %vm3842_vm6 }
 0x215   :  { %v3898_v37 = vmul.f32 0.5, %v3897_v20  ;;  %v7988_v53 = vadd.f32 %v3496_v2, %v3048_v7  ;;  %5550 = vrsqrt.f32 %v7978_v16  ;;  %vm3852_vm10 = vweird.f32 %v7980_v34 }
 0x216   :  { %4541 = vst [vmem:[%s9223_s3 + $0x10] sm:$0xff] %v4477_v63  ;;  %v3838_v31 = vmul.f32 0.5, %v3837_v55  ;;  %v1697_v14 = vpop.f32.mrf.mxu2  ;;  %v3847_v4 = vmul.f32 %v7980_v34, %v3846_v0  ;;  %5552 = vrsqrt.f32 %v7984_v13  ;;  %vm3931_vm12 = vweird.f32 %v7959_v27  ;;  %vm3853_vm13 = vmor %vm3851_vm9, %vm3852_vm10 }
 0x217   :  { %9326 = vst [vmem:[#allocation4_spill] sm:$0xff] %v7988_v53  ;;  %v3899_v48 = vsub.f32 1.5, %v3898_v37  ;;  %v3668_v29 = vpop.xlane.xlu0 %3667  ;;  %v1866_v54 = vpop.f32.mrf.mxu3  ;;  %v1698_v57 = vadd.f32 %v1697_v14, %v1529_v43  ;;  %v3624_v59 = vmul.f32 %v7988_v53, %v7988_v53  ;;  %vm3871_vm15 = vweird.f32 %v7978_v16 }
 0x218   :  { %v7999_v26 = vpop.eup %5548  ;;  %v3839_v17 = vsub.f32 1.5, %v3838_v31  ;;  %v8001_v7 = vmax.f32 %v3668_v29, 1e-16  ;;  %v3654_v39 = vpop.xlane.xlu2 %3653  ;;  %v3848_v40 = vmul.f32 0.5, %v3847_v4  ;;  %vm3881_vm0 = vweird.f32 %v7984_v13 }
 0x219   :  { %v1361_v20 = vpop.f32.mrf.mxu0  ;;  %v3900_v2 = vmul.f32 %v7957_v15, %v3899_v48  ;;  %v3926_v63 = vmul.f32 %v7999_v26, %v7959_v27  ;;  %3733 = vadd.xlane.f32.xlu0 %v3624_v59  ;;  %v8021_v10 = vmax.f32 %v3654_v39, 1e-16  ;;  %v9327_v48 = vld [vmem:[#allocation18_spill] sm:$0xff]  ;;  %vm3932_vm14 = vweird.f32 %v7999_v26  ;;  %v9331_v27 = vld [vmem:[#allocation21_spill] sm:$0xff] }
 0x21a   :  { %v1530_v55 = vpop.f32.mrf.mxu1  ;;  %v3840_v43 = vmul.f32 %v7961_v36, %v3839_v17  ;;  %5554 = vrsqrt.f32 %v8001_v7  ;;  %v3658_v37 = vpop.xlane.xlu1 %3657  ;;  %v3849_v0 = vsub.f32 1.5, %v3848_v40  ;;  %v1867_v17 = vadd.f32 %v1866_v54, %v1698_v57  ;;  %vm3933_vm1 = vmor %vm3931_vm12, %vm3932_vm14 }
 0x21b   :  { %v3904_v21 = vsel %vm3903_vm8, %v7957_v15, %v3900_v2  ;;  %v3927_v31 = vmul.f32 %v7999_v26, %v3926_v63  ;;  %v8023_v14 = vpop.eup %5550  ;;  %v9328_v15 = vld [vmem:[#allocation19_spill] sm:$0xff]  ;;  %5556 = vrsqrt.f32 %v8021_v10  ;;  %v8057_v44 = vmax.f32 %v3658_v37, 1e-16 }
 0x21c   :  { %v4481_v4 = vmul.f32 %v3904_v21, %v9327_v48  ;;  %v3844_v29 = vsel %vm3843_vm11, %v7961_v36, %v3840_v43  ;;  %v8028_v59 = vpop.eup %5552  ;;  %v3850_v53 = vmul.f32 %v7980_v34, %v3849_v0  ;;  %v3866_v39 = vmul.f32 %v8023_v14, %v7978_v16 }
 0x21d   :  { %v4475_v2 = vmul.f32 %v3844_v29, %v9328_v15  ;;  %v3928_v40 = vmul.f32 0.5, %v3927_v31  ;;  %v3876_v36 = vmul.f32 %v8028_v59, %v7984_v13  ;;  %v9329_v31 = vld [vmem:[#allocation20_spill] sm:$0xff]  ;;  %v9330_v29 = vld [vmem:[#allocation15_spill] sm:$0xff]  ;;  %vm3872_vm2 = vweird.f32 %v8023_v14 }
 0x21e   :  { %4545 = vst [vmem:[%s9223_s3 + $0x30] sm:$0xff] %v4481_v4  ;;  %v1699_v54 = vpop.f32.mrf.mxu2  ;;  %v3854_v57 = vsel %vm3853_vm13, %v7980_v34, %v3850_v53  ;;  %v3867_v18 = vmul.f32 %v8023_v14, %v3866_v39  ;;  %v3497_v15 = vmul.f32 %v9330_v29, %v1867_v17  ;;  %v1531_v39 = vadd.f32 %v1530_v55, %v1361_v20  ;;  %vm3873_vm5 = vmor %vm3871_vm15, %vm3872_vm2  ;;  %v9334_v13 = vld [vmem:[#allocation23_spill] sm:$0xff] }
 0x21f   :  { %4539 = vst [vmem:[%s9223_s3] sm:$0xff] %v4475_v2  ;;  %v3929_v63 = vsub.f32 1.5, %v3928_v40  ;;  %v3674_v43 = vpop.xlane.xlu0 %3673  ;;  %v1868_v21 = vpop.f32.mrf.mxu3  ;;  %v4476_v48 = vmul.f32 %v3854_v57, %v9329_v31  ;;  %v3877_v4 = vmul.f32 %v8028_v59, %v3876_v36  ;;  %5558 = vrsqrt.f32 %v8057_v44 }
 0x220   :  { %v8052_v0 = vpop.eup %5554  ;;  %v3660_v2 = vpop.xlane.xlu2 %3659  ;;  %v3868_v53 = vmul.f32 0.5, %v3867_v18  ;;  %v8071_v17 = vmax.f32 %v3674_v43, 1e-16  ;;  %v1700_v18 = vadd.f32 %v1699_v54, %v1531_v39  ;;  %vm3882_vm3 = vweird.f32 %v8028_v59 }
 0x221   :  { %v1364_v52 = vpop.f32.mrf.mxu0  ;;  %v3930_v34 = vmul.f32 %v7999_v26, %v3929_v63  ;;  %v3956_v40 = vmul.f32 %v8052_v0, %v8001_v7  ;;  %4540 = vst [vmem:[%s9223_s3 + $0x8] sm:$0xff] %v4476_v48  ;;  %v3878_v37 = vmul.f32 0.5, %v3877_v4  ;;  %v3049_v63 = vld [vmem:[%s9222_s2 + $0x170] sm:$0xff]  ;;  %v8081_v43 = vpop.eup %5556  ;;  %vm3961_vm4 = vweird.f32 %v8001_v7  ;;  %vm3883_vm7 = vmor %vm3881_vm0, %vm3882_vm3 }
 0x222   :  { %v1533_v9 = vpop.f32.mrf.mxu1  ;;  %v3664_v36 = vpop.xlane.xlu1 %3663  ;;  %v3869_v55 = vsub.f32 1.5, %v3868_v53  ;;  %5560 = vrsqrt.f32 %v8071_v17  ;;  %v8085_v29 = vmax.f32 %v3660_v2, 1e-16  ;;  %vm3962_vm6 = vweird.f32 %v8052_v0 }
 0x223   :  { %v3934_v20 = vsel %vm3933_vm1, %v7999_v26, %v3930_v34  ;;  %v3957_v57 = vmul.f32 %v8052_v0, %v3956_v40  ;;  %v3879_v48 = vsub.f32 1.5, %v3878_v37  ;;  %v8096_v34 = vadd.f32 %v3497_v15, %v3049_v63  ;;  %v9333_v15 = vld [vmem:[#allocation22_spill] sm:$0xff]  ;;  %vm3963_vm9 = vmor %vm3961_vm4, %vm3962_vm6 }
 0x224   :  { %v4484_v31 = vmul.f32 %v3934_v20, %v9331_v27  ;;  %v3870_v4 = vmul.f32 %v8023_v14, %v3869_v55  ;;  %v3886_v53 = vmul.f32 %v8081_v43, %v8021_v10  ;;  %v1869_v16 = vadd.f32 %v1868_v21, %v1700_v18 }
 0x225   :  { %v3958_v26 = vmul.f32 0.5, %v3957_v57  ;;  %v3880_v54 = vmul.f32 %v8028_v59, %v3879_v48  ;;  %9332 = vst [vmem:[#allocation36_spill] sm:$0xff] %v8096_v34  ;;  %5562 = vrsqrt.f32 %v8085_v29  ;;  %v8106_v55 = vpop.eup %5558  ;;  %vm3891_vm8 = vweird.f32 %v8021_v10 }
 0x226   :  { %4548 = vst [vmem:[%s9223_s3 + $0x48] sm:$0xff] %v4484_v31  ;;  %v1702_v2 = vpop.f32.mrf.mxu2  ;;  %v3874_v40 = vsel %vm3873_vm5, %v8023_v14, %v3870_v4  ;;  %v3887_v27 = vmul.f32 %v8081_v43, %v3886_v53  ;;  %v3906_v18 = vmul.f32 %v8106_v55, %v8057_v44  ;;  %v1534_v4 = vadd.f32 %v1533_v9, %v1364_v52 }
 0x227   :  { %v3959_v39 = vsub.f32 1.5, %v3958_v26  ;;  %v3680_v37 = vpop.xlane.xlu0 %3679  ;;  %v1871_v20 = vpop.f32.mrf.mxu3  ;;  %v4478_v57 = vmul.f32 %v3874_v40, %v9333_v15  ;;  %v3884_v63 = vsel %vm3883_vm7, %v8028_v59, %v3880_v54  ;;  %vm3911_vm10 = vweird.f32 %v8057_v44 }
 0x228   :  { %v3666_v14 = vpop.xlane.xlu2 %3665  ;;  %v4479_v48 = vmul.f32 %v3884_v63, %v9334_v13  ;;  %v8120_v40 = vpop.eup %5560  ;;  %v3888_v59 = vmul.f32 0.5, %v3887_v27  ;;  %v8130_v54 = vmax.f32 %v3664_v36, 1e-16  ;;  %v3625_v9 = vmul.f32 %v8096_v34, %v8096_v34  ;;  %v3050_v27 = vld [vmem:[%s9222_s2 + $0x178] sm:$0xff] }
 0x229   :  { %v8112_v31 = vpop.f32.mrf.mxu0  ;;  %v3960_v21 = vmul.f32 %v8052_v0, %v3959_v39  ;;  %4542 = vst [vmem:[%s9223_s3 + $0x18] sm:$0xff] %v4478_v57  ;;  %v3907_v39 = vmul.f32 %v8106_v55, %v3906_v18  ;;  %v3986_v7 = vmul.f32 %v8120_v40, %v8071_v17  ;;  %v3498_v15 = vmul.f32 %v7632_v30, %v1869_v16  ;;  %v9335_v57 = vld [vmem:[#allocation24_spill] sm:$0xff] }
 0x22a   :  { %v8118_v26 = vpop.f32.mrf.mxu1  ;;  %v3670_v52 = vpop.xlane.xlu1 %3669  ;;  %4543 = vst [vmem:[%s9223_s3 + $0x20] sm:$0xff] %v4479_v48  ;;  %v3889_v63 = vsub.f32 1.5, %v3888_v59  ;;  %vm3892_vm11 = vweird.f32 %v8081_v43  ;;  %5564 = vrsqrt.f32 %v8130_v54  ;;  %3735 = vadd.xlane.f32.xlu1 %v3625_v9  ;;  %v1703_v30 = vadd.f32 %v1702_v2, %v1534_v4 }
 0x22b   :  { %v3964_v53 = vsel %vm3963_vm9, %v8052_v0, %v3960_v21  ;;  %v8148_v0 = vpop.eup %5562  ;;  %v3908_v13 = vmul.f32 0.5, %v3907_v39  ;;  %v3987_v48 = vmul.f32 %v8120_v40, %v3986_v7  ;;  %v8151_v21 = vmax.f32 %v3680_v37, 1e-16  ;;  %vm3893_vm13 = vmor %vm3891_vm8, %vm3892_vm11 }
 0x22c   :  { %v4487_v36 = vmul.f32 %v3964_v53, %v9335_v57  ;;  %v3890_v16 = vmul.f32 %v8081_v43, %v3889_v63  ;;  %vm3912_vm12 = vweird.f32 %v8106_v55  ;;  %v3916_v18 = vmul.f32 %v8148_v0, %v8085_v29 }
 0x22d   :  { %v8160_v59 = vmax.f32 %v3666_v14, 1e-16  ;;  %v3909_v2 = vsub.f32 1.5, %v3908_v13  ;;  %v3988_v37 = vmul.f32 0.5, %v3987_v48  ;;  %v8166_v4 = vadd.f32 %v3498_v15, %v3050_v27  ;;  %vm3913_vm15 = vmor %vm3911_vm10, %vm3912_vm12 }
 0x22e   :  { %4551 = vst [vmem:[%s9223_s3 + $0x60] sm:$0xff] %v4487_v36  ;;  %v1704_v9 = vpop.f32.mrf.mxu2  ;;  %5566 = vrsqrt.f32 %v8151_v21  ;;  %v3894_v7 = vsel %vm3893_vm13, %v8081_v43, %v3890_v16  ;;  %vm3992_vm14 = vweird.f32 %v8120_v40  ;;  %v3917_v14 = vmul.f32 %v8148_v0, %v3916_v18  ;;  %v9337_v36 = vld [vmem:[#allocation25_spill] sm:$0xff] }
 0x22f   :  { %9336 = vst [vmem:[#allocation14_spill] sm:$0xff] %v8166_v4  ;;  %v3686_v53 = vpop.xlane.xlu0 %3685  ;;  %v8169_v39 = vpop.f32.mrf.mxu3  ;;  %5568 = vrsqrt.f32 %v8160_v59  ;;  %v4480_v63 = vmul.f32 %v3894_v7, %v9337_v36  ;;  %v3910_v15 = vmul.f32 %v8106_v55, %v3909_v2  ;;  %v3989_v27 = vsub.f32 1.5, %v3988_v37 }
 0x230   :  { %v3672_v57 = vpop.xlane.xlu2 %3671  ;;  %v1872_v13 = vadd.f32 %v1871_v20, %v1703_v30  ;;  %v8181_v34 = vpop.eup %5564  ;;  %vm3991_vm0 = vweird.f32 %v8071_v17  ;;  %v3918_v43 = vmul.f32 0.5, %v3917_v14  ;;  %vm3921_vm1 = vweird.f32 %v8085_v29  ;;  %v9338_v17 = vld [vmem:[#allocation26_spill] sm:$0xff]  ;;  %v9339_v14 = vld [vmem:[#allocation11_spill] sm:$0xff] }
 0x231   :  { %v8175_v10 = vpop.f32.mrf.mxu0  ;;  %v8189_v16 = vmax.f32 %v3670_v52, 1e-16  ;;  %4544 = vst [vmem:[%s9223_s3 + $0x28] sm:$0xff] %v4480_v63  ;;  %v3914_v20 = vsel %vm3913_vm15, %v8106_v55, %v3910_v15  ;;  %v3990_v30 = vmul.f32 %v8120_v40, %v3989_v27  ;;  %v3936_v44 = vmul.f32 %v8181_v34, %v8130_v54  ;;  %vm3993_vm3 = vmor %vm3991_vm0, %vm3992_vm14  ;;  %v9340_v27 = vld [vmem:[#allocation27_spill] sm:$0xff] }
 0x232   :  { %v8179_v48 = vpop.f32.mrf.mxu1  ;;  %v8191_v18 = vpop.xlane.xlu1 %3675  ;;  %vm3941_vm2 = vweird.f32 %v8130_v54  ;;  %v4482_v2 = vmul.f32 %v3914_v20, %v9338_v17  ;;  %v3919_v52 = vsub.f32 1.5, %v3918_v43  ;;  %vm3922_vm4 = vweird.f32 %v8148_v0  ;;  %v3051_v17 = vld [vmem:[%s9222_s2 + $0x180] sm:$0xff]  ;;  %v9343_v54 = vld [vmem:[#allocation29_spill] sm:$0xff] }
 0x233   :  { %5570 = vrsqrt.f32 %v8189_v16  ;;  %v3994_v55 = vsel %vm3993_vm3, %v8120_v40, %v3990_v30  ;;  %v3937_v7 = vmul.f32 %v8181_v34, %v3936_v44  ;;  %v3499_v36 = vmul.f32 %v9339_v14, %v1872_v13  ;;  %vm3923_vm6 = vmor %vm3921_vm1, %vm3922_vm4 }
 0x234   :  { %v8206_v37 = vpop.eup %5566  ;;  %v3626_v63 = vmul.f32 %v8166_v4, %v8166_v4  ;;  %4546 = vst [vmem:[%s9223_s3 + $0x38] sm:$0xff] %v4482_v2  ;;  %v4490_v43 = vmul.f32 %v3994_v55, %v9340_v27  ;;  %v3920_v20 = vmul.f32 %v8148_v0, %v3919_v52  ;;  %vm4021_vm5 = vweird.f32 %v8151_v21 }
 0x235   :  { %v8213_v15 = vpop.eup %5568  ;;  %v4016_v40 = vmul.f32 %v8206_v37, %v8151_v21  ;;  %v1536_v13 = vadd.f32 %v8118_v26, %v8112_v31  ;;  %v3938_v44 = vmul.f32 0.5, %v3937_v7  ;;  %vm3942_vm7 = vweird.f32 %v8181_v34 }
 0x236   :  { %v8225_v30 = vpop.f32.mrf.mxu2  ;;  %v3946_v2 = vmul.f32 %v8213_v15, %v8160_v59  ;;  %3737 = vadd.xlane.f32.xlu2 %v3626_v63  ;;  %v8237_v52 = vmax.f32 %v3686_v53, 1e-16  ;;  %4554 = vst [vmem:[%s9223_s3 + $0x78] sm:$0xff] %v4490_v43  ;;  %v3924_v29 = vsel %vm3923_vm6, %v8148_v0, %v3920_v20  ;;  %v8246_v7 = vmax.f32 %v3672_v57, 1e-16  ;;  %v9341_v63 = vld [vmem:[#allocation28_spill] sm:$0xff]  ;;  %vm3943_vm9 = vmor %vm3941_vm2, %vm3942_vm7 }
 0x237   :  { %v8239_v31 = vpop.f32.mrf.mxu3  ;;  %v4017_v26 = vmul.f32 %v8206_v37, %v4016_v40  ;;  %v1705_v55 = vadd.f32 %v1704_v9, %v1536_v13  ;;  %v4483_v53 = vmul.f32 %v3924_v29, %v9341_v63  ;;  %v3939_v4 = vsub.f32 1.5, %v3938_v44  ;;  %v3692_v47 = vpop.xlane.xlu0 %3691  ;;  %v3052_v29 = vld [vmem:[%s9222_s2 + $0x188] sm:$0xff] }
 0x238   :  { %v8248_v14 = vpop.xlane.xlu2 %3677  ;;  %v3947_v22 = vmul.f32 %v8213_v15, %v3946_v2  ;;  %5572 = vrsqrt.f32 %v8237_v52  ;;  %v8259_v9 = vadd.f32 %v3499_v36, %v3051_v17  ;;  %vm3951_vm8 = vweird.f32 %v8160_v59 }
 0x239   :  { %v8250_v27 = vpop.f32.mrf.mxu0  ;;  %v8257_v0 = vpop.eup %5570  ;;  %v4018_v20 = vmul.f32 0.5, %v4017_v26  ;;  %v1874_v57 = vadd.f32 %v8169_v39, %v1705_v55  ;;  %5574 = vrsqrt.f32 %v8246_v7  ;;  %4547 = vst [vmem:[%s9223_s3 + $0x40] sm:$0xff] %v4483_v53  ;;  %v3940_v13 = vmul.f32 %v8181_v34, %v3939_v4 }
 0x23a   :  { %v8255_v43 = vpop.f32.mrf.mxu1  ;;  %9342 = vst [vmem:[#allocation18_spill] sm:$0xff] %v8259_v9  ;;  %v3682_v40 = vpop.xlane.xlu1 %3681  ;;  %v3948_v44 = vmul.f32 0.5, %v3947_v22  ;;  %v3966_v2 = vmul.f32 %v8257_v0, %v8189_v16  ;;  %vm4022_vm10 = vweird.f32 %v8206_v37  ;;  %vm3952_vm11 = vweird.f32 %v8213_v15 }
 0x23b   :  { %v4019_v39 = vsub.f32 1.5, %v4018_v20  ;;  %v3500_v36 = vmul.f32 %v7663_v25, %v1874_v57  ;;  %v3944_v4 = vsel %vm3943_vm9, %v8181_v34, %v3940_v13  ;;  %v8283_v26 = vmax.f32 %v8191_v18, 1e-16  ;;  %vm4023_vm13 = vmor %vm4021_vm5, %vm4022_vm10 }
 0x23c   :  { %v3949_v22 = vsub.f32 1.5, %v3948_v44  ;;  %v3967_v17 = vmul.f32 %v8257_v0, %v3966_v2  ;;  %v4485_v55 = vmul.f32 %v3944_v4, %v9343_v54  ;;  %vm3972_vm12 = vweird.f32 %v8257_v0  ;;  %vm3953_vm14 = vmor %vm3951_vm8, %vm3952_vm11  ;;  %v9345_v4 = vld [vmem:[#allocation30_spill] sm:$0xff] }
 0x23d   :  { %v4020_v63 = vmul.f32 %v8206_v37, %v4019_v39  ;;  %v3627_v25 = vmul.f32 %v8259_v9, %v8259_v9  ;;  %v1539_v57 = vadd.f32 %v8179_v48, %v8175_v10  ;;  %5576 = vrsqrt.f32 %v8283_v26 }
 0x23e   :  { %v8290_v34 = vpop.f32.mrf.mxu2  ;;  %v8292_v53 = vpop.eup %5572  ;;  %v3950_v20 = vmul.f32 %v8213_v15, %v3949_v22  ;;  %v3968_v18 = vmul.f32 0.5, %v3967_v17  ;;  %4549 = vst [vmem:[%s9223_s3 + $0x50] sm:$0xff] %v4485_v55  ;;  %v8314_v10 = vadd.f32 %v3500_v36, %v3052_v29  ;;  %v8316_v48 = vmax.f32 %v3692_v47, 1e-16 }
 0x23f   :  { %v8300_v13 = vpop.f32.mrf.mxu3  ;;  %v8302_v44 = vpop.eup %5574  ;;  %v4024_v2 = vsel %vm4023_vm13, %v8206_v37, %v4020_v63  ;;  %v4046_v21 = vmul.f32 %v8292_v53, %v8237_v52  ;;  %3739 = vadd.xlane.f32.xlu0 %v3627_v25  ;;  %v9346_v63 = vld [vmem:[#allocation31_spill] sm:$0xff]  ;;  %vm3971_vm15 = vweird.f32 %v8189_v16  ;;  %v1708_v29 = vadd.f32 %v8225_v30, %v1539_v57 }
 0x240   :  { %9344 = vst [vmem:[#allocation19_spill] sm:$0xff] %v8314_v10  ;;  %v4493_v22 = vmul.f32 %v4024_v2, %v9345_v4  ;;  %v3954_v17 = vsel %vm3953_vm14, %v8213_v15, %v3950_v20  ;;  %v3969_v37 = vsub.f32 1.5, %v3968_v18  ;;  %v3976_v54 = vmul.f32 %v8302_v44, %v8246_v7  ;;  %v3684_v59 = vpop.xlane.xlu2 %3683  ;;  %v3698_v25 = vpop.xlane.xlu0 %3697  ;;  %vm3973_vm0 = vmor %vm3971_vm15, %vm3972_vm12 }
 0x241   :  { %v8318_v39 = vpop.f32.mrf.mxu0  ;;  %v4486_v9 = vmul.f32 %v3954_v17, %v9346_v63  ;;  %v4047_v36 = vmul.f32 %v8292_v53, %v4046_v21  ;;  %5578 = vrsqrt.f32 %v8316_v48  ;;  %vm4051_vm1 = vweird.f32 %v8237_v52 }
 0x242   :  { %v8324_v55 = vpop.f32.mrf.mxu1  ;;  %4557 = vst [vmem:[%s9223_s3 + $0x90] sm:$0xff] %v4493_v22  ;;  %v3970_v47 = vmul.f32 %v8257_v0, %v3969_v37  ;;  %v3977_v15 = vmul.f32 %v8302_v44, %v3976_v54  ;;  %v8343_v18 = vmax.f32 %v8248_v14, 1e-16  ;;  %v8345_v2 = vmax.f32 %v3682_v40, 1e-16  ;;  %v8347_v16 = vpop.xlane.xlu1 %3687  ;;  %v9347_v22 = vld [vmem:[#allocation32_spill] sm:$0xff] }
 0x243   :  { %4550 = vst [vmem:[%s9223_s3 + $0x58] sm:$0xff] %v4486_v9  ;;  %v4048_v20 = vmul.f32 0.5, %v4047_v36  ;;  %v8349_v21 = vpop.eup %5576  ;;  %v1877_v9 = vadd.f32 %v8239_v31, %v1708_v29  ;;  %v3628_v4 = vmul.f32 %v8314_v10, %v8314_v10  ;;  %vm4052_vm2 = vweird.f32 %v8292_v53 }
 0x244   :  { %v3974_v30 = vsel %vm3973_vm0, %v8257_v0, %v3970_v47  ;;  %v3978_v57 = vmul.f32 0.5, %v3977_v15  ;;  %v3996_v14 = vmul.f32 %v8349_v21, %v8283_v26  ;;  %vm3982_vm3 = vweird.f32 %v8302_v44  ;;  %vm4053_vm4 = vmor %vm4051_vm1, %vm4052_vm2 }
 0x245   :  { %v4488_v17 = vmul.f32 %v3974_v30, %v9347_v22  ;;  %v4049_v37 = vsub.f32 1.5, %v4048_v20  ;;  %5580 = vrsqrt.f32 %v8343_v18  ;;  %v1541_v31 = vadd.f32 %v8255_v43, %v8250_v27  ;;  %3741 = vadd.xlane.f32.xlu1 %v3628_v4 }
 0x246   :  { %v8359_v40 = vpop.f32.mrf.mxu2  ;;  %v3979_v54 = vsub.f32 1.5, %v3978_v57  ;;  %v3997_v47 = vmul.f32 %v8349_v21, %v3996_v14  ;;  %v3501_v15 = vmul.f32 %v7684_v33, %v1877_v9  ;;  %5582 = vrsqrt.f32 %v8345_v2  ;;  %v3053_v33 = vld [vmem:[%s9222_s2 + $0x190] sm:$0xff]  ;;  %v9348_v9 = vld [vmem:[#allocation33_spill] sm:$0xff] }
 0x247   :  { %v8365_v0 = vpop.f32.mrf.mxu3  ;;  %v8367_v63 = vpop.eup %5578  ;;  %4552 = vst [vmem:[%s9223_s3 + $0x68] sm:$0xff] %v4488_v17  ;;  %v4050_v36 = vmul.f32 %v8292_v53, %v4049_v37  ;;  %vm3981_vm5 = vweird.f32 %v8246_v7  ;;  %vm4002_vm6 = vweird.f32 %v8349_v21  ;;  %v8395_v57 = vmax.f32 %v3698_v25, 1e-16 }
 0x248   :  { %v3980_v27 = vmul.f32 %v8302_v44, %v3979_v54  ;;  %v4076_v43 = vmul.f32 %v8367_v63, %v8316_v48  ;;  %vm3983_vm7 = vmor %vm3981_vm5, %vm3982_vm3  ;;  %v3998_v52 = vmul.f32 0.5, %v3997_v47  ;;  %v1710_v7 = vadd.f32 %v8290_v34, %v1541_v31  ;;  %v8403_v14 = vpop.xlane.xlu2 %3689  ;;  %v9349_v54 = vld [vmem:[#allocation34_spill] sm:$0xff] }
 0x249   :  { %v8376_v29 = vpop.f32.mrf.mxu0  ;;  %v4054_v30 = vsel %vm4053_vm4, %v8292_v53, %v4050_v36  ;;  %v8401_v37 = vmax.f32 %v3684_v59, 1e-16  ;;  %v8406_v10 = vadd.f32 %v3501_v15, %v3053_v33  ;;  %5584 = vrsqrt.f32 %v8395_v57  ;;  %v3704_v59 = vpop.xlane.xlu0 %3703 }
 0x24a   :  { %v8390_v20 = vpop.f32.mrf.mxu1  ;;  %v4496_v4 = vmul.f32 %v4054_v30, %v9348_v9  ;;  %v3984_v22 = vsel %vm3983_vm7, %v8302_v44, %v3980_v27  ;;  %v4077_v17 = vmul.f32 %v8367_v63, %v4076_v43  ;;  %v3999_v36 = vsub.f32 1.5, %v3998_v52 }
 0x24b   :  { %v4489_v53 = vmul.f32 %v3984_v22, %v9349_v54  ;;  %9350 = vst [vmem:[#allocation20_spill] sm:$0xff] %v8406_v10  ;;  %v8409_v25 = vpop.eup %5580  ;;  %vm4001_vm8 = vweird.f32 %v8283_v26  ;;  %v1879_v44 = vadd.f32 %v8300_v13, %v1710_v7  ;;  %5586 = vrsqrt.f32 %v8401_v37  ;;  %v3694_v26 = vpop.xlane.xlu1 %3693  ;;  %v9351_v22 = vld [vmem:[#allocation35_spill] sm:$0xff] }
 0x24c   :  { %4560 = vst [vmem:[%s9223_s3 + $0xa8] sm:$0xff] %v4496_v4  ;;  %v4078_v34 = vmul.f32 0.5, %v4077_v17  ;;  %v8417_v31 = vpop.eup %5582  ;;  %v4000_v47 = vmul.f32 %v8349_v21, %v3999_v36  ;;  %vm4081_vm9 = vweird.f32 %v8316_v48  ;;  %v4006_v15 = vmul.f32 %v8409_v25, %v8343_v18  ;;  %vm4003_vm11 = vmor %vm4001_vm8, %vm4002_vm6  ;;  %v9352_v36 = vld [vmem:[#allocation6_spill] sm:$0xff] }
 0x24d   :  { %4553 = vst [vmem:[%s9223_s3 + $0x70] sm:$0xff] %v4489_v53  ;;  %vm4011_vm10 = vweird.f32 %v8343_v18  ;;  %vm4082_vm12 = vweird.f32 %v8367_v63  ;;  %v4026_v43 = vmul.f32 %v8417_v31, %v8345_v2  ;;  %vm4031_vm13 = vweird.f32 %v8345_v2  ;;  %v9355_v2 = vld [vmem:[#allocation39_spill] sm:$0xff] }
 0x24e   :  { %v8427_v13 = vpop.f32.mrf.mxu2  ;;  %v4079_v27 = vsub.f32 1.5, %v4078_v34  ;;  %v4004_v30 = vsel %vm4003_vm11, %v8349_v21, %v4000_v47  ;;  %v4007_v52 = vmul.f32 %v8409_v25, %v4006_v15  ;;  %v8440_v7 = vmax.f32 %v8347_v16, 1e-16  ;;  %vm4083_vm14 = vmor %vm4081_vm9, %vm4082_vm12  ;;  %v3054_v47 = vld [vmem:[%s9222_s2 + $0x198] sm:$0xff] }
 0x24f   :  { %v8435_v33 = vpop.f32.mrf.mxu3  ;;  %v3629_v9 = vmul.f32 %v8406_v10, %v8406_v10  ;;  %v4491_v17 = vmul.f32 %v4004_v30, %v9351_v22  ;;  %v4027_v53 = vmul.f32 %v8417_v31, %v4026_v43  ;;  %v3502_v34 = vmul.f32 %v9352_v36, %v1879_v44  ;;  %v8452_v21 = vpop.eup %5584 }
 0x250   :  { %v4080_v54 = vmul.f32 %v8367_v63, %v4079_v27  ;;  %v4008_v16 = vmul.f32 0.5, %v4007_v52  ;;  %v1544_v15 = vadd.f32 %v8324_v55, %v8318_v39  ;;  %5588 = vrsqrt.f32 %v8440_v7  ;;  %v9353_v39 = vld [vmem:[#allocation37_spill] sm:$0xff] }
 0x251   :  { %v8444_v4 = vpop.f32.mrf.mxu0  ;;  %3743 = vadd.xlane.f32.xlu2 %v3629_v9  ;;  %v8464_v44 = vmax.f32 %v3704_v59, 1e-16  ;;  %v8466_v27 = vpop.eup %5586  ;;  %4555 = vst [vmem:[%s9223_s3 + $0x80] sm:$0xff] %v4491_v17  ;;  %vm4012_vm15 = vweird.f32 %v8409_v25  ;;  %v4028_v43 = vmul.f32 0.5, %v4027_v53  ;;  %v4106_v30 = vmul.f32 %v8452_v21, %v8395_v57 }
 0x252   :  { %v8450_v19 = vpop.f32.mrf.mxu1  ;;  %v4084_v48 = vsel %vm4083_vm14, %v8367_v63, %v4080_v54  ;;  %vm4111_vm0 = vweird.f32 %v8395_v57  ;;  %v4009_v59 = vsub.f32 1.5, %v4008_v16  ;;  %vm4032_vm1 = vweird.f32 %v8417_v31  ;;  %v8484_v17 = vpop.xlane.xlu2 %3695  ;;  %vm4013_vm2 = vmor %vm4011_vm10, %vm4012_vm15 }
 0x253   :  { %v4499_v55 = vmul.f32 %v4084_v48, %v9353_v39  ;;  %v4036_v52 = vmul.f32 %v8466_v27, %v8401_v37  ;;  %v4029_v9 = vsub.f32 1.5, %v4028_v43  ;;  %v4107_v22 = vmul.f32 %v8452_v21, %v4106_v30  ;;  %v3710_v30 = vpop.xlane.xlu0 %3709  ;;  %vm4033_vm4 = vmor %vm4031_vm13, %vm4032_vm1 }
 0x254   :  { %v8481_v63 = vadd.f32 %v3502_v34, %v3054_v47  ;;  %5590 = vrsqrt.f32 %v8464_v44  ;;  %v4010_v54 = vmul.f32 %v8409_v25, %v4009_v59  ;;  %v1713_v36 = vadd.f32 %v8359_v40, %v1544_v15  ;;  %v9354_v59 = vld [vmem:[#allocation38_spill] sm:$0xff] }
 0x255   :  { %4563 = vst [vmem:[%s9223_s3 + $0xc0] sm:$0xff] %v4499_v55  ;;  %v4037_v53 = vmul.f32 %v8466_v27, %v4036_v52  ;;  %v8493_v16 = vmax.f32 %v8403_v14, 1e-16  ;;  %v4030_v34 = vmul.f32 %v8417_v31, %v4029_v9  ;;  %v4108_v47 = vmul.f32 0.5, %v4107_v22  ;;  %v8516_v55 = vpop.xlane.xlu1 %3699 }
 0x256   :  { %v8495_v48 = vpop.f32.mrf.mxu2  ;;  %vm4112_vm3 = vweird.f32 %v8452_v21  ;;  %v8503_v43 = vmax.f32 %v3694_v26, 1e-16  ;;  %v8507_v40 = vpop.eup %5588  ;;  %v4014_v14 = vsel %vm4013_vm2, %v8409_v25, %v4010_v54  ;;  %v1882_v15 = vadd.f32 %v8365_v0, %v1713_v36 }
 0x257   :  { %v8505_v39 = vpop.f32.mrf.mxu3  ;;  %v4038_v18 = vmul.f32 0.5, %v4037_v53  ;;  %5592 = vrsqrt.f32 %v8493_v16  ;;  %v4492_v52 = vmul.f32 %v4014_v14, %v9354_v59  ;;  %v4034_v9 = vsel %vm4033_vm4, %v8417_v31, %v4030_v34  ;;  %vm4113_vm8 = vmor %vm4111_vm0, %vm4112_vm3 }
 0x258   :  { %v4109_v22 = vsub.f32 1.5, %v4108_v47  ;;  %v4056_v25 = vmul.f32 %v8507_v40, %v8440_v7  ;;  %v4494_v53 = vmul.f32 %v4034_v9, %v9355_v2  ;;  %vm4041_vm5 = vweird.f32 %v8401_v37  ;;  %v9356_v9 = vld [vmem:[#allocation8_spill] sm:$0xff] }
 0x259   :  { %v8518_v26 = vpop.f32.mrf.mxu0  ;;  %v4039_v10 = vsub.f32 1.5, %v4038_v18  ;;  %vm4042_vm6 = vweird.f32 %v8466_v27  ;;  %4556 = vst [vmem:[%s9223_s3 + $0x88] sm:$0xff] %v4492_v52  ;;  %vm4061_vm7 = vweird.f32 %v8440_v7  ;;  %5594 = vrsqrt.f32 %v8503_v43  ;;  %v9358_v7 = vld [vmem:[#allocation10_spill] sm:$0xff] }
 0x25a   :  { %v8524_v54 = vpop.f32.mrf.mxu1  ;;  %v8529_v0 = vpop.eup %5590  ;;  %v4110_v31 = vmul.f32 %v8452_v21, %v4109_v22  ;;  %v4057_v36 = vmul.f32 %v8507_v40, %v4056_v25  ;;  %4558 = vst [vmem:[%s9223_s3 + $0x98] sm:$0xff] %v4494_v53  ;;  %vm4141_vm9 = vweird.f32 %v8464_v44  ;;  %v1546_v14 = vadd.f32 %v8390_v20, %v8376_v29  ;;  %vm4043_vm10 = vmor %vm4041_vm5, %vm4042_vm6  ;;  %v3055_v29 = vld [vmem:[%s9222_s2 + $0x1a0] sm:$0xff] }
 0x25b   :  { %v4040_v34 = vmul.f32 %v8466_v27, %v4039_v10  ;;  %v4136_v47 = vmul.f32 %v8529_v0, %v8464_v44  ;;  %v3503_v52 = vmul.f32 %v7736_v61, %v1882_v15  ;;  %v3630_v57 = vmul.f32 %v8481_v63, %v8481_v63  ;;  %v9357_v61 = vld [vmem:[#allocation5_spill] sm:$0xff] }
 0x25c   :  { %v4114_v18 = vsel %vm4113_vm8, %v8452_v21, %v4110_v31  ;;  %v4058_v59 = vmul.f32 0.5, %v4057_v36  ;;  %v8565_v20 = vmax.f32 %v3710_v30, 1e-16  ;;  %vm4062_vm11 = vweird.f32 %v8507_v40 }
 0x25d   :  { %v8557_v10 = vpop.eup %5592  ;;  %v4502_v22 = vmul.f32 %v4114_v18, %v9356_v9  ;;  %v4044_v25 = vsel %vm4043_vm10, %v8466_v27, %v4040_v34  ;;  %v4137_v2 = vmul.f32 %v8529_v0, %v4136_v47  ;;  %3745 = vadd.xlane.f32.xlu0 %v3630_v57  ;;  %v8573_v27 = vpop.xlane.xlu2 %3701  ;;  %vm4142_vm12 = vweird.f32 %v8529_v0  ;;  %vm4063_vm13 = vmor %vm4061_vm7, %vm4062_vm11 }
 0x25e   :  { %v8567_v37 = vpop.f32.mrf.mxu2  ;;  %v4495_v21 = vmul.f32 %v4044_v25, %v9357_v61  ;;  %v4059_v15 = vsub.f32 1.5, %v4058_v59  ;;  %v4066_v53 = vmul.f32 %v8557_v10, %v8493_v16  ;;  %5596 = vrsqrt.f32 %v8565_v20  ;;  %v3716_v25 = vpop.xlane.xlu0 %3715  ;;  %vm4143_vm15 = vmor %vm4141_vm9, %vm4142_vm12 }
 0x25f   :  { %v8575_v31 = vpop.f32.mrf.mxu3  ;;  %4566 = vst [vmem:[%s9223_s3 + $0xd8] sm:$0xff] %v4502_v22  ;;  %v4138_v30 = vmul.f32 0.5, %v4137_v2  ;;  %v1715_v36 = vadd.f32 %v8427_v13, %v1546_v14  ;;  %v8585_v47 = vpop.eup %5594  ;;  %v8591_v59 = vadd.f32 %v3503_v52, %v3055_v29  ;;  %v8595_v9 = vmax.f32 %v8484_v17, 1e-16 }
 0x260   :  { %4559 = vst [vmem:[%s9223_s3 + $0xa0] sm:$0xff] %v4495_v21  ;;  %v4060_v18 = vmul.f32 %v8507_v40, %v4059_v15  ;;  %v4067_v57 = vmul.f32 %v8557_v10, %v4066_v53  ;;  %vm4072_vm14 = vweird.f32 %v8557_v10  ;;  %v4086_v14 = vmul.f32 %v8585_v47, %v8503_v43  ;;  %v3706_v2 = vpop.xlane.xlu1 %3705 }
 0x261   :  { %v8583_v34 = vpop.f32.mrf.mxu0  ;;  %v4139_v13 = vsub.f32 1.5, %v4138_v30  ;;  %v1884_v52 = vadd.f32 %v8435_v33, %v1715_v36  ;;  %5598 = vrsqrt.f32 %v8595_v9  ;;  %v1549_v61 = vadd.f32 %v8450_v19, %v8444_v4 }
 0x262   :  { %v8597_v22 = vpop.f32.mrf.mxu1  ;;  %v4064_v17 = vsel %vm4063_vm13, %v8507_v40, %v4060_v18  ;;  %v4068_v29 = vmul.f32 0.5, %v4067_v57  ;;  %v4087_v53 = vmul.f32 %v8585_v47, %v4086_v14  ;;  %v3056_v40 = vld [vmem:[%s9222_s2 + $0x1a8] sm:$0xff]  ;;  %v8623_v19 = vmax.f32 %v8516_v55, 1e-16 }
 0x263   :  { %v4497_v21 = vmul.f32 %v4064_v17, %v9358_v7  ;;  %v4140_v15 = vmul.f32 %v8529_v0, %v4139_v13  ;;  %v3504_v30 = vmul.f32 %v7754_v56, %v1884_v52  ;;  %v3631_v4 = vmul.f32 %v8591_v59, %v8591_v59 }
 0x264   :  { %v4069_v33 = vsub.f32 1.5, %v4068_v29  ;;  %v8627_v36 = vmax.f32 %v3716_v25, 1e-16  ;;  %v8629_v18 = vpop.eup %5596  ;;  %vm4071_vm0 = vweird.f32 %v8493_v16  ;;  %v4088_v44 = vmul.f32 0.5, %v4087_v53 }
 0x265   :  { %4561 = vst [vmem:[%s9223_s3 + $0xb0] sm:$0xff] %v4497_v21  ;;  %v4144_v56 = vsel %vm4143_vm15, %v8529_v0, %v4140_v15  ;;  %v4166_v14 = vmul.f32 %v8629_v18, %v8565_v20  ;;  %3747 = vadd.xlane.f32.xlu1 %v3631_v4  ;;  %v1718_v52 = vadd.f32 %v8495_v48, %v1549_v61  ;;  %vm4073_vm1 = vmor %vm4071_vm0, %vm4072_vm14  ;;  %vm4092_vm2 = vweird.f32 %v8585_v47  ;;  %v3708_v61 = vpop.xlane.xlu2 %3707 }
 0x266   :  { %v8636_v57 = vpop.f32.mrf.mxu2  ;;  %v4505_v55 = vmul.f32 %v4144_v56, %v7625_v45  ;;  %v4070_v13 = vmul.f32 %v8557_v10, %v4069_v33  ;;  %v4089_v0 = vsub.f32 1.5, %v4088_v44  ;;  %v8648_v16 = vadd.f32 %v3504_v30, %v3056_v40  ;;  %v3722_v56 = vpop.xlane.xlu0 %3721 }
 0x267   :  { %v8643_v25 = vpop.f32.mrf.mxu3  ;;  %5600 = vrsqrt.f32 %v8623_v19  ;;  %v8653_v17 = vpop.eup %5598  ;;  %v4167_v29 = vmul.f32 %v8629_v18, %v4166_v14  ;;  %vm4091_vm3 = vweird.f32 %v8503_v43  ;;  %vm4171_vm5 = vweird.f32 %v8565_v20 }
 0x268   :  { %4569 = vst [vmem:[%s9223_s3 + $0xf0] sm:$0xff] %v4505_v55  ;;  %v4074_v48 = vsel %vm4073_vm1, %v8557_v10, %v4070_v13  ;;  %5602 = vrsqrt.f32 %v8627_v36  ;;  %v4090_v15 = vmul.f32 %v8585_v47, %v4089_v0  ;;  %v4096_v53 = vmul.f32 %v8653_v17, %v8595_v9  ;;  %vm4093_vm4 = vmor %vm4091_vm3, %vm4092_vm2  ;;  %v3712_v44 = vpop.xlane.xlu1 %3711 }
 0x269   :  { %v8651_v45 = vpop.f32.mrf.mxu0  ;;  %v4498_v21 = vmul.f32 %v4074_v48, %v7630_v3  ;;  %v4168_v10 = vmul.f32 0.5, %v4167_v29  ;;  %v1887_v30 = vadd.f32 %v8505_v39, %v1718_v52  ;;  %v8673_v33 = vmax.f32 %v8573_v27, 1e-16 }
 0x26a   :  { %v8661_v7 = vpop.f32.mrf.mxu1  ;;  %v4094_v3 = vsel %vm4093_vm4, %v8585_v47, %v4090_v15  ;;  %v4097_v43 = vmul.f32 %v8653_v17, %v4096_v53  ;;  %v8680_v40 = vmax.f32 %v3706_v2, 1e-16  ;;  %v3632_v4 = vmul.f32 %v8648_v16, %v8648_v16 }
 0x26b   :  { %4562 = vst [vmem:[%s9223_s3 + $0xb8] sm:$0xff] %v4498_v21  ;;  %v4500_v39 = vmul.f32 %v4094_v3, %v7640_v32  ;;  %v4169_v55 = vsub.f32 1.5, %v4168_v10  ;;  %vm4172_vm6 = vweird.f32 %v8629_v18  ;;  %5604 = vrsqrt.f32 %v8673_v33  ;;  %v3057_v21 = vld [vmem:[%s9222_s2 + $0x1b0] sm:$0xff] }
 0x26c   :  { %v4098_v13 = vmul.f32 0.5, %v4097_v43  ;;  %vm4101_vm7 = vweird.f32 %v8595_v9  ;;  %v1551_v47 = vadd.f32 %v8524_v54, %v8518_v26  ;;  %5606 = vrsqrt.f32 %v8680_v40  ;;  %3749 = vadd.xlane.f32.xlu2 %v3632_v4  ;;  %vm4173_vm8 = vmor %vm4171_vm5, %vm4172_vm6 }
 0x26d   :  { %v8687_v27 = vpop.eup %5600  ;;  %4564 = vst [vmem:[%s9223_s3 + $0xc8] sm:$0xff] %v4500_v39  ;;  %v4170_v32 = vmul.f32 %v8629_v18, %v4169_v55  ;;  %v3505_v0 = vmul.f32 %v7675_v38, %v1887_v30  ;;  %v8704_v48 = vmax.f32 %v3722_v56, 1e-16  ;;  %vm4102_vm9 = vweird.f32 %v8653_v17 }
 0x26e   :  { %v8693_v2 = vpop.f32.mrf.mxu2  ;;  %v8695_v14 = vpop.eup %5602  ;;  %v4116_v52 = vmul.f32 %v8687_v27, %v8623_v19  ;;  %v4099_v54 = vsub.f32 1.5, %v4098_v13  ;;  %v1720_v38 = vadd.f32 %v8567_v37, %v1551_v47  ;;  %vm4121_vm10 = vweird.f32 %v8623_v19  ;;  %vm4103_vm12 = vmor %vm4101_vm7, %vm4102_vm9 }
 0x26f   :  { %v8706_v26 = vpop.f32.mrf.mxu3  ;;  %v4196_v29 = vmul.f32 %v8695_v14, %v8627_v36  ;;  %v4174_v53 = vsel %vm4173_vm8, %v8629_v18, %v4170_v32  ;;  %5608 = vrsqrt.f32 %v8704_v48  ;;  %vm4201_vm11 = vweird.f32 %v8627_v36 }
 0x270   :  { %v4117_v10 = vmul.f32 %v8687_v27, %v4116_v52  ;;  %v4508_v30 = vmul.f32 %v4174_v53, %v7667_v46  ;;  %v4100_v3 = vmul.f32 %v8653_v17, %v4099_v54  ;;  %v8737_v4 = vadd.f32 %v3505_v0, %v3057_v21  ;;  %v3714_v46 = vpop.xlane.xlu2 %3713  ;;  %v8761_v54 = vpop.xlane.xlu1 %3717 }
 0x271   :  { %v8719_v15 = vpop.f32.mrf.mxu0  ;;  %v4197_v43 = vmul.f32 %v8695_v14, %v4196_v29  ;;  %v8731_v37 = vpop.eup %5604  ;;  %v8739_v56 = vmax.f32 %v3708_v61, 1e-16  ;;  %v8741_v39 = vmax.f32 %v3712_v44, 1e-16  ;;  %vm4131_vm13 = vweird.f32 %v8673_v33 }
 0x272   :  { %v8725_v20 = vpop.f32.mrf.mxu1  ;;  %v4118_v18 = vmul.f32 0.5, %v4117_v10  ;;  %v8743_v55 = vpop.eup %5606  ;;  %4572 = vst [vmem:[%s9223_s3 + $0x108] sm:$0xff] %v4508_v30  ;;  %v4104_v13 = vsel %vm4103_vm12, %v8653_v17, %v4100_v3  ;;  %v4126_v9 = vmul.f32 %v8731_v37, %v8673_v33  ;;  %v1889_v61 = vadd.f32 %v8575_v31, %v1720_v38 }
 0x273   :  { %v4198_v47 = vmul.f32 0.5, %v4197_v43  ;;  %v4501_v44 = vmul.f32 %v4104_v13, %v7671_v50  ;;  %vm4122_vm14 = vweird.f32 %v8687_v27  ;;  %v4146_v52 = vmul.f32 %v8743_v55, %v8680_v40 }
 0x274   :  { %v4119_v32 = vsub.f32 1.5, %v4118_v18  ;;  %vm4151_vm15 = vweird.f32 %v8680_v40  ;;  %vm4202_vm0 = vweird.f32 %v8695_v14  ;;  %v4127_v17 = vmul.f32 %v8731_v37, %v4126_v9  ;;  %vm4123_vm1 = vmor %vm4121_vm10, %vm4122_vm14  ;;  %v3058_v18 = vld [vmem:[%s9222_s2 + $0x1b8] sm:$0xff] }
 0x275   :  { %v4199_v0 = vsub.f32 1.5, %v4198_v47  ;;  %5610 = vrsqrt.f32 %v8739_v56  ;;  %v8765_v50 = vpop.eup %5608  ;;  %4565 = vst [vmem:[%s9223_s3 + $0xd0] sm:$0xff] %v4501_v44  ;;  %v4147_v21 = vmul.f32 %v8743_v55, %v4146_v52  ;;  %v1554_v38 = vadd.f32 %v8597_v22, %v8583_v34  ;;  %vm4203_vm3 = vmor %vm4201_vm11, %vm4202_vm0 }
 0x276   :  { %v8763_v31 = vpop.f32.mrf.mxu2  ;;  %v4120_v29 = vmul.f32 %v8687_v27, %v4119_v32  ;;  %5612 = vrsqrt.f32 %v8741_v39  ;;  %v4128_v30 = vmul.f32 0.5, %v4127_v17  ;;  %v4226_v3 = vmul.f32 %v8765_v50, %v8704_v48 }
 0x277   :  { %v8775_v53 = vpop.f32.mrf.mxu3  ;;  %v4200_v10 = vmul.f32 %v8695_v14, %v4199_v0  ;;  %vm4231_vm2 = vweird.f32 %v8704_v48  ;;  %v3506_v43 = vmul.f32 %v7781_v42, %v1889_v61  ;;  %vm4132_vm4 = vweird.f32 %v8731_v37 }
 0x278   :  { %v4124_v22 = vsel %vm4123_vm1, %v8687_v27, %v4120_v29  ;;  %v4148_v19 = vmul.f32 0.5, %v4147_v21  ;;  %vm4152_vm5 = vweird.f32 %v8743_v55  ;;  %v4129_v47 = vsub.f32 1.5, %v4128_v30  ;;  %vm4133_vm6 = vmor %vm4131_vm13, %vm4132_vm4  ;;  %v3720_v21 = vpop.xlane.xlu2 %3719  ;;  %v3059_v30 = vld [vmem:[%s9222_s2 + $0x1c0] sm:$0xff] }
 0x279   :  { %v8786_v34 = vpop.f32.mrf.mxu0  ;;  %v4503_v42 = vmul.f32 %v4124_v22, %v7679_v51  ;;  %v4204_v27 = vsel %vm4203_vm3, %v8695_v14, %v4200_v10  ;;  %v4227_v9 = vmul.f32 %v8765_v50, %v4226_v3  ;;  %v3633_v44 = vmul.f32 %v8737_v4, %v8737_v4  ;;  %vm4153_vm9 = vmor %vm4151_vm15, %vm4152_vm5 }
 0x27a   :  { %v8798_v13 = vpop.f32.mrf.mxu1  ;;  %v4511_v36 = vmul.f32 %v4204_v27, %v7733_v41  ;;  %v4149_v61 = vsub.f32 1.5, %v4148_v19  ;;  %v1723_v32 = vadd.f32 %v8636_v57, %v1554_v38  ;;  %v4130_v51 = vmul.f32 %v8731_v37, %v4129_v47 }
 0x27b   :  { %v8807_v52 = vpop.eup %5610  ;;  %4567 = vst [vmem:[%s9223_s3 + $0xe0] sm:$0xff] %v4503_v42  ;;  %v4228_v14 = vmul.f32 0.5, %v4227_v9  ;;  %v8813_v0 = vadd.f32 %v3506_v43, %v3058_v18  ;;  %v8815_v17 = vmax.f32 %v3714_v46, 1e-16  ;;  %vm4232_vm7 = vweird.f32 %v8765_v50  ;;  %3751 = vadd.xlane.f32.xlu0 %v3633_v44 }
 0x27c   :  { %v8817_v41 = vpop.eup %5612  ;;  %4575 = vst [vmem:[%s9223_s3 + $0x120] sm:$0xff] %v4511_v36  ;;  %v4150_v57 = vmul.f32 %v8743_v55, %v4149_v61  ;;  %v4156_v29 = vmul.f32 %v8807_v52, %v8739_v56  ;;  %vm4161_vm8 = vweird.f32 %v8739_v56  ;;  %v1892_v46 = vadd.f32 %v8643_v25, %v1723_v32  ;;  %vm4233_vm10 = vmor %vm4231_vm2, %vm4232_vm7  ;;  %v3728_v61 = vpop.xlane.xlu0 %3727 }
 0x27d   :  { %v4134_v38 = vsel %vm4133_vm6, %v8731_v37, %v4130_v51  ;;  %v4229_v33 = vsub.f32 1.5, %v4228_v14  ;;  %v4176_v10 = vmul.f32 %v8817_v41, %v8741_v39  ;;  %v1556_v3 = vadd.f32 %v8661_v7, %v8651_v45  ;;  %v3724_v45 = vpop.xlane.xlu1 %3723 }
 0x27e   :  { %v8844_v25 = vpop.f32.mrf.mxu2  ;;  %v4504_v37 = vmul.f32 %v4134_v38, %v7728_v24  ;;  %v4154_v43 = vsel %vm4153_vm9, %v8743_v55, %v4150_v57  ;;  %v4157_v40 = vmul.f32 %v8807_v52, %v4156_v29  ;;  %v3507_v22 = vmul.f32 %v7810_v12, %v1892_v46 }
 0x27f   :  { %v8850_v19 = vpop.f32.mrf.mxu3  ;;  %v4506_v18 = vmul.f32 %v4154_v43, %v7738_v23  ;;  %v4230_v42 = vmul.f32 %v8765_v50, %v4229_v33  ;;  %v4177_v27 = vmul.f32 %v8817_v41, %v4176_v10  ;;  %5614 = vrsqrt.f32 %v8815_v17 }
 0x280   :  { %4568 = vst [vmem:[%s9223_s3 + $0xe8] sm:$0xff] %v4504_v37  ;;  %v4158_v24 = vmul.f32 0.5, %v4157_v40  ;;  %vm4181_vm11 = vweird.f32 %v8741_v39  ;;  %v8866_v23 = vadd.f32 %v3507_v22, %v3059_v30  ;;  %v8869_v12 = vmax.f32 %v8761_v54, 1e-16 }
 0x281   :  { %v8856_v7 = vpop.f32.mrf.mxu0  ;;  %4570 = vst [vmem:[%s9223_s3 + $0xf8] sm:$0xff] %v4506_v18  ;;  %v4234_v47 = vsel %vm4233_vm10, %v8765_v50, %v4230_v42  ;;  %v4178_v9 = vmul.f32 0.5, %v4177_v27  ;;  %v3634_v48 = vmul.f32 %v8813_v0, %v8813_v0  ;;  %v1725_v36 = vadd.f32 %v8693_v2, %v1556_v3 }
 0x282   :  { %v8871_v55 = vpop.f32.mrf.mxu1  ;;  %v4514_v44 = vmul.f32 %v4234_v47, %v7764_v1  ;;  %v4159_v32 = vsub.f32 1.5, %v4158_v24  ;;  %vm4162_vm12 = vweird.f32 %v8807_v52  ;;  %5616 = vrsqrt.f32 %v8869_v12  ;;  %v3060_v1 = vld [vmem:[%s9222_s2 + $0x1c8] sm:$0xff] }
 0x283   :  { %v4179_v54 = vsub.f32 1.5, %v4178_v9  ;;  %vm4182_vm13 = vweird.f32 %v8817_v41  ;;  %3753 = vadd.xlane.f32.xlu1 %v3634_v48  ;;  %v1894_v50 = vadd.f32 %v8706_v26, %v1725_v36  ;;  %v8885_v51 = vmax.f32 %v3720_v21, 1e-16  ;;  %vm4163_vm14 = vmor %vm4161_vm8, %vm4162_vm12 }
 0x284   :  { %4578 = vst [vmem:[%s9223_s3 + $0x138] sm:$0xff] %v4514_v44  ;;  %v4160_v2 = vmul.f32 %v8807_v52, %v4159_v32  ;;  %v8894_v14 = vmax.f32 %v3724_v45, 1e-16  ;;  %v3635_v57 = vmul.f32 %v8866_v23, %v8866_v23  ;;  %v8898_v29 = vmax.f32 %v3728_v61, 1e-16  ;;  %vm4183_vm15 = vmor %vm4181_vm11, %vm4182_vm13  ;;  %v3061_v44 = vld [vmem:[%s9222_s2 + $0x1d0] sm:$0xff] }
 0x285   :  { %v8900_v26 = vpop.eup %5614  ;;  %v4180_v46 = vmul.f32 %v8817_v41, %v4179_v54  ;;  %v3508_v21 = vmul.f32 %v7743_v5, %v1894_v50  ;;  %5618 = vrsqrt.f32 %v8885_v51  ;;  %v1559_v38 = vadd.f32 %v8725_v20, %v8719_v15  ;;  %v3726_v5 = vpop.xlane.xlu2 %3725 }
 0x286   :  { %v8909_v33 = vpop.f32.mrf.mxu2  ;;  %v4164_v10 = vsel %vm4163_vm14, %v8807_v52, %v4160_v2  ;;  %v4186_v56 = vmul.f32 %v8900_v26, %v8815_v17  ;;  %5620 = vrsqrt.f32 %v8894_v14  ;;  %3755 = vadd.xlane.f32.xlu2 %v3635_v57  ;;  %v3730_v52 = vpop.xlane.xlu1 %3729  ;;  %vm4191_vm0 = vweird.f32 %v8815_v17 }
 0x287   :  { %v8919_v30 = vpop.f32.mrf.mxu3  ;;  %v4507_v15 = vmul.f32 %v4164_v10, %v7771_v11  ;;  %v4184_v20 = vsel %vm4183_vm15, %v8817_v41, %v4180_v46  ;;  %v8923_v3 = vadd.f32 %v3508_v21, %v3060_v1  ;;  %5622 = vrsqrt.f32 %v8898_v29 }
 0x288   :  { %v8927_v39 = vpop.eup %5616  ;;  %v4509_v43 = vmul.f32 %v4184_v20, %v7778_v62  ;;  %v4187_v40 = vmul.f32 %v8900_v26, %v4186_v56  ;;  %vm4211_vm1 = vweird.f32 %v8869_v12  ;;  %v1728_v41 = vadd.f32 %v8763_v31, %v1559_v38 }
 0x289   :  { %v8925_v37 = vpop.f32.mrf.mxu0  ;;  %4571 = vst [vmem:[%s9223_s3 + $0x100] sm:$0xff] %v4507_v15  ;;  %v4206_v11 = vmul.f32 %v8927_v39, %v8869_v12  ;;  %v8942_v62 = vmax.f32 %v3726_v5, 1e-16  ;;  %vm4192_vm2 = vweird.f32 %v8900_v26  ;;  %v3636_v42 = vmul.f32 %v8923_v3, %v8923_v3 }
 0x28a   :  { %v8933_v22 = vpop.f32.mrf.mxu1  ;;  %4573 = vst [vmem:[%s9223_s3 + $0x110] sm:$0xff] %v4509_v43  ;;  %v4188_v18 = vmul.f32 0.5, %v4187_v40  ;;  %v8950_v27 = vmax.f32 %v3730_v52, 1e-16  ;;  %vm4212_vm3 = vweird.f32 %v8927_v39  ;;  %v1897_v31 = vadd.f32 %v8775_v53, %v1728_v41  ;;  %vm4193_vm8 = vmor %vm4191_vm0, %vm4192_vm2 }
 0x28b   :  { %v8952_v45 = vpop.eup %5618  ;;  %v4207_v24 = vmul.f32 %v8927_v39, %v4206_v11  ;;  %5624 = vrsqrt.f32 %v8942_v62  ;;  %vm4221_vm4 = vweird.f32 %v8885_v51  ;;  %v1561_v36 = vadd.f32 %v8798_v13, %v8786_v34  ;;  %3757 = vadd.xlane.f32.xlu0 %v3636_v42  ;;  %vm4213_vm11 = vmor %vm4211_vm1, %vm4212_vm3 }
 0x28c   :  { %v8958_v47 = vpop.eup %5620  ;;  %v4189_v9 = vsub.f32 1.5, %v4188_v18  ;;  %v4216_v48 = vmul.f32 %v8952_v45, %v8885_v51  ;;  %5626 = vrsqrt.f32 %v8950_v27  ;;  %vm4222_vm5 = vweird.f32 %v8952_v45 }
 0x28d   :  { %v4208_v61 = vmul.f32 0.5, %v4207_v24  ;;  %v4236_v53 = vmul.f32 %v8958_v47, %v8894_v14  ;;  %vm4241_vm6 = vweird.f32 %v8894_v14  ;;  %v3509_v32 = vmul.f32 %v7832_v35, %v1897_v31  ;;  %v8976_v34 = vpop.eup %5622  ;;  %vm4223_vm15 = vmor %vm4221_vm4, %vm4222_vm5 }
 0x28e   :  { %v8974_v54 = vpop.f32.mrf.mxu2  ;;  %v4190_v13 = vmul.f32 %v8900_v26, %v4189_v9  ;;  %v4217_v50 = vmul.f32 %v8952_v45, %v4216_v48  ;;  %vm4242_vm7 = vweird.f32 %v8958_v47  ;;  %v1730_v2 = vadd.f32 %v8844_v25, %v1561_v36 }
 0x28f   :  { %v8982_v1 = vpop.f32.mrf.mxu3  ;;  %v4209_v35 = vsub.f32 1.5, %v4208_v61  ;;  %v4237_v57 = vmul.f32 %v8958_v47, %v4236_v53  ;;  %v4256_v46 = vmul.f32 %v8976_v34, %v8898_v29  ;;  %vm4261_vm9 = vweird.f32 %v8898_v29  ;;  %v3732_v61 = vpop.xlane.xlu2 %3731  ;;  %vm4243_vm0 = vmor %vm4241_vm6, %vm4242_vm7 }
 0x290   :  { %vm4262_vm10 = vweird.f32 %v8976_v34  ;;  %v4194_v25 = vsel %vm4193_vm8, %v8900_v26, %v4190_v13  ;;  %v4218_v38 = vmul.f32 0.5, %v4217_v50  ;;  %v8996_v10 = vadd.f32 %v3509_v32, %v3061_v44 }
 0x291   :  { %v8993_v21 = vpop.f32.mrf.mxu0  ;;  %v1899_v17 = vadd.f32 %v8850_v19, %v1730_v2  ;;  %v9001_v5 = vpop.eup %5624  ;;  %v4510_v15 = vmul.f32 %v4194_v25, %v7824_v49  ;;  %v4210_v20 = vmul.f32 %v8927_v39, %v4209_v35  ;;  %v4238_v52 = vmul.f32 0.5, %v4237_v57  ;;  %v3062_v49 = vld [vmem:[%s9222_s2 + $0x1d8] sm:$0xff]  ;;  %vm4263_vm1 = vmor %vm4261_vm9, %vm4262_vm10 }
 0x292   :  { %v8999_v56 = vpop.f32.mrf.mxu1  ;;  %v4257_v43 = vmul.f32 %v8976_v34, %v4256_v46  ;;  %v9006_v40 = vpop.eup %5626  ;;  %v4219_v26 = vsub.f32 1.5, %v4218_v38  ;;  %v4246_v19 = vmul.f32 %v9001_v5, %v8942_v62  ;;  %vm4251_vm12 = vweird.f32 %v8942_v62  ;;  %v3063_v62 = vld [vmem:[%s9222_s2 + $0x1e0] sm:$0xff] }
 0x293   :  { %vm4252_vm13 = vweird.f32 %v9001_v5  ;;  %v3510_v11 = vmul.f32 %v7845_v8, %v1899_v17  ;;  %4574 = vst [vmem:[%s9223_s3 + $0x118] sm:$0xff] %v4510_v15  ;;  %v4214_v12 = vsel %vm4213_vm11, %v8927_v39, %v4210_v20  ;;  %v4239_v41 = vsub.f32 1.5, %v4238_v52  ;;  %v9359_v20 = vld [vmem:[#allocation9_spill] sm:$0xff] }
 0x294   :  { %v4258_v18 = vmul.f32 0.5, %v4257_v43  ;;  %v4266_v42 = vmul.f32 %v9006_v40, %v8950_v27  ;;  %v4512_v24 = vmul.f32 %v4214_v12, %v7827_v58  ;;  %v4220_v31 = vmul.f32 %v8952_v45, %v4219_v26  ;;  %vm4253_vm3 = vmor %vm4251_vm12, %vm4252_vm13  ;;  %v9360_v43 = vld [vmem:[#allocation12_spill] sm:$0xff] }
 0x295   :  { %v4247_v9 = vmul.f32 %v9001_v5, %v4246_v19  ;;  %vm4272_vm14 = vweird.f32 %v9006_v40  ;;  %v4240_v8 = vmul.f32 %v8958_v47, %v4239_v41  ;;  %v9036_v36 = vadd.f32 %v3510_v11, %v3062_v49  ;;  %v9361_v19 = vld [vmem:[#allocation17_spill] sm:$0xff] }
 0x296   :  { %v4259_v39 = vsub.f32 1.5, %v4258_v18  ;;  %v4267_v48 = vmul.f32 %v9006_v40, %v4266_v42  ;;  %v1737_v58 = vpop.f32.mrf.mxu2  ;;  %4576 = vst [vmem:[%s9223_s3 + $0x128] sm:$0xff] %v4512_v24  ;;  %v4224_v53 = vsel %vm4223_vm15, %v8952_v45, %v4220_v31  ;;  %v1564_v44 = vadd.f32 %v8871_v55, %v8856_v7 }
 0x297   :  { %v4248_v51 = vmul.f32 0.5, %v4247_v9  ;;  %v3637_v32 = vmul.f32 %v8996_v10, %v8996_v10  ;;  %v4513_v13 = vmul.f32 %v4224_v53, %v7847_v60  ;;  %v4244_v50 = vsel %vm4243_vm0, %v8958_v47, %v4240_v8  ;;  %v1906_v45 = vpop.f32.mrf.mxu3  ;;  %v3734_v60 = vpop.xlane.xlu0 %3733 }
 0x298   :  { %v4260_v2 = vmul.f32 %v8976_v34, %v4259_v39  ;;  %v4268_v35 = vmul.f32 0.5, %v4267_v48  ;;  %v4515_v57 = vmul.f32 %v4244_v50, %v7849_v6  ;;  %v9058_v7 = vmax.f32 %v3732_v61, 1e-16  ;;  %v3065_v39 = vld [vmem:[%s9222_s2 + $0x1f0] sm:$0xff] }
 0x299   :  { %v4249_v14 = vsub.f32 1.5, %v4248_v51  ;;  %3759 = vadd.xlane.f32.xlu1 %v3637_v32  ;;  %v1733_v55 = vadd.f32 %v8909_v33, %v1564_v44  ;;  %4577 = vst [vmem:[%s9223_s3 + $0x130] sm:$0xff] %v4513_v13  ;;  %v1566_v6 = vadd.f32 %v8933_v22, %v8925_v37  ;;  %v3638_v29 = vmul.f32 %v9036_v36, %v9036_v36  ;;  %v1401_v25 = vpop.f32.mrf.mxu0 }
 0x29a   :  { %v4264_v47 = vsel %vm4263_vm1, %v8976_v34, %v4260_v2  ;;  %v4269_v46 = vsub.f32 1.5, %v4268_v35  ;;  %v1570_v38 = vpop.f32.mrf.mxu1  ;;  %4579 = vst [vmem:[%s9223_s3 + $0x140] sm:$0xff] %v4515_v57  ;;  %vm4271_vm2 = vweird.f32 %v8950_v27  ;;  %5628 = vrsqrt.f32 %v9058_v7  ;;  %v3066_v35 = vld [vmem:[%s9222_s2 + $0x1f8] sm:$0xff] }
 0x29b   :  { %v4517_v33 = vmul.f32 %v4264_v47, %v7879_v28  ;;  %v4250_v17 = vmul.f32 %v9001_v5, %v4249_v14  ;;  %v1902_v22 = vadd.f32 %v8919_v30, %v1733_v55  ;;  %3761 = vadd.xlane.f32.xlu2 %v3638_v29  ;;  %v9082_v34 = vmax.f32 %v3734_v60, 1e-16  ;;  %vm4273_vm4 = vmor %vm4271_vm2, %vm4272_vm14  ;;  %v9364_v57 = vld [vmem:[#allocation7_spill] sm:$0xff] }
 0x29c   :  { %v4270_v37 = vmul.f32 %v9006_v40, %v4269_v46  ;;  %v1735_v28 = vadd.f32 %v8974_v54, %v1566_v6  ;;  %v1569_v30 = vadd.f32 %v8999_v56, %v8993_v21  ;;  %v1571_v15 = vadd.f32 %v1570_v38, %v1401_v25  ;;  %v3064_v56 = vld [vmem:[%s9222_s2 + $0x1e8] sm:$0xff] }
 0x29d   :  { %4581 = vst [vmem:[%s9223_s3 + $0x150] sm:$0xff] %v4517_v33  ;;  %v4254_v27 = vsel %vm4253_vm3, %v9001_v5, %v4250_v17  ;;  %v3511_v26 = vmul.f32 %v9360_v43, %v1902_v22  ;;  %5630 = vrsqrt.f32 %v9082_v34  ;;  %v3736_v12 = vpop.xlane.xlu1 %3735  ;;  %vm4281_vm6 = vweird.f32 %v9058_v7 }
 0x29e   :  { %v4516_v52 = vmul.f32 %v4254_v27, %v9359_v20  ;;  %v4274_v54 = vsel %vm4273_vm4, %v9006_v40, %v4270_v37  ;;  %v1739_v5 = vpop.f32.mrf.mxu2  ;;  %v1904_v11 = vadd.f32 %v8982_v1, %v1735_v28  ;;  %v1738_v41 = vadd.f32 %v1737_v58, %v1569_v30  ;;  %v9362_v1 = vld [vmem:[#allocation13_spill] sm:$0xff]  ;;  %v9363_v58 = vld [vmem:[#allocation16_spill] sm:$0xff] }
 0x29f   :  { %v4518_v49 = vmul.f32 %v4274_v54, %v9361_v19  ;;  %v9105_v21 = vadd.f32 %v3511_v26, %v3063_v62  ;;  %v3817_v40 = vmax.f32 %v3736_v12, 1e-16  ;;  %v1740_v18 = vadd.f32 %v1739_v5, %v1571_v15  ;;  %v1908_v48 = vpop.f32.mrf.mxu3  ;;  %v9365_v62 = vld [vmem:[#allocation40_spill] sm:$0xff] }
 0x2a0   :  { %4580 = vst [vmem:[%s9223_s3 + $0x148] sm:$0xff] %v4516_v52  ;;  %v5629_v42 = vpop.eup %5628  ;;  %v3512_v24 = vmul.f32 %v9362_v1, %v1904_v11  ;;  %v1907_v31 = vadd.f32 %v1906_v45, %v1738_v41  ;;  %vm4291_vm9 = vweird.f32 %v9082_v34  ;;  %v9366_v54 = vld [vmem:[#allocation4_spill] sm:$0xff] }
 0x2a1   :  { %4582 = vst [vmem:[%s9223_s3 + $0x158] sm:$0xff] %v4518_v49  ;;  %v4276_v9 = vmul.f32 %v5629_v42, %v9058_v7  ;;  %v3639_v8 = vmul.f32 %v9105_v21, %v9105_v21  ;;  %5632 = vrsqrt.f32 %v3817_v40  ;;  %v1909_v51 = vadd.f32 %v1908_v48, %v1740_v18  ;;  %v9367_v49 = vld [vmem:[#allocation36_spill] sm:$0xff] }
 0x2a2   :  { %v9120_v61 = vadd.f32 %v3512_v24, %v3064_v56  ;;  %v3513_v53 = vmul.f32 %v9363_v58, %v1907_v31  ;;  %vm4282_vm5 = vweird.f32 %v5629_v42  ;;  %vm4301_vm12 = vweird.f32 %v3817_v40 }
 0x2a3   :  { %v5631_v44 = vpop.eup %5630  ;;  %v4277_v32 = vmul.f32 %v5629_v42, %v4276_v9  ;;  %3763 = vadd.xlane.f32.xlu0 %v3639_v8  ;;  %v3514_v14 = vmul.f32 %v9364_v57, %v1909_v51  ;;  %vm4283_vm7 = vmor %vm4281_vm6, %vm4282_vm5 }
 0x2a4   :  { %v4286_v13 = vmul.f32 %v5631_v44, %v9082_v34  ;;  %v9124_v50 = vadd.f32 %v3513_v53, %v3065_v39  ;;  %v3640_v2 = vmul.f32 %v9120_v61, %v9120_v61  ;;  %vm4292_vm8 = vweird.f32 %v5631_v44  ;;  %v9368_v39 = vld [vmem:[#allocation14_spill] sm:$0xff] }
 0x2a5   :  { %v4278_v45 = vmul.f32 0.5, %v4277_v32  ;;  %v9134_v6 = vadd.f32 %v3514_v14, %v3066_v35  ;;  %vm4293_vm10 = vmor %vm4291_vm9, %vm4292_vm8  ;;  %v9369_v14 = vld [vmem:[#allocation18_spill] sm:$0xff] }
 0x2a6   :  { %v4287_v55 = vmul.f32 %v5631_v44, %v4286_v13  ;;  %3765 = vadd.xlane.f32.xlu1 %v3640_v2  ;;  %v3641_v60 = vmul.f32 %v9124_v50, %v9124_v50 }
 0x2a7   :  { %v5633_v47 = vpop.eup %5632  ;;  %v4279_v46 = vsub.f32 1.5, %v4278_v45  ;;  %v3642_v17 = vmul.f32 %v9134_v6, %v9134_v6 }
 0x2a8   :  { %v4288_v29 = vmul.f32 0.5, %v4287_v55  ;;  %v4296_v25 = vmul.f32 %v5633_v47, %v3817_v40  ;;  %3767 = vadd.xlane.f32.xlu2 %v3641_v60  ;;  %vm4302_vm11 = vweird.f32 %v5633_v47 }
 0x2a9   :  { %v4280_v38 = vmul.f32 %v5629_v42, %v4279_v46  ;;  %v3738_v33 = vpop.xlane.xlu2 %3737  ;;  %vm4303_vm13 = vmor %vm4301_vm12, %vm4302_vm11 }
 0x2aa   :  { %v4289_v37 = vsub.f32 1.5, %v4288_v29  ;;  %v4297_v22 = vmul.f32 %v5633_v47, %v4296_v25  ;;  %v3818_v28 = vmax.f32 %v3738_v33, 1e-16 }
 0x2ab   :  { %v4284_v27 = vsel %vm4283_vm7, %v5629_v42, %v4280_v38  ;;  %3769 = vadd.xlane.f32.xlu0 %v3642_v17  ;;  %v9370_v38 = vld [vmem:[#allocation19_spill] sm:$0xff] }
 0x2ac   :  { %v4519_v30 = vmul.f32 %v4284_v27, %v9365_v62  ;;  %v4290_v15 = vmul.f32 %v5631_v44, %v4289_v37  ;;  %v4298_v20 = vmul.f32 0.5, %v4297_v22  ;;  %5634 = vrsqrt.f32 %v3818_v28 }
 0x2ad   :  { %vm4311_vm15 = vweird.f32 %v3818_v28 }
 0x2ae   :  { %4583 = vst [vmem:[%s9223_s3 + $0x160] sm:$0xff] %v4519_v30  ;;  %v4294_v7 = vsel %vm4293_vm10, %v5631_v44, %v4290_v15  ;;  %v4299_v52 = vsub.f32 1.5, %v4298_v20  ;;  %v9371_v20 = vld [vmem:[#allocation20_spill] sm:$0xff] }
 0x2af   :  { %v4520_v43 = vmul.f32 %v4294_v7, %v9366_v54 }
 0x2b0   :  { %v4300_v26 = vmul.f32 %v5633_v47, %v4299_v52 }
 0x2b1   :  { %4584 = vst [vmem:[%s9223_s3 + $0x168] sm:$0xff] %v4520_v43 }
 0x2b2   :  { %v5635_v34 = vpop.eup %5634  ;;  %v4304_v5 = vsel %vm4303_vm13, %v5633_v47, %v4300_v26  ;;  %v3740_v19 = vpop.xlane.xlu0 %3739 }
 0x2b3   :  { %v4521_v11 = vmul.f32 %v4304_v5, %v9367_v49  ;;  %v4306_v12 = vmul.f32 %v5635_v34, %v3818_v28  ;;  %v3819_v41 = vmax.f32 %v3740_v19, 1e-16  ;;  %vm4312_vm14 = vweird.f32 %v5635_v34 }
 0x2b4   :  { %vm4313_vm0 = vmor %vm4311_vm15, %vm4312_vm14 }
 0x2b5   :  { %4585 = vst [vmem:[%s9223_s3 + $0x170] sm:$0xff] %v4521_v11  ;;  %v4307_v56 = vmul.f32 %v5635_v34, %v4306_v12  ;;  %5636 = vrsqrt.f32 %v3819_v41  ;;  %vm4321_vm2 = vweird.f32 %v3819_v41 }
 0x2b7   :  { %v4308_v18 = vmul.f32 0.5, %v4307_v56 }
 0x2b8   :  { %v3742_v42 = vpop.xlane.xlu1 %3741 }
 0x2b9   :  { %v4309_v40 = vsub.f32 1.5, %v4308_v18  ;;  %v3820_v1 = vmax.f32 %v3742_v42, 1e-16 }
 0x2bb   :  { %v5637_v24 = vpop.eup %5636  ;;  %v4310_v31 = vmul.f32 %v5635_v34, %v4309_v40  ;;  %5638 = vrsqrt.f32 %v3820_v1  ;;  %vm4331_vm5 = vweird.f32 %v3820_v1 }
 0x2bc   :  { %v4316_v9 = vmul.f32 %v5637_v24, %v3819_v41  ;;  %vm4322_vm1 = vweird.f32 %v5637_v24 }
 0x2bd   :  { %v4314_v8 = vsel %vm4313_vm0, %v5635_v34, %v4310_v31  ;;  %vm4323_vm3 = vmor %vm4321_vm2, %vm4322_vm1 }
 0x2be   :  { %v4522_v48 = vmul.f32 %v4314_v8, %v9368_v39  ;;  %v4317_v58 = vmul.f32 %v5637_v24, %v4316_v9 }
 0x2c0   :  { %4586 = vst [vmem:[%s9223_s3 + $0x178] sm:$0xff] %v4522_v48  ;;  %v4318_v53 = vmul.f32 0.5, %v4317_v58 }
 0x2c1   :  { %v5639_v51 = vpop.eup %5638 }
 0x2c2   :  { %v4319_v44 = vsub.f32 1.5, %v4318_v53  ;;  %v4326_v32 = vmul.f32 %v5639_v51, %v3820_v1  ;;  %vm4332_vm4 = vweird.f32 %v5639_v51 }
 0x2c3   :  { %vm4333_vm6 = vmor %vm4331_vm5, %vm4332_vm4 }
 0x2c4   :  { %v4320_v13 = vmul.f32 %v5637_v24, %v4319_v44  ;;  %v3744_v2 = vpop.xlane.xlu2 %3743  ;;  %v4327_v35 = vmul.f32 %v5639_v51, %v4326_v32 }
 0x2c5   :  { %v3821_v45 = vmax.f32 %v3744_v2, 1e-16 }
 0x2c6   :  { %v4324_v57 = vsel %vm4323_vm3, %v5637_v24, %v4320_v13  ;;  %v4328_v60 = vmul.f32 0.5, %v4327_v35 }
 0x2c7   :  { %v4523_v55 = vmul.f32 %v4324_v57, %v9369_v14  ;;  %5640 = vrsqrt.f32 %v3821_v45  ;;  %vm4341_vm8 = vweird.f32 %v3821_v45 }
 0x2c8   :  { %v4329_v47 = vsub.f32 1.5, %v4328_v60 }
 0x2c9   :  { %4587 = vst [vmem:[%s9223_s3 + $0x180] sm:$0xff] %v4523_v55 }
 0x2ca   :  { %v4330_v46 = vmul.f32 %v5639_v51, %v4329_v47 }
 0x2cc   :  { %v4334_v25 = vsel %vm4333_vm6, %v5639_v51, %v4330_v46 }
 0x2cd   :  { %v5641_v29 = vpop.eup %5640  ;;  %v4524_v33 = vmul.f32 %v4334_v25, %v9370_v38 }
 0x2ce   :  { %v4336_v17 = vmul.f32 %v5641_v29, %v3821_v45  ;;  %vm4342_vm7 = vweird.f32 %v5641_v29 }
 0x2cf   :  { %4588 = vst [vmem:[%s9223_s3 + $0x188] sm:$0xff] %v4524_v33  ;;  %vm4343_vm9 = vmor %vm4341_vm8, %vm4342_vm7 }
 0x2d0   :  { %v4337_v37 = vmul.f32 %v5641_v29, %v4336_v17  ;;  %v3746_v22 = vpop.xlane.xlu0 %3745 }
 0x2d1   :  { %v3822_v27 = vmax.f32 %v3746_v22, 1e-16 }
 0x2d2   :  { %v4338_v28 = vmul.f32 0.5, %v4337_v37 }
 0x2d3   :  { %5642 = vrsqrt.f32 %v3822_v27  ;;  %vm4351_vm11 = vweird.f32 %v3822_v27 }
 0x2d4   :  { %v4339_v62 = vsub.f32 1.5, %v4338_v28 }
 0x2d6   :  { %v4340_v30 = vmul.f32 %v5641_v29, %v4339_v62 }
 0x2d8   :  { %v4344_v15 = vsel %vm4343_vm9, %v5641_v29, %v4340_v30  ;;  %v3748_v52 = vpop.xlane.xlu1 %3747 }
 0x2d9   :  { %v4525_v7 = vmul.f32 %v4344_v15, %v9371_v20  ;;  %v5643_v54 = vpop.eup %5642  ;;  %v3823_v43 = vmax.f32 %v3748_v52, 1e-16 }
 0x2da   :  { %v4346_v26 = vmul.f32 %v5643_v54, %v3822_v27  ;;  %vm4352_vm10 = vweird.f32 %v5643_v54 }
 0x2db   :  { %4589 = vst [vmem:[%s9223_s3 + $0x190] sm:$0xff] %v4525_v7  ;;  %5644 = vrsqrt.f32 %v3823_v43  ;;  %vm4353_vm12 = vmor %vm4351_vm11, %vm4352_vm10  ;;  %vm4361_vm14 = vweird.f32 %v3823_v43 }
 0x2dc   :  { %v4347_v34 = vmul.f32 %v5643_v54, %v4346_v26 }
 0x2de   :  { %v4348_v5 = vmul.f32 0.5, %v4347_v34 }
 0x2df   :  { %v3750_v19 = vpop.xlane.xlu2 %3749 }
 0x2e0   :  { %v4349_v49 = vsub.f32 1.5, %v4348_v5  ;;  %v3824_v11 = vmax.f32 %v3750_v19, 1e-16 }
 0x2e1   :  { %v5645_v12 = vpop.eup %5644 }
 0x2e2   :  { %v4350_v41 = vmul.f32 %v5643_v54, %v4349_v49  ;;  %v4356_v56 = vmul.f32 %v5645_v12, %v3823_v43  ;;  %5646 = vrsqrt.f32 %v3824_v11  ;;  %vm4362_vm13 = vweird.f32 %v5645_v12 }
 0x2e3   :  { %vm4363_vm15 = vmor %vm4361_vm14, %vm4362_vm13  ;;  %vm4371_vm1 = vweird.f32 %v3824_v11 }
 0x2e4   :  { %v4354_v18 = vsel %vm4353_vm12, %v5643_v54, %v4350_v41  ;;  %v4357_v40 = vmul.f32 %v5645_v12, %v4356_v56 }
 0x2e5   :  { %v4526_v42 = vmul.f32 %v4354_v18, %v8481_v63 }
 0x2e6   :  { %v4358_v1 = vmul.f32 0.5, %v4357_v40 }
 0x2e7   :  { %4590 = vst [vmem:[%s9223_s3 + $0x198] sm:$0xff] %v4526_v42 }
 0x2e8   :  { %v5647_v24 = vpop.eup %5646  ;;  %v4359_v31 = vsub.f32 1.5, %v4358_v1 }
 0x2e9   :  { %v4366_v9 = vmul.f32 %v5647_v24, %v3824_v11  ;;  %vm4372_vm0 = vweird.f32 %v5647_v24 }
 0x2ea   :  { %v4360_v8 = vmul.f32 %v5645_v12, %v4359_v31  ;;  %vm4373_vm2 = vmor %vm4371_vm1, %vm4372_vm0 }
 0x2eb   :  { %v4367_v39 = vmul.f32 %v5647_v24, %v4366_v9 }
 0x2ec   :  { %v4364_v48 = vsel %vm4363_vm15, %v5645_v12, %v4360_v8 }
 0x2ed   :  { %v4527_v58 = vmul.f32 %v4364_v48, %v8591_v59  ;;  %v4368_v53 = vmul.f32 0.5, %v4367_v39 }
 0x2ee   :  { %v3752_v51 = vpop.xlane.xlu0 %3751 }
 0x2ef   :  { %4591 = vst [vmem:[%s9223_s3 + $0x1a0] sm:$0xff] %v4527_v58  ;;  %v4369_v63 = vsub.f32 1.5, %v4368_v53  ;;  %v3825_v44 = vmax.f32 %v3752_v51, 1e-16 }
 0x2f1   :  { %v4370_v32 = vmul.f32 %v5647_v24, %v4369_v63  ;;  %5648 = vrsqrt.f32 %v3825_v44  ;;  %vm4381_vm4 = vweird.f32 %v3825_v44 }
 0x2f3   :  { %v4374_v13 = vsel %vm4373_vm2, %v5647_v24, %v4370_v32 }
 0x2f4   :  { %v4528_v2 = vmul.f32 %v4374_v13, %v8648_v16 }
 0x2f6   :  { %v3754_v35 = vpop.xlane.xlu1 %3753  ;;  %4592 = vst [vmem:[%s9223_s3 + $0x1a8] sm:$0xff] %v4528_v2 }
 0x2f7   :  { %v3826_v59 = vmax.f32 %v3754_v35, 1e-16  ;;  %v5649_v45 = vpop.eup %5648 }
 0x2f8   :  { %v4376_v57 = vmul.f32 %v5649_v45, %v3825_v44  ;;  %vm4382_vm3 = vweird.f32 %v5649_v45 }
 0x2f9   :  { %5650 = vrsqrt.f32 %v3826_v59  ;;  %v3756_v14 = vpop.xlane.xlu2 %3755  ;;  %vm4383_vm5 = vmor %vm4381_vm4, %vm4382_vm3  ;;  %vm4391_vm7 = vweird.f32 %v3826_v59 }
 0x2fa   :  { %v3827_v55 = vmax.f32 %v3756_v14, 1e-16  ;;  %v4377_v60 = vmul.f32 %v5649_v45, %v4376_v57 }
 0x2fc   :  { %5652 = vrsqrt.f32 %v3827_v55  ;;  %v4378_v47 = vmul.f32 0.5, %v4377_v60  ;;  %vm4401_vm10 = vweird.f32 %v3827_v55 }
 0x2fe   :  { %v4379_v29 = vsub.f32 1.5, %v4378_v47  ;;  %v3758_v25 = vpop.xlane.xlu0 %3757 }
 0x2ff   :  { %v5651_v46 = vpop.eup %5650  ;;  %v3828_v16 = vmax.f32 %v3758_v25, 1e-16 }
 0x300   :  { %v4386_v38 = vmul.f32 %v5651_v46, %v3826_v59  ;;  %v4380_v33 = vmul.f32 %v5649_v45, %v4379_v29  ;;  %vm4392_vm6 = vweird.f32 %v5651_v46 }
 0x301   :  { %5654 = vrsqrt.f32 %v3828_v16  ;;  %vm4393_vm8 = vmor %vm4391_vm7, %vm4392_vm6  ;;  %vm4411_vm13 = vweird.f32 %v3828_v16 }
 0x302   :  { %v5653_v17 = vpop.eup %5652  ;;  %v4387_v37 = vmul.f32 %v5651_v46, %v4386_v38  ;;  %v4384_v22 = vsel %vm4383_vm5, %v5649_v45, %v4380_v33 }
 0x303   :  { %v4396_v28 = vmul.f32 %v5653_v17, %v3827_v55  ;;  %v4529_v27 = vmul.f32 %v4384_v22, %v8737_v4  ;;  %vm4402_vm9 = vweird.f32 %v5653_v17 }
 0x304   :  { %v4388_v62 = vmul.f32 0.5, %v4387_v37  ;;  %vm4403_vm11 = vmor %vm4401_vm10, %vm4402_vm9 }
 0x305   :  { %v4397_v30 = vmul.f32 %v5653_v17, %v4396_v28  ;;  %4593 = vst [vmem:[%s9223_s3 + $0x1b0] sm:$0xff] %v4529_v27 }
 0x306   :  { %v4389_v15 = vsub.f32 1.5, %v4388_v62 }
 0x307   :  { %v4398_v20 = vmul.f32 0.5, %v4397_v30  ;;  %v5655_v7 = vpop.eup %5654 }
 0x308   :  { %v4390_v52 = vmul.f32 %v5651_v46, %v4389_v15  ;;  %v4406_v43 = vmul.f32 %v5655_v7, %v3828_v16  ;;  %vm4412_vm12 = vweird.f32 %v5655_v7 }
 0x309   :  { %v4399_v54 = vsub.f32 1.5, %v4398_v20  ;;  %vm4413_vm14 = vmor %vm4411_vm13, %vm4412_vm12 }
 0x30a   :  { %v4394_v26 = vsel %vm4393_vm8, %v5651_v46, %v4390_v52  ;;  %v4407_v5 = vmul.f32 %v5655_v7, %v4406_v43 }
 0x30b   :  { %v4530_v34 = vmul.f32 %v4394_v26, %v8813_v0  ;;  %v4400_v4 = vmul.f32 %v5653_v17, %v4399_v54 }
 0x30c   :  { %v3760_v19 = vpop.xlane.xlu1 %3759  ;;  %v4408_v12 = vmul.f32 0.5, %v4407_v5 }
 0x30d   :  { %v3829_v49 = vmax.f32 %v3760_v19, 1e-16  ;;  %4594 = vst [vmem:[%s9223_s3 + $0x1b8] sm:$0xff] %v4530_v34  ;;  %v4404_v11 = vsel %vm4403_vm11, %v5653_v17, %v4400_v4 }
 0x30e   :  { %v4531_v41 = vmul.f32 %v4404_v11, %v8866_v23  ;;  %v3762_v56 = vpop.xlane.xlu2 %3761  ;;  %v4409_v18 = vsub.f32 1.5, %v4408_v12 }
 0x30f   :  { %5656 = vrsqrt.f32 %v3829_v49  ;;  %v3830_v40 = vmax.f32 %v3762_v56, 1e-16  ;;  %vm4421_vm0 = vweird.f32 %v3829_v49 }
 0x310   :  { %4595 = vst [vmem:[%s9223_s3 + $0x1c0] sm:$0xff] %v4531_v41  ;;  %v4410_v0 = vmul.f32 %v5655_v7, %v4409_v18 }
 0x311   :  { %5658 = vrsqrt.f32 %v3830_v40  ;;  %vm4431_vm3 = vweird.f32 %v3830_v40 }
 0x312   :  { %v4414_v42 = vsel %vm4413_vm14, %v5655_v7, %v4410_v0 }
 0x313   :  { %v4532_v24 = vmul.f32 %v4414_v42, %v8923_v3 }
 0x315   :  { %v5657_v1 = vpop.eup %5656  ;;  %4596 = vst [vmem:[%s9223_s3 + $0x1c8] sm:$0xff] %v4532_v24 }
 0x316   :  { %v4416_v31 = vmul.f32 %v5657_v1, %v3829_v49  ;;  %v3764_v23 = vpop.xlane.xlu0 %3763  ;;  %vm4422_vm15 = vweird.f32 %v5657_v1 }
 0x317   :  { %v5659_v9 = vpop.eup %5658  ;;  %v3831_v39 = vmax.f32 %v3764_v23, 1e-16  ;;  %vm4423_vm1 = vmor %vm4421_vm0, %vm4422_vm15 }
 0x318   :  { %v4417_v8 = vmul.f32 %v5657_v1, %v4416_v31  ;;  %v4426_v48 = vmul.f32 %v5659_v9, %v3830_v40  ;;  %vm4432_vm2 = vweird.f32 %v5659_v9 }
 0x319   :  { %5660 = vrsqrt.f32 %v3831_v39  ;;  %v3766_v53 = vpop.xlane.xlu1 %3765  ;;  %vm4433_vm4 = vmor %vm4431_vm3, %vm4432_vm2  ;;  %vm4441_vm6 = vweird.f32 %v3831_v39 }
 0x31a   :  { %v4418_v58 = vmul.f32 0.5, %v4417_v8  ;;  %v4427_v51 = vmul.f32 %v5659_v9, %v4426_v48  ;;  %v3832_v63 = vmax.f32 %v3766_v53, 1e-16 }
 0x31b   :  { %v3768_v32 = vpop.xlane.xlu2 %3767 }
 0x31c   :  { %v4419_v44 = vsub.f32 1.5, %v4418_v58  ;;  %v4428_v13 = vmul.f32 0.5, %v4427_v51  ;;  %5662 = vrsqrt.f32 %v3832_v63  ;;  %v3833_v3 = vmax.f32 %v3768_v32, 1e-16 }
 0x31d   :  { %vm4451_vm9 = vweird.f32 %v3832_v63 }
 0x31e   :  { %v4420_v2 = vmul.f32 %v5657_v1, %v4419_v44  ;;  %v4429_v35 = vsub.f32 1.5, %v4428_v13  ;;  %5664 = vrsqrt.f32 %v3833_v3  ;;  %v3770_v59 = vpop.xlane.xlu0 %3769  ;;  %vm4461_vm12 = vweird.f32 %v3833_v3 }
 0x31f   :  { %v5661_v45 = vpop.eup %5660  ;;  %v3834_v14 = vmax.f32 %v3770_v59, 1e-16 }
 0x320   :  { %v4424_v57 = vsel %vm4423_vm1, %v5657_v1, %v4420_v2  ;;  %v4430_v60 = vmul.f32 %v5659_v9, %v4429_v35  ;;  %v4436_v47 = vmul.f32 %v5661_v45, %v3831_v39  ;;  %vm4442_vm5 = vweird.f32 %v5661_v45 }
 0x321   :  { %v4533_v55 = vmul.f32 %v4424_v57, %v8996_v10  ;;  %5666 = vrsqrt.f32 %v3834_v14  ;;  %vm4443_vm7 = vmor %vm4441_vm6, %vm4442_vm5  ;;  %vm4471_vm15 = vweird.f32 %v3834_v14 }
 0x322   :  { %v5663_v46 = vpop.eup %5662  ;;  %v4434_v29 = vsel %vm4433_vm4, %v5659_v9, %v4430_v60  ;;  %v4437_v25 = vmul.f32 %v5661_v45, %v4436_v47 }
 0x323   :  { %4597 = vst [vmem:[%s9223_s3 + $0x1d0] sm:$0xff] %v4533_v55  ;;  %v4534_v38 = vmul.f32 %v4434_v29, %v9036_v36  ;;  %v4446_v16 = vmul.f32 %v5663_v46, %v3832_v63  ;;  %vm4452_vm8 = vweird.f32 %v5663_v46 }
 0x324   :  { %v5665_v33 = vpop.eup %5664  ;;  %v4438_v17 = vmul.f32 0.5, %v4437_v25  ;;  %vm4453_vm11 = vmor %vm4451_vm9, %vm4452_vm8 }
 0x325   :  { %4598 = vst [vmem:[%s9223_s3 + $0x1d8] sm:$0xff] %v4534_v38  ;;  %v4447_v10 = vmul.f32 %v5663_v46, %v4446_v16  ;;  %v4456_v37 = vmul.f32 %v5665_v33, %v3833_v3  ;;  %vm4462_vm10 = vweird.f32 %v5665_v33 }
 0x326   :  { %v4439_v22 = vsub.f32 1.5, %v4438_v17  ;;  %vm4463_vm13 = vmor %vm4461_vm12, %vm4462_vm10 }
 0x327   :  { %v5667_v28 = vpop.eup %5666  ;;  %v4448_v27 = vmul.f32 0.5, %v4447_v10  ;;  %v4457_v62 = vmul.f32 %v5665_v33, %v4456_v37 }
 0x328   :  { %v4440_v30 = vmul.f32 %v5661_v45, %v4439_v22  ;;  %v4466_v15 = vmul.f32 %v5667_v28, %v3834_v14  ;;  %vm4472_vm14 = vweird.f32 %v5667_v28 }
 0x329   :  { %v4449_v20 = vsub.f32 1.5, %v4448_v27  ;;  %v4458_v36 = vmul.f32 0.5, %v4457_v62  ;;  %vm4473_vm0 = vmor %vm4471_vm15, %vm4472_vm14 }
 0x32a   :  { %v4444_v7 = vsel %vm4443_vm7, %v5661_v45, %v4440_v30  ;;  %v4467_v52 = vmul.f32 %v5667_v28, %v4466_v15 }
 0x32b   :  { %v4535_v54 = vmul.f32 %v4444_v7, %v9105_v21  ;;  %v4450_v43 = vmul.f32 %v5663_v46, %v4449_v20  ;;  %v4459_v26 = vsub.f32 1.5, %v4458_v36 }
 0x32c   :  { %v4468_v34 = vmul.f32 0.5, %v4467_v52 }
 0x32d   :  { %4599 = vst [vmem:[%s9223_s3 + $0x1e0] sm:$0xff] %v4535_v54  ;;  %v4454_v4 = vsel %vm4453_vm11, %v5663_v46, %v4450_v43  ;;  %v4460_v5 = vmul.f32 %v5665_v33, %v4459_v26 }
 0x32e   :  { %v4536_v19 = vmul.f32 %v4454_v4, %v9120_v61  ;;  %v4469_v49 = vsub.f32 1.5, %v4468_v34 }
 0x32f   :  { %v4464_v11 = vsel %vm4463_vm13, %v5665_v33, %v4460_v5 }
 0x330   :  { %4600 = vst [vmem:[%s9223_s3 + $0x1e8] sm:$0xff] %v4536_v19  ;;  %v4537_v21 = vmul.f32 %v4464_v11, %v9124_v50  ;;  %v4470_v12 = vmul.f32 %v5667_v28, %v4469_v49 }
 0x332   :  { %4601 = vst [vmem:[%s9223_s3 + $0x1f0] sm:$0xff] %v4537_v21  ;;  %v4474_v41 = vsel %vm4473_vm0, %v5667_v28, %v4470_v12 }
 0x333   :  { %v4538_v61 = vmul.f32 %v4474_v41, %v9134_v6 }
 0x335   :  { %4602 = vst [vmem:[%s9223_s3 + $0x1f8] sm:$0xff] %v4538_v61 }

</bundles_post_ra>
